<compile_context>
chip_gen: v6e
topology: v6e:2x2x1
jax: 0.10.0
libtpu: 0.0.40
codegen_flags: <defaults>
</compile_context>

<pallas_src>
import numpy as np

import jax
import jax.numpy as jnp
from jax.experimental import pallas as pl
from jax.experimental.pallas import tpu as pltpu


# ----------------------------- Pallas kernel -------------------------------

def _encoder_kernel(x_ref, t1_ref, b1_ref, t2_ref, b2_ref,
                    wfc_ref, bfc_ref, g_ref, beta_ref, o_ref):
    """Fused conv1+conv2 (as Toeplitz matmuls) + fc + LayerNorm + eigennorm."""
    cdt = t1_ref.dtype                     # compute dtype of the matmul operands
    x = x_ref[...].astype(cdt)             # (BB, C*H*W)

    # conv1 (stride 2) as dense matmul; /255 already folded into t1.
    h1 = jnp.dot(x, t1_ref[...], preferred_element_type=jnp.float32) + b1_ref[...]
    h1 = jnp.maximum(h1, 0.0)              # (BB, 32*7*7), f32

    # conv2 (stride 1) as dense matmul.
    h2 = jnp.dot(h1.astype(cdt), t2_ref[...],
                 preferred_element_type=jnp.float32) + b2_ref[...]
    h2 = jnp.maximum(h2, 0.0)              # (BB, 32*5*5) == torch conv.view(B,-1)

    # fc
    y = jnp.dot(h2.astype(cdt), wfc_ref[...],
                preferred_element_type=jnp.float32) + bfc_ref[...]   # (BB, feat)

    # LayerNorm (biased var, eps=1e-5) with eigennorm folded into gamma/beta.
    mean = jnp.mean(y, axis=-1, keepdims=True)
    cen = y - mean
    var = jnp.mean(cen * cen, axis=-1, keepdims=True)
    o_ref[...] = cen * jax.lax.rsqrt(var + 1e-5) * g_ref[...] + beta_ref[...]


# --------------------------- host-side param prep ---------------------------

def _conv_as_matmul_weight(w_oihw, H, W, stride, scale=1.0):
    """Dense (C_in*H*W, C_out*OH*OW) matrix M such that, for x flattened in
    NCHW order, x_flat @ M equals the NCHW-flattened VALID conv2d(x, w)."""
    w = np.asarray(w_oihw, dtype=np.float32) * scale
    O, I, KH, KW = w.shape
    OH = (H - KH) // stride + 1
    OW = (W - KW) // stride + 1
    M = np.zeros((I, H, W, O, OH, OW), dtype=np.float32)
    for kh in range(KH):
        for kw in range(KW):
            wt = w[:, :, kh, kw].T                     # (I, O)
            for oh in range(OH):
                h = oh * stride + kh
                for ow in range(OW):
                    wp = ow * stride + kw
                    M[:, h, wp, :, oh, ow] = wt
    return M.reshape(I * H * W, O * OH * OW), OH, OW


def prepare_params(params, obs_shape, compute_dtype=jnp.bfloat16):
    """One-time parameter preparation (outside the hot path).

    compute_dtype: dtype of the MXU operands (t1/t2/wfc and the in-kernel x
    cast).  bf16 default for v5e/v6e/v7x throughput; pass jnp.float32 for
    torch-exact numerics.  (On v7x, fp8 e4m3 for t1/t2 is a further option.)
    """
    C, H, W = obs_shape
    # conv1: fold the /255 pixel normalization into the weight matrix.
    t1, oh1, ow1 = _conv_as_matmul_weight(params['w1'], H, W, stride=2,
                                          scale=1.0 / 255.0)
    t2, oh2, ow2 = _conv_as_matmul_weight(params['w2'], oh1, ow1, stride=1)

    b1 = np.repeat(np.asarray(params['b1'], np.float32), oh1 * ow1)[None, :]
    b2 = np.repeat(np.asarray(params['b2'], np.float32), oh2 * ow2)[None, :]

    # torch Linear weight is (out, in); conv2 output column order is NCHW-flat
    # which is exactly torch's conv.view(B, -1) order -> plain transpose.
    wfc = np.asarray(params['w_fc'], np.float32).T
    bfc = np.asarray(params['b_fc'], np.float32)[None, :]

    # Fold the eval-mode eigennorm division into the LayerNorm affine.
    en = np.asarray(params['eigennorm'], np.float32)
    g = (np.asarray(params['ln_gamma'], np.float32) / en)[None, :]
    b = (np.asarray(params['ln_beta'], np.float32) / en)[None, :]

    return {
        't1': jnp.asarray(t1, compute_dtype),
        'b1': jnp.asarray(b1, jnp.float32),
        't2': jnp.asarray(t2, compute_dtype),
        'b2': jnp.asarray(b2, jnp.float32),
        'wfc': jnp.asarray(wfc, compute_dtype),
        'bfc': jnp.asarray(bfc, jnp.float32),
        'g': jnp.asarray(g, jnp.float32),
        'b': jnp.asarray(b, jnp.float32),
    }


# ------------------------------- forward -----------------------------------

def _pick_batch_tile(B, max_bb=512):
    """Batch-tile (row-block) size.

    B <= 128: one full-batch block (no padding, single grid step).
    B  > 128: blocks of at most `max_bb` rows, rounded up to a multiple of 8,
              with >= 2 grid steps so ("parallel",) can use both v7x TCs.
    """
    if B <= 128:
        return B
    n_steps = max(2, -(-B // max_bb))
    bb = -(-B // n_steps)
    return ((bb + 7) // 8) * 8


def pixel_encoder_l2norm_forward(obs_nchw, prep):
    """obs_nchw: (B, C, H, W) float32 pixel values in [0, 255]."""
    # TODO(synk): training-mode running eigennorm/eigvals buffer updates are
    # host-side stateful momentum; only the eval path (out / eigennorm) is
    # implemented here (folded into the LN affine).  output_softmaxed /
    # max_norm are off by default and not implemented.
    B = obs_nchw.shape[0]
    x = obs_nchw.reshape(B, -1).astype(jnp.float32)   # NCHW contiguous flatten (free)
    in_flat = x.shape[1]
    feat = prep['g'].shape[-1]

    BB = _pick_batch_tile(B)
    grid = -(-B // BB)          # ragged last tile handled by Pallas (no jnp.pad)

    # Weights/biases: constant block index -> single-buffered, VMEM-resident.
    def wspec(shape):
        return pl.BlockSpec(shape, lambda i: (0, 0), pipeline_mode=pl.Buffered(1))

    out = pl.pallas_call(
        _encoder_kernel,
        out_shape=jax.ShapeDtypeStruct((B, feat), jnp.float32),
        grid=(grid,),
        in_specs=[
            pl.BlockSpec((BB, in_flat), lambda i: (i, 0)),
            wspec(prep['t1'].shape),
            wspec(prep['b1'].shape),
            wspec(prep['t2'].shape),
            wspec(prep['b2'].shape),
            wspec(prep['wfc'].shape),
            wspec(prep['bfc'].shape),
            wspec(prep['g'].shape),
            wspec(prep['b'].shape),
        ],
        out_specs=pl.BlockSpec((BB, feat), lambda i: (i, 0)),
        compiler_params=pltpu.CompilerParams(
            dimension_semantics=("parallel",),
            vmem_limit_bytes=48 * 1024 * 1024,
        ),
    )(x, prep['t1'], prep['b1'], prep['t2'], prep['b2'],
      prep['wfc'], prep['bfc'], prep['g'], prep['b'])
    return out


# ------------------------- pure-JAX reference check --------------------------

def _reference_forward(obs, params):
    x = obs / 255.0
    y = jax.lax.conv_general_dilated(x, params['w1'], (2, 2), 'VALID',
                                     dimension_numbers=('NCHW', 'OIHW', 'NCHW'))
    y = jax.nn.relu(y + params['b1'][None, :, None, None])
    y = jax.lax.conv_general_dilated(y, params['w2'], (1, 1), 'VALID',
                                     dimension_numbers=('NCHW', 'OIHW', 'NCHW'))
    y = jax.nn.relu(y + params['b2'][None, :, None, None])
    h = y.reshape(y.shape[0], -1)
    hfc = h @ params['w_fc'].T + params['b_fc']
    mean = hfc.mean(-1, keepdims=True)
    var = ((hfc - mean) ** 2).mean(-1, keepdims=True)
    ln = (hfc - mean) * jax.lax.rsqrt(var + 1e-5) * params['ln_gamma'] + params['ln_beta']
    return ln / params['eigennorm']


# --------------------------------- main -------------------------------------

if __name__ == "__main__":
    # obs_shape = (4, 16, 16), feature_dim = 32, num_layers = 2, num_filters = 32
    B, C, H, W = 2, 4, 16, 16
    NUM_FILTERS = 32
    FEATURE_DIM = 32
    # conv1 (stride 2): 16 -> 7 ; conv2 (stride 1): 7 -> 5 ; flat = 32*5*5 = 800
    OUT_DIM = NUM_FILTERS * 5 * 5

    key = jax.random.PRNGKey(0)
    ks = jax.random.split(key, 8)

    params = {
        'w1': jax.random.normal(ks[0], (NUM_FILTERS, C, 3, 3), jnp.float32) * 0.05,
        'b1': jax.random.normal(ks[1], (NUM_FILTERS,), jnp.float32) * 0.05,
        'w2': jax.random.normal(ks[2], (NUM_FILTERS, NUM_FILTERS, 3, 3), jnp.float32) * 0.05,
        'b2': jax.random.normal(ks[3], (NUM_FILTERS,), jnp.float32) * 0.05,
        'w_fc': jax.random.normal(ks[4], (FEATURE_DIM, OUT_DIM), jnp.float32) * 0.02,
        'b_fc': jax.random.normal(ks[5], (FEATURE_DIM,), jnp.float32) * 0.02,
        'ln_gamma': jnp.ones((FEATURE_DIM,), jnp.float32),
        'ln_beta': jnp.zeros((FEATURE_DIM,), jnp.float32),
        'eigennorm': jnp.ones((FEATURE_DIM,), jnp.float32),  # registered buffer (init = ones)
    }

    # Integer pixel values (as uint8 observations would be), kept in f32.
    obs = jax.random.randint(ks[6], (B, C, H, W), 0, 256).astype(jnp.float32)

    # One-time host-side prep.  Default bf16 MXU operands (perf path);
    # f32 variant used below to verify exact semantics.
    prep_bf16 = prepare_params(params, (C, H, W))                       # bf16 default
    prep_f32 = prepare_params(params, (C, H, W), compute_dtype=jnp.float32)

    fwd = jax.jit(pixel_encoder_l2norm_forward)

    out_bf16 = jax.block_until_ready(fwd(obs, prep_bf16))
    out_f32 = jax.block_until_ready(fwd(obs, prep_f32))

    assert out_bf16.shape == (B, FEATURE_DIM) and out_bf16.dtype == jnp.float32
    assert bool(jnp.all(jnp.isfinite(out_bf16)))
    assert bool(jnp.all(jnp.isfinite(out_f32)))

    # Self-check against a pure-JAX reference of the torch module.
    ref = _reference_forward(obs, params)
    assert bool(jnp.max(jnp.abs(out_f32 - ref)) < 2e-3)     # exact-semantics path
    assert bool(jnp.max(jnp.abs(out_bf16 - ref)) < 1e-1)    # bf16 operand path

    print("KERNEL_OK")
</pallas_src>

<mosaic_0001>
module attributes {stable_mosaic.version = 11 : i64} {
  func.func @_encoder_kernel(%arg0: i32, %arg1: memref<2x1024xf32, #tpu.memory_space<vmem>>, %arg2: memref<1024x1568xbf16, #tpu.memory_space<vmem>>, %arg3: memref<1x1568xf32, #tpu.memory_space<vmem>>, %arg4: memref<1568x800xbf16, #tpu.memory_space<vmem>>, %arg5: memref<1x800xf32, #tpu.memory_space<vmem>>, %arg6: memref<800x32xbf16, #tpu.memory_space<vmem>>, %arg7: memref<1x32xf32, #tpu.memory_space<vmem>>, %arg8: memref<1x32xf32, #tpu.memory_space<vmem>>, %arg9: memref<1x32xf32, #tpu.memory_space<vmem>>, %arg10: memref<2x32xf32, #tpu.memory_space<vmem>>) attributes {dimension_semantics = [#tpu.dimension_semantics<parallel>], iteration_bounds = array<i64: 1>, scalar_prefetch = 0 : i64, scratch_operands = 0 : i64, tpu.core_type = #tpu.core_type<tc>, window_params = [{transform_indices = @transform_0, window_bounds = array<i64: 2, 1024>}, {pipeline_mode = #tpu.pipeline_mode<synchronous>, transform_indices = @transform_1, window_bounds = array<i64: 1024, 1568>}, {pipeline_mode = #tpu.pipeline_mode<synchronous>, transform_indices = @transform_2, window_bounds = array<i64: 1, 1568>}, {pipeline_mode = #tpu.pipeline_mode<synchronous>, transform_indices = @transform_3, window_bounds = array<i64: 1568, 800>}, {pipeline_mode = #tpu.pipeline_mode<synchronous>, transform_indices = @transform_4, window_bounds = array<i64: 1, 800>}, {pipeline_mode = #tpu.pipeline_mode<synchronous>, transform_indices = @transform_5, window_bounds = array<i64: 800, 32>}, {pipeline_mode = #tpu.pipeline_mode<synchronous>, transform_indices = @transform_6, window_bounds = array<i64: 1, 32>}, {pipeline_mode = #tpu.pipeline_mode<synchronous>, transform_indices = @transform_7, window_bounds = array<i64: 1, 32>}, {pipeline_mode = #tpu.pipeline_mode<synchronous>, transform_indices = @transform_8, window_bounds = array<i64: 1, 32>}, {transform_indices = @transform_9, window_bounds = array<i64: 2, 32>}]} {
    %c0 = arith.constant 0 : index
    %c0_0 = arith.constant 0 : index
    %0 = vector.load %arg1[%c0, %c0_0] : memref<2x1024xf32, #tpu.memory_space<vmem>>, vector<2x1024xf32>
    %1 = arith.truncf %0 : vector<2x1024xf32> to vector<2x1024xbf16>
    %c0_1 = arith.constant 0 : index
    %c0_2 = arith.constant 0 : index
    %2 = vector.load %arg2[%c0_1, %c0_2] : memref<1024x1568xbf16, #tpu.memory_space<vmem>>, vector<1024x1568xbf16>
    %cst = arith.constant dense<0.000000e+00> : vector<2x1568xf32>
    %3 = tpu.matmul %1, %2, %cst {dimension_numbers = #tpu.dot_dimension_numbers<[1], [0], [0], [1], [0, 0, 1, 1], [], []>} : vector<2x1024xbf16>, vector<1024x1568xbf16>, vector<2x1568xf32> -> vector<2x1568xf32>
    %c0_3 = arith.constant 0 : index
    %c0_4 = arith.constant 0 : index
    %4 = vector.load %arg3[%c0_3, %c0_4] : memref<1x1568xf32, #tpu.memory_space<vmem>>, vector<1x1568xf32>
    %5 = vector.broadcast %4 : vector<1x1568xf32> to vector<2x1568xf32>
    %6 = arith.addf %3, %5 : vector<2x1568xf32>
    %cst_5 = arith.constant 0.000000e+00 : f32
    %7 = vector.broadcast %cst_5 : f32 to vector<2x1568xf32>
    %8 = arith.maximumf %6, %7 : vector<2x1568xf32>
    %9 = arith.truncf %8 : vector<2x1568xf32> to vector<2x1568xbf16>
    %c0_6 = arith.constant 0 : index
    %c0_7 = arith.constant 0 : index
    %10 = vector.load %arg4[%c0_6, %c0_7] : memref<1568x800xbf16, #tpu.memory_space<vmem>>, vector<1568x800xbf16>
    %cst_8 = arith.constant dense<0.000000e+00> : vector<2x800xf32>
    %11 = tpu.matmul %9, %10, %cst_8 {dimension_numbers = #tpu.dot_dimension_numbers<[1], [0], [0], [1], [0, 0, 1, 1], [], []>} : vector<2x1568xbf16>, vector<1568x800xbf16>, vector<2x800xf32> -> vector<2x800xf32>
    %c0_9 = arith.constant 0 : index
    %c0_10 = arith.constant 0 : index
    %12 = vector.load %arg5[%c0_9, %c0_10] : memref<1x800xf32, #tpu.memory_space<vmem>>, vector<1x800xf32>
    %13 = vector.broadcast %12 : vector<1x800xf32> to vector<2x800xf32>
    %14 = arith.addf %11, %13 : vector<2x800xf32>
    %cst_11 = arith.constant 0.000000e+00 : f32
    %15 = vector.broadcast %cst_11 : f32 to vector<2x800xf32>
    %16 = arith.maximumf %14, %15 : vector<2x800xf32>
    %17 = arith.truncf %16 : vector<2x800xf32> to vector<2x800xbf16>
    %c0_12 = arith.constant 0 : index
    %c0_13 = arith.constant 0 : index
    %18 = vector.load %arg6[%c0_12, %c0_13] : memref<800x32xbf16, #tpu.memory_space<vmem>>, vector<800x32xbf16>
    %cst_14 = arith.constant dense<0.000000e+00> : vector<2x32xf32>
    %19 = tpu.matmul %17, %18, %cst_14 {dimension_numbers = #tpu.dot_dimension_numbers<[1], [0], [0], [1], [0, 0, 1, 1], [], []>} : vector<2x800xbf16>, vector<800x32xbf16>, vector<2x32xf32> -> vector<2x32xf32>
    %c0_15 = arith.constant 0 : index
    %c0_16 = arith.constant 0 : index
    %20 = vector.load %arg7[%c0_15, %c0_16] : memref<1x32xf32, #tpu.memory_space<vmem>>, vector<1x32xf32>
    %21 = vector.broadcast %20 : vector<1x32xf32> to vector<2x32xf32>
    %22 = arith.addf %19, %21 : vector<2x32xf32>
    %cst_17 = arith.constant dense<0.000000e+00> : vector<2xf32>
    %23 = vector.multi_reduction <add>, %22, %cst_17 [1] : vector<2x32xf32> to vector<2xf32>
    %24 = vector.shape_cast %23 : vector<2xf32> to vector<2x1xf32>
    %cst_18 = arith.constant 3.200000e+01 : f32
    %25 = vector.broadcast %cst_18 : f32 to vector<2x1xf32>
    %26 = arith.divf %24, %25 : vector<2x1xf32>
    %27 = vector.broadcast %26 : vector<2x1xf32> to vector<2x32xf32>
    %28 = arith.subf %22, %27 : vector<2x32xf32>
    %29 = arith.mulf %28, %28 : vector<2x32xf32>
    %cst_19 = arith.constant dense<0.000000e+00> : vector<2xf32>
    %30 = vector.multi_reduction <add>, %29, %cst_19 [1] : vector<2x32xf32> to vector<2xf32>
    %31 = vector.shape_cast %30 : vector<2xf32> to vector<2x1xf32>
    %cst_20 = arith.constant 3.200000e+01 : f32
    %32 = vector.broadcast %cst_20 : f32 to vector<2x1xf32>
    %33 = arith.divf %31, %32 : vector<2x1xf32>
    %cst_21 = arith.constant 9.99999974E-6 : f32
    %34 = vector.broadcast %cst_21 : f32 to vector<2x1xf32>
    %35 = arith.addf %33, %34 : vector<2x1xf32>
    %36 = math.rsqrt %35 : vector<2x1xf32>
    %37 = vector.broadcast %36 : vector<2x1xf32> to vector<2x32xf32>
    %38 = arith.mulf %28, %37 : vector<2x32xf32>
    %c0_22 = arith.constant 0 : index
    %c0_23 = arith.constant 0 : index
    %39 = vector.load %arg8[%c0_22, %c0_23] : memref<1x32xf32, #tpu.memory_space<vmem>>, vector<1x32xf32>
    %40 = vector.broadcast %39 : vector<1x32xf32> to vector<2x32xf32>
    %41 = arith.mulf %38, %40 : vector<2x32xf32>
    %c0_24 = arith.constant 0 : index
    %c0_25 = arith.constant 0 : index
    %42 = vector.load %arg9[%c0_24, %c0_25] : memref<1x32xf32, #tpu.memory_space<vmem>>, vector<1x32xf32>
    %43 = vector.broadcast %42 : vector<1x32xf32> to vector<2x32xf32>
    %44 = arith.addf %41, %43 : vector<2x32xf32>
    %c0_26 = arith.constant 0 : index
    %c0_27 = arith.constant 0 : index
    %45 = vector.load %arg10[%c0_26, %c0_27] : memref<2x32xf32, #tpu.memory_space<vmem>>, vector<2x32xf32>
    tpu.vector_store %arg10[%c0_26, %c0_27], %44 {strides = array<i32>} : memref<2x32xf32, #tpu.memory_space<vmem>>, vector<2x32xf32>,
    return
  }
  func.func @transform_0(%arg0: i32) -> (i32, i32) {
    %c0_i32 = arith.constant 0 : i32
    %c0_i32_0 = arith.constant 0 : i32
    return %arg0, %c0_i32 : i32, i32
  }
  func.func @transform_1(%arg0: i32) -> (i32, i32) {
    %c0_i32 = arith.constant 0 : i32
    %c0_i32_0 = arith.constant 0 : i32
    %c0_i32_1 = arith.constant 0 : i32
    return %c0_i32, %c0_i32_0 : i32, i32
  }
  func.func @transform_2(%arg0: i32) -> (i32, i32) {
    %c0_i32 = arith.constant 0 : i32
    %c0_i32_0 = arith.constant 0 : i32
    %c0_i32_1 = arith.constant 0 : i32
    return %c0_i32, %c0_i32_0 : i32, i32
  }
  func.func @transform_3(%arg0: i32) -> (i32, i32) {
    %c0_i32 = arith.constant 0 : i32
    %c0_i32_0 = arith.constant 0 : i32
    %c0_i32_1 = arith.constant 0 : i32
    return %c0_i32, %c0_i32_0 : i32, i32
  }
  func.func @transform_4(%arg0: i32) -> (i32, i32) {
    %c0_i32 = arith.constant 0 : i32
    %c0_i32_0 = arith.constant 0 : i32
    %c0_i32_1 = arith.constant 0 : i32
    return %c0_i32, %c0_i32_0 : i32, i32
  }
  func.func @transform_5(%arg0: i32) -> (i32, i32) {
    %c0_i32 = arith.constant 0 : i32
    %c0_i32_0 = arith.constant 0 : i32
    %c0_i32_1 = arith.constant 0 : i32
    return %c0_i32, %c0_i32_0 : i32, i32
  }
  func.func @transform_6(%arg0: i32) -> (i32, i32) {
    %c0_i32 = arith.constant 0 : i32
    %c0_i32_0 = arith.constant 0 : i32
    %c0_i32_1 = arith.constant 0 : i32
    return %c0_i32, %c0_i32_0 : i32, i32
  }
  func.func @transform_7(%arg0: i32) -> (i32, i32) {
    %c0_i32 = arith.constant 0 : i32
    %c0_i32_0 = arith.constant 0 : i32
    %c0_i32_1 = arith.constant 0 : i32
    return %c0_i32, %c0_i32_0 : i32, i32
  }
  func.func @transform_8(%arg0: i32) -> (i32, i32) {
    %c0_i32 = arith.constant 0 : i32
    %c0_i32_0 = arith.constant 0 : i32
    %c0_i32_1 = arith.constant 0 : i32
    return %c0_i32, %c0_i32_0 : i32, i32
  }
  func.func @transform_9(%arg0: i32) -> (i32, i32) {
    %c0_i32 = arith.constant 0 : i32
    %c0_i32_0 = arith.constant 0 : i32
    return %arg0, %c0_i32 : i32, i32
  }
}

</mosaic_0001>

<bundles_post_ra>
// kernel: pixel_encoder_l2norm_forward.1
= control target key start
LH: loop header
LB: loop body
LE: loop exit
PB: predicated region body
PF: predicated region fallthrough
CT: control target
= control target key end

     0   :  { %v16737_v36 = vmov 1983009808   ;;  %v42_v38 = vlaneseq  ;;  %s21917_s0 = inlined_call_operand.vmem [shape: f32[2,1024], index: 0, kind: input, shape index: {}]   ;;  %s21918_s1 = inlined_call_operand.vmem [shape: bf16[1024,1568], index: 1, kind: input, shape index: {}]   ;;  %s21919_s2 = inlined_call_operand.vmem [shape: f32[1,1568], index: 2, kind: input, shape index: {}]   ;;  %s21920_s3 = inlined_call_operand.vmem [shape: bf16[1568,800], index: 3, kind: input, shape index: {}]   ;;  %s21921_s4 = inlined_call_operand.vmem [shape: f32[1,800], index: 4, kind: input, shape index: {}]   ;;  %s21922_s5 = inlined_call_operand.vmem [shape: bf16[800,32], index: 5, kind: input, shape index: {}]   ;;  %s21923_s6 = inlined_call_operand.vmem [shape: f32[1,32], index: 6, kind: input, shape index: {}]   ;;  %s21924_s7 = inlined_call_operand.vmem [shape: f32[1,32], index: 7, kind: input, shape index: {}]   ;;  %s21925_s8 = inlined_call_operand.vmem [shape: f32[1,32], index: 8, kind: input, shape index: {}]   ;;  %s21926_s9 = inlined_call_operand.hbm [shape: f32[2,32], index: 9, kind: output, shape index: {}]  }
   0x1   :  { %v14460_v0 = vld [vmem:[%s21918_s1 + $0x2dc] ss:$52 sps:$4 sm:$0xff]   ;;  %v14464_v2 = vld [vmem:[%s21918_s1 + $0x2d8] ss:$52 sps:$4 sm:$0xff]   ;;  %v14466_v4 = vld [vmem:[%s21918_s1 + $0x274] ss:$52 sps:$4 sm:$0xff]   ;;  %v40_v37 = vunpack.c.l.s4 %v16737_v36 }
   0x2   :  { %v14462_v1 = vld [vmem:[%s21918_s1 + $0x95c] ss:$52 sps:$4 sm:$0xff]   ;;  %5277 = vmatprep.subr.bf16.mxu0 %v14460_v0  ;;  %v14465_v3 = vld [vmem:[%s21918_s1 + $0x958] ss:$52 sps:$4 sm:$0xff]   ;;  %v14468_v5 = vld [vmem:[%s21918_s1 + $0x8f4] ss:$52 sps:$4 sm:$0xff]  }
   0x3   :  { %5318 = vmatprep.subr.bf16.mxu1 %v14462_v1  ;;  %5278 = vmatpush1.bf16.msra.mxu0 %v14464_v2  ;;  %v14470_v6 = vld [vmem:[%s21918_s1 + $0x270] ss:$52 sps:$4 sm:$0xff]   ;;  %v14472_v8 = vld [vmem:[%s21918_s1 + $0x20c] ss:$52 sps:$4 sm:$0xff]   ;;  %v14476_v10 = vld [vmem:[%s21918_s1 + $0x208] ss:$52 sps:$4 sm:$0xff]   ;;  %v41_v42 = vunpack.c.0.s8 %v40_v37 }
   0x4   :  { %5319 = vmatpush1.bf16.msra.mxu1 %v14465_v3  ;;  %5279 = vmatprep.subr.bf16.mxu0 %v14466_v4  ;;  %v14471_v7 = vld [vmem:[%s21918_s1 + $0x8f0] ss:$52 sps:$4 sm:$0xff]   ;;  %v14474_v9 = vld [vmem:[%s21918_s1 + $0x88c] ss:$52 sps:$4 sm:$0xff]   ;;  %v14477_v11 = vld [vmem:[%s21918_s1 + $0x888] ss:$52 sps:$4 sm:$0xff]  }
   0x5   :  { %5320 = vmatprep.subr.bf16.mxu1 %v14468_v5  ;;  %v14478_v12 = vld [vmem:[%s21918_s1 + $0x1a4] ss:$52 sps:$4 sm:$0xff]   ;;  %v14482_v14 = vld [vmem:[%s21918_s1 + $0x1a0] ss:$52 sps:$4 sm:$0xff]   ;;  %v14484_v16 = vld [vmem:[%s21918_s1 + $0x13c] ss:$52 sps:$4 sm:$0xff]  }
   0x6   :  { %v14480_v13 = vld [vmem:[%s21918_s1 + $0x824] ss:$52 sps:$4 sm:$0xff]   ;;  %v14483_v15 = vld [vmem:[%s21918_s1 + $0x820] ss:$52 sps:$4 sm:$0xff]   ;;  %v14486_v17 = vld [vmem:[%s21918_s1 + $0x7bc] ss:$52 sps:$4 sm:$0xff]  }
   0x7   :  { %5280 = vmatpush1.bf16.msra.mxu0 %v14470_v6  ;;  %v14488_v18 = vld [vmem:[%s21918_s1 + $0x138] ss:$52 sps:$4 sm:$0xff]   ;;  %v14490_v20 = vld [vmem:[%s21918_s1 + $0xd4] ss:$52 sps:$4 sm:$0xff]   ;;  %v14494_v22 = vld [vmem:[%s21918_s1 + $0xd0] ss:$52 sps:$4 sm:$0xff]  }
   0x8   :  { %5321 = vmatpush1.bf16.msra.mxu1 %v14471_v7  ;;  %5281 = vmatprep.subr.bf16.mxu0 %v14472_v8  ;;  %v14489_v19 = vld [vmem:[%s21918_s1 + $0x7b8] ss:$52 sps:$4 sm:$0xff]   ;;  %v14492_v21 = vld [vmem:[%s21918_s1 + $0x754] ss:$52 sps:$4 sm:$0xff]   ;;  %v14495_v23 = vld [vmem:[%s21918_s1 + $0x750] ss:$52 sps:$4 sm:$0xff]  }
   0x9   :  { %5322 = vmatprep.subr.bf16.mxu1 %v14474_v9  ;;  %v14496_v24 = vld [vmem:[%s21918_s1 + $0x6c] ss:$52 sps:$4 sm:$0xff]   ;;  %v14500_v26 = vld [vmem:[%s21918_s1 + $0x68] ss:$52 sps:$4 sm:$0xff]   ;;  %v14502_v28 = vld [vmem:[%s21918_s1 + $0x4] ss:$52 sps:$4 sm:$0xff]  }
   0xa   :  { %v14498_v25 = vld [vmem:[%s21918_s1 + $0x6ec] ss:$52 sps:$4 sm:$0xff]   ;;  %v14501_v27 = vld [vmem:[%s21918_s1 + $0x6e8] ss:$52 sps:$4 sm:$0xff]   ;;  %v14504_v29 = vld [vmem:[%s21918_s1 + $0x684] ss:$52 sps:$4 sm:$0xff]  }
   0xb   :  { %5282 = vmatpush1.bf16.msra.mxu0 %v14476_v10  ;;  %v14506_v30 = vld [vmem:[%s21918_s1] ss:$52 sps:$4 sm:$0xff]   ;;  %v14508_v32 = vld [vmem:[%s21918_s1 + $0x61c] ss:$52 sps:$4 sm:$0xff]   ;;  %v14512_v34 = vld [vmem:[%s21918_s1 + $0x618] ss:$52 sps:$4 sm:$0xff]  }
   0xc   :  { %5323 = vmatpush1.bf16.msra.mxu1 %v14477_v11  ;;  %5283 = vmatprep.subr.bf16.mxu0 %v14478_v12  ;;  %v14507_v31 = vld [vmem:[%s21918_s1 + $0x680] ss:$52 sps:$4 sm:$0xff]   ;;  %v14510_v33 = vld [vmem:[%s21918_s1 + $0xc9c] ss:$52 sps:$4 sm:$0xff]   ;;  %v14513_v35 = vld [vmem:[%s21918_s1 + $0xc98] ss:$52 sps:$4 sm:$0xff]  }
   0xd   :  { %5324 = vmatprep.subr.bf16.mxu1 %v14480_v13  ;;  %v14514_v39 = vld [vmem:[%s21918_s1 + $0x5b4] ss:$52 sps:$4 sm:$0xff]   ;;  %v14518_v41 = vld [vmem:[%s21918_s1 + $0x5b0] ss:$52 sps:$4 sm:$0xff]   ;;  %v16909_v43 = vshrl.u32 %v42_v38, 7 }
   0xe   :  { %v14516_v40 = vld [vmem:[%s21918_s1 + $0xc34] ss:$52 sps:$4 sm:$0xff]   ;;  %v14519_v44 = vld [vmem:[%s21918_s1 + $0xc30] ss:$52 sps:$4 sm:$0xff]   ;;  %v14520_v45 = vld [vmem:[%s21918_s1 + $0x54c] ss:$52 sps:$4 sm:$0xff]  }
   0xf   :  { %5284 = vmatpush1.bf16.msra.mxu0 %v14482_v14  ;;  %v14522_v46 = vld [vmem:[%s21918_s1 + $0xbcc] ss:$52 sps:$4 sm:$0xff]   ;;  %v14524_v47 = vld [vmem:[%s21918_s1 + $0x548] ss:$52 sps:$4 sm:$0xff]   ;;  %v16927_v49 = vsub.s32 %v41_v42, %v16909_v43  ;;  %v14526_v50 = vld [vmem:[%s21918_s1 + $0x4e4] ss:$52 sps:$4 sm:$0xff]  }
  0x10   :  { %5325 = vmatpush1.bf16.msra.mxu1 %v14483_v15  ;;  %5285 = vmatprep.subr.bf16.mxu0 %v14484_v16  ;;  %v14525_v48 = vld [vmem:[%s21918_s1 + $0xbc8] ss:$52 sps:$4 sm:$0xff]   ;;  %v14528_v51 = vld [vmem:[%s21918_s1 + $0xb64] ss:$52 sps:$4 sm:$0xff]   ;;  %v14530_v53 = vld [vmem:[%s21918_s1 + $0x4e0] ss:$52 sps:$4 sm:$0xff]  }
  0x11   :  { %5326 = vmatprep.subr.bf16.mxu1 %v14486_v17  ;;  %v34_v52 = vld [vmem:[%s21917_s0] sm:$0xff]  ;;  %v14532_v57 = vld [vmem:[%s21918_s1 + $0x47c] ss:$52 sps:$4 sm:$0xff]   ;;  %v14536_v61 = vld [vmem:[%s21918_s1 + $0x478] ss:$52 sps:$4 sm:$0xff]  }
  0x12   :  { %v45_v54 = vrot.slane %v34_v52, %v16927_v49  ;;  %v38_v55 = vcombine.high %v34_v52, %v34_v52  ;;  %v14531_v56 = vld [vmem:[%s21918_s1 + $0xb60] ss:$52 sps:$4 sm:$0xff]   ;;  %v14534_v58 = vld [vmem:[%s21918_s1 + $0xafc] ss:$52 sps:$4 sm:$0xff]   ;;  %v14537_v0 = vld [vmem:[%s21918_s1 + $0xaf8] ss:$52 sps:$4 sm:$0xff]  }
  0x13   :  { %5286 = vmatpush1.bf16.msra.mxu0 %v14488_v18  ;;  %v14538_v1 = vld [vmem:[%s21918_s1 + $0x414] ss:$52 sps:$4 sm:$0xff]   ;;  %v14542_v4 = vld [vmem:[%s21918_s1 + $0x410] ss:$52 sps:$4 sm:$0xff]   ;;  %v14544_v6 = vld [vmem:[%s21918_s1 + $0x3ac] ss:$52 sps:$4 sm:$0xff]  }
  0x14   :  { %5327 = vmatpush1.bf16.msra.mxu1 %v14489_v19  ;;  %5287 = vmatprep.subr.bf16.mxu0 %v14490_v20  ;;  %v53_v59 = vcombine.high %v45_v54, %v45_v54  ;;  %v52_v60 = vrot.slane %v38_v55, %v16927_v49  ;;  %v14540_v2 = vld [vmem:[%s21918_s1 + $0xa94] ss:$52 sps:$4 sm:$0xff]   ;;  %v14543_v5 = vld [vmem:[%s21918_s1 + $0xa90] ss:$52 sps:$4 sm:$0xff]   ;;  %v14546_v7 = vld [vmem:[%s21918_s1 + $0xa2c] ss:$52 sps:$4 sm:$0xff]   ;;  %v17006_v16 = vpack.c.bf16 %v45_v54, %v45_v54 }
  0x15   :  { %5328 = vmatprep.subr.bf16.mxu1 %v14492_v21  ;;  %v14548_v8 = vld [vmem:[%s21918_s1 + $0x3a8] ss:$52 sps:$4 sm:$0xff]   ;;  %v14550_v10 = vld [vmem:[%s21918_s1 + $0x344] ss:$52 sps:$4 sm:$0xff]   ;;  %v14554_v12 = vld [vmem:[%s21918_s1 + $0x340] ss:$52 sps:$4 sm:$0xff]  }
  0x16   :  { %v16955_v62 = vpack.c.bf16 %v53_v59, %v53_v59  ;;  %v54_v63 = vcombine.high %v52_v60, %v52_v60  ;;  %v14549_v9 = vld [vmem:[%s21918_s1 + $0xa28] ss:$52 sps:$4 sm:$0xff]   ;;  %v14552_v11 = vld [vmem:[%s21918_s1 + $0x9c4] ss:$52 sps:$4 sm:$0xff]   ;;  %v14555_v13 = vld [vmem:[%s21918_s1 + $0x9c0] ss:$52 sps:$4 sm:$0xff]   ;;  %v17008_v17 = vpack.c.bf16 %v52_v60, %v52_v60 }
  0x17   :  { %5288 = vmatpush1.bf16.msra.mxu0 %v14494_v22  ;;  %v14559_v14 = vld [vmem:[%s21918_s1 + $0xfdc] ss:$52 sps:$4 sm:$0xff]   ;;  %v14557_v18 = vld [vmem:[%s21918_s1 + $0xfd8] ss:$52 sps:$4 sm:$0xff]   ;;  %v14565_v20 = vld [vmem:[%s21918_s1 + $0xf74] ss:$52 sps:$4 sm:$0xff]  }
  0x18   :  { %5329 = vmatpush1.bf16.msra.mxu1 %v14495_v23  ;;  %5289 = vmatprep.subr.bf16.mxu0 %v14496_v24  ;;  %v16966_v3 = vpack.c.bf16 %v54_v63, %v54_v63  ;;  %v14562_v15 = vld [vmem:[%s21918_s1 + $0x165c] ss:$52 sps:$4 sm:$0xff]   ;;  %v14560_v19 = vld [vmem:[%s21918_s1 + $0x1658] ss:$52 sps:$4 sm:$0xff]   ;;  %v14568_v21 = vld [vmem:[%s21918_s1 + $0x15f4] ss:$52 sps:$4 sm:$0xff]  }
  0x19   :  { %5330 = vmatprep.subr.bf16.mxu1 %v14498_v25  ;;  %5309 = vmatprep.mubr.bf16.mxu0 %v16955_v62  ;;  %v14563_v22 = vld [vmem:[%s21918_s1 + $0xf70] ss:$52 sps:$4 sm:$0xff]   ;;  %v14571_v24 = vld [vmem:[%s21918_s1 + $0xf0c] ss:$52 sps:$4 sm:$0xff]   ;;  %v14589_v36 = vld [vmem:[%s21918_s1 + $0xdd4] ss:$52 sps:$4 sm:$0xff]  }
  0x1a   :  { %5350 = vmatprep.mubr.bf16.mxu1 %v16966_v3  ;;  %v14566_v23 = vld [vmem:[%s21918_s1 + $0x15f0] ss:$52 sps:$4 sm:$0xff]   ;;  %v14574_v25 = vld [vmem:[%s21918_s1 + $0x158c] ss:$52 sps:$4 sm:$0xff]   ;;  %v14592_v37 = vld [vmem:[%s21918_s1 + $0x1454] ss:$52 sps:$4 sm:$0xff]  }
  0x1b   :  { %5290 = vmatpush1.bf16.msra.mxu0 %v14500_v26  ;;  %v14569_v26 = vld [vmem:[%s21918_s1 + $0xf08] ss:$52 sps:$4 sm:$0xff]   ;;  %v14587_v38 = vld [vmem:[%s21918_s1 + $0xdd0] ss:$52 sps:$4 sm:$0xff]   ;;  %v14602_v55 = vld [vmem:[%s21918_s1 + $0x1380] ss:$52 sps:$4 sm:$0xff]  }
  0x1c   :  { %5331 = vmatpush1.bf16.msra.mxu1 %v14501_v27  ;;  %5291 = vmatprep.subr.bf16.mxu0 %v14502_v28  ;;  %v14572_v27 = vld [vmem:[%s21918_s1 + $0x1588] ss:$52 sps:$4 sm:$0xff]   ;;  %v14577_v28 = vld [vmem:[%s21918_s1 + $0xea4] ss:$52 sps:$4 sm:$0xff]  }
  0x1d   :  { %5332 = vmatprep.subr.bf16.mxu1 %v14504_v29  ;;  %v14580_v29 = vld [vmem:[%s21918_s1 + $0x1524] ss:$52 sps:$4 sm:$0xff]   ;;  %v35_v42 = vld [vmem:[%s21917_s0 + $0x8] sm:$0xff] }
  0x1e   :  { %v14604_v52 = vld [vmem:[%s21918_s1 + $0x1384] ss:$52 sps:$4 sm:$0xff]   ;;  %v14616_v63 = vld [vmem:[%s21918_s1 + $0x1934] ss:$52 sps:$4 sm:$0xff]  }
  0x1f   :  { %5292 = vmatpush1.bf16.msra.mxu0 %v14506_v30  ;;  %v14575_v30 = vld [vmem:[%s21918_s1 + $0xea0] ss:$52 sps:$4 sm:$0xff]   ;;  %v14605_v59 = vld [vmem:[%s21918_s1 + $0x1318] ss:$52 sps:$4 sm:$0xff]  }
  0x20   :  { %5333 = vmatpush1.bf16.msra.mxu1 %v14507_v31  ;;  %5293 = vmatprep.subr.bf16.mxu0 %v14508_v32  ;;  %v14578_v31 = vld [vmem:[%s21918_s1 + $0x1520] ss:$52 sps:$4 sm:$0xff]   ;;  %v14583_v32 = vld [vmem:[%s21918_s1 + $0xe3c] ss:$52 sps:$4 sm:$0xff]   ;;  %v14608_v60 = vld [vmem:[%s21918_s1 + $0x1998] ss:$52 sps:$4 sm:$0xff]  }
  0x21   :  { %5334 = vmatprep.subr.bf16.mxu1 %v14510_v33  ;;  %v14586_v33 = vld [vmem:[%s21918_s1 + $0x14bc] ss:$52 sps:$4 sm:$0xff]  }
  0x23   :  { %5294 = vmatpush2.bf16.msra.mxu0 %v14512_v34  ;;  %v14581_v34 = vld [vmem:[%s21918_s1 + $0xe38] ss:$52 sps:$4 sm:$0xff]  }
  0x24   :  { %5335 = vmatpush2.bf16.msra.mxu1 %v14513_v35  ;;  %5295 = vmatprep.subr.bf16.mxu0 %v14514_v39  ;;  %v14584_v35 = vld [vmem:[%s21918_s1 + $0x14b8] ss:$52 sps:$4 sm:$0xff]   ;;  %v14590_v39 = vld [vmem:[%s21918_s1 + $0x1450] ss:$52 sps:$4 sm:$0xff]  }
  0x25   :  { %5336 = vmatprep.subr.bf16.mxu1 %v14516_v40  ;;  %v14595_v40 = vld [vmem:[%s21918_s1 + $0xd6c] ss:$52 sps:$4 sm:$0xff]  }
  0x27   :  { %5296 = vmatpush2.bf16.msra.mxu0 %v14518_v41  ;;  %v14598_v41 = vld [vmem:[%s21918_s1 + $0x13ec] ss:$52 sps:$4 sm:$0xff]  }
  0x28   :  { %5337 = vmatpush2.bf16.msra.mxu1 %v14519_v44  ;;  %5297 = vmatprep.subr.bf16.mxu0 %v14520_v45  ;;  %v17088_v44 = vrot.slane %v35_v42, %v16927_v49  ;;  %v55_v45 = vcombine.high %v35_v42, %v35_v42  ;;  %v14669_v42 = vld [vmem:[%s21918_s1 + $0x890] ss:$52 sps:$4 sm:$0xff]  }
  0x29   :  { %5338 = vmatprep.subr.bf16.mxu1 %v14522_v46  ;;  %v14593_v46 = vld [vmem:[%s21918_s1 + $0xd68] ss:$52 sps:$4 sm:$0xff]  }
  0x2b   :  { %5298 = vmatpush2.bf16.msra.mxu0 %v14524_v47  ;;  %v14596_v47 = vld [vmem:[%s21918_s1 + $0x13e8] ss:$52 sps:$4 sm:$0xff]  }
  0x2c   :  { %5339 = vmatpush2.bf16.msra.mxu1 %v14525_v48  ;;  %5299 = vmatprep.subr.bf16.mxu0 %v14526_v50  ;;  %v70_v48 = vcombine.high %v17088_v44, %v17088_v44  ;;  %v17099_v50 = vrot.slane %v55_v45, %v16927_v49  ;;  %v14599_v49 = vld [vmem:[%s21918_s1 + $0xd00] ss:$52 sps:$4 sm:$0xff]  }
  0x2d   :  { %5340 = vmatprep.subr.bf16.mxu1 %v14528_v51  ;;  %v14601_v51 = vld [vmem:[%s21918_s1 + $0xd04] ss:$52 sps:$4 sm:$0xff]   ;;  %v14677_v45 = vld [vmem:[%s21918_s1 + $0x82c] ss:$52 sps:$4 sm:$0xff]  }
  0x2e   :  { %v71_v54 = vcombine.high %v17099_v50, %v17099_v50 }
  0x2f   :  { %5300 = vmatpush2.bf16.msra.mxu0 %v14530_v53  ;;  %v17107_v53 = vpack.c.bf16 %v70_v48, %v70_v48  ;;  %v14680_v48 = vld [vmem:[%s21918_s1 + $0x144] ss:$52 sps:$4 sm:$0xff]  }
  0x30   :  { %5341 = vmatpush2.bf16.msra.mxu1 %v14531_v56  ;;  %5301 = vmatprep.subr.bf16.mxu0 %v14532_v57  ;;  %v17117_v56 = vpack.c.bf16 %v71_v54, %v71_v54  ;;  %v14607_v57 = vld [vmem:[%s21918_s1 + $0x131c] ss:$52 sps:$4 sm:$0xff]  }
  0x31   :  { %5342 = vmatprep.subr.bf16.mxu1 %v14534_v58  ;;  %v14610_v58 = vld [vmem:[%s21918_s1 + $0x199c] ss:$52 sps:$4 sm:$0xff]  }
  0x32   :  { %v14686_v54 = vld [vmem:[%s21918_s1 + $0xdc] ss:$52 sps:$4 sm:$0xff]  }
  0x33   :  { %5302 = vmatpush2.bf16.msra.mxu0 %v14536_v61  ;;  %v14613_v61 = vld [vmem:[%s21918_s1 + $0x12b4] ss:$52 sps:$4 sm:$0xff]  }
  0x34   :  { %5343 = vmatpush2.bf16.msra.mxu1 %v14537_v0  ;;  %5303 = vmatprep.subr.bf16.mxu0 %v14538_v1  ;;  %v14611_v0 = vld [vmem:[%s21918_s1 + $0x12b0] ss:$52 sps:$4 sm:$0xff]  }
  0x35   :  { %5344 = vmatprep.subr.bf16.mxu1 %v14540_v2  ;;  %v14614_v1 = vld [vmem:[%s21918_s1 + $0x1930] ss:$52 sps:$4 sm:$0xff]   ;;  %v14619_v2 = vld [vmem:[%s21918_s1 + $0x124c] ss:$52 sps:$4 sm:$0xff]  }
  0x37   :  { %5304 = vmatpush2.bf16.msra.mxu0 %v14542_v4  ;;  %v14622_v4 = vld [vmem:[%s21918_s1 + $0x18cc] ss:$52 sps:$4 sm:$0xff]  }
  0x38   :  { %5345 = vmatpush2.bf16.msra.mxu1 %v14543_v5  ;;  %5305 = vmatprep.subr.bf16.mxu0 %v14544_v6  ;;  %v14617_v5 = vld [vmem:[%s21918_s1 + $0x1248] ss:$52 sps:$4 sm:$0xff]  }
  0x39   :  { %5346 = vmatprep.subr.bf16.mxu1 %v14546_v7  ;;  %v14620_v6 = vld [vmem:[%s21918_s1 + $0x18c8] ss:$52 sps:$4 sm:$0xff]   ;;  %v14625_v7 = vld [vmem:[%s21918_s1 + $0x11e4] ss:$52 sps:$4 sm:$0xff]  }
  0x3b   :  { %5306 = vmatpush2.bf16.msra.mxu0 %v14548_v8  ;;  %v14628_v8 = vld [vmem:[%s21918_s1 + $0x1864] ss:$52 sps:$4 sm:$0xff]  }
  0x3c   :  { %5347 = vmatpush2.bf16.msra.mxu1 %v14549_v9  ;;  %5307 = vmatprep.subr.bf16.mxu0 %v14550_v10  ;;  %v14623_v9 = vld [vmem:[%s21918_s1 + $0x11e0] ss:$52 sps:$4 sm:$0xff]  }
  0x3d   :  { %5348 = vmatprep.subr.bf16.mxu1 %v14552_v11  ;;  %v14626_v10 = vld [vmem:[%s21918_s1 + $0x1860] ss:$52 sps:$4 sm:$0xff]   ;;  %v14631_v11 = vld [vmem:[%s21918_s1 + $0x117c] ss:$52 sps:$4 sm:$0xff]  }
  0x3f   :  { %5308 = vmatpush2.bf16.msra.mxu0 %v14554_v12  ;;  %v14634_v12 = vld [vmem:[%s21918_s1 + $0x17fc] ss:$52 sps:$4 sm:$0xff]  }
  0x40   :  { %5349 = vmatpush2.bf16.msra.mxu1 %v14555_v13  ;;  %5359 = vmatprep.subr.bf16.mxu0 %v14559_v14  ;;  %v14629_v13 = vld [vmem:[%s21918_s1 + $0x1178] ss:$52 sps:$4 sm:$0xff]  }
  0x41   :  { %5400 = vmatprep.subr.bf16.mxu1 %v14562_v15  ;;  %v14632_v14 = vld [vmem:[%s21918_s1 + $0x17f8] ss:$52 sps:$4 sm:$0xff]   ;;  %v14637_v15 = vld [vmem:[%s21918_s1 + $0x1114] ss:$52 sps:$4 sm:$0xff]  }
  0x42   :  { %5310 = vmatmul.mubr.bf16.vlgmr.msra.gmra.mxu0 %v17006_v16 }
  0x43   :  { %5351 = vmatmul.mubr.bf16.vlgmr.msra.gmra.mxu1 %v17008_v17  ;;  %5360 = vmatpush1.bf16.msra.mxu0 %v14557_v18  ;;  %v14640_v18 = vld [vmem:[%s21918_s1 + $0x1794] ss:$52 sps:$4 sm:$0xff]  }
  0x44   :  { %5401 = vmatpush1.bf16.msra.mxu1 %v14560_v19  ;;  %5361 = vmatprep.subr.bf16.mxu0 %v14565_v20  ;;  %v14635_v19 = vld [vmem:[%s21918_s1 + $0x1110] ss:$52 sps:$4 sm:$0xff]  }
  0x45   :  { %5402 = vmatprep.subr.bf16.mxu1 %v14568_v21  ;;  %5391 = vmatprep.mubr.bf16.mxu0 %v17107_v53  ;;  %v14638_v20 = vld [vmem:[%s21918_s1 + $0x1790] ss:$52 sps:$4 sm:$0xff]   ;;  %v14643_v21 = vld [vmem:[%s21918_s1 + $0x10ac] ss:$52 sps:$4 sm:$0xff]  }
  0x46   :  { %5432 = vmatprep.mubr.bf16.mxu1 %v17117_v56 }
  0x47   :  { %5362 = vmatpush1.bf16.msra.mxu0 %v14563_v22  ;;  %v14646_v22 = vld [vmem:[%s21918_s1 + $0x172c] ss:$52 sps:$4 sm:$0xff]  }
  0x48   :  { %5403 = vmatpush1.bf16.msra.mxu1 %v14566_v23  ;;  %5363 = vmatprep.subr.bf16.mxu0 %v14571_v24  ;;  %v14641_v23 = vld [vmem:[%s21918_s1 + $0x10a8] ss:$52 sps:$4 sm:$0xff]  }
  0x49   :  { %5404 = vmatprep.subr.bf16.mxu1 %v14574_v25  ;;  %v14644_v24 = vld [vmem:[%s21918_s1 + $0x1728] ss:$52 sps:$4 sm:$0xff]   ;;  %v14649_v25 = vld [vmem:[%s21918_s1 + $0x1044] ss:$52 sps:$4 sm:$0xff]  }
  0x4b   :  { %5364 = vmatpush1.bf16.msra.mxu0 %v14569_v26  ;;  %v14652_v26 = vld [vmem:[%s21918_s1 + $0x16c4] ss:$52 sps:$4 sm:$0xff]  }
  0x4c   :  { %5405 = vmatpush1.bf16.msra.mxu1 %v14572_v27  ;;  %5365 = vmatprep.subr.bf16.mxu0 %v14577_v28  ;;  %v14647_v27 = vld [vmem:[%s21918_s1 + $0x1040] ss:$52 sps:$4 sm:$0xff]  }
  0x4d   :  { %5406 = vmatprep.subr.bf16.mxu1 %v14580_v29  ;;  %v14650_v28 = vld [vmem:[%s21918_s1 + $0x16c0] ss:$52 sps:$4 sm:$0xff]   ;;  %v14656_v29 = vld [vmem:[%s21918_s1 + $0x2e4] ss:$52 sps:$4 sm:$0xff]  }
  0x4f   :  { %5366 = vmatpush1.bf16.msra.mxu0 %v14575_v30  ;;  %v14659_v30 = vld [vmem:[%s21918_s1 + $0x964] ss:$52 sps:$4 sm:$0xff]  }
  0x50   :  { %5407 = vmatpush1.bf16.msra.mxu1 %v14578_v31  ;;  %5367 = vmatprep.subr.bf16.mxu0 %v14583_v32  ;;  %v17225_v31 = vpack.c.bf16 %v17088_v44, %v17088_v44  ;;  %v17229_v32 = vpack.c.bf16 %v17099_v50, %v17099_v50  ;;  %v14674_v44 = vld [vmem:[%s21918_s1 + $0x1ac] ss:$52 sps:$4 sm:$0xff]   ;;  %v14683_v50 = vld [vmem:[%s21918_s1 + $0x7c4] ss:$52 sps:$4 sm:$0xff]  }
  0x51   :  { %5408 = vmatprep.subr.bf16.mxu1 %v14586_v33  ;;  %v14654_v33 = vld [vmem:[%s21918_s1 + $0x2e0] ss:$52 sps:$4 sm:$0xff]  }
  0x53   :  { %5368 = vmatpush1.bf16.msra.mxu0 %v14581_v34  ;;  %v14657_v34 = vld [vmem:[%s21918_s1 + $0x960] ss:$52 sps:$4 sm:$0xff]  }
  0x54   :  { %5409 = vmatpush1.bf16.msra.mxu1 %v14584_v35  ;;  %5369 = vmatprep.subr.bf16.mxu0 %v14589_v36  ;;  %v14662_v35 = vld [vmem:[%s21918_s1 + $0x27c] ss:$52 sps:$4 sm:$0xff]  }
  0x55   :  { %5410 = vmatprep.subr.bf16.mxu1 %v14592_v37  ;;  %v14665_v36 = vld [vmem:[%s21918_s1 + $0x8fc] ss:$52 sps:$4 sm:$0xff]   ;;  %v14660_v37 = vld [vmem:[%s21918_s1 + $0x278] ss:$52 sps:$4 sm:$0xff]  }
  0x57   :  { %5370 = vmatpush1.bf16.msra.mxu0 %v14587_v38  ;;  %v14663_v38 = vld [vmem:[%s21918_s1 + $0x8f8] ss:$52 sps:$4 sm:$0xff]  }
  0x58   :  { %5411 = vmatpush1.bf16.msra.mxu1 %v14590_v39  ;;  %5371 = vmatprep.subr.bf16.mxu0 %v14595_v40  ;;  %v14668_v39 = vld [vmem:[%s21918_s1 + $0x214] ss:$52 sps:$4 sm:$0xff]  }
  0x59   :  { %5412 = vmatprep.subr.bf16.mxu1 %v14598_v41  ;;  %v14671_v40 = vld [vmem:[%s21918_s1 + $0x894] ss:$52 sps:$4 sm:$0xff]   ;;  %v14666_v41 = vld [vmem:[%s21918_s1 + $0x210] ss:$52 sps:$4 sm:$0xff]  }
  0x5b   :  { %5372 = vmatpush1.bf16.msra.mxu0 %v14593_v46  ;;  %v14672_v46 = vld [vmem:[%s21918_s1 + $0x1a8] ss:$52 sps:$4 sm:$0xff]  }
  0x5c   :  { %5413 = vmatpush1.bf16.msra.mxu1 %v14596_v47  ;;  %5373 = vmatprep.subr.bf16.mxu0 %v14601_v51  ;;  %v14675_v47 = vld [vmem:[%s21918_s1 + $0x828] ss:$52 sps:$4 sm:$0xff]   ;;  %v14678_v51 = vld [vmem:[%s21918_s1 + $0x140] ss:$52 sps:$4 sm:$0xff]  }
  0x5d   :  { %5414 = vmatprep.subr.bf16.mxu1 %v14604_v52  ;;  %v14681_v52 = vld [vmem:[%s21918_s1 + $0x7c0] ss:$52 sps:$4 sm:$0xff]  }
  0x5f   :  { %5374 = vmatpush1.bf16.msra.mxu0 %v14599_v49  ;;  %v14689_v49 = vld [vmem:[%s21918_s1 + $0x75c] ss:$52 sps:$4 sm:$0xff]  }
  0x60   :  { %5415 = vmatpush1.bf16.msra.mxu1 %v14602_v55  ;;  %5375 = vmatprep.subr.bf16.mxu0 %v14607_v57  ;;  %v14684_v55 = vld [vmem:[%s21918_s1 + $0xd8] ss:$52 sps:$4 sm:$0xff]  }
  0x61   :  { %5416 = vmatprep.subr.bf16.mxu1 %v14610_v58  ;;  %v14687_v57 = vld [vmem:[%s21918_s1 + $0x758] ss:$52 sps:$4 sm:$0xff]   ;;  %v14692_v58 = vld [vmem:[%s21918_s1 + $0x74] ss:$52 sps:$4 sm:$0xff]  }
  0x63   :  { %5376 = vmatpush2.bf16.msra.mxu0 %v14605_v59  ;;  %v14695_v59 = vld [vmem:[%s21918_s1 + $0x6f4] ss:$52 sps:$4 sm:$0xff]  }
  0x64   :  { %5417 = vmatpush2.bf16.msra.mxu1 %v14608_v60  ;;  %5377 = vmatprep.subr.bf16.mxu0 %v14613_v61  ;;  %v14690_v60 = vld [vmem:[%s21918_s1 + $0x70] ss:$52 sps:$4 sm:$0xff]  }
  0x65   :  { %5418 = vmatprep.subr.bf16.mxu1 %v14616_v63  ;;  %v14693_v61 = vld [vmem:[%s21918_s1 + $0x6f0] ss:$52 sps:$4 sm:$0xff]   ;;  %v14698_v63 = vld [vmem:[%s21918_s1 + $0xc] ss:$52 sps:$4 sm:$0xff]  }
  0x67   :  { %5378 = vmatpush2.bf16.msra.mxu0 %v14611_v0  ;;  %v14701_v0 = vld [vmem:[%s21918_s1 + $0x68c] ss:$52 sps:$4 sm:$0xff]  }
  0x68   :  { %5419 = vmatpush2.bf16.msra.mxu1 %v14614_v1  ;;  %5379 = vmatprep.subr.bf16.mxu0 %v14619_v2  ;;  %v14696_v1 = vld [vmem:[%s21918_s1 + $0x8] ss:$52 sps:$4 sm:$0xff]  }
  0x69   :  { %5420 = vmatprep.subr.bf16.mxu1 %v14622_v4  ;;  %v14699_v2 = vld [vmem:[%s21918_s1 + $0x688] ss:$52 sps:$4 sm:$0xff]   ;;  %v14704_v4 = vld [vmem:[%s21918_s1 + $0x624] ss:$52 sps:$4 sm:$0xff]  }
  0x6b   :  { %5380 = vmatpush2.bf16.msra.mxu0 %v14617_v5  ;;  %v14707_v5 = vld [vmem:[%s21918_s1 + $0xca4] ss:$52 sps:$4 sm:$0xff]  }
  0x6c   :  { %5421 = vmatpush2.bf16.msra.mxu1 %v14620_v6  ;;  %5381 = vmatprep.subr.bf16.mxu0 %v14625_v7  ;;  %v14702_v6 = vld [vmem:[%s21918_s1 + $0x620] ss:$52 sps:$4 sm:$0xff]  }
  0x6d   :  { %5422 = vmatprep.subr.bf16.mxu1 %v14628_v8  ;;  %v14705_v7 = vld [vmem:[%s21918_s1 + $0xca0] ss:$52 sps:$4 sm:$0xff]   ;;  %v14710_v8 = vld [vmem:[%s21918_s1 + $0x5bc] ss:$52 sps:$4 sm:$0xff]  }
  0x6f   :  { %5382 = vmatpush2.bf16.msra.mxu0 %v14623_v9  ;;  %v14713_v9 = vld [vmem:[%s21918_s1 + $0xc3c] ss:$52 sps:$4 sm:$0xff]  }
  0x70   :  { %5423 = vmatpush2.bf16.msra.mxu1 %v14626_v10  ;;  %5383 = vmatprep.subr.bf16.mxu0 %v14631_v11  ;;  %v14708_v10 = vld [vmem:[%s21918_s1 + $0x5b8] ss:$52 sps:$4 sm:$0xff]  }
  0x71   :  { %5424 = vmatprep.subr.bf16.mxu1 %v14634_v12  ;;  %v14711_v11 = vld [vmem:[%s21918_s1 + $0xc38] ss:$52 sps:$4 sm:$0xff]   ;;  %v14716_v12 = vld [vmem:[%s21918_s1 + $0x554] ss:$52 sps:$4 sm:$0xff]  }
  0x73   :  { %5384 = vmatpush2.bf16.msra.mxu0 %v14629_v13  ;;  %v14719_v13 = vld [vmem:[%s21918_s1 + $0xbd4] ss:$52 sps:$4 sm:$0xff]  }
  0x74   :  { %5425 = vmatpush2.bf16.msra.mxu1 %v14632_v14  ;;  %5385 = vmatprep.subr.bf16.mxu0 %v14637_v15  ;;  %v14714_v14 = vld [vmem:[%s21918_s1 + $0x550] ss:$52 sps:$4 sm:$0xff]  }
  0x75   :  { %5426 = vmatprep.subr.bf16.mxu1 %v14640_v18  ;;  %v14717_v15 = vld [vmem:[%s21918_s1 + $0xbd0] ss:$52 sps:$4 sm:$0xff]   ;;  %v14722_v18 = vld [vmem:[%s21918_s1 + $0x4ec] ss:$52 sps:$4 sm:$0xff]  }
  0x77   :  { %5386 = vmatpush2.bf16.msra.mxu0 %v14635_v19  ;;  %v14725_v19 = vld [vmem:[%s21918_s1 + $0xb6c] ss:$52 sps:$4 sm:$0xff]  }
  0x78   :  { %5427 = vmatpush2.bf16.msra.mxu1 %v14638_v20  ;;  %5387 = vmatprep.subr.bf16.mxu0 %v14643_v21  ;;  %v14720_v20 = vld [vmem:[%s21918_s1 + $0x4e8] ss:$52 sps:$4 sm:$0xff]  }
  0x79   :  { %5428 = vmatprep.subr.bf16.mxu1 %v14646_v22  ;;  %v14723_v21 = vld [vmem:[%s21918_s1 + $0xb68] ss:$52 sps:$4 sm:$0xff]   ;;  %v14728_v22 = vld [vmem:[%s21918_s1 + $0x484] ss:$52 sps:$4 sm:$0xff]  }
  0x7b   :  { %5388 = vmatpush2.bf16.msra.mxu0 %v14641_v23  ;;  %v14731_v23 = vld [vmem:[%s21918_s1 + $0xb04] ss:$52 sps:$4 sm:$0xff]  }
  0x7c   :  { %5429 = vmatpush2.bf16.msra.mxu1 %v14644_v24  ;;  %5389 = vmatprep.subr.bf16.mxu0 %v14649_v25  ;;  %v14726_v24 = vld [vmem:[%s21918_s1 + $0x480] ss:$52 sps:$4 sm:$0xff]  }
  0x7d   :  { %5430 = vmatprep.subr.bf16.mxu1 %v14652_v26  ;;  %v14729_v25 = vld [vmem:[%s21918_s1 + $0xb00] ss:$52 sps:$4 sm:$0xff]   ;;  %v14734_v26 = vld [vmem:[%s21918_s1 + $0x41c] ss:$52 sps:$4 sm:$0xff]  }
  0x7f   :  { %5390 = vmatpush2.bf16.msra.mxu0 %v14647_v27  ;;  %v14737_v27 = vld [vmem:[%s21918_s1 + $0xa9c] ss:$52 sps:$4 sm:$0xff]  }
  0x80   :  { %5431 = vmatpush2.bf16.msra.mxu1 %v14650_v28  ;;  %5441 = vmatprep.subr.bf16.mxu0 %v14656_v29  ;;  %v14732_v28 = vld [vmem:[%s21918_s1 + $0x418] ss:$52 sps:$4 sm:$0xff]  }
  0x81   :  { %5482 = vmatprep.subr.bf16.mxu1 %v14659_v30  ;;  %v14735_v29 = vld [vmem:[%s21918_s1 + $0xa98] ss:$52 sps:$4 sm:$0xff]   ;;  %v14740_v30 = vld [vmem:[%s21918_s1 + $0x3b4] ss:$52 sps:$4 sm:$0xff]  }
  0x82   :  { %5392 = vmatmul.mubr.bf16.vlgmr.msra.gmra.mxu0 %v17225_v31 }
  0x83   :  { %5433 = vmatmul.mubr.bf16.vlgmr.msra.gmra.mxu1 %v17229_v32  ;;  %5442 = vmatpush1.bf16.msra.mxu0 %v14654_v33  ;;  %v14743_v33 = vld [vmem:[%s21918_s1 + $0xa34] ss:$52 sps:$4 sm:$0xff]  }
  0x84   :  { %5483 = vmatpush1.bf16.msra.mxu1 %v14657_v34  ;;  %5443 = vmatprep.subr.bf16.mxu0 %v14662_v35  ;;  %v14738_v34 = vld [vmem:[%s21918_s1 + $0x3b0] ss:$52 sps:$4 sm:$0xff]  }
  0x85   :  { %5484 = vmatprep.subr.bf16.mxu1 %v14665_v36  ;;  %5473 = vmatprep.mubr.bf16.mxu0 %v16955_v62  ;;  %v14741_v35 = vld [vmem:[%s21918_s1 + $0xa30] ss:$52 sps:$4 sm:$0xff]   ;;  %v14746_v36 = vld [vmem:[%s21918_s1 + $0x34c] ss:$52 sps:$4 sm:$0xff]  }
  0x86   :  { %5514 = vmatprep.mubr.bf16.mxu1 %v16966_v3 }
  0x87   :  { %5444 = vmatpush1.bf16.msra.mxu0 %v14660_v37  ;;  %v14749_v37 = vld [vmem:[%s21918_s1 + $0x9cc] ss:$52 sps:$4 sm:$0xff]  }
  0x88   :  { %5485 = vmatpush1.bf16.msra.mxu1 %v14663_v38  ;;  %5445 = vmatprep.subr.bf16.mxu0 %v14668_v39  ;;  %v14744_v38 = vld [vmem:[%s21918_s1 + $0x348] ss:$52 sps:$4 sm:$0xff]  }
  0x89   :  { %5486 = vmatprep.subr.bf16.mxu1 %v14671_v40  ;;  %v14747_v39 = vld [vmem:[%s21918_s1 + $0x9c8] ss:$52 sps:$4 sm:$0xff]   ;;  %v14752_v40 = vld [vmem:[%s21918_s1 + $0xfe4] ss:$52 sps:$4 sm:$0xff]  }
  0x8b   :  { %5446 = vmatpush1.bf16.msra.mxu0 %v14666_v41  ;;  %v14755_v41 = vld [vmem:[%s21918_s1 + $0x1664] ss:$52 sps:$4 sm:$0xff]  }
  0x8c   :  { %5487 = vmatpush1.bf16.msra.mxu1 %v14669_v42  ;;  %5447 = vmatprep.subr.bf16.mxu0 %v14674_v44  ;;  %v14750_v42 = vld [vmem:[%s21918_s1 + $0xfe0] ss:$52 sps:$4 sm:$0xff]  }
  0x8d   :  { %5488 = vmatprep.subr.bf16.mxu1 %v14677_v45  ;;  %v14753_v44 = vld [vmem:[%s21918_s1 + $0x1660] ss:$52 sps:$4 sm:$0xff]   ;;  %v14758_v45 = vld [vmem:[%s21918_s1 + $0xf7c] ss:$52 sps:$4 sm:$0xff]  }
  0x8f   :  { %5448 = vmatpush1.bf16.msra.mxu0 %v14672_v46  ;;  %v14761_v46 = vld [vmem:[%s21918_s1 + $0x15fc] ss:$52 sps:$4 sm:$0xff]  }
  0x90   :  { %5489 = vmatpush1.bf16.msra.mxu1 %v14675_v47  ;;  %5449 = vmatprep.subr.bf16.mxu0 %v14680_v48  ;;  %v14756_v47 = vld [vmem:[%s21918_s1 + $0xf78] ss:$52 sps:$4 sm:$0xff]  }
  0x91   :  { %5490 = vmatprep.subr.bf16.mxu1 %v14683_v50  ;;  %v14759_v48 = vld [vmem:[%s21918_s1 + $0x15f8] ss:$52 sps:$4 sm:$0xff]   ;;  %v14764_v50 = vld [vmem:[%s21918_s1 + $0xf14] ss:$52 sps:$4 sm:$0xff]  }
  0x93   :  { %5450 = vmatpush1.bf16.msra.mxu0 %v14678_v51  ;;  %v14767_v51 = vld [vmem:[%s21918_s1 + $0x1594] ss:$52 sps:$4 sm:$0xff]  }
  0x94   :  { %5491 = vmatpush1.bf16.msra.mxu1 %v14681_v52  ;;  %5451 = vmatprep.subr.bf16.mxu0 %v14686_v54  ;;  %v14762_v52 = vld [vmem:[%s21918_s1 + $0xf10] ss:$52 sps:$4 sm:$0xff]  }
  0x95   :  { %5492 = vmatprep.subr.bf16.mxu1 %v14689_v49  ;;  %v14765_v54 = vld [vmem:[%s21918_s1 + $0x1590] ss:$52 sps:$4 sm:$0xff]   ;;  %v14770_v49 = vld [vmem:[%s21918_s1 + $0xeac] ss:$52 sps:$4 sm:$0xff]  }
  0x97   :  { %5452 = vmatpush1.bf16.msra.mxu0 %v14684_v55  ;;  %v14773_v55 = vld [vmem:[%s21918_s1 + $0x152c] ss:$52 sps:$4 sm:$0xff]  }
  0x98   :  { %5493 = vmatpush1.bf16.msra.mxu1 %v14687_v57  ;;  %5453 = vmatprep.subr.bf16.mxu0 %v14692_v58  ;;  %v14768_v57 = vld [vmem:[%s21918_s1 + $0xea8] ss:$52 sps:$4 sm:$0xff]  }
  0x99   :  { %5494 = vmatprep.subr.bf16.mxu1 %v14695_v59  ;;  %v14771_v58 = vld [vmem:[%s21918_s1 + $0x1528] ss:$52 sps:$4 sm:$0xff]   ;;  %v14776_v59 = vld [vmem:[%s21918_s1 + $0xe44] ss:$52 sps:$4 sm:$0xff]  }
  0x9b   :  { %5454 = vmatpush1.bf16.msra.mxu0 %v14690_v60  ;;  %v14779_v60 = vld [vmem:[%s21918_s1 + $0x14c4] ss:$52 sps:$4 sm:$0xff]  }
  0x9c   :  { %5495 = vmatpush1.bf16.msra.mxu1 %v14693_v61  ;;  %5455 = vmatprep.subr.bf16.mxu0 %v14698_v63  ;;  %v14774_v61 = vld [vmem:[%s21918_s1 + $0xe40] ss:$52 sps:$4 sm:$0xff]  }
  0x9d   :  { %5496 = vmatprep.subr.bf16.mxu1 %v14701_v0  ;;  %v14777_v63 = vld [vmem:[%s21918_s1 + $0x14c0] ss:$52 sps:$4 sm:$0xff]   ;;  %v14782_v0 = vld [vmem:[%s21918_s1 + $0xddc] ss:$52 sps:$4 sm:$0xff]  }
  0x9f   :  { %5456 = vmatpush1.bf16.msra.mxu0 %v14696_v1  ;;  %v14785_v1 = vld [vmem:[%s21918_s1 + $0x145c] ss:$52 sps:$4 sm:$0xff]  }
  0xa0   :  { %5497 = vmatpush1.bf16.msra.mxu1 %v14699_v2  ;;  %5457 = vmatprep.subr.bf16.mxu0 %v14704_v4  ;;  %v14780_v2 = vld [vmem:[%s21918_s1 + $0xdd8] ss:$52 sps:$4 sm:$0xff]  }
  0xa1   :  { %5498 = vmatprep.subr.bf16.mxu1 %v14707_v5  ;;  %v14783_v4 = vld [vmem:[%s21918_s1 + $0x1458] ss:$52 sps:$4 sm:$0xff]   ;;  %v14788_v5 = vld [vmem:[%s21918_s1 + $0xd74] ss:$52 sps:$4 sm:$0xff]  }
  0xa3   :  { %5458 = vmatpush2.bf16.msra.mxu0 %v14702_v6  ;;  %v14791_v6 = vld [vmem:[%s21918_s1 + $0x13f4] ss:$52 sps:$4 sm:$0xff]  }
  0xa4   :  { %5499 = vmatpush2.bf16.msra.mxu1 %v14705_v7  ;;  %5459 = vmatprep.subr.bf16.mxu0 %v14710_v8  ;;  %v14786_v7 = vld [vmem:[%s21918_s1 + $0xd70] ss:$52 sps:$4 sm:$0xff]  }
  0xa5   :  { %5500 = vmatprep.subr.bf16.mxu1 %v14713_v9  ;;  %v14789_v8 = vld [vmem:[%s21918_s1 + $0x13f0] ss:$52 sps:$4 sm:$0xff]   ;;  %v14794_v9 = vld [vmem:[%s21918_s1 + $0xd0c] ss:$52 sps:$4 sm:$0xff]  }
  0xa7   :  { %5460 = vmatpush2.bf16.msra.mxu0 %v14708_v10  ;;  %v14797_v10 = vld [vmem:[%s21918_s1 + $0x138c] ss:$52 sps:$4 sm:$0xff]  }
  0xa8   :  { %5501 = vmatpush2.bf16.msra.mxu1 %v14711_v11  ;;  %5461 = vmatprep.subr.bf16.mxu0 %v14716_v12  ;;  %v14792_v11 = vld [vmem:[%s21918_s1 + $0xd08] ss:$52 sps:$4 sm:$0xff]  }
  0xa9   :  { %5502 = vmatprep.subr.bf16.mxu1 %v14719_v13  ;;  %v14795_v12 = vld [vmem:[%s21918_s1 + $0x1388] ss:$52 sps:$4 sm:$0xff]   ;;  %v14800_v13 = vld [vmem:[%s21918_s1 + $0x1324] ss:$52 sps:$4 sm:$0xff]  }
  0xab   :  { %5462 = vmatpush2.bf16.msra.mxu0 %v14714_v14  ;;  %v14803_v14 = vld [vmem:[%s21918_s1 + $0x19a4] ss:$52 sps:$4 sm:$0xff]  }
  0xac   :  { %5503 = vmatpush2.bf16.msra.mxu1 %v14717_v15  ;;  %5463 = vmatprep.subr.bf16.mxu0 %v14722_v18  ;;  %v14798_v15 = vld [vmem:[%s21918_s1 + $0x1320] ss:$52 sps:$4 sm:$0xff]  }
  0xad   :  { %5504 = vmatprep.subr.bf16.mxu1 %v14725_v19  ;;  %v14801_v18 = vld [vmem:[%s21918_s1 + $0x19a0] ss:$52 sps:$4 sm:$0xff]   ;;  %v14806_v19 = vld [vmem:[%s21918_s1 + $0x12bc] ss:$52 sps:$4 sm:$0xff]  }
  0xaf   :  { %5464 = vmatpush2.bf16.msra.mxu0 %v14720_v20  ;;  %v14809_v20 = vld [vmem:[%s21918_s1 + $0x193c] ss:$52 sps:$4 sm:$0xff]  }
  0xb0   :  { %5505 = vmatpush2.bf16.msra.mxu1 %v14723_v21  ;;  %5465 = vmatprep.subr.bf16.mxu0 %v14728_v22  ;;  %v14804_v21 = vld [vmem:[%s21918_s1 + $0x12b8] ss:$52 sps:$4 sm:$0xff]  }
  0xb1   :  { %5506 = vmatprep.subr.bf16.mxu1 %v14731_v23  ;;  %v14807_v22 = vld [vmem:[%s21918_s1 + $0x1938] ss:$52 sps:$4 sm:$0xff]   ;;  %v14812_v23 = vld [vmem:[%s21918_s1 + $0x1254] ss:$52 sps:$4 sm:$0xff]  }
  0xb3   :  { %5466 = vmatpush2.bf16.msra.mxu0 %v14726_v24  ;;  %v14815_v24 = vld [vmem:[%s21918_s1 + $0x18d4] ss:$52 sps:$4 sm:$0xff]  }
  0xb4   :  { %5507 = vmatpush2.bf16.msra.mxu1 %v14729_v25  ;;  %5467 = vmatprep.subr.bf16.mxu0 %v14734_v26  ;;  %v14810_v25 = vld [vmem:[%s21918_s1 + $0x1250] ss:$52 sps:$4 sm:$0xff]  }
  0xb5   :  { %5508 = vmatprep.subr.bf16.mxu1 %v14737_v27  ;;  %v14813_v26 = vld [vmem:[%s21918_s1 + $0x18d0] ss:$52 sps:$4 sm:$0xff]   ;;  %v14818_v27 = vld [vmem:[%s21918_s1 + $0x11ec] ss:$52 sps:$4 sm:$0xff]  }
  0xb7   :  { %5468 = vmatpush2.bf16.msra.mxu0 %v14732_v28  ;;  %v14821_v28 = vld [vmem:[%s21918_s1 + $0x186c] ss:$52 sps:$4 sm:$0xff]  }
  0xb8   :  { %5509 = vmatpush2.bf16.msra.mxu1 %v14735_v29  ;;  %5469 = vmatprep.subr.bf16.mxu0 %v14740_v30  ;;  %v14816_v29 = vld [vmem:[%s21918_s1 + $0x11e8] ss:$52 sps:$4 sm:$0xff]  }
  0xb9   :  { %5510 = vmatprep.subr.bf16.mxu1 %v14743_v33  ;;  %v14819_v30 = vld [vmem:[%s21918_s1 + $0x1868] ss:$52 sps:$4 sm:$0xff]   ;;  %v14824_v33 = vld [vmem:[%s21918_s1 + $0x1184] ss:$52 sps:$4 sm:$0xff]  }
  0xbb   :  { %5470 = vmatpush2.bf16.msra.mxu0 %v14738_v34  ;;  %v14827_v34 = vld [vmem:[%s21918_s1 + $0x1804] ss:$52 sps:$4 sm:$0xff]  }
  0xbc   :  { %5511 = vmatpush2.bf16.msra.mxu1 %v14741_v35  ;;  %5471 = vmatprep.subr.bf16.mxu0 %v14746_v36  ;;  %v14822_v35 = vld [vmem:[%s21918_s1 + $0x1180] ss:$52 sps:$4 sm:$0xff]  }
  0xbd   :  { %5512 = vmatprep.subr.bf16.mxu1 %v14749_v37  ;;  %v14825_v36 = vld [vmem:[%s21918_s1 + $0x1800] ss:$52 sps:$4 sm:$0xff]   ;;  %v14830_v37 = vld [vmem:[%s21918_s1 + $0x111c] ss:$52 sps:$4 sm:$0xff]  }
  0xbf   :  { %5472 = vmatpush2.bf16.msra.mxu0 %v14744_v38  ;;  %v14833_v38 = vld [vmem:[%s21918_s1 + $0x179c] ss:$52 sps:$4 sm:$0xff]  }
  0xc0   :  { %5513 = vmatpush2.bf16.msra.mxu1 %v14747_v39  ;;  %5523 = vmatprep.subr.bf16.mxu0 %v14752_v40  ;;  %v14828_v39 = vld [vmem:[%s21918_s1 + $0x1118] ss:$52 sps:$4 sm:$0xff]  }
  0xc1   :  { %5564 = vmatprep.subr.bf16.mxu1 %v14755_v41  ;;  %v14831_v40 = vld [vmem:[%s21918_s1 + $0x1798] ss:$52 sps:$4 sm:$0xff]   ;;  %v14836_v41 = vld [vmem:[%s21918_s1 + $0x10b4] ss:$52 sps:$4 sm:$0xff]  }
  0xc2   :  { %5474 = vmatmul.mubr.bf16.vlgmr.msra.gmra.mxu0 %v17006_v16 }
  0xc3   :  { %5515 = vmatmul.mubr.bf16.vlgmr.msra.gmra.mxu1 %v17008_v17  ;;  %5524 = vmatpush1.bf16.msra.mxu0 %v14750_v42  ;;  %v14839_v42 = vld [vmem:[%s21918_s1 + $0x1734] ss:$52 sps:$4 sm:$0xff]  }
  0xc4   :  { %5565 = vmatpush1.bf16.msra.mxu1 %v14753_v44  ;;  %5525 = vmatprep.subr.bf16.mxu0 %v14758_v45  ;;  %v14834_v44 = vld [vmem:[%s21918_s1 + $0x10b0] ss:$52 sps:$4 sm:$0xff]  }
  0xc5   :  { %5566 = vmatprep.subr.bf16.mxu1 %v14761_v46  ;;  %5555 = vmatprep.mubr.bf16.mxu0 %v17107_v53  ;;  %v14837_v45 = vld [vmem:[%s21918_s1 + $0x1730] ss:$52 sps:$4 sm:$0xff]   ;;  %v14842_v46 = vld [vmem:[%s21918_s1 + $0x104c] ss:$52 sps:$4 sm:$0xff]  }
  0xc6   :  { %5596 = vmatprep.mubr.bf16.mxu1 %v17117_v56 }
  0xc7   :  { %5526 = vmatpush1.bf16.msra.mxu0 %v14756_v47  ;;  %v14845_v47 = vld [vmem:[%s21918_s1 + $0x16cc] ss:$52 sps:$4 sm:$0xff]  }
  0xc8   :  { %5567 = vmatpush1.bf16.msra.mxu1 %v14759_v48  ;;  %5527 = vmatprep.subr.bf16.mxu0 %v14764_v50  ;;  %v14840_v48 = vld [vmem:[%s21918_s1 + $0x1048] ss:$52 sps:$4 sm:$0xff]  }
  0xc9   :  { %5568 = vmatprep.subr.bf16.mxu1 %v14767_v51  ;;  %v14843_v50 = vld [vmem:[%s21918_s1 + $0x16c8] ss:$52 sps:$4 sm:$0xff]   ;;  %v984_v51 = vld [vmem:[%s21919_s2] sm:$0xff] }
  0xcb   :  { %5528 = vmatpush1.bf16.msra.mxu0 %v14762_v52  ;;  %v17621_v52 = vsub.s32 0, %v16909_v43 }
  0xcc   :  { %5569 = vmatpush1.bf16.msra.mxu1 %v14765_v54  ;;  %5529 = vmatprep.subr.bf16.mxu0 %v14770_v49  ;;  %v14848_v54 = vld [vmem:[%s21918_s1 + $0x2ec] ss:$52 sps:$4 sm:$0xff]  }
  0xcd   :  { %5570 = vmatprep.subr.bf16.mxu1 %v14773_v55  ;;  %v14851_v49 = vld [vmem:[%s21918_s1 + $0x96c] ss:$52 sps:$4 sm:$0xff]   ;;  %v17630_v55 = vsub.s32 1, %v16909_v43 }
  0xcf   :  { %5530 = vmatpush1.bf16.msra.mxu0 %v14768_v57  ;;  %v14846_v57 = vld [vmem:[%s21918_s1 + $0x2e8] ss:$52 sps:$4 sm:$0xff]  }
  0xd0   :  { %5571 = vmatpush1.bf16.msra.mxu1 %v14771_v58  ;;  %5531 = vmatprep.subr.bf16.mxu0 %v14776_v59  ;;  %v991_v58 = vrot.slane %v984_v51, %v17621_v52  ;;  %v14849_v59 = vld [vmem:[%s21918_s1 + $0x968] ss:$52 sps:$4 sm:$0xff]  }
  0xd1   :  { %5572 = vmatprep.subr.bf16.mxu1 %v14779_v60  ;;  %v14854_v60 = vld [vmem:[%s21918_s1 + $0x284] ss:$52 sps:$4 sm:$0xff]  }
  0xd3   :  { %5532 = vmatpush1.bf16.msra.mxu0 %v14774_v61  ;;  %v14857_v61 = vld [vmem:[%s21918_s1 + $0x904] ss:$52 sps:$4 sm:$0xff]  }
  0xd4   :  { %5573 = vmatpush1.bf16.msra.mxu1 %v14777_v63  ;;  %5533 = vmatprep.subr.bf16.mxu0 %v14782_v0  ;;  %v995_v63 = vrot.slane %v984_v51, %v17630_v55  ;;  %v14900_v51 = vld [vmem:[%s21918_s1 + $0x5c0] ss:$52 sps:$4 sm:$0xff]  }
  0xd5   :  { %5574 = vmatprep.subr.bf16.mxu1 %v14785_v1 }
  0xd7   :  { %5534 = vmatpush1.bf16.msra.mxu0 %v14780_v2  ;;  %v14852_v2 = vld [vmem:[%s21918_s1 + $0x280] ss:$52 sps:$4 sm:$0xff]  }
  0xd8   :  { %5575 = vmatpush1.bf16.msra.mxu1 %v14783_v4  ;;  %5535 = vmatprep.subr.bf16.mxu0 %v14788_v5  ;;  %v14855_v4 = vld [vmem:[%s21918_s1 + $0x900] ss:$52 sps:$4 sm:$0xff]  }
  0xd9   :  { %5576 = vmatprep.subr.bf16.mxu1 %v14791_v6 }
  0xdb   :  { %5536 = vmatpush1.bf16.msra.mxu0 %v14786_v7 }
  0xdc   :  { %5577 = vmatpush1.bf16.msra.mxu1 %v14789_v8  ;;  %5537 = vmatprep.subr.bf16.mxu0 %v14794_v9  ;;  %v14860_v8 = vld [vmem:[%s21918_s1 + $0x21c] ss:$52 sps:$4 sm:$0xff]  }
  0xdd   :  { %5578 = vmatprep.subr.bf16.mxu1 %v14797_v10  ;;  %v14863_v9 = vld [vmem:[%s21918_s1 + $0x89c] ss:$52 sps:$4 sm:$0xff]  }
  0xdf   :  { %5538 = vmatpush1.bf16.msra.mxu0 %v14792_v11 }
  0xe0   :  { %5579 = vmatpush1.bf16.msra.mxu1 %v14795_v12  ;;  %5539 = vmatprep.subr.bf16.mxu0 %v14800_v13  ;;  %v14858_v12 = vld [vmem:[%s21918_s1 + $0x218] ss:$52 sps:$4 sm:$0xff]  }
  0xe1   :  { %5580 = vmatprep.subr.bf16.mxu1 %v14803_v14  ;;  %v14861_v13 = vld [vmem:[%s21918_s1 + $0x898] ss:$52 sps:$4 sm:$0xff]  }
  0xe3   :  { %5540 = vmatpush2.bf16.msra.mxu0 %v14798_v15 }
  0xe4   :  { %5581 = vmatpush2.bf16.msra.mxu1 %v14801_v18  ;;  %5541 = vmatprep.subr.bf16.mxu0 %v14806_v19 }
  0xe5   :  { %5582 = vmatprep.subr.bf16.mxu1 %v14809_v20 }
  0xe7   :  { %5542 = vmatpush2.bf16.msra.mxu0 %v14804_v21  ;;  %v14866_v21 = vld [vmem:[%s21918_s1 + $0x1b4] ss:$52 sps:$4 sm:$0xff]  }
  0xe8   :  { %5583 = vmatpush2.bf16.msra.mxu1 %v14807_v22  ;;  %5543 = vmatprep.subr.bf16.mxu0 %v14812_v23  ;;  %v14869_v22 = vld [vmem:[%s21918_s1 + $0x834] ss:$52 sps:$4 sm:$0xff]   ;;  %v14864_v23 = vld [vmem:[%s21918_s1 + $0x1b0] ss:$52 sps:$4 sm:$0xff]  }
  0xe9   :  { %5584 = vmatprep.subr.bf16.mxu1 %v14815_v24  ;;  %v14867_v24 = vld [vmem:[%s21918_s1 + $0x830] ss:$52 sps:$4 sm:$0xff]  }
  0xeb   :  { %5544 = vmatpush2.bf16.msra.mxu0 %v14810_v25  ;;  %v14872_v25 = vld [vmem:[%s21918_s1 + $0x14c] ss:$52 sps:$4 sm:$0xff]  }
  0xec   :  { %5585 = vmatpush2.bf16.msra.mxu1 %v14813_v26  ;;  %5545 = vmatprep.subr.bf16.mxu0 %v14818_v27  ;;  %v14875_v26 = vld [vmem:[%s21918_s1 + $0x7cc] ss:$52 sps:$4 sm:$0xff]   ;;  %v14870_v27 = vld [vmem:[%s21918_s1 + $0x148] ss:$52 sps:$4 sm:$0xff]  }
  0xed   :  { %5586 = vmatprep.subr.bf16.mxu1 %v14821_v28  ;;  %v14873_v28 = vld [vmem:[%s21918_s1 + $0x7c8] ss:$52 sps:$4 sm:$0xff]  }
  0xef   :  { %5546 = vmatpush2.bf16.msra.mxu0 %v14816_v29  ;;  %v14878_v29 = vld [vmem:[%s21918_s1 + $0xe4] ss:$52 sps:$4 sm:$0xff]  }
  0xf0   :  { %5587 = vmatpush2.bf16.msra.mxu1 %v14819_v30  ;;  %5547 = vmatprep.subr.bf16.mxu0 %v14824_v33  ;;  %v14881_v30 = vld [vmem:[%s21918_s1 + $0x764] ss:$52 sps:$4 sm:$0xff]   ;;  %v14876_v33 = vld [vmem:[%s21918_s1 + $0xe0] ss:$52 sps:$4 sm:$0xff]  }
  0xf1   :  { %5588 = vmatprep.subr.bf16.mxu1 %v14827_v34  ;;  %v14879_v34 = vld [vmem:[%s21918_s1 + $0x760] ss:$52 sps:$4 sm:$0xff]  }
  0xf3   :  { %5548 = vmatpush2.bf16.msra.mxu0 %v14822_v35  ;;  %v14884_v35 = vld [vmem:[%s21918_s1 + $0x7c] ss:$52 sps:$4 sm:$0xff]  }
  0xf4   :  { %5589 = vmatpush2.bf16.msra.mxu1 %v14825_v36  ;;  %5549 = vmatprep.subr.bf16.mxu0 %v14830_v37  ;;  %v14887_v36 = vld [vmem:[%s21918_s1 + $0x6fc] ss:$52 sps:$4 sm:$0xff]   ;;  %v14882_v37 = vld [vmem:[%s21918_s1 + $0x78] ss:$52 sps:$4 sm:$0xff]  }
  0xf5   :  { %5590 = vmatprep.subr.bf16.mxu1 %v14833_v38  ;;  %v14885_v38 = vld [vmem:[%s21918_s1 + $0x6f8] ss:$52 sps:$4 sm:$0xff]  }
  0xf7   :  { %5550 = vmatpush2.bf16.msra.mxu0 %v14828_v39  ;;  %v14890_v39 = vld [vmem:[%s21918_s1 + $0x14] ss:$52 sps:$4 sm:$0xff]  }
  0xf8   :  { %5591 = vmatpush2.bf16.msra.mxu1 %v14831_v40  ;;  %5551 = vmatprep.subr.bf16.mxu0 %v14836_v41  ;;  %v14893_v40 = vld [vmem:[%s21918_s1 + $0x694] ss:$52 sps:$4 sm:$0xff]   ;;  %v14888_v41 = vld [vmem:[%s21918_s1 + $0x10] ss:$52 sps:$4 sm:$0xff]  }
  0xf9   :  { %5592 = vmatprep.subr.bf16.mxu1 %v14839_v42  ;;  %v14891_v42 = vld [vmem:[%s21918_s1 + $0x690] ss:$52 sps:$4 sm:$0xff]  }
  0xfb   :  { %5552 = vmatpush2.bf16.msra.mxu0 %v14834_v44  ;;  %v14896_v44 = vld [vmem:[%s21918_s1 + $0x62c] ss:$52 sps:$4 sm:$0xff]  }
  0xfc   :  { %5593 = vmatpush2.bf16.msra.mxu1 %v14837_v45  ;;  %5553 = vmatprep.subr.bf16.mxu0 %v14842_v46  ;;  %v14899_v45 = vld [vmem:[%s21918_s1 + $0xcac] ss:$52 sps:$4 sm:$0xff]   ;;  %v14894_v46 = vld [vmem:[%s21918_s1 + $0x628] ss:$52 sps:$4 sm:$0xff]  }
  0xfd   :  { %5594 = vmatprep.subr.bf16.mxu1 %v14845_v47  ;;  %v14897_v47 = vld [vmem:[%s21918_s1 + $0xca8] ss:$52 sps:$4 sm:$0xff]  }
  0xff   :  { %5554 = vmatpush2.bf16.msra.mxu0 %v14840_v48  ;;  %v14902_v48 = vld [vmem:[%s21918_s1 + $0x5c4] ss:$52 sps:$4 sm:$0xff]  }
 0x100   :  { %5595 = vmatpush2.bf16.msra.mxu1 %v14843_v50  ;;  %5605 = vmatprep.subr.bf16.mxu0 %v14848_v54  ;;  %v14905_v50 = vld [vmem:[%s21918_s1 + $0xc44] ss:$52 sps:$4 sm:$0xff]   ;;  %v14903_v54 = vld [vmem:[%s21918_s1 + $0xc40] ss:$52 sps:$4 sm:$0xff]  }
 0x101   :  { %5646 = vmatprep.subr.bf16.mxu1 %v14851_v49  ;;  %v14908_v49 = vld [vmem:[%s21918_s1 + $0x55c] ss:$52 sps:$4 sm:$0xff]  }
 0x102   :  { %v5311_v0 = vpop.f32.mrf.mxu0  ;;  %5556 = vmatmul.mubr.bf16.vlgmr.msra.gmra.mxu0 %v17225_v31 }
 0x103   :  { %v5352_v1 = vpop.f32.mrf.mxu1  ;;  %5597 = vmatmul.mubr.bf16.vlgmr.msra.gmra.mxu1 %v17229_v32  ;;  %v5312_v5 = vadd.f32 %v5311_v0, %v991_v58  ;;  %5606 = vmatpush1.bf16.msra.mxu0 %v14846_v57  ;;  %v14911_v57 = vld [vmem:[%s21918_s1 + $0xbdc] ss:$52 sps:$4 sm:$0xff]   ;;  %v14906_v58 = vld [vmem:[%s21918_s1 + $0x558] ss:$52 sps:$4 sm:$0xff]  }
 0x104   :  { %5647 = vmatpush1.bf16.msra.mxu1 %v14849_v59  ;;  %v5313_v6 = vpop.f32.mrf.mxu0  ;;  %5607 = vmatprep.subr.bf16.mxu0 %v14854_v60  ;;  %v14909_v59 = vld [vmem:[%s21918_s1 + $0xbd8] ss:$52 sps:$4 sm:$0xff]   ;;  %v14914_v60 = vld [vmem:[%s21918_s1 + $0x4f4] ss:$52 sps:$4 sm:$0xff]   ;;  %v14915_v0 = vld [vmem:[%s21918_s1 + $0xb70] ss:$52 sps:$4 sm:$0xff]  }
 0x105   :  { %v5354_v7 = vpop.f32.mrf.mxu1  ;;  %5648 = vmatprep.subr.bf16.mxu1 %v14857_v61  ;;  %v17660_v10 = vadd.f32 %v5352_v1, %v5312_v5  ;;  %v5314_v11 = vadd.f32 %v5313_v6, %v995_v63  ;;  %5637 = vmatprep.mubr.bf16.mxu0 %v16955_v62  ;;  %v14917_v61 = vld [vmem:[%s21918_s1 + $0xb74] ss:$52 sps:$4 sm:$0xff]   ;;  %v14912_v63 = vld [vmem:[%s21918_s1 + $0x4f0] ss:$52 sps:$4 sm:$0xff]   ;;  %v14920_v1 = vld [vmem:[%s21918_s1 + $0x48c] ss:$52 sps:$4 sm:$0xff]  }
 0x106   :  { %5678 = vmatprep.mubr.bf16.mxu1 %v16966_v3  ;;  %v5315_v14 = vpop.f32.mrf.mxu0  ;;  %v14921_v5 = vld [vmem:[%s21918_s1 + $0xb08] ss:$52 sps:$4 sm:$0xff]   ;;  %v14926_v6 = vld [vmem:[%s21918_s1 + $0x424] ss:$52 sps:$4 sm:$0xff]  }
 0x107   :  { %v5356_v15 = vpop.f32.mrf.mxu1  ;;  %v17670_v18 = vadd.f32 %v5354_v7, %v5314_v11  ;;  %5608 = vmatpush1.bf16.msra.mxu0 %v14852_v2  ;;  %v14923_v2 = vld [vmem:[%s21918_s1 + $0xb0c] ss:$52 sps:$4 sm:$0xff]   ;;  %v14929_v7 = vld [vmem:[%s21918_s1 + $0xaa4] ss:$52 sps:$4 sm:$0xff]   ;;  %v14932_v11 = vld [vmem:[%s21918_s1 + $0x3bc] ss:$52 sps:$4 sm:$0xff]  }
 0x108   :  { %5649 = vmatpush1.bf16.msra.mxu1 %v14855_v4  ;;  %v5316_v19 = vpop.f32.mrf.mxu0  ;;  %5609 = vmatprep.subr.bf16.mxu0 %v14860_v8  ;;  %v14918_v4 = vld [vmem:[%s21918_s1 + $0x488] ss:$52 sps:$4 sm:$0xff]   ;;  %v14924_v8 = vld [vmem:[%s21918_s1 + $0x420] ss:$52 sps:$4 sm:$0xff]   ;;  %v14933_v14 = vld [vmem:[%s21918_s1 + $0xa38] ss:$52 sps:$4 sm:$0xff]  }
 0x109   :  { %v5357_v20 = vpop.f32.mrf.mxu1  ;;  %5650 = vmatprep.subr.bf16.mxu1 %v14863_v9  ;;  %v14927_v9 = vld [vmem:[%s21918_s1 + $0xaa0] ss:$52 sps:$4 sm:$0xff]  }
 0x10a   :  { %v14938_v15 = vld [vmem:[%s21918_s1 + $0x354] ss:$52 sps:$4 sm:$0xff]   ;;  %v14936_v20 = vld [vmem:[%s21918_s1 + $0x350] ss:$52 sps:$4 sm:$0xff]  }
 0x10b   :  { %5610 = vmatpush1.bf16.msra.mxu0 %v14858_v12  ;;  %v14935_v12 = vld [vmem:[%s21918_s1 + $0xa3c] ss:$52 sps:$4 sm:$0xff]   ;;  %v14941_v19 = vld [vmem:[%s21918_s1 + $0x9d4] ss:$52 sps:$4 sm:$0xff]  }
 0x10c   :  { %5651 = vmatpush1.bf16.msra.mxu1 %v14861_v13  ;;  %5611 = vmatprep.subr.bf16.mxu0 %v14866_v21  ;;  %v14930_v13 = vld [vmem:[%s21918_s1 + $0x3b8] ss:$52 sps:$4 sm:$0xff]   ;;  %v14939_v21 = vld [vmem:[%s21918_s1 + $0x9d0] ss:$52 sps:$4 sm:$0xff]  }
 0x10d   :  { %5652 = vmatprep.subr.bf16.mxu1 %v14869_v22  ;;  %v14944_v22 = vld [vmem:[%s21918_s1 + $0xfec] ss:$52 sps:$4 sm:$0xff]  }
 0x10f   :  { %5612 = vmatpush1.bf16.msra.mxu0 %v14864_v23  ;;  %v14947_v23 = vld [vmem:[%s21918_s1 + $0x166c] ss:$52 sps:$4 sm:$0xff]  }
 0x110   :  { %5653 = vmatpush1.bf16.msra.mxu1 %v14867_v24  ;;  %5613 = vmatprep.subr.bf16.mxu0 %v14872_v25  ;;  %v14942_v24 = vld [vmem:[%s21918_s1 + $0xfe8] ss:$52 sps:$4 sm:$0xff]  }
 0x111   :  { %5654 = vmatprep.subr.bf16.mxu1 %v14875_v26  ;;  %v14945_v25 = vld [vmem:[%s21918_s1 + $0x1668] ss:$52 sps:$4 sm:$0xff]   ;;  %v14950_v26 = vld [vmem:[%s21918_s1 + $0xf84] ss:$52 sps:$4 sm:$0xff]  }
 0x113   :  { %5614 = vmatpush1.bf16.msra.mxu0 %v14870_v27  ;;  %v14953_v27 = vld [vmem:[%s21918_s1 + $0x1604] ss:$52 sps:$4 sm:$0xff]  }
 0x114   :  { %5655 = vmatpush1.bf16.msra.mxu1 %v14873_v28  ;;  %5615 = vmatprep.subr.bf16.mxu0 %v14878_v29  ;;  %v14948_v28 = vld [vmem:[%s21918_s1 + $0xf80] ss:$52 sps:$4 sm:$0xff]  }
 0x115   :  { %5656 = vmatprep.subr.bf16.mxu1 %v14881_v30  ;;  %v14951_v29 = vld [vmem:[%s21918_s1 + $0x1600] ss:$52 sps:$4 sm:$0xff]  }
 0x117   :  { %5616 = vmatpush1.bf16.msra.mxu0 %v14876_v33 }
 0x118   :  { %5657 = vmatpush1.bf16.msra.mxu1 %v14879_v34  ;;  %5617 = vmatprep.subr.bf16.mxu0 %v14884_v35 }
 0x119   :  { %5658 = vmatprep.subr.bf16.mxu1 %v14887_v36 }
 0x11b   :  { %5618 = vmatpush1.bf16.msra.mxu0 %v14882_v37  ;;  %v14956_v37 = vld [vmem:[%s21918_s1 + $0xf1c] ss:$52 sps:$4 sm:$0xff]  }
 0x11c   :  { %5659 = vmatpush1.bf16.msra.mxu1 %v14885_v38  ;;  %5619 = vmatprep.subr.bf16.mxu0 %v14890_v39  ;;  %v14959_v38 = vld [vmem:[%s21918_s1 + $0x159c] ss:$52 sps:$4 sm:$0xff]  }
 0x11d   :  { %5660 = vmatprep.subr.bf16.mxu1 %v14893_v40 }
 0x11f   :  { %5620 = vmatpush1.bf16.msra.mxu0 %v14888_v41  ;;  %v14957_v41 = vld [vmem:[%s21918_s1 + $0x1598] ss:$52 sps:$4 sm:$0xff]  }
 0x120   :  { %5661 = vmatpush1.bf16.msra.mxu1 %v14891_v42  ;;  %5621 = vmatprep.subr.bf16.mxu0 %v14896_v44 }
 0x121   :  { %5662 = vmatprep.subr.bf16.mxu1 %v14899_v45 }
 0x123   :  { %5622 = vmatpush2.bf16.msra.mxu0 %v14894_v46 }
 0x124   :  { %5663 = vmatpush2.bf16.msra.mxu1 %v14897_v47  ;;  %5623 = vmatprep.subr.bf16.mxu0 %v14902_v48  ;;  %v14962_v47 = vld [vmem:[%s21918_s1 + $0xeb4] ss:$52 sps:$4 sm:$0xff]  }
 0x125   :  { %5664 = vmatprep.subr.bf16.mxu1 %v14905_v50  ;;  %v14965_v48 = vld [vmem:[%s21918_s1 + $0x1534] ss:$52 sps:$4 sm:$0xff]   ;;  %v14960_v50 = vld [vmem:[%s21918_s1 + $0xeb0] ss:$52 sps:$4 sm:$0xff]  }
 0x127   :  { %5624 = vmatpush2.bf16.msra.mxu0 %v14900_v51  ;;  %v14963_v51 = vld [vmem:[%s21918_s1 + $0x1530] ss:$52 sps:$4 sm:$0xff]  }
 0x128   :  { %5665 = vmatpush2.bf16.msra.mxu1 %v14903_v54  ;;  %5625 = vmatprep.subr.bf16.mxu0 %v14908_v49  ;;  %v14968_v54 = vld [vmem:[%s21918_s1 + $0xe4c] ss:$52 sps:$4 sm:$0xff]  }
 0x129   :  { %5666 = vmatprep.subr.bf16.mxu1 %v14911_v57  ;;  %v14971_v49 = vld [vmem:[%s21918_s1 + $0x14cc] ss:$52 sps:$4 sm:$0xff]   ;;  %v14966_v57 = vld [vmem:[%s21918_s1 + $0xe48] ss:$52 sps:$4 sm:$0xff]  }
 0x12b   :  { %5626 = vmatpush2.bf16.msra.mxu0 %v14906_v58  ;;  %v14969_v58 = vld [vmem:[%s21918_s1 + $0x14c8] ss:$52 sps:$4 sm:$0xff]  }
 0x12c   :  { %5667 = vmatpush2.bf16.msra.mxu1 %v14909_v59  ;;  %5627 = vmatprep.subr.bf16.mxu0 %v14914_v60  ;;  %v14974_v59 = vld [vmem:[%s21918_s1 + $0xde4] ss:$52 sps:$4 sm:$0xff]  }
 0x12d   :  { %5668 = vmatprep.subr.bf16.mxu1 %v14917_v61  ;;  %v14977_v60 = vld [vmem:[%s21918_s1 + $0x1464] ss:$52 sps:$4 sm:$0xff]   ;;  %v14972_v61 = vld [vmem:[%s21918_s1 + $0xde0] ss:$52 sps:$4 sm:$0xff]  }
 0x12f   :  { %5628 = vmatpush2.bf16.msra.mxu0 %v14912_v63  ;;  %v14975_v63 = vld [vmem:[%s21918_s1 + $0x1460] ss:$52 sps:$4 sm:$0xff]  }
 0x130   :  { %5669 = vmatpush2.bf16.msra.mxu1 %v14915_v0  ;;  %5629 = vmatprep.subr.bf16.mxu0 %v14920_v1  ;;  %v14980_v0 = vld [vmem:[%s21918_s1 + $0xd7c] ss:$52 sps:$4 sm:$0xff]  }
 0x131   :  { %5670 = vmatprep.subr.bf16.mxu1 %v14923_v2  ;;  %v14983_v1 = vld [vmem:[%s21918_s1 + $0x13fc] ss:$52 sps:$4 sm:$0xff]   ;;  %v14978_v2 = vld [vmem:[%s21918_s1 + $0xd78] ss:$52 sps:$4 sm:$0xff]  }
 0x133   :  { %5630 = vmatpush2.bf16.msra.mxu0 %v14918_v4  ;;  %v14981_v4 = vld [vmem:[%s21918_s1 + $0x13f8] ss:$52 sps:$4 sm:$0xff]  }
 0x134   :  { %5671 = vmatpush2.bf16.msra.mxu1 %v14921_v5  ;;  %5631 = vmatprep.subr.bf16.mxu0 %v14926_v6  ;;  %v14986_v5 = vld [vmem:[%s21918_s1 + $0xd14] ss:$52 sps:$4 sm:$0xff]  }
 0x135   :  { %5672 = vmatprep.subr.bf16.mxu1 %v14929_v7  ;;  %v14989_v6 = vld [vmem:[%s21918_s1 + $0x1394] ss:$52 sps:$4 sm:$0xff]   ;;  %v14984_v7 = vld [vmem:[%s21918_s1 + $0xd10] ss:$52 sps:$4 sm:$0xff]  }
 0x137   :  { %5632 = vmatpush2.bf16.msra.mxu0 %v14924_v8  ;;  %v14987_v8 = vld [vmem:[%s21918_s1 + $0x1390] ss:$52 sps:$4 sm:$0xff]  }
 0x138   :  { %5673 = vmatpush2.bf16.msra.mxu1 %v14927_v9  ;;  %5633 = vmatprep.subr.bf16.mxu0 %v14932_v11  ;;  %v14992_v9 = vld [vmem:[%s21918_s1 + $0x132c] ss:$52 sps:$4 sm:$0xff]  }
 0x139   :  { %5674 = vmatprep.subr.bf16.mxu1 %v14935_v12  ;;  %v14995_v11 = vld [vmem:[%s21918_s1 + $0x19ac] ss:$52 sps:$4 sm:$0xff]   ;;  %v14990_v12 = vld [vmem:[%s21918_s1 + $0x1328] ss:$52 sps:$4 sm:$0xff]  }
 0x13b   :  { %5634 = vmatpush2.bf16.msra.mxu0 %v14930_v13  ;;  %v14993_v13 = vld [vmem:[%s21918_s1 + $0x19a8] ss:$52 sps:$4 sm:$0xff]  }
 0x13c   :  { %5675 = vmatpush2.bf16.msra.mxu1 %v14933_v14  ;;  %5635 = vmatprep.subr.bf16.mxu0 %v14938_v15  ;;  %v14998_v14 = vld [vmem:[%s21918_s1 + $0x12c4] ss:$52 sps:$4 sm:$0xff]  }
 0x13d   :  { %5676 = vmatprep.subr.bf16.mxu1 %v14941_v19  ;;  %v15001_v15 = vld [vmem:[%s21918_s1 + $0x1944] ss:$52 sps:$4 sm:$0xff]   ;;  %v14996_v19 = vld [vmem:[%s21918_s1 + $0x12c0] ss:$52 sps:$4 sm:$0xff]  }
 0x13f   :  { %5636 = vmatpush2.bf16.msra.mxu0 %v14936_v20  ;;  %v14999_v20 = vld [vmem:[%s21918_s1 + $0x1940] ss:$52 sps:$4 sm:$0xff]  }
 0x140   :  { %5677 = vmatpush2.bf16.msra.mxu1 %v14939_v21  ;;  %5687 = vmatprep.subr.bf16.mxu0 %v14944_v22  ;;  %v15004_v21 = vld [vmem:[%s21918_s1 + $0x125c] ss:$52 sps:$4 sm:$0xff]  }
 0x141   :  { %5728 = vmatprep.subr.bf16.mxu1 %v14947_v23  ;;  %v15007_v22 = vld [vmem:[%s21918_s1 + $0x18dc] ss:$52 sps:$4 sm:$0xff]   ;;  %v15002_v23 = vld [vmem:[%s21918_s1 + $0x1258] ss:$52 sps:$4 sm:$0xff]  }
 0x142   :  { %v5393_v30 = vpop.f32.mrf.mxu0  ;;  %5638 = vmatmul.mubr.bf16.vlgmr.msra.gmra.mxu0 %v17006_v16 }
 0x143   :  { %v5434_v33 = vpop.f32.mrf.mxu1  ;;  %5679 = vmatmul.mubr.bf16.vlgmr.msra.gmra.mxu1 %v17008_v17  ;;  %v5394_v34 = vadd.f32 %v5393_v30, %v17660_v10  ;;  %5688 = vmatpush1.bf16.msra.mxu0 %v14942_v24  ;;  %v14954_v10 = vld [vmem:[%s21918_s1 + $0xf18] ss:$52 sps:$4 sm:$0xff]  }
 0x144   :  { %5729 = vmatpush1.bf16.msra.mxu1 %v14945_v25  ;;  %v5395_v35 = vpop.f32.mrf.mxu0  ;;  %5689 = vmatprep.subr.bf16.mxu0 %v14950_v26  ;;  %v15005_v24 = vld [vmem:[%s21918_s1 + $0x18d8] ss:$52 sps:$4 sm:$0xff]   ;;  %v15010_v25 = vld [vmem:[%s21918_s1 + $0x11f4] ss:$52 sps:$4 sm:$0xff]  }
 0x145   :  { %v5436_v36 = vpop.f32.mrf.mxu1  ;;  %5730 = vmatprep.subr.bf16.mxu1 %v14953_v27  ;;  %v17861_v39 = vadd.f32 %v5434_v33, %v5394_v34  ;;  %v5396_v40 = vadd.f32 %v5395_v35, %v17670_v18  ;;  %5719 = vmatprep.mubr.bf16.mxu0 %v17107_v53  ;;  %v15013_v26 = vld [vmem:[%s21918_s1 + $0x1874] ss:$52 sps:$4 sm:$0xff]   ;;  %v15008_v27 = vld [vmem:[%s21918_s1 + $0x11f0] ss:$52 sps:$4 sm:$0xff]   ;;  %v15019_v30 = vld [vmem:[%s21918_s1 + $0x180c] ss:$52 sps:$4 sm:$0xff]  }
 0x146   :  { %5760 = vmatprep.mubr.bf16.mxu1 %v17117_v56  ;;  %v5397_v42 = vpop.f32.mrf.mxu0  ;;  %v15014_v33 = vld [vmem:[%s21918_s1 + $0x1188] ss:$52 sps:$4 sm:$0xff]   ;;  %v15022_v35 = vld [vmem:[%s21918_s1 + $0x1124] ss:$52 sps:$4 sm:$0xff]  }
 0x147   :  { %v5438_v44 = vpop.f32.mrf.mxu1  ;;  %v17872_v45 = vadd.f32 %v5436_v36, %v5396_v40  ;;  %5690 = vmatpush1.bf16.msra.mxu0 %v14948_v28  ;;  %v15011_v28 = vld [vmem:[%s21918_s1 + $0x1870] ss:$52 sps:$4 sm:$0xff]   ;;  %v15017_v34 = vld [vmem:[%s21918_s1 + $0x1808] ss:$52 sps:$4 sm:$0xff]   ;;  %v15029_v42 = vld [vmem:[%s21918_s1 + $0x1738] ss:$52 sps:$4 sm:$0xff]  }
 0x148   :  { %5731 = vmatpush1.bf16.msra.mxu1 %v14951_v29  ;;  %v5398_v46 = vpop.f32.mrf.mxu0  ;;  %5691 = vmatprep.subr.bf16.mxu0 %v14956_v37  ;;  %v15016_v29 = vld [vmem:[%s21918_s1 + $0x118c] ss:$52 sps:$4 sm:$0xff]   ;;  %v15025_v36 = vld [vmem:[%s21918_s1 + $0x17a4] ss:$52 sps:$4 sm:$0xff]   ;;  %v15028_v40 = vld [vmem:[%s21918_s1 + $0x10bc] ss:$52 sps:$4 sm:$0xff]  }
 0x149   :  { %v5439_v18 = vpop.f32.mrf.mxu1  ;;  %5732 = vmatprep.subr.bf16.mxu1 %v14959_v38  ;;  %v15020_v37 = vld [vmem:[%s21918_s1 + $0x1120] ss:$52 sps:$4 sm:$0xff]  }
 0x14a   :  { %v15023_v38 = vld [vmem:[%s21918_s1 + $0x17a0] ss:$52 sps:$4 sm:$0xff]   ;;  %v15032_v18 = vld [vmem:[%s21918_s1 + $0x1050] ss:$52 sps:$4 sm:$0xff]  }
 0x14b   :  { %5692 = vmatpush1.bf16.msra.mxu0 %v14954_v10  ;;  %v15031_v10 = vld [vmem:[%s21918_s1 + $0x173c] ss:$52 sps:$4 sm:$0xff]   ;;  %v15034_v44 = vld [vmem:[%s21918_s1 + $0x1054] ss:$52 sps:$4 sm:$0xff]  }
 0x14c   :  { %5733 = vmatpush1.bf16.msra.mxu1 %v14957_v41  ;;  %5693 = vmatprep.subr.bf16.mxu0 %v14962_v47  ;;  %v15026_v41 = vld [vmem:[%s21918_s1 + $0x10b8] ss:$52 sps:$4 sm:$0xff]   ;;  %v15037_v46 = vld [vmem:[%s21918_s1 + $0x16d4] ss:$52 sps:$4 sm:$0xff]   ;;  %v15035_v47 = vld [vmem:[%s21918_s1 + $0x16d0] ss:$52 sps:$4 sm:$0xff]  }
 0x14d   :  { %5734 = vmatprep.subr.bf16.mxu1 %v14965_v48  ;;  %v18031_v48 = vsub.s32 2, %v16909_v43 }
 0x14f   :  { %5694 = vmatpush1.bf16.msra.mxu0 %v14960_v50  ;;  %v15040_v50 = vld [vmem:[%s21918_s1 + $0x2f4] ss:$52 sps:$4 sm:$0xff]  }
 0x150   :  { %5735 = vmatpush1.bf16.msra.mxu1 %v14963_v51  ;;  %5695 = vmatprep.subr.bf16.mxu0 %v14968_v54  ;;  %v15043_v51 = vld [vmem:[%s21918_s1 + $0x974] ss:$52 sps:$4 sm:$0xff]   ;;  %v15038_v54 = vld [vmem:[%s21918_s1 + $0x2f0] ss:$52 sps:$4 sm:$0xff]  }
 0x151   :  { %5736 = vmatprep.subr.bf16.mxu1 %v14971_v49  ;;  %v15041_v49 = vld [vmem:[%s21918_s1 + $0x970] ss:$52 sps:$4 sm:$0xff]  }
 0x153   :  { %5696 = vmatpush1.bf16.msra.mxu0 %v14966_v57  ;;  %v18046_v57 = vsub.s32 3, %v16909_v43 }
 0x154   :  { %5737 = vmatpush1.bf16.msra.mxu1 %v14969_v58  ;;  %5697 = vmatprep.subr.bf16.mxu0 %v14974_v59  ;;  %v16710_v58 = vld [vmem:[%s21919_s2] sm:$0xff] }
 0x155   :  { %5738 = vmatprep.subr.bf16.mxu1 %v14977_v60  ;;  %v999_v59 = vrot.slane %v16710_v58, %v18031_v48  ;;  %v15046_v60 = vld [vmem:[%s21918_s1 + $0x28c] ss:$52 sps:$4 sm:$0xff]  }
 0x157   :  { %5698 = vmatpush1.bf16.msra.mxu0 %v14972_v61  ;;  %v15049_v61 = vld [vmem:[%s21918_s1 + $0x90c] ss:$52 sps:$4 sm:$0xff]  }
 0x158   :  { %5739 = vmatpush1.bf16.msra.mxu1 %v14975_v63  ;;  %5699 = vmatprep.subr.bf16.mxu0 %v14980_v0  ;;  %v1003_v63 = vrot.slane %v16710_v58, %v18046_v57  ;;  %v15044_v0 = vld [vmem:[%s21918_s1 + $0x288] ss:$52 sps:$4 sm:$0xff]  }
 0x159   :  { %5740 = vmatprep.subr.bf16.mxu1 %v14983_v1  ;;  %v15047_v1 = vld [vmem:[%s21918_s1 + $0x908] ss:$52 sps:$4 sm:$0xff]  }
 0x15a   :  { %v15092_v58 = vld [vmem:[%s21918_s1 + $0x5c8] ss:$52 sps:$4 sm:$0xff]  }
 0x15b   :  { %5700 = vmatpush1.bf16.msra.mxu0 %v14978_v2 }
 0x15c   :  { %5741 = vmatpush1.bf16.msra.mxu1 %v14981_v4  ;;  %5701 = vmatprep.subr.bf16.mxu0 %v14986_v5 }
 0x15d   :  { %5742 = vmatprep.subr.bf16.mxu1 %v14989_v6 }
 0x15f   :  { %5702 = vmatpush1.bf16.msra.mxu0 %v14984_v7 }
 0x160   :  { %5743 = vmatpush1.bf16.msra.mxu1 %v14987_v8  ;;  %5703 = vmatprep.subr.bf16.mxu0 %v14992_v9  ;;  %v15052_v8 = vld [vmem:[%s21918_s1 + $0x224] ss:$52 sps:$4 sm:$0xff]  }
 0x161   :  { %5744 = vmatprep.subr.bf16.mxu1 %v14995_v11  ;;  %v15055_v9 = vld [vmem:[%s21918_s1 + $0x8a4] ss:$52 sps:$4 sm:$0xff]  }
 0x163   :  { %5704 = vmatpush2.bf16.msra.mxu0 %v14990_v12 }
 0x164   :  { %5745 = vmatpush2.bf16.msra.mxu1 %v14993_v13  ;;  %5705 = vmatprep.subr.bf16.mxu0 %v14998_v14  ;;  %v15050_v13 = vld [vmem:[%s21918_s1 + $0x220] ss:$52 sps:$4 sm:$0xff]  }
 0x165   :  { %5746 = vmatprep.subr.bf16.mxu1 %v15001_v15  ;;  %v15053_v14 = vld [vmem:[%s21918_s1 + $0x8a0] ss:$52 sps:$4 sm:$0xff]  }
 0x167   :  { %5706 = vmatpush2.bf16.msra.mxu0 %v14996_v19 }
 0x168   :  { %5747 = vmatpush2.bf16.msra.mxu1 %v14999_v20  ;;  %5707 = vmatprep.subr.bf16.mxu0 %v15004_v21 }
 0x169   :  { %5748 = vmatprep.subr.bf16.mxu1 %v15007_v22 }
 0x16b   :  { %5708 = vmatpush2.bf16.msra.mxu0 %v15002_v23  ;;  %v15058_v23 = vld [vmem:[%s21918_s1 + $0x1bc] ss:$52 sps:$4 sm:$0xff]  }
 0x16c   :  { %5749 = vmatpush2.bf16.msra.mxu1 %v15005_v24  ;;  %5709 = vmatprep.subr.bf16.mxu0 %v15010_v25  ;;  %v15061_v24 = vld [vmem:[%s21918_s1 + $0x83c] ss:$52 sps:$4 sm:$0xff]   ;;  %v15056_v25 = vld [vmem:[%s21918_s1 + $0x1b8] ss:$52 sps:$4 sm:$0xff]  }
 0x16d   :  { %5750 = vmatprep.subr.bf16.mxu1 %v15013_v26  ;;  %v15059_v26 = vld [vmem:[%s21918_s1 + $0x838] ss:$52 sps:$4 sm:$0xff]  }
 0x16f   :  { %5710 = vmatpush2.bf16.msra.mxu0 %v15008_v27  ;;  %v15064_v27 = vld [vmem:[%s21918_s1 + $0x154] ss:$52 sps:$4 sm:$0xff]  }
 0x170   :  { %5751 = vmatpush2.bf16.msra.mxu1 %v15011_v28  ;;  %5711 = vmatprep.subr.bf16.mxu0 %v15016_v29  ;;  %v15067_v28 = vld [vmem:[%s21918_s1 + $0x7d4] ss:$52 sps:$4 sm:$0xff]   ;;  %v15062_v29 = vld [vmem:[%s21918_s1 + $0x150] ss:$52 sps:$4 sm:$0xff]  }
 0x171   :  { %5752 = vmatprep.subr.bf16.mxu1 %v15019_v30  ;;  %v15065_v30 = vld [vmem:[%s21918_s1 + $0x7d0] ss:$52 sps:$4 sm:$0xff]  }
 0x173   :  { %5712 = vmatpush2.bf16.msra.mxu0 %v15014_v33  ;;  %v15070_v33 = vld [vmem:[%s21918_s1 + $0xec] ss:$52 sps:$4 sm:$0xff]  }
 0x174   :  { %5753 = vmatpush2.bf16.msra.mxu1 %v15017_v34  ;;  %5713 = vmatprep.subr.bf16.mxu0 %v15022_v35  ;;  %v15073_v34 = vld [vmem:[%s21918_s1 + $0x76c] ss:$52 sps:$4 sm:$0xff]   ;;  %v15068_v35 = vld [vmem:[%s21918_s1 + $0xe8] ss:$52 sps:$4 sm:$0xff]  }
 0x175   :  { %5754 = vmatprep.subr.bf16.mxu1 %v15025_v36  ;;  %v15071_v36 = vld [vmem:[%s21918_s1 + $0x768] ss:$52 sps:$4 sm:$0xff]  }
 0x177   :  { %5714 = vmatpush2.bf16.msra.mxu0 %v15020_v37  ;;  %v15076_v37 = vld [vmem:[%s21918_s1 + $0x84] ss:$52 sps:$4 sm:$0xff]  }
 0x178   :  { %5755 = vmatpush2.bf16.msra.mxu1 %v15023_v38  ;;  %5715 = vmatprep.subr.bf16.mxu0 %v15028_v40  ;;  %v15079_v38 = vld [vmem:[%s21918_s1 + $0x704] ss:$52 sps:$4 sm:$0xff]   ;;  %v15074_v40 = vld [vmem:[%s21918_s1 + $0x80] ss:$52 sps:$4 sm:$0xff]  }
 0x179   :  { %5756 = vmatprep.subr.bf16.mxu1 %v15031_v10  ;;  %v15077_v10 = vld [vmem:[%s21918_s1 + $0x700] ss:$52 sps:$4 sm:$0xff]  }
 0x17b   :  { %5716 = vmatpush2.bf16.msra.mxu0 %v15026_v41  ;;  %v15082_v41 = vld [vmem:[%s21918_s1 + $0x1c] ss:$52 sps:$4 sm:$0xff]  }
 0x17c   :  { %5757 = vmatpush2.bf16.msra.mxu1 %v15029_v42  ;;  %5717 = vmatprep.subr.bf16.mxu0 %v15034_v44  ;;  %v15085_v42 = vld [vmem:[%s21918_s1 + $0x69c] ss:$52 sps:$4 sm:$0xff]   ;;  %v15080_v44 = vld [vmem:[%s21918_s1 + $0x18] ss:$52 sps:$4 sm:$0xff]  }
 0x17d   :  { %5758 = vmatprep.subr.bf16.mxu1 %v15037_v46  ;;  %v15083_v46 = vld [vmem:[%s21918_s1 + $0x698] ss:$52 sps:$4 sm:$0xff]  }
 0x17f   :  { %5718 = vmatpush2.bf16.msra.mxu0 %v15032_v18  ;;  %v15088_v18 = vld [vmem:[%s21918_s1 + $0x634] ss:$52 sps:$4 sm:$0xff]  }
 0x180   :  { %5759 = vmatpush2.bf16.msra.mxu1 %v15035_v47  ;;  %5769 = vmatprep.subr.bf16.mxu0 %v15040_v50  ;;  %v15091_v47 = vld [vmem:[%s21918_s1 + $0xcb4] ss:$52 sps:$4 sm:$0xff]   ;;  %v15086_v50 = vld [vmem:[%s21918_s1 + $0x630] ss:$52 sps:$4 sm:$0xff]  }
 0x181   :  { %5810 = vmatprep.subr.bf16.mxu1 %v15043_v51  ;;  %v15089_v51 = vld [vmem:[%s21918_s1 + $0xcb0] ss:$52 sps:$4 sm:$0xff]  }
 0x182   :  { %v5475_v2 = vpop.f32.mrf.mxu0  ;;  %5720 = vmatmul.mubr.bf16.vlgmr.msra.gmra.mxu0 %v17225_v31 }
 0x183   :  { %v5516_v4 = vpop.f32.mrf.mxu1  ;;  %5761 = vmatmul.mubr.bf16.vlgmr.msra.gmra.mxu1 %v17229_v32  ;;  %v5476_v5 = vadd.f32 %v5475_v2, %v999_v59  ;;  %5770 = vmatpush1.bf16.msra.mxu0 %v15038_v54  ;;  %v15094_v54 = vld [vmem:[%s21918_s1 + $0x5cc] ss:$52 sps:$4 sm:$0xff]   ;;  %v15095_v59 = vld [vmem:[%s21918_s1 + $0xc48] ss:$52 sps:$4 sm:$0xff]  }
 0x184   :  { %5811 = vmatpush1.bf16.msra.mxu1 %v15041_v49  ;;  %v5477_v6 = vpop.f32.mrf.mxu0  ;;  %5771 = vmatprep.subr.bf16.mxu0 %v15046_v60  ;;  %v15097_v49 = vld [vmem:[%s21918_s1 + $0xc4c] ss:$52 sps:$4 sm:$0xff]   ;;  %v15100_v60 = vld [vmem:[%s21918_s1 + $0x564] ss:$52 sps:$4 sm:$0xff]   ;;  %v15109_v2 = vld [vmem:[%s21918_s1 + $0xb7c] ss:$52 sps:$4 sm:$0xff]  }
 0x185   :  { %v5518_v7 = vpop.f32.mrf.mxu1  ;;  %5812 = vmatprep.subr.bf16.mxu1 %v15049_v61  ;;  %v18073_v11 = vadd.f32 %v5516_v4, %v5476_v5  ;;  %v5478_v12 = vadd.f32 %v5477_v6, %v1003_v63  ;;  %5801 = vmatprep.mubr.bf16.mxu0 %v16955_v62  ;;  %v15103_v61 = vld [vmem:[%s21918_s1 + $0xbe4] ss:$52 sps:$4 sm:$0xff]   ;;  %v15098_v63 = vld [vmem:[%s21918_s1 + $0x560] ss:$52 sps:$4 sm:$0xff]  }
 0x186   :  { %5842 = vmatprep.mubr.bf16.mxu1 %v16966_v3  ;;  %v5479_v15 = vpop.f32.mrf.mxu0  ;;  %v15104_v4 = vld [vmem:[%s21918_s1 + $0x4f8] ss:$52 sps:$4 sm:$0xff]   ;;  %v15112_v6 = vld [vmem:[%s21918_s1 + $0x494] ss:$52 sps:$4 sm:$0xff]  }
 0x187   :  { %v5520_v19 = vpop.f32.mrf.mxu1  ;;  %v18083_v20 = vadd.f32 %v5518_v7, %v5478_v12  ;;  %5772 = vmatpush1.bf16.msra.mxu0 %v15044_v0  ;;  %v15101_v0 = vld [vmem:[%s21918_s1 + $0xbe0] ss:$52 sps:$4 sm:$0xff]   ;;  %v15107_v5 = vld [vmem:[%s21918_s1 + $0xb78] ss:$52 sps:$4 sm:$0xff]   ;;  %v15119_v15 = vld [vmem:[%s21918_s1 + $0xaa8] ss:$52 sps:$4 sm:$0xff]  }
 0x188   :  { %5813 = vmatpush1.bf16.msra.mxu1 %v15047_v1  ;;  %v5480_v21 = vpop.f32.mrf.mxu0  ;;  %5773 = vmatprep.subr.bf16.mxu0 %v15052_v8  ;;  %v15106_v1 = vld [vmem:[%s21918_s1 + $0x4fc] ss:$52 sps:$4 sm:$0xff]   ;;  %v15115_v7 = vld [vmem:[%s21918_s1 + $0xb14] ss:$52 sps:$4 sm:$0xff]   ;;  %v15118_v12 = vld [vmem:[%s21918_s1 + $0x42c] ss:$52 sps:$4 sm:$0xff]  }
 0x189   :  { %v5521_v22 = vpop.f32.mrf.mxu1  ;;  %5814 = vmatprep.subr.bf16.mxu1 %v15055_v9  ;;  %v15110_v8 = vld [vmem:[%s21918_s1 + $0x490] ss:$52 sps:$4 sm:$0xff]  }
 0x18a   :  { %v15113_v9 = vld [vmem:[%s21918_s1 + $0xb10] ss:$52 sps:$4 sm:$0xff]   ;;  %v15122_v22 = vld [vmem:[%s21918_s1 + $0x3c0] ss:$52 sps:$4 sm:$0xff]  }
 0x18b   :  { %5774 = vmatpush1.bf16.msra.mxu0 %v15050_v13  ;;  %v15121_v13 = vld [vmem:[%s21918_s1 + $0xaac] ss:$52 sps:$4 sm:$0xff]   ;;  %v15124_v19 = vld [vmem:[%s21918_s1 + $0x3c4] ss:$52 sps:$4 sm:$0xff]  }
 0x18c   :  { %5815 = vmatpush1.bf16.msra.mxu1 %v15053_v14  ;;  %5775 = vmatprep.subr.bf16.mxu0 %v15058_v23  ;;  %v15116_v14 = vld [vmem:[%s21918_s1 + $0x428] ss:$52 sps:$4 sm:$0xff]   ;;  %v15127_v21 = vld [vmem:[%s21918_s1 + $0xa44] ss:$52 sps:$4 sm:$0xff]   ;;  %v15125_v23 = vld [vmem:[%s21918_s1 + $0xa40] ss:$52 sps:$4 sm:$0xff]  }
 0x18d   :  { %5816 = vmatprep.subr.bf16.mxu1 %v15061_v24  ;;  %v15130_v24 = vld [vmem:[%s21918_s1 + $0x35c] ss:$52 sps:$4 sm:$0xff]  }
 0x18f   :  { %5776 = vmatpush1.bf16.msra.mxu0 %v15056_v25  ;;  %v15133_v25 = vld [vmem:[%s21918_s1 + $0x9dc] ss:$52 sps:$4 sm:$0xff]  }
 0x190   :  { %5817 = vmatpush1.bf16.msra.mxu1 %v15059_v26  ;;  %5777 = vmatprep.subr.bf16.mxu0 %v15064_v27  ;;  %v15128_v26 = vld [vmem:[%s21918_s1 + $0x358] ss:$52 sps:$4 sm:$0xff]  }
 0x191   :  { %5818 = vmatprep.subr.bf16.mxu1 %v15067_v28  ;;  %v15131_v27 = vld [vmem:[%s21918_s1 + $0x9d8] ss:$52 sps:$4 sm:$0xff]   ;;  %v15136_v28 = vld [vmem:[%s21918_s1 + $0xff4] ss:$52 sps:$4 sm:$0xff]  }
 0x193   :  { %5778 = vmatpush1.bf16.msra.mxu0 %v15062_v29  ;;  %v15139_v29 = vld [vmem:[%s21918_s1 + $0x1674] ss:$52 sps:$4 sm:$0xff]  }
 0x194   :  { %5819 = vmatpush1.bf16.msra.mxu1 %v15065_v30  ;;  %5779 = vmatprep.subr.bf16.mxu0 %v15070_v33  ;;  %v15134_v30 = vld [vmem:[%s21918_s1 + $0xff0] ss:$52 sps:$4 sm:$0xff]  }
 0x195   :  { %5820 = vmatprep.subr.bf16.mxu1 %v15073_v34  ;;  %v15137_v33 = vld [vmem:[%s21918_s1 + $0x1670] ss:$52 sps:$4 sm:$0xff]   ;;  %v15142_v34 = vld [vmem:[%s21918_s1 + $0xf8c] ss:$52 sps:$4 sm:$0xff]  }
 0x197   :  { %5780 = vmatpush1.bf16.msra.mxu0 %v15068_v35  ;;  %v15145_v35 = vld [vmem:[%s21918_s1 + $0x160c] ss:$52 sps:$4 sm:$0xff]  }
 0x198   :  { %5821 = vmatpush1.bf16.msra.mxu1 %v15071_v36  ;;  %5781 = vmatprep.subr.bf16.mxu0 %v15076_v37  ;;  %v15140_v36 = vld [vmem:[%s21918_s1 + $0xf88] ss:$52 sps:$4 sm:$0xff]  }
 0x199   :  { %5822 = vmatprep.subr.bf16.mxu1 %v15079_v38  ;;  %v15143_v37 = vld [vmem:[%s21918_s1 + $0x1608] ss:$52 sps:$4 sm:$0xff]  }
 0x19b   :  { %5782 = vmatpush1.bf16.msra.mxu0 %v15074_v40 }
 0x19c   :  { %5823 = vmatpush1.bf16.msra.mxu1 %v15077_v10  ;;  %5783 = vmatprep.subr.bf16.mxu0 %v15082_v41 }
 0x19d   :  { %5824 = vmatprep.subr.bf16.mxu1 %v15085_v42 }
 0x19f   :  { %5784 = vmatpush1.bf16.msra.mxu0 %v15080_v44  ;;  %v15148_v44 = vld [vmem:[%s21918_s1 + $0xf24] ss:$52 sps:$4 sm:$0xff]  }
 0x1a0   :  { %5825 = vmatpush1.bf16.msra.mxu1 %v15083_v46  ;;  %5785 = vmatprep.subr.bf16.mxu0 %v15088_v18  ;;  %v15151_v46 = vld [vmem:[%s21918_s1 + $0x15a4] ss:$52 sps:$4 sm:$0xff]  }
 0x1a1   :  { %5826 = vmatprep.subr.bf16.mxu1 %v15091_v47 }
 0x1a3   :  { %5786 = vmatpush2.bf16.msra.mxu0 %v15086_v50  ;;  %v15149_v50 = vld [vmem:[%s21918_s1 + $0x15a0] ss:$52 sps:$4 sm:$0xff]  }
 0x1a4   :  { %5827 = vmatpush2.bf16.msra.mxu1 %v15089_v51  ;;  %5787 = vmatprep.subr.bf16.mxu0 %v15094_v54 }
 0x1a5   :  { %5828 = vmatprep.subr.bf16.mxu1 %v15097_v49 }
 0x1a7   :  { %5788 = vmatpush2.bf16.msra.mxu0 %v15092_v58 }
 0x1a8   :  { %5829 = vmatpush2.bf16.msra.mxu1 %v15095_v59  ;;  %5789 = vmatprep.subr.bf16.mxu0 %v15100_v60  ;;  %v15154_v59 = vld [vmem:[%s21918_s1 + $0xebc] ss:$52 sps:$4 sm:$0xff]  }
 0x1a9   :  { %5830 = vmatprep.subr.bf16.mxu1 %v15103_v61  ;;  %v15157_v60 = vld [vmem:[%s21918_s1 + $0x153c] ss:$52 sps:$4 sm:$0xff]   ;;  %v15152_v61 = vld [vmem:[%s21918_s1 + $0xeb8] ss:$52 sps:$4 sm:$0xff]  }
 0x1ab   :  { %5790 = vmatpush2.bf16.msra.mxu0 %v15098_v63  ;;  %v15155_v63 = vld [vmem:[%s21918_s1 + $0x1538] ss:$52 sps:$4 sm:$0xff]  }
 0x1ac   :  { %5831 = vmatpush2.bf16.msra.mxu1 %v15101_v0  ;;  %5791 = vmatprep.subr.bf16.mxu0 %v15106_v1  ;;  %v15160_v0 = vld [vmem:[%s21918_s1 + $0xe54] ss:$52 sps:$4 sm:$0xff]  }
 0x1ad   :  { %5832 = vmatprep.subr.bf16.mxu1 %v15109_v2  ;;  %v15163_v1 = vld [vmem:[%s21918_s1 + $0x14d4] ss:$52 sps:$4 sm:$0xff]   ;;  %v15158_v2 = vld [vmem:[%s21918_s1 + $0xe50] ss:$52 sps:$4 sm:$0xff]  }
 0x1af   :  { %5792 = vmatpush2.bf16.msra.mxu0 %v15104_v4  ;;  %v15161_v4 = vld [vmem:[%s21918_s1 + $0x14d0] ss:$52 sps:$4 sm:$0xff]  }
 0x1b0   :  { %5833 = vmatpush2.bf16.msra.mxu1 %v15107_v5  ;;  %5793 = vmatprep.subr.bf16.mxu0 %v15112_v6  ;;  %v15166_v5 = vld [vmem:[%s21918_s1 + $0xdec] ss:$52 sps:$4 sm:$0xff]  }
 0x1b1   :  { %5834 = vmatprep.subr.bf16.mxu1 %v15115_v7  ;;  %v15169_v6 = vld [vmem:[%s21918_s1 + $0x146c] ss:$52 sps:$4 sm:$0xff]   ;;  %v15164_v7 = vld [vmem:[%s21918_s1 + $0xde8] ss:$52 sps:$4 sm:$0xff]  }
 0x1b3   :  { %5794 = vmatpush2.bf16.msra.mxu0 %v15110_v8  ;;  %v15167_v8 = vld [vmem:[%s21918_s1 + $0x1468] ss:$52 sps:$4 sm:$0xff]  }
 0x1b4   :  { %5835 = vmatpush2.bf16.msra.mxu1 %v15113_v9  ;;  %5795 = vmatprep.subr.bf16.mxu0 %v15118_v12  ;;  %v15172_v9 = vld [vmem:[%s21918_s1 + $0xd84] ss:$52 sps:$4 sm:$0xff]  }
 0x1b5   :  { %5836 = vmatprep.subr.bf16.mxu1 %v15121_v13  ;;  %v15175_v12 = vld [vmem:[%s21918_s1 + $0x1404] ss:$52 sps:$4 sm:$0xff]   ;;  %v15170_v13 = vld [vmem:[%s21918_s1 + $0xd80] ss:$52 sps:$4 sm:$0xff]  }
 0x1b7   :  { %5796 = vmatpush2.bf16.msra.mxu0 %v15116_v14  ;;  %v15173_v14 = vld [vmem:[%s21918_s1 + $0x1400] ss:$52 sps:$4 sm:$0xff]  }
 0x1b8   :  { %5837 = vmatpush2.bf16.msra.mxu1 %v15119_v15  ;;  %5797 = vmatprep.subr.bf16.mxu0 %v15124_v19  ;;  %v15178_v15 = vld [vmem:[%s21918_s1 + $0xd1c] ss:$52 sps:$4 sm:$0xff]  }
 0x1b9   :  { %5838 = vmatprep.subr.bf16.mxu1 %v15127_v21  ;;  %v15181_v19 = vld [vmem:[%s21918_s1 + $0x139c] ss:$52 sps:$4 sm:$0xff]   ;;  %v15176_v21 = vld [vmem:[%s21918_s1 + $0xd18] ss:$52 sps:$4 sm:$0xff]  }
 0x1bb   :  { %5798 = vmatpush2.bf16.msra.mxu0 %v15122_v22  ;;  %v15179_v22 = vld [vmem:[%s21918_s1 + $0x1398] ss:$52 sps:$4 sm:$0xff]  }
 0x1bc   :  { %5839 = vmatpush2.bf16.msra.mxu1 %v15125_v23  ;;  %5799 = vmatprep.subr.bf16.mxu0 %v15130_v24  ;;  %v15184_v23 = vld [vmem:[%s21918_s1 + $0x1334] ss:$52 sps:$4 sm:$0xff]  }
 0x1bd   :  { %5840 = vmatprep.subr.bf16.mxu1 %v15133_v25  ;;  %v15187_v24 = vld [vmem:[%s21918_s1 + $0x19b4] ss:$52 sps:$4 sm:$0xff]   ;;  %v15182_v25 = vld [vmem:[%s21918_s1 + $0x1330] ss:$52 sps:$4 sm:$0xff]  }
 0x1bf   :  { %5800 = vmatpush2.bf16.msra.mxu0 %v15128_v26  ;;  %v15185_v26 = vld [vmem:[%s21918_s1 + $0x19b0] ss:$52 sps:$4 sm:$0xff]  }
 0x1c0   :  { %5841 = vmatpush2.bf16.msra.mxu1 %v15131_v27  ;;  %5851 = vmatprep.subr.bf16.mxu0 %v15136_v28  ;;  %v15190_v27 = vld [vmem:[%s21918_s1 + $0x12cc] ss:$52 sps:$4 sm:$0xff]  }
 0x1c1   :  { %5892 = vmatprep.subr.bf16.mxu1 %v15139_v29  ;;  %v15193_v28 = vld [vmem:[%s21918_s1 + $0x194c] ss:$52 sps:$4 sm:$0xff]   ;;  %v15188_v29 = vld [vmem:[%s21918_s1 + $0x12c8] ss:$52 sps:$4 sm:$0xff]  }
 0x1c2   :  { %v5557_v38 = vpop.f32.mrf.mxu0  ;;  %5802 = vmatmul.mubr.bf16.vlgmr.msra.gmra.mxu0 %v17006_v16 }
 0x1c3   :  { %v5598_v40 = vpop.f32.mrf.mxu1  ;;  %5843 = vmatmul.mubr.bf16.vlgmr.msra.gmra.mxu1 %v17008_v17  ;;  %v5558_v10 = vadd.f32 %v5557_v38, %v18073_v11  ;;  %5852 = vmatpush1.bf16.msra.mxu0 %v15134_v30  ;;  %v15146_v11 = vld [vmem:[%s21918_s1 + $0xf20] ss:$52 sps:$4 sm:$0xff]   ;;  %v15191_v30 = vld [vmem:[%s21918_s1 + $0x1948] ss:$52 sps:$4 sm:$0xff]  }
 0x1c4   :  { %5893 = vmatpush1.bf16.msra.mxu1 %v15137_v33  ;;  %v5559_v41 = vpop.f32.mrf.mxu0  ;;  %5853 = vmatprep.subr.bf16.mxu0 %v15142_v34  ;;  %v15196_v33 = vld [vmem:[%s21918_s1 + $0x1264] ss:$52 sps:$4 sm:$0xff]   ;;  %v15205_v38 = vld [vmem:[%s21918_s1 + $0x187c] ss:$52 sps:$4 sm:$0xff]  }
 0x1c5   :  { %v5600_v42 = vpop.f32.mrf.mxu1  ;;  %5894 = vmatprep.subr.bf16.mxu1 %v15145_v35  ;;  %v18274_v18 = vadd.f32 %v5598_v40, %v5558_v10  ;;  %v5560_v47 = vadd.f32 %v5559_v41, %v18083_v20  ;;  %5883 = vmatprep.mubr.bf16.mxu0 %v17107_v53  ;;  %v15199_v34 = vld [vmem:[%s21918_s1 + $0x18e4] ss:$52 sps:$4 sm:$0xff]   ;;  %v15194_v35 = vld [vmem:[%s21918_s1 + $0x1260] ss:$52 sps:$4 sm:$0xff]  }
 0x1c6   :  { %5924 = vmatprep.mubr.bf16.mxu1 %v17117_v56  ;;  %v5561_v51 = vpop.f32.mrf.mxu0  ;;  %v15200_v40 = vld [vmem:[%s21918_s1 + $0x11f8] ss:$52 sps:$4 sm:$0xff]   ;;  %v15208_v41 = vld [vmem:[%s21918_s1 + $0x1194] ss:$52 sps:$4 sm:$0xff]  }
 0x1c7   :  { %v5602_v54 = vpop.f32.mrf.mxu1  ;;  %v18285_v49 = vadd.f32 %v5600_v42, %v5560_v47  ;;  %5854 = vmatpush1.bf16.msra.mxu0 %v15140_v36  ;;  %v15197_v36 = vld [vmem:[%s21918_s1 + $0x18e0] ss:$52 sps:$4 sm:$0xff]   ;;  %v15203_v10 = vld [vmem:[%s21918_s1 + $0x1878] ss:$52 sps:$4 sm:$0xff]   ;;  %v15215_v51 = vld [vmem:[%s21918_s1 + $0x17a8] ss:$52 sps:$4 sm:$0xff]  }
 0x1c8   :  { %5895 = vmatpush1.bf16.msra.mxu1 %v15143_v37  ;;  %v5562_v58 = vpop.f32.mrf.mxu0  ;;  %5855 = vmatprep.subr.bf16.mxu0 %v15148_v44  ;;  %v15202_v37 = vld [vmem:[%s21918_s1 + $0x11fc] ss:$52 sps:$4 sm:$0xff]   ;;  %v15211_v42 = vld [vmem:[%s21918_s1 + $0x1814] ss:$52 sps:$4 sm:$0xff]   ;;  %v15214_v47 = vld [vmem:[%s21918_s1 + $0x112c] ss:$52 sps:$4 sm:$0xff]  }
 0x1c9   :  { %v5603_v20 = vpop.f32.mrf.mxu1  ;;  %5896 = vmatprep.subr.bf16.mxu1 %v15151_v46  ;;  %v15206_v44 = vld [vmem:[%s21918_s1 + $0x1190] ss:$52 sps:$4 sm:$0xff]  }
 0x1ca   :  { %v15209_v46 = vld [vmem:[%s21918_s1 + $0x1810] ss:$52 sps:$4 sm:$0xff]   ;;  %v15218_v20 = vld [vmem:[%s21918_s1 + $0x10c0] ss:$52 sps:$4 sm:$0xff]  }
 0x1cb   :  { %5856 = vmatpush1.bf16.msra.mxu0 %v15146_v11  ;;  %v15217_v11 = vld [vmem:[%s21918_s1 + $0x17ac] ss:$52 sps:$4 sm:$0xff]   ;;  %v15220_v54 = vld [vmem:[%s21918_s1 + $0x10c4] ss:$52 sps:$4 sm:$0xff]  }
 0x1cc   :  { %5897 = vmatpush1.bf16.msra.mxu1 %v15149_v50  ;;  %5857 = vmatprep.subr.bf16.mxu0 %v15154_v59  ;;  %v15212_v50 = vld [vmem:[%s21918_s1 + $0x1128] ss:$52 sps:$4 sm:$0xff]   ;;  %v15223_v58 = vld [vmem:[%s21918_s1 + $0x1744] ss:$52 sps:$4 sm:$0xff]   ;;  %v15221_v59 = vld [vmem:[%s21918_s1 + $0x1740] ss:$52 sps:$4 sm:$0xff]  }
 0x1cd   :  { %5898 = vmatprep.subr.bf16.mxu1 %v15157_v60  ;;  %v15226_v60 = vld [vmem:[%s21918_s1 + $0x105c] ss:$52 sps:$4 sm:$0xff]  }
 0x1cf   :  { %5858 = vmatpush1.bf16.msra.mxu0 %v15152_v61  ;;  %v15229_v61 = vld [vmem:[%s21918_s1 + $0x16dc] ss:$52 sps:$4 sm:$0xff]  }
 0x1d0   :  { %5899 = vmatpush1.bf16.msra.mxu1 %v15155_v63  ;;  %5859 = vmatprep.subr.bf16.mxu0 %v15160_v0  ;;  %v15224_v63 = vld [vmem:[%s21918_s1 + $0x1058] ss:$52 sps:$4 sm:$0xff]  }
 0x1d1   :  { %5900 = vmatprep.subr.bf16.mxu1 %v15163_v1  ;;  %v15227_v0 = vld [vmem:[%s21918_s1 + $0x16d8] ss:$52 sps:$4 sm:$0xff]   ;;  %v18444_v1 = vsub.s32 4, %v16909_v43 }
 0x1d3   :  { %5860 = vmatpush1.bf16.msra.mxu0 %v15158_v2  ;;  %v15232_v2 = vld [vmem:[%s21918_s1 + $0x2fc] ss:$52 sps:$4 sm:$0xff]  }
 0x1d4   :  { %5901 = vmatpush1.bf16.msra.mxu1 %v15161_v4  ;;  %5861 = vmatprep.subr.bf16.mxu0 %v15166_v5  ;;  %v15235_v4 = vld [vmem:[%s21918_s1 + $0x97c] ss:$52 sps:$4 sm:$0xff]   ;;  %v1010_v5 = vsub.s32 5, %v16909_v43 }
 0x1d5   :  { %5902 = vmatprep.subr.bf16.mxu1 %v15169_v6  ;;  %v15230_v6 = vld [vmem:[%s21918_s1 + $0x2f8] ss:$52 sps:$4 sm:$0xff]  }
 0x1d7   :  { %5862 = vmatpush1.bf16.msra.mxu0 %v15164_v7  ;;  %v15233_v7 = vld [vmem:[%s21918_s1 + $0x978] ss:$52 sps:$4 sm:$0xff]  }
 0x1d8   :  { %5903 = vmatpush1.bf16.msra.mxu1 %v15167_v8  ;;  %5863 = vmatprep.subr.bf16.mxu0 %v15172_v9  ;;  %v16711_v8 = vld [vmem:[%s21919_s2] sm:$0xff] }
 0x1d9   :  { %5904 = vmatprep.subr.bf16.mxu1 %v15175_v12  ;;  %v1007_v9 = vrot.slane %v16711_v8, %v18444_v1  ;;  %v15238_v12 = vld [vmem:[%s21918_s1 + $0x294] ss:$52 sps:$4 sm:$0xff]  }
 0x1db   :  { %5864 = vmatpush1.bf16.msra.mxu0 %v15170_v13  ;;  %v15241_v13 = vld [vmem:[%s21918_s1 + $0x914] ss:$52 sps:$4 sm:$0xff]  }
 0x1dc   :  { %5905 = vmatpush1.bf16.msra.mxu1 %v15173_v14  ;;  %5865 = vmatprep.subr.bf16.mxu0 %v15178_v15  ;;  %v1011_v14 = vrot.slane %v16711_v8, %v1010_v5  ;;  %v15236_v15 = vld [vmem:[%s21918_s1 + $0x290] ss:$52 sps:$4 sm:$0xff]   ;;  %v15278_v8 = vld [vmem:[%s21918_s1 + $0x638] ss:$52 sps:$4 sm:$0xff]  }
 0x1dd   :  { %5906 = vmatprep.subr.bf16.mxu1 %v15181_v19  ;;  %v15239_v19 = vld [vmem:[%s21918_s1 + $0x910] ss:$52 sps:$4 sm:$0xff]  }
 0x1df   :  { %5866 = vmatpush1.bf16.msra.mxu0 %v15176_v21 }
 0x1e0   :  { %5907 = vmatpush1.bf16.msra.mxu1 %v15179_v22  ;;  %5867 = vmatprep.subr.bf16.mxu0 %v15184_v23 }
 0x1e1   :  { %5908 = vmatprep.subr.bf16.mxu1 %v15187_v24 }
 0x1e3   :  { %5868 = vmatpush2.bf16.msra.mxu0 %v15182_v25 }
 0x1e4   :  { %5909 = vmatpush2.bf16.msra.mxu1 %v15185_v26  ;;  %5869 = vmatprep.subr.bf16.mxu0 %v15190_v27  ;;  %v15244_v26 = vld [vmem:[%s21918_s1 + $0x22c] ss:$52 sps:$4 sm:$0xff]  }
 0x1e5   :  { %5910 = vmatprep.subr.bf16.mxu1 %v15193_v28  ;;  %v15247_v27 = vld [vmem:[%s21918_s1 + $0x8ac] ss:$52 sps:$4 sm:$0xff]  }
 0x1e7   :  { %5870 = vmatpush2.bf16.msra.mxu0 %v15188_v29 }
 0x1e8   :  { %5911 = vmatpush2.bf16.msra.mxu1 %v15191_v30  ;;  %5871 = vmatprep.subr.bf16.mxu0 %v15196_v33  ;;  %v15242_v30 = vld [vmem:[%s21918_s1 + $0x228] ss:$52 sps:$4 sm:$0xff]  }
 0x1e9   :  { %5912 = vmatprep.subr.bf16.mxu1 %v15199_v34  ;;  %v15245_v33 = vld [vmem:[%s21918_s1 + $0x8a8] ss:$52 sps:$4 sm:$0xff]  }
 0x1eb   :  { %5872 = vmatpush2.bf16.msra.mxu0 %v15194_v35 }
 0x1ec   :  { %5913 = vmatpush2.bf16.msra.mxu1 %v15197_v36  ;;  %5873 = vmatprep.subr.bf16.mxu0 %v15202_v37 }
 0x1ed   :  { %5914 = vmatprep.subr.bf16.mxu1 %v15205_v38 }
 0x1ef   :  { %5874 = vmatpush2.bf16.msra.mxu0 %v15200_v40  ;;  %v15250_v40 = vld [vmem:[%s21918_s1 + $0x1c4] ss:$52 sps:$4 sm:$0xff]  }
 0x1f0   :  { %5915 = vmatpush2.bf16.msra.mxu1 %v15203_v10  ;;  %5875 = vmatprep.subr.bf16.mxu0 %v15208_v41  ;;  %v15253_v10 = vld [vmem:[%s21918_s1 + $0x844] ss:$52 sps:$4 sm:$0xff]   ;;  %v15248_v41 = vld [vmem:[%s21918_s1 + $0x1c0] ss:$52 sps:$4 sm:$0xff]  }
 0x1f1   :  { %5916 = vmatprep.subr.bf16.mxu1 %v15211_v42  ;;  %v15251_v42 = vld [vmem:[%s21918_s1 + $0x840] ss:$52 sps:$4 sm:$0xff]  }
 0x1f3   :  { %5876 = vmatpush2.bf16.msra.mxu0 %v15206_v44  ;;  %v15256_v44 = vld [vmem:[%s21918_s1 + $0x15c] ss:$52 sps:$4 sm:$0xff]  }
 0x1f4   :  { %5917 = vmatpush2.bf16.msra.mxu1 %v15209_v46  ;;  %5877 = vmatprep.subr.bf16.mxu0 %v15214_v47  ;;  %v15259_v46 = vld [vmem:[%s21918_s1 + $0x7dc] ss:$52 sps:$4 sm:$0xff]   ;;  %v15254_v47 = vld [vmem:[%s21918_s1 + $0x158] ss:$52 sps:$4 sm:$0xff]  }
 0x1f5   :  { %5918 = vmatprep.subr.bf16.mxu1 %v15217_v11  ;;  %v15257_v11 = vld [vmem:[%s21918_s1 + $0x7d8] ss:$52 sps:$4 sm:$0xff]  }
 0x1f7   :  { %5878 = vmatpush2.bf16.msra.mxu0 %v15212_v50  ;;  %v15262_v50 = vld [vmem:[%s21918_s1 + $0xf4] ss:$52 sps:$4 sm:$0xff]  }
 0x1f8   :  { %5919 = vmatpush2.bf16.msra.mxu1 %v15215_v51  ;;  %5879 = vmatprep.subr.bf16.mxu0 %v15220_v54  ;;  %v15265_v51 = vld [vmem:[%s21918_s1 + $0x774] ss:$52 sps:$4 sm:$0xff]   ;;  %v15260_v54 = vld [vmem:[%s21918_s1 + $0xf0] ss:$52 sps:$4 sm:$0xff]  }
 0x1f9   :  { %5920 = vmatprep.subr.bf16.mxu1 %v15223_v58  ;;  %v15263_v58 = vld [vmem:[%s21918_s1 + $0x770] ss:$52 sps:$4 sm:$0xff]  }
 0x1fb   :  { %5880 = vmatpush2.bf16.msra.mxu0 %v15218_v20  ;;  %v15268_v20 = vld [vmem:[%s21918_s1 + $0x8c] ss:$52 sps:$4 sm:$0xff]  }
 0x1fc   :  { %5921 = vmatpush2.bf16.msra.mxu1 %v15221_v59  ;;  %5881 = vmatprep.subr.bf16.mxu0 %v15226_v60  ;;  %v15271_v59 = vld [vmem:[%s21918_s1 + $0x70c] ss:$52 sps:$4 sm:$0xff]   ;;  %v15266_v60 = vld [vmem:[%s21918_s1 + $0x88] ss:$52 sps:$4 sm:$0xff]  }
 0x1fd   :  { %5922 = vmatprep.subr.bf16.mxu1 %v15229_v61  ;;  %v15269_v61 = vld [vmem:[%s21918_s1 + $0x708] ss:$52 sps:$4 sm:$0xff]  }
 0x1ff   :  { %5882 = vmatpush2.bf16.msra.mxu0 %v15224_v63  ;;  %v15274_v63 = vld [vmem:[%s21918_s1 + $0x24] ss:$52 sps:$4 sm:$0xff]  }
 0x200   :  { %5923 = vmatpush2.bf16.msra.mxu1 %v15227_v0  ;;  %5933 = vmatprep.subr.bf16.mxu0 %v15232_v2  ;;  %v15277_v0 = vld [vmem:[%s21918_s1 + $0x6a4] ss:$52 sps:$4 sm:$0xff]   ;;  %v15272_v2 = vld [vmem:[%s21918_s1 + $0x20] ss:$52 sps:$4 sm:$0xff]  }
 0x201   :  { %5974 = vmatprep.subr.bf16.mxu1 %v15235_v4  ;;  %v15275_v4 = vld [vmem:[%s21918_s1 + $0x6a0] ss:$52 sps:$4 sm:$0xff]  }
 0x202   :  { %v5639_v21 = vpop.f32.mrf.mxu0  ;;  %5884 = vmatmul.mubr.bf16.vlgmr.msra.gmra.mxu0 %v17225_v31 }
 0x203   :  { %v5680_v22 = vpop.f32.mrf.mxu1  ;;  %5925 = vmatmul.mubr.bf16.vlgmr.msra.gmra.mxu1 %v17229_v32  ;;  %v5640_v23 = vadd.f32 %v5639_v21, %v1007_v9  ;;  %5934 = vmatpush1.bf16.msra.mxu0 %v15230_v6  ;;  %v15280_v6 = vld [vmem:[%s21918_s1 + $0x63c] ss:$52 sps:$4 sm:$0xff]   ;;  %v15281_v9 = vld [vmem:[%s21918_s1 + $0xcb8] ss:$52 sps:$4 sm:$0xff]  }
 0x204   :  { %5975 = vmatpush1.bf16.msra.mxu1 %v15233_v7  ;;  %v5641_v24 = vpop.f32.mrf.mxu0  ;;  %5935 = vmatprep.subr.bf16.mxu0 %v15238_v12  ;;  %v15283_v7 = vld [vmem:[%s21918_s1 + $0xcbc] ss:$52 sps:$4 sm:$0xff]   ;;  %v15286_v12 = vld [vmem:[%s21918_s1 + $0x5d4] ss:$52 sps:$4 sm:$0xff]   ;;  %v15295_v21 = vld [vmem:[%s21918_s1 + $0xbec] ss:$52 sps:$4 sm:$0xff]  }
 0x205   :  { %v5682_v25 = vpop.f32.mrf.mxu1  ;;  %5976 = vmatprep.subr.bf16.mxu1 %v15241_v13  ;;  %v18485_v28 = vadd.f32 %v5680_v22, %v5640_v23  ;;  %v5642_v29 = vadd.f32 %v5641_v24, %v1011_v14  ;;  %5965 = vmatprep.mubr.bf16.mxu0 %v16955_v62  ;;  %v15289_v13 = vld [vmem:[%s21918_s1 + $0xc54] ss:$52 sps:$4 sm:$0xff]   ;;  %v15284_v14 = vld [vmem:[%s21918_s1 + $0x5d0] ss:$52 sps:$4 sm:$0xff]  }
 0x206   :  { %6006 = vmatprep.mubr.bf16.mxu1 %v16966_v3  ;;  %v5643_v34 = vpop.f32.mrf.mxu0  ;;  %v15290_v22 = vld [vmem:[%s21918_s1 + $0x568] ss:$52 sps:$4 sm:$0xff]   ;;  %v15298_v24 = vld [vmem:[%s21918_s1 + $0x504] ss:$52 sps:$4 sm:$0xff]  }
 0x207   :  { %v5684_v35 = vpop.f32.mrf.mxu1  ;;  %v18495_v36 = vadd.f32 %v5682_v25, %v5642_v29  ;;  %5936 = vmatpush1.bf16.msra.mxu0 %v15236_v15  ;;  %v15287_v15 = vld [vmem:[%s21918_s1 + $0xc50] ss:$52 sps:$4 sm:$0xff]   ;;  %v15293_v23 = vld [vmem:[%s21918_s1 + $0xbe8] ss:$52 sps:$4 sm:$0xff]   ;;  %v15305_v34 = vld [vmem:[%s21918_s1 + $0xb18] ss:$52 sps:$4 sm:$0xff]  }
 0x208   :  { %5977 = vmatpush1.bf16.msra.mxu1 %v15239_v19  ;;  %v5644_v37 = vpop.f32.mrf.mxu0  ;;  %5937 = vmatprep.subr.bf16.mxu0 %v15244_v26  ;;  %v15292_v19 = vld [vmem:[%s21918_s1 + $0x56c] ss:$52 sps:$4 sm:$0xff]   ;;  %v15301_v25 = vld [vmem:[%s21918_s1 + $0xb84] ss:$52 sps:$4 sm:$0xff]   ;;  %v15304_v29 = vld [vmem:[%s21918_s1 + $0x49c] ss:$52 sps:$4 sm:$0xff]  }
 0x209   :  { %v5685_v38 = vpop.f32.mrf.mxu1  ;;  %5978 = vmatprep.subr.bf16.mxu1 %v15247_v27  ;;  %v15296_v26 = vld [vmem:[%s21918_s1 + $0x500] ss:$52 sps:$4 sm:$0xff]  }
 0x20a   :  { %v15299_v27 = vld [vmem:[%s21918_s1 + $0xb80] ss:$52 sps:$4 sm:$0xff]   ;;  %v15308_v38 = vld [vmem:[%s21918_s1 + $0x430] ss:$52 sps:$4 sm:$0xff]  }
 0x20b   :  { %5938 = vmatpush1.bf16.msra.mxu0 %v15242_v30  ;;  %v15307_v30 = vld [vmem:[%s21918_s1 + $0xb1c] ss:$52 sps:$4 sm:$0xff]   ;;  %v15310_v35 = vld [vmem:[%s21918_s1 + $0x434] ss:$52 sps:$4 sm:$0xff]  }
 0x20c   :  { %5979 = vmatpush1.bf16.msra.mxu1 %v15245_v33  ;;  %5939 = vmatprep.subr.bf16.mxu0 %v15250_v40  ;;  %v15302_v33 = vld [vmem:[%s21918_s1 + $0x498] ss:$52 sps:$4 sm:$0xff]   ;;  %v15313_v37 = vld [vmem:[%s21918_s1 + $0xab4] ss:$52 sps:$4 sm:$0xff]   ;;  %v15311_v40 = vld [vmem:[%s21918_s1 + $0xab0] ss:$52 sps:$4 sm:$0xff]  }
 0x20d   :  { %5980 = vmatprep.subr.bf16.mxu1 %v15253_v10  ;;  %v15316_v10 = vld [vmem:[%s21918_s1 + $0x3cc] ss:$52 sps:$4 sm:$0xff]  }
 0x20f   :  { %5940 = vmatpush1.bf16.msra.mxu0 %v15248_v41  ;;  %v15319_v41 = vld [vmem:[%s21918_s1 + $0xa4c] ss:$52 sps:$4 sm:$0xff]  }
 0x210   :  { %5981 = vmatpush1.bf16.msra.mxu1 %v15251_v42  ;;  %5941 = vmatprep.subr.bf16.mxu0 %v15256_v44  ;;  %v15314_v42 = vld [vmem:[%s21918_s1 + $0x3c8] ss:$52 sps:$4 sm:$0xff]  }
 0x211   :  { %5982 = vmatprep.subr.bf16.mxu1 %v15259_v46  ;;  %v15317_v44 = vld [vmem:[%s21918_s1 + $0xa48] ss:$52 sps:$4 sm:$0xff]   ;;  %v15322_v46 = vld [vmem:[%s21918_s1 + $0x364] ss:$52 sps:$4 sm:$0xff]  }
 0x213   :  { %5942 = vmatpush1.bf16.msra.mxu0 %v15254_v47  ;;  %v15325_v47 = vld [vmem:[%s21918_s1 + $0x9e4] ss:$52 sps:$4 sm:$0xff]  }
 0x214   :  { %5983 = vmatpush1.bf16.msra.mxu1 %v15257_v11  ;;  %5943 = vmatprep.subr.bf16.mxu0 %v15262_v50  ;;  %v15320_v11 = vld [vmem:[%s21918_s1 + $0x360] ss:$52 sps:$4 sm:$0xff]  }
 0x215   :  { %5984 = vmatprep.subr.bf16.mxu1 %v15265_v51  ;;  %v15323_v50 = vld [vmem:[%s21918_s1 + $0x9e0] ss:$52 sps:$4 sm:$0xff]   ;;  %v15328_v51 = vld [vmem:[%s21918_s1 + $0xffc] ss:$52 sps:$4 sm:$0xff]  }
 0x217   :  { %5944 = vmatpush1.bf16.msra.mxu0 %v15260_v54  ;;  %v15331_v54 = vld [vmem:[%s21918_s1 + $0x167c] ss:$52 sps:$4 sm:$0xff]  }
 0x218   :  { %5985 = vmatpush1.bf16.msra.mxu1 %v15263_v58  ;;  %5945 = vmatprep.subr.bf16.mxu0 %v15268_v20  ;;  %v15326_v58 = vld [vmem:[%s21918_s1 + $0xff8] ss:$52 sps:$4 sm:$0xff]  }
 0x219   :  { %5986 = vmatprep.subr.bf16.mxu1 %v15271_v59  ;;  %v15329_v20 = vld [vmem:[%s21918_s1 + $0x1678] ss:$52 sps:$4 sm:$0xff]   ;;  %v15334_v59 = vld [vmem:[%s21918_s1 + $0xf94] ss:$52 sps:$4 sm:$0xff]  }
 0x21b   :  { %5946 = vmatpush1.bf16.msra.mxu0 %v15266_v60  ;;  %v15337_v60 = vld [vmem:[%s21918_s1 + $0x1614] ss:$52 sps:$4 sm:$0xff]  }
 0x21c   :  { %5987 = vmatpush1.bf16.msra.mxu1 %v15269_v61  ;;  %5947 = vmatprep.subr.bf16.mxu0 %v15274_v63  ;;  %v15332_v61 = vld [vmem:[%s21918_s1 + $0xf90] ss:$52 sps:$4 sm:$0xff]  }
 0x21d   :  { %5988 = vmatprep.subr.bf16.mxu1 %v15277_v0  ;;  %v15335_v63 = vld [vmem:[%s21918_s1 + $0x1610] ss:$52 sps:$4 sm:$0xff]  }
 0x21f   :  { %5948 = vmatpush1.bf16.msra.mxu0 %v15272_v2 }
 0x220   :  { %5989 = vmatpush1.bf16.msra.mxu1 %v15275_v4  ;;  %5949 = vmatprep.subr.bf16.mxu0 %v15280_v6 }
 0x221   :  { %5990 = vmatprep.subr.bf16.mxu1 %v15283_v7 }
 0x223   :  { %5950 = vmatpush2.bf16.msra.mxu0 %v15278_v8  ;;  %v15340_v8 = vld [vmem:[%s21918_s1 + $0xf2c] ss:$52 sps:$4 sm:$0xff]  }
 0x224   :  { %5991 = vmatpush2.bf16.msra.mxu1 %v15281_v9  ;;  %5951 = vmatprep.subr.bf16.mxu0 %v15286_v12  ;;  %v15343_v9 = vld [vmem:[%s21918_s1 + $0x15ac] ss:$52 sps:$4 sm:$0xff]  }
 0x225   :  { %5992 = vmatprep.subr.bf16.mxu1 %v15289_v13 }
 0x227   :  { %5952 = vmatpush2.bf16.msra.mxu0 %v15284_v14  ;;  %v15341_v14 = vld [vmem:[%s21918_s1 + $0x15a8] ss:$52 sps:$4 sm:$0xff]  }
 0x228   :  { %5993 = vmatpush2.bf16.msra.mxu1 %v15287_v15  ;;  %5953 = vmatprep.subr.bf16.mxu0 %v15292_v19 }
 0x229   :  { %5994 = vmatprep.subr.bf16.mxu1 %v15295_v21 }
 0x22b   :  { %5954 = vmatpush2.bf16.msra.mxu0 %v15290_v22 }
 0x22c   :  { %5995 = vmatpush2.bf16.msra.mxu1 %v15293_v23  ;;  %5955 = vmatprep.subr.bf16.mxu0 %v15298_v24  ;;  %v15346_v23 = vld [vmem:[%s21918_s1 + $0xec4] ss:$52 sps:$4 sm:$0xff]  }
 0x22d   :  { %5996 = vmatprep.subr.bf16.mxu1 %v15301_v25  ;;  %v15349_v24 = vld [vmem:[%s21918_s1 + $0x1544] ss:$52 sps:$4 sm:$0xff]   ;;  %v15344_v25 = vld [vmem:[%s21918_s1 + $0xec0] ss:$52 sps:$4 sm:$0xff]  }
 0x22f   :  { %5956 = vmatpush2.bf16.msra.mxu0 %v15296_v26  ;;  %v15347_v26 = vld [vmem:[%s21918_s1 + $0x1540] ss:$52 sps:$4 sm:$0xff]  }
 0x230   :  { %5997 = vmatpush2.bf16.msra.mxu1 %v15299_v27  ;;  %5957 = vmatprep.subr.bf16.mxu0 %v15304_v29  ;;  %v15352_v27 = vld [vmem:[%s21918_s1 + $0xe5c] ss:$52 sps:$4 sm:$0xff]  }
 0x231   :  { %5998 = vmatprep.subr.bf16.mxu1 %v15307_v30  ;;  %v15355_v29 = vld [vmem:[%s21918_s1 + $0x14dc] ss:$52 sps:$4 sm:$0xff]   ;;  %v15350_v30 = vld [vmem:[%s21918_s1 + $0xe58] ss:$52 sps:$4 sm:$0xff]  }
 0x233   :  { %5958 = vmatpush2.bf16.msra.mxu0 %v15302_v33  ;;  %v15353_v33 = vld [vmem:[%s21918_s1 + $0x14d8] ss:$52 sps:$4 sm:$0xff]  }
 0x234   :  { %5999 = vmatpush2.bf16.msra.mxu1 %v15305_v34  ;;  %5959 = vmatprep.subr.bf16.mxu0 %v15310_v35  ;;  %v15358_v34 = vld [vmem:[%s21918_s1 + $0xdf4] ss:$52 sps:$4 sm:$0xff]  }
 0x235   :  { %6000 = vmatprep.subr.bf16.mxu1 %v15313_v37  ;;  %v15361_v35 = vld [vmem:[%s21918_s1 + $0x1474] ss:$52 sps:$4 sm:$0xff]   ;;  %v15356_v37 = vld [vmem:[%s21918_s1 + $0xdf0] ss:$52 sps:$4 sm:$0xff]  }
 0x237   :  { %5960 = vmatpush2.bf16.msra.mxu0 %v15308_v38  ;;  %v15359_v38 = vld [vmem:[%s21918_s1 + $0x1470] ss:$52 sps:$4 sm:$0xff]  }
 0x238   :  { %6001 = vmatpush2.bf16.msra.mxu1 %v15311_v40  ;;  %5961 = vmatprep.subr.bf16.mxu0 %v15316_v10  ;;  %v15364_v40 = vld [vmem:[%s21918_s1 + $0xd8c] ss:$52 sps:$4 sm:$0xff]  }
 0x239   :  { %6002 = vmatprep.subr.bf16.mxu1 %v15319_v41  ;;  %v15367_v10 = vld [vmem:[%s21918_s1 + $0x140c] ss:$52 sps:$4 sm:$0xff]   ;;  %v15362_v41 = vld [vmem:[%s21918_s1 + $0xd88] ss:$52 sps:$4 sm:$0xff]  }
 0x23b   :  { %5962 = vmatpush2.bf16.msra.mxu0 %v15314_v42  ;;  %v15365_v42 = vld [vmem:[%s21918_s1 + $0x1408] ss:$52 sps:$4 sm:$0xff]  }
 0x23c   :  { %6003 = vmatpush2.bf16.msra.mxu1 %v15317_v44  ;;  %5963 = vmatprep.subr.bf16.mxu0 %v15322_v46  ;;  %v15370_v44 = vld [vmem:[%s21918_s1 + $0xd24] ss:$52 sps:$4 sm:$0xff]  }
 0x23d   :  { %6004 = vmatprep.subr.bf16.mxu1 %v15325_v47  ;;  %v15373_v46 = vld [vmem:[%s21918_s1 + $0x13a4] ss:$52 sps:$4 sm:$0xff]   ;;  %v15368_v47 = vld [vmem:[%s21918_s1 + $0xd20] ss:$52 sps:$4 sm:$0xff]  }
 0x23f   :  { %5964 = vmatpush2.bf16.msra.mxu0 %v15320_v11  ;;  %v15371_v11 = vld [vmem:[%s21918_s1 + $0x13a0] ss:$52 sps:$4 sm:$0xff]  }
 0x240   :  { %6005 = vmatpush2.bf16.msra.mxu1 %v15323_v50  ;;  %6015 = vmatprep.subr.bf16.mxu0 %v15328_v51  ;;  %v15376_v50 = vld [vmem:[%s21918_s1 + $0x133c] ss:$52 sps:$4 sm:$0xff]  }
 0x241   :  { %6056 = vmatprep.subr.bf16.mxu1 %v15331_v54  ;;  %v15379_v51 = vld [vmem:[%s21918_s1 + $0x19bc] ss:$52 sps:$4 sm:$0xff]   ;;  %v15374_v54 = vld [vmem:[%s21918_s1 + $0x1338] ss:$52 sps:$4 sm:$0xff]  }
 0x242   :  { %v5721_v0 = vpop.f32.mrf.mxu0  ;;  %5966 = vmatmul.mubr.bf16.vlgmr.msra.gmra.mxu0 %v17006_v16 }
 0x243   :  { %v5762_v2 = vpop.f32.mrf.mxu1  ;;  %6007 = vmatmul.mubr.bf16.vlgmr.msra.gmra.mxu1 %v17008_v17  ;;  %v5722_v4 = vadd.f32 %v5721_v0, %v18485_v28  ;;  %6016 = vmatpush1.bf16.msra.mxu0 %v15326_v58  ;;  %v15338_v28 = vld [vmem:[%s21918_s1 + $0xf28] ss:$52 sps:$4 sm:$0xff]   ;;  %v15377_v58 = vld [vmem:[%s21918_s1 + $0x19b8] ss:$52 sps:$4 sm:$0xff]  }
 0x244   :  { %6057 = vmatpush1.bf16.msra.mxu1 %v15329_v20  ;;  %v5723_v6 = vpop.f32.mrf.mxu0  ;;  %6017 = vmatprep.subr.bf16.mxu0 %v15334_v59  ;;  %v15382_v20 = vld [vmem:[%s21918_s1 + $0x12d4] ss:$52 sps:$4 sm:$0xff]   ;;  %v15391_v0 = vld [vmem:[%s21918_s1 + $0x18ec] ss:$52 sps:$4 sm:$0xff]  }
 0x245   :  { %v5764_v7 = vpop.f32.mrf.mxu1  ;;  %6058 = vmatprep.subr.bf16.mxu1 %v15337_v60  ;;  %v18686_v12 = vadd.f32 %v5762_v2, %v5722_v4  ;;  %v5724_v13 = vadd.f32 %v5723_v6, %v18495_v36  ;;  %6047 = vmatprep.mubr.bf16.mxu0 %v17107_v53  ;;  %v15385_v59 = vld [vmem:[%s21918_s1 + $0x1954] ss:$52 sps:$4 sm:$0xff]   ;;  %v15380_v60 = vld [vmem:[%s21918_s1 + $0x12d0] ss:$52 sps:$4 sm:$0xff]  }
 0x246   :  { %6088 = vmatprep.mubr.bf16.mxu1 %v17117_v56  ;;  %v5725_v15 = vpop.f32.mrf.mxu0  ;;  %v15386_v2 = vld [vmem:[%s21918_s1 + $0x1268] ss:$52 sps:$4 sm:$0xff]   ;;  %v15394_v6 = vld [vmem:[%s21918_s1 + $0x1204] ss:$52 sps:$4 sm:$0xff]  }
 0x247   :  { %v5766_v19 = vpop.f32.mrf.mxu1  ;;  %v18697_v21 = vadd.f32 %v5764_v7, %v5724_v13  ;;  %6018 = vmatpush1.bf16.msra.mxu0 %v15332_v61  ;;  %v15383_v61 = vld [vmem:[%s21918_s1 + $0x1950] ss:$52 sps:$4 sm:$0xff]   ;;  %v15389_v4 = vld [vmem:[%s21918_s1 + $0x18e8] ss:$52 sps:$4 sm:$0xff]   ;;  %v15401_v15 = vld [vmem:[%s21918_s1 + $0x1818] ss:$52 sps:$4 sm:$0xff]  }
 0x248   :  { %6059 = vmatpush1.bf16.msra.mxu1 %v15335_v63  ;;  %v5726_v22 = vpop.f32.mrf.mxu0  ;;  %6019 = vmatprep.subr.bf16.mxu0 %v15340_v8  ;;  %v15388_v63 = vld [vmem:[%s21918_s1 + $0x126c] ss:$52 sps:$4 sm:$0xff]   ;;  %v15397_v7 = vld [vmem:[%s21918_s1 + $0x1884] ss:$52 sps:$4 sm:$0xff]   ;;  %v15400_v13 = vld [vmem:[%s21918_s1 + $0x119c] ss:$52 sps:$4 sm:$0xff]  }
 0x249   :  { %v5767_v36 = vpop.f32.mrf.mxu1  ;;  %6060 = vmatprep.subr.bf16.mxu1 %v15343_v9  ;;  %v15392_v8 = vld [vmem:[%s21918_s1 + $0x1200] ss:$52 sps:$4 sm:$0xff]  }
 0x24a   :  { %v15395_v9 = vld [vmem:[%s21918_s1 + $0x1880] ss:$52 sps:$4 sm:$0xff]   ;;  %v15404_v36 = vld [vmem:[%s21918_s1 + $0x1130] ss:$52 sps:$4 sm:$0xff]  }
 0x24b   :  { %6020 = vmatpush1.bf16.msra.mxu0 %v15338_v28  ;;  %v15403_v28 = vld [vmem:[%s21918_s1 + $0x181c] ss:$52 sps:$4 sm:$0xff]   ;;  %v15406_v19 = vld [vmem:[%s21918_s1 + $0x1134] ss:$52 sps:$4 sm:$0xff]  }
 0x24c   :  { %6061 = vmatpush1.bf16.msra.mxu1 %v15341_v14  ;;  %6021 = vmatprep.subr.bf16.mxu0 %v15346_v23  ;;  %v15398_v14 = vld [vmem:[%s21918_s1 + $0x1198] ss:$52 sps:$4 sm:$0xff]   ;;  %v15409_v22 = vld [vmem:[%s21918_s1 + $0x17b4] ss:$52 sps:$4 sm:$0xff]   ;;  %v15407_v23 = vld [vmem:[%s21918_s1 + $0x17b0] ss:$52 sps:$4 sm:$0xff]  }
 0x24d   :  { %6062 = vmatprep.subr.bf16.mxu1 %v15349_v24  ;;  %v15412_v24 = vld [vmem:[%s21918_s1 + $0x10cc] ss:$52 sps:$4 sm:$0xff]  }
 0x24f   :  { %6022 = vmatpush1.bf16.msra.mxu0 %v15344_v25  ;;  %v15415_v25 = vld [vmem:[%s21918_s1 + $0x174c] ss:$52 sps:$4 sm:$0xff]  }
 0x250   :  { %6063 = vmatpush1.bf16.msra.mxu1 %v15347_v26  ;;  %6023 = vmatprep.subr.bf16.mxu0 %v15352_v27  ;;  %v15410_v26 = vld [vmem:[%s21918_s1 + $0x10c8] ss:$52 sps:$4 sm:$0xff]  }
 0x251   :  { %6064 = vmatprep.subr.bf16.mxu1 %v15355_v29  ;;  %v15413_v27 = vld [vmem:[%s21918_s1 + $0x1748] ss:$52 sps:$4 sm:$0xff]   ;;  %v15418_v29 = vld [vmem:[%s21918_s1 + $0x1064] ss:$52 sps:$4 sm:$0xff]  }
 0x253   :  { %6024 = vmatpush1.bf16.msra.mxu0 %v15350_v30  ;;  %v15421_v30 = vld [vmem:[%s21918_s1 + $0x16e4] ss:$52 sps:$4 sm:$0xff]  }
 0x254   :  { %6065 = vmatpush1.bf16.msra.mxu1 %v15353_v33  ;;  %6025 = vmatprep.subr.bf16.mxu0 %v15358_v34  ;;  %v15416_v33 = vld [vmem:[%s21918_s1 + $0x1060] ss:$52 sps:$4 sm:$0xff]  }
 0x255   :  { %6066 = vmatprep.subr.bf16.mxu1 %v15361_v35  ;;  %v15419_v34 = vld [vmem:[%s21918_s1 + $0x16e0] ss:$52 sps:$4 sm:$0xff]   ;;  %v1014_v35 = vsub.s32 6, %v16909_v43 }
 0x257   :  { %6026 = vmatpush1.bf16.msra.mxu0 %v15356_v37  ;;  %v15424_v37 = vld [vmem:[%s21918_s1 + $0x304] ss:$52 sps:$4 sm:$0xff]  }
 0x258   :  { %6067 = vmatpush1.bf16.msra.mxu1 %v15359_v38  ;;  %6027 = vmatprep.subr.bf16.mxu0 %v15364_v40  ;;  %v15427_v38 = vld [vmem:[%s21918_s1 + $0x984] ss:$52 sps:$4 sm:$0xff]   ;;  %v15422_v40 = vld [vmem:[%s21918_s1 + $0x300] ss:$52 sps:$4 sm:$0xff]  }
 0x259   :  { %6068 = vmatprep.subr.bf16.mxu1 %v15367_v10  ;;  %v1018_v10 = vsub.s32 7, %v16909_v43 }
 0x25b   :  { %6028 = vmatpush1.bf16.msra.mxu0 %v15362_v41  ;;  %v16712_v41 = vld [vmem:[%s21919_s2] sm:$0xff] }
 0x25c   :  { %6069 = vmatpush1.bf16.msra.mxu1 %v15365_v42  ;;  %6029 = vmatprep.subr.bf16.mxu0 %v15370_v44  ;;  %v1015_v42 = vrot.slane %v16712_v41, %v1014_v35  ;;  %v15425_v44 = vld [vmem:[%s21918_s1 + $0x980] ss:$52 sps:$4 sm:$0xff]  }
 0x25d   :  { %6070 = vmatprep.subr.bf16.mxu1 %v15373_v46  ;;  %v15430_v46 = vld [vmem:[%s21918_s1 + $0x29c] ss:$52 sps:$4 sm:$0xff]  }
 0x25f   :  { %6030 = vmatpush1.bf16.msra.mxu0 %v15368_v47  ;;  %v15433_v47 = vld [vmem:[%s21918_s1 + $0x91c] ss:$52 sps:$4 sm:$0xff]  }
 0x260   :  { %6071 = vmatpush1.bf16.msra.mxu1 %v15371_v11  ;;  %6031 = vmatprep.subr.bf16.mxu0 %v15376_v50  ;;  %v1019_v11 = vrot.slane %v16712_v41, %v1018_v10  ;;  %v15428_v50 = vld [vmem:[%s21918_s1 + $0x298] ss:$52 sps:$4 sm:$0xff]   ;;  %v15464_v41 = vld [vmem:[%s21918_s1 + $0x28] ss:$52 sps:$4 sm:$0xff]  }
 0x261   :  { %6072 = vmatprep.subr.bf16.mxu1 %v15379_v51  ;;  %v15431_v51 = vld [vmem:[%s21918_s1 + $0x918] ss:$52 sps:$4 sm:$0xff]  }
 0x262   :  { %v15469_v10 = vld [vmem:[%s21918_s1 + $0x6ac] ss:$52 sps:$4 sm:$0xff]  }
 0x263   :  { %6032 = vmatpush2.bf16.msra.mxu0 %v15374_v54 }
 0x264   :  { %6073 = vmatpush2.bf16.msra.mxu1 %v15377_v58  ;;  %6033 = vmatprep.subr.bf16.mxu0 %v15382_v20 }
 0x265   :  { %6074 = vmatprep.subr.bf16.mxu1 %v15385_v59 }
 0x267   :  { %6034 = vmatpush2.bf16.msra.mxu0 %v15380_v60 }
 0x268   :  { %6075 = vmatpush2.bf16.msra.mxu1 %v15383_v61  ;;  %6035 = vmatprep.subr.bf16.mxu0 %v15388_v63  ;;  %v15436_v61 = vld [vmem:[%s21918_s1 + $0x234] ss:$52 sps:$4 sm:$0xff]  }
 0x269   :  { %6076 = vmatprep.subr.bf16.mxu1 %v15391_v0  ;;  %v15439_v63 = vld [vmem:[%s21918_s1 + $0x8b4] ss:$52 sps:$4 sm:$0xff]  }
 0x26b   :  { %6036 = vmatpush2.bf16.msra.mxu0 %v15386_v2 }
 0x26c   :  { %6077 = vmatpush2.bf16.msra.mxu1 %v15389_v4  ;;  %6037 = vmatprep.subr.bf16.mxu0 %v15394_v6  ;;  %v15434_v4 = vld [vmem:[%s21918_s1 + $0x230] ss:$52 sps:$4 sm:$0xff]  }
 0x26d   :  { %6078 = vmatprep.subr.bf16.mxu1 %v15397_v7  ;;  %v15437_v6 = vld [vmem:[%s21918_s1 + $0x8b0] ss:$52 sps:$4 sm:$0xff]  }
 0x26f   :  { %6038 = vmatpush2.bf16.msra.mxu0 %v15392_v8 }
 0x270   :  { %6079 = vmatpush2.bf16.msra.mxu1 %v15395_v9  ;;  %6039 = vmatprep.subr.bf16.mxu0 %v15400_v13 }
 0x271   :  { %6080 = vmatprep.subr.bf16.mxu1 %v15403_v28 }
 0x273   :  { %6040 = vmatpush2.bf16.msra.mxu0 %v15398_v14  ;;  %v15442_v14 = vld [vmem:[%s21918_s1 + $0x1cc] ss:$52 sps:$4 sm:$0xff]  }
 0x274   :  { %6081 = vmatpush2.bf16.msra.mxu1 %v15401_v15  ;;  %6041 = vmatprep.subr.bf16.mxu0 %v15406_v19  ;;  %v15445_v15 = vld [vmem:[%s21918_s1 + $0x84c] ss:$52 sps:$4 sm:$0xff]   ;;  %v15440_v19 = vld [vmem:[%s21918_s1 + $0x1c8] ss:$52 sps:$4 sm:$0xff]  }
 0x275   :  { %6082 = vmatprep.subr.bf16.mxu1 %v15409_v22  ;;  %v15443_v22 = vld [vmem:[%s21918_s1 + $0x848] ss:$52 sps:$4 sm:$0xff]  }
 0x277   :  { %6042 = vmatpush2.bf16.msra.mxu0 %v15404_v36  ;;  %v15448_v36 = vld [vmem:[%s21918_s1 + $0x164] ss:$52 sps:$4 sm:$0xff]  }
 0x278   :  { %6083 = vmatpush2.bf16.msra.mxu1 %v15407_v23  ;;  %6043 = vmatprep.subr.bf16.mxu0 %v15412_v24  ;;  %v15451_v23 = vld [vmem:[%s21918_s1 + $0x7e4] ss:$52 sps:$4 sm:$0xff]   ;;  %v15446_v24 = vld [vmem:[%s21918_s1 + $0x160] ss:$52 sps:$4 sm:$0xff]  }
 0x279   :  { %6084 = vmatprep.subr.bf16.mxu1 %v15415_v25  ;;  %v15449_v25 = vld [vmem:[%s21918_s1 + $0x7e0] ss:$52 sps:$4 sm:$0xff]  }
 0x27b   :  { %6044 = vmatpush2.bf16.msra.mxu0 %v15410_v26  ;;  %v15454_v26 = vld [vmem:[%s21918_s1 + $0xfc] ss:$52 sps:$4 sm:$0xff]  }
 0x27c   :  { %6085 = vmatpush2.bf16.msra.mxu1 %v15413_v27  ;;  %6045 = vmatprep.subr.bf16.mxu0 %v15418_v29  ;;  %v15457_v27 = vld [vmem:[%s21918_s1 + $0x77c] ss:$52 sps:$4 sm:$0xff]   ;;  %v15452_v29 = vld [vmem:[%s21918_s1 + $0xf8] ss:$52 sps:$4 sm:$0xff]  }
 0x27d   :  { %6086 = vmatprep.subr.bf16.mxu1 %v15421_v30  ;;  %v15455_v30 = vld [vmem:[%s21918_s1 + $0x778] ss:$52 sps:$4 sm:$0xff]  }
 0x27f   :  { %6046 = vmatpush2.bf16.msra.mxu0 %v15416_v33  ;;  %v15460_v33 = vld [vmem:[%s21918_s1 + $0x94] ss:$52 sps:$4 sm:$0xff]  }
 0x280   :  { %6087 = vmatpush2.bf16.msra.mxu1 %v15419_v34  ;;  %6097 = vmatprep.subr.bf16.mxu0 %v15424_v37  ;;  %v15463_v34 = vld [vmem:[%s21918_s1 + $0x714] ss:$52 sps:$4 sm:$0xff]   ;;  %v15458_v37 = vld [vmem:[%s21918_s1 + $0x90] ss:$52 sps:$4 sm:$0xff]  }
 0x281   :  { %6138 = vmatprep.subr.bf16.mxu1 %v15427_v38  ;;  %v15461_v38 = vld [vmem:[%s21918_s1 + $0x710] ss:$52 sps:$4 sm:$0xff]  }
 0x282   :  { %v5803_v54 = vpop.f32.mrf.mxu0  ;;  %6048 = vmatmul.mubr.bf16.vlgmr.msra.gmra.mxu0 %v17225_v31 }
 0x283   :  { %v5844_v58 = vpop.f32.mrf.mxu1  ;;  %6089 = vmatmul.mubr.bf16.vlgmr.msra.gmra.mxu1 %v17229_v32  ;;  %v5804_v20 = vadd.f32 %v5803_v54, %v1015_v42  ;;  %6098 = vmatpush1.bf16.msra.mxu0 %v15422_v40  ;;  %v15466_v40 = vld [vmem:[%s21918_s1 + $0x2c] ss:$52 sps:$4 sm:$0xff]   ;;  %v15467_v42 = vld [vmem:[%s21918_s1 + $0x6a8] ss:$52 sps:$4 sm:$0xff]  }
 0x284   :  { %6139 = vmatpush1.bf16.msra.mxu1 %v15425_v44  ;;  %v5805_v59 = vpop.f32.mrf.mxu0  ;;  %6099 = vmatprep.subr.bf16.mxu0 %v15430_v46  ;;  %v15472_v44 = vld [vmem:[%s21918_s1 + $0x644] ss:$52 sps:$4 sm:$0xff]  }
 0x285   :  { %v5846_v60 = vpop.f32.mrf.mxu1  ;;  %6140 = vmatprep.subr.bf16.mxu1 %v15433_v47  ;;  %v18894_v0 = vadd.f32 %v5844_v58, %v5804_v20  ;;  %v5806_v2 = vadd.f32 %v5805_v59, %v1019_v11  ;;  %6129 = vmatprep.mubr.bf16.mxu0 %v16955_v62  ;;  %v15475_v46 = vld [vmem:[%s21918_s1 + $0xcc4] ss:$52 sps:$4 sm:$0xff]   ;;  %v15470_v47 = vld [vmem:[%s21918_s1 + $0x640] ss:$52 sps:$4 sm:$0xff]  }
 0x286   :  { %6170 = vmatprep.mubr.bf16.mxu1 %v16966_v3  ;;  %v5807_v7 = vpop.f32.mrf.mxu0  ;;  %v15473_v11 = vld [vmem:[%s21918_s1 + $0xcc0] ss:$52 sps:$4 sm:$0xff]   ;;  %v15476_v54 = vld [vmem:[%s21918_s1 + $0x5d8] ss:$52 sps:$4 sm:$0xff]  }
 0x287   :  { %v5848_v8 = vpop.f32.mrf.mxu1  ;;  %v18904_v9 = vadd.f32 %v5846_v60, %v5806_v2  ;;  %6100 = vmatpush1.bf16.msra.mxu0 %v15428_v50  ;;  %v15478_v50 = vld [vmem:[%s21918_s1 + $0x5dc] ss:$52 sps:$4 sm:$0xff]   ;;  %v15479_v58 = vld [vmem:[%s21918_s1 + $0xc58] ss:$52 sps:$4 sm:$0xff]   ;;  %v15484_v20 = vld [vmem:[%s21918_s1 + $0x574] ss:$52 sps:$4 sm:$0xff]  }
 0x288   :  { %6141 = vmatpush1.bf16.msra.mxu1 %v15431_v51  ;;  %v5808_v13 = vpop.f32.mrf.mxu0  ;;  %6101 = vmatprep.subr.bf16.mxu0 %v15436_v61  ;;  %v15481_v51 = vld [vmem:[%s21918_s1 + $0xc5c] ss:$52 sps:$4 sm:$0xff]   ;;  %v15487_v59 = vld [vmem:[%s21918_s1 + $0xbf4] ss:$52 sps:$4 sm:$0xff]   ;;  %v15493_v2 = vld [vmem:[%s21918_s1 + $0xb8c] ss:$52 sps:$4 sm:$0xff]  }
 0x289   :  { %v5849_v28 = vpop.f32.mrf.mxu1  ;;  %6142 = vmatprep.subr.bf16.mxu1 %v15439_v63  ;;  %v15482_v60 = vld [vmem:[%s21918_s1 + $0x570] ss:$52 sps:$4 sm:$0xff]   ;;  %v15490_v63 = vld [vmem:[%s21918_s1 + $0x50c] ss:$52 sps:$4 sm:$0xff]  }
 0x28a   :  { %v15485_v61 = vld [vmem:[%s21918_s1 + $0xbf0] ss:$52 sps:$4 sm:$0xff]   ;;  %v15494_v13 = vld [vmem:[%s21918_s1 + $0x4a0] ss:$52 sps:$4 sm:$0xff]  }
 0x28b   :  { %6102 = vmatpush1.bf16.msra.mxu0 %v15434_v4  ;;  %v15488_v4 = vld [vmem:[%s21918_s1 + $0x508] ss:$52 sps:$4 sm:$0xff]   ;;  %v15496_v7 = vld [vmem:[%s21918_s1 + $0x4a4] ss:$52 sps:$4 sm:$0xff]   ;;  %v15497_v28 = vld [vmem:[%s21918_s1 + $0xb20] ss:$52 sps:$4 sm:$0xff]  }
 0x28c   :  { %6143 = vmatpush1.bf16.msra.mxu1 %v15437_v6  ;;  %6103 = vmatprep.subr.bf16.mxu0 %v15442_v14  ;;  %v15491_v6 = vld [vmem:[%s21918_s1 + $0xb88] ss:$52 sps:$4 sm:$0xff]   ;;  %v15499_v8 = vld [vmem:[%s21918_s1 + $0xb24] ss:$52 sps:$4 sm:$0xff]  }
 0x28d   :  { %6144 = vmatprep.subr.bf16.mxu1 %v15445_v15  ;;  %v15502_v14 = vld [vmem:[%s21918_s1 + $0x43c] ss:$52 sps:$4 sm:$0xff]  }
 0x28e   :  { %v15505_v15 = vld [vmem:[%s21918_s1 + $0xabc] ss:$52 sps:$4 sm:$0xff]  }
 0x28f   :  { %6104 = vmatpush1.bf16.msra.mxu0 %v15440_v19  ;;  %v15500_v19 = vld [vmem:[%s21918_s1 + $0x438] ss:$52 sps:$4 sm:$0xff]  }
 0x290   :  { %6145 = vmatpush1.bf16.msra.mxu1 %v15443_v22  ;;  %6105 = vmatprep.subr.bf16.mxu0 %v15448_v36  ;;  %v15503_v22 = vld [vmem:[%s21918_s1 + $0xab8] ss:$52 sps:$4 sm:$0xff]   ;;  %v15508_v36 = vld [vmem:[%s21918_s1 + $0x3d4] ss:$52 sps:$4 sm:$0xff]  }
 0x291   :  { %6146 = vmatprep.subr.bf16.mxu1 %v15451_v23  ;;  %v15511_v23 = vld [vmem:[%s21918_s1 + $0xa54] ss:$52 sps:$4 sm:$0xff]  }
 0x293   :  { %6106 = vmatpush1.bf16.msra.mxu0 %v15446_v24  ;;  %v15506_v24 = vld [vmem:[%s21918_s1 + $0x3d0] ss:$52 sps:$4 sm:$0xff]  }
 0x294   :  { %6147 = vmatpush1.bf16.msra.mxu1 %v15449_v25  ;;  %6107 = vmatprep.subr.bf16.mxu0 %v15454_v26  ;;  %v15509_v25 = vld [vmem:[%s21918_s1 + $0xa50] ss:$52 sps:$4 sm:$0xff]   ;;  %v15514_v26 = vld [vmem:[%s21918_s1 + $0x36c] ss:$52 sps:$4 sm:$0xff]  }
 0x295   :  { %6148 = vmatprep.subr.bf16.mxu1 %v15457_v27  ;;  %v15517_v27 = vld [vmem:[%s21918_s1 + $0x9ec] ss:$52 sps:$4 sm:$0xff]  }
 0x297   :  { %6108 = vmatpush1.bf16.msra.mxu0 %v15452_v29  ;;  %v15512_v29 = vld [vmem:[%s21918_s1 + $0x368] ss:$52 sps:$4 sm:$0xff]  }
 0x298   :  { %6149 = vmatpush1.bf16.msra.mxu1 %v15455_v30  ;;  %6109 = vmatprep.subr.bf16.mxu0 %v15460_v33  ;;  %v15515_v30 = vld [vmem:[%s21918_s1 + $0x9e8] ss:$52 sps:$4 sm:$0xff]   ;;  %v15520_v33 = vld [vmem:[%s21918_s1 + $0x1004] ss:$52 sps:$4 sm:$0xff]  }
 0x299   :  { %6150 = vmatprep.subr.bf16.mxu1 %v15463_v34  ;;  %v15523_v34 = vld [vmem:[%s21918_s1 + $0x1684] ss:$52 sps:$4 sm:$0xff]  }
 0x29b   :  { %6110 = vmatpush1.bf16.msra.mxu0 %v15458_v37  ;;  %v15518_v37 = vld [vmem:[%s21918_s1 + $0x1000] ss:$52 sps:$4 sm:$0xff]  }
 0x29c   :  { %6151 = vmatpush1.bf16.msra.mxu1 %v15461_v38  ;;  %6111 = vmatprep.subr.bf16.mxu0 %v15466_v40  ;;  %v15521_v38 = vld [vmem:[%s21918_s1 + $0x1680] ss:$52 sps:$4 sm:$0xff]   ;;  %v15526_v40 = vld [vmem:[%s21918_s1 + $0xf9c] ss:$52 sps:$4 sm:$0xff]  }
 0x29d   :  { %6152 = vmatprep.subr.bf16.mxu1 %v15469_v10  ;;  %v15529_v10 = vld [vmem:[%s21918_s1 + $0x161c] ss:$52 sps:$4 sm:$0xff]  }
 0x29f   :  { %6112 = vmatpush1.bf16.msra.mxu0 %v15464_v41  ;;  %v15524_v41 = vld [vmem:[%s21918_s1 + $0xf98] ss:$52 sps:$4 sm:$0xff]  }
 0x2a0   :  { %6153 = vmatpush1.bf16.msra.mxu1 %v15467_v42  ;;  %6113 = vmatprep.subr.bf16.mxu0 %v15472_v44  ;;  %v15527_v42 = vld [vmem:[%s21918_s1 + $0x1618] ss:$52 sps:$4 sm:$0xff]  }
 0x2a1   :  { %6154 = vmatprep.subr.bf16.mxu1 %v15475_v46 }
 0x2a3   :  { %6114 = vmatpush2.bf16.msra.mxu0 %v15470_v47  ;;  %v15532_v47 = vld [vmem:[%s21918_s1 + $0xf34] ss:$52 sps:$4 sm:$0xff]  }
 0x2a4   :  { %6155 = vmatpush2.bf16.msra.mxu1 %v15473_v11  ;;  %6115 = vmatprep.subr.bf16.mxu0 %v15478_v50  ;;  %v15535_v11 = vld [vmem:[%s21918_s1 + $0x15b4] ss:$52 sps:$4 sm:$0xff]  }
 0x2a5   :  { %6156 = vmatprep.subr.bf16.mxu1 %v15481_v51 }
 0x2a7   :  { %6116 = vmatpush2.bf16.msra.mxu0 %v15476_v54 }
 0x2a8   :  { %6157 = vmatpush2.bf16.msra.mxu1 %v15479_v58  ;;  %6117 = vmatprep.subr.bf16.mxu0 %v15484_v20 }
 0x2a9   :  { %6158 = vmatprep.subr.bf16.mxu1 %v15487_v59  ;;  %v15530_v59 = vld [vmem:[%s21918_s1 + $0xf30] ss:$52 sps:$4 sm:$0xff]  }
 0x2ab   :  { %6118 = vmatpush2.bf16.msra.mxu0 %v15482_v60  ;;  %v15533_v60 = vld [vmem:[%s21918_s1 + $0x15b0] ss:$52 sps:$4 sm:$0xff]  }
 0x2ac   :  { %6159 = vmatpush2.bf16.msra.mxu1 %v15485_v61  ;;  %6119 = vmatprep.subr.bf16.mxu0 %v15490_v63  ;;  %v15538_v63 = vld [vmem:[%s21918_s1 + $0xecc] ss:$52 sps:$4 sm:$0xff]  }
 0x2ad   :  { %6160 = vmatprep.subr.bf16.mxu1 %v15493_v2 }
 0x2af   :  { %6120 = vmatpush2.bf16.msra.mxu0 %v15488_v4 }
 0x2b0   :  { %6161 = vmatpush2.bf16.msra.mxu1 %v15491_v6  ;;  %6121 = vmatprep.subr.bf16.mxu0 %v15496_v7  ;;  %v15536_v7 = vld [vmem:[%s21918_s1 + $0xec8] ss:$52 sps:$4 sm:$0xff]  }
 0x2b1   :  { %6162 = vmatprep.subr.bf16.mxu1 %v15499_v8  ;;  %v15539_v8 = vld [vmem:[%s21918_s1 + $0x1548] ss:$52 sps:$4 sm:$0xff]  }
 0x2b3   :  { %6122 = vmatpush2.bf16.msra.mxu0 %v15494_v13  ;;  %v15544_v13 = vld [vmem:[%s21918_s1 + $0xe64] ss:$52 sps:$4 sm:$0xff]  }
 0x2b4   :  { %6163 = vmatpush2.bf16.msra.mxu1 %v15497_v28  ;;  %6123 = vmatprep.subr.bf16.mxu0 %v15502_v14  ;;  %v15547_v28 = vld [vmem:[%s21918_s1 + $0x14e4] ss:$52 sps:$4 sm:$0xff]   ;;  %v15542_v14 = vld [vmem:[%s21918_s1 + $0xe60] ss:$52 sps:$4 sm:$0xff]  }
 0x2b5   :  { %6164 = vmatprep.subr.bf16.mxu1 %v15505_v15  ;;  %v15545_v15 = vld [vmem:[%s21918_s1 + $0x14e0] ss:$52 sps:$4 sm:$0xff]  }
 0x2b7   :  { %6124 = vmatpush2.bf16.msra.mxu0 %v15500_v19  ;;  %v15550_v19 = vld [vmem:[%s21918_s1 + $0xdfc] ss:$52 sps:$4 sm:$0xff]  }
 0x2b8   :  { %6165 = vmatpush2.bf16.msra.mxu1 %v15503_v22  ;;  %6125 = vmatprep.subr.bf16.mxu0 %v15508_v36  ;;  %v15553_v22 = vld [vmem:[%s21918_s1 + $0x147c] ss:$52 sps:$4 sm:$0xff]   ;;  %v15548_v36 = vld [vmem:[%s21918_s1 + $0xdf8] ss:$52 sps:$4 sm:$0xff]  }
 0x2b9   :  { %6166 = vmatprep.subr.bf16.mxu1 %v15511_v23  ;;  %v15551_v23 = vld [vmem:[%s21918_s1 + $0x1478] ss:$52 sps:$4 sm:$0xff]  }
 0x2bb   :  { %6126 = vmatpush2.bf16.msra.mxu0 %v15506_v24  ;;  %v15556_v24 = vld [vmem:[%s21918_s1 + $0xd94] ss:$52 sps:$4 sm:$0xff]  }
 0x2bc   :  { %6167 = vmatpush2.bf16.msra.mxu1 %v15509_v25  ;;  %6127 = vmatprep.subr.bf16.mxu0 %v15514_v26  ;;  %v15559_v25 = vld [vmem:[%s21918_s1 + $0x1414] ss:$52 sps:$4 sm:$0xff]   ;;  %v15554_v26 = vld [vmem:[%s21918_s1 + $0xd90] ss:$52 sps:$4 sm:$0xff]  }
 0x2bd   :  { %6168 = vmatprep.subr.bf16.mxu1 %v15517_v27  ;;  %v15557_v27 = vld [vmem:[%s21918_s1 + $0x1410] ss:$52 sps:$4 sm:$0xff]  }
 0x2bf   :  { %6128 = vmatpush2.bf16.msra.mxu0 %v15512_v29  ;;  %v15562_v29 = vld [vmem:[%s21918_s1 + $0xd2c] ss:$52 sps:$4 sm:$0xff]  }
 0x2c0   :  { %6169 = vmatpush2.bf16.msra.mxu1 %v15515_v30  ;;  %6179 = vmatprep.subr.bf16.mxu0 %v15520_v33  ;;  %v15565_v30 = vld [vmem:[%s21918_s1 + $0x13ac] ss:$52 sps:$4 sm:$0xff]   ;;  %v15560_v33 = vld [vmem:[%s21918_s1 + $0xd28] ss:$52 sps:$4 sm:$0xff]  }
 0x2c1   :  { %6220 = vmatprep.subr.bf16.mxu1 %v15523_v34  ;;  %v15563_v34 = vld [vmem:[%s21918_s1 + $0x13a8] ss:$52 sps:$4 sm:$0xff]  }
 0x2c2   :  { %v5885_v44 = vpop.f32.mrf.mxu0  ;;  %6130 = vmatmul.mubr.bf16.vlgmr.msra.gmra.mxu0 %v17006_v16 }
 0x2c3   :  { %v5926_v46 = vpop.f32.mrf.mxu1  ;;  %6171 = vmatmul.mubr.bf16.vlgmr.msra.gmra.mxu1 %v17008_v17  ;;  %v5886_v50 = vadd.f32 %v5885_v44, %v18894_v0  ;;  %6180 = vmatpush1.bf16.msra.mxu0 %v15518_v37  ;;  %v15568_v37 = vld [vmem:[%s21918_s1 + $0x1344] ss:$52 sps:$4 sm:$0xff]  }
 0x2c4   :  { %6221 = vmatpush1.bf16.msra.mxu1 %v15521_v38  ;;  %v5887_v51 = vpop.f32.mrf.mxu0  ;;  %6181 = vmatprep.subr.bf16.mxu0 %v15526_v40  ;;  %v15571_v38 = vld [vmem:[%s21918_s1 + $0x19c4] ss:$52 sps:$4 sm:$0xff]   ;;  %v15566_v40 = vld [vmem:[%s21918_s1 + $0x1340] ss:$52 sps:$4 sm:$0xff]  }
 0x2c5   :  { %v5928_v54 = vpop.f32.mrf.mxu1  ;;  %6222 = vmatprep.subr.bf16.mxu1 %v15529_v10  ;;  %v19095_v58 = vadd.f32 %v5926_v46, %v5886_v50  ;;  %v5888_v20 = vadd.f32 %v5887_v51, %v18904_v9  ;;  %6211 = vmatprep.mubr.bf16.mxu0 %v17107_v53  ;;  %v15541_v9 = vld [vmem:[%s21918_s1 + $0x154c] ss:$52 sps:$4 sm:$0xff]   ;;  %v15578_v50 = vld [vmem:[%s21918_s1 + $0x1270] ss:$52 sps:$4 sm:$0xff]  }
 0x2c6   :  { %6252 = vmatprep.mubr.bf16.mxu1 %v17117_v56  ;;  %v5889_v0 = vpop.f32.mrf.mxu0  ;;  %v15569_v10 = vld [vmem:[%s21918_s1 + $0x19c0] ss:$52 sps:$4 sm:$0xff]   ;;  %v15572_v44 = vld [vmem:[%s21918_s1 + $0x12d8] ss:$52 sps:$4 sm:$0xff]   ;;  %v15581_v51 = vld [vmem:[%s21918_s1 + $0x18f0] ss:$52 sps:$4 sm:$0xff]  }
 0x2c7   :  { %v5930_v61 = vpop.f32.mrf.mxu1  ;;  %v19112_v2 = vadd.f32 %v5928_v54, %v5888_v20  ;;  %6182 = vmatpush1.bf16.msra.mxu0 %v15524_v41  ;;  %v15574_v41 = vld [vmem:[%s21918_s1 + $0x12dc] ss:$52 sps:$4 sm:$0xff]   ;;  %v15575_v46 = vld [vmem:[%s21918_s1 + $0x1958] ss:$52 sps:$4 sm:$0xff]  }
 0x2c8   :  { %6223 = vmatpush1.bf16.msra.mxu1 %v15527_v42  ;;  %v5890_v4 = vpop.f32.mrf.mxu0  ;;  %6183 = vmatprep.subr.bf16.mxu0 %v15532_v47  ;;  %v15577_v42 = vld [vmem:[%s21918_s1 + $0x195c] ss:$52 sps:$4 sm:$0xff]   ;;  %v15580_v47 = vld [vmem:[%s21918_s1 + $0x1274] ss:$52 sps:$4 sm:$0xff]   ;;  %v15586_v54 = vld [vmem:[%s21918_s1 + $0x120c] ss:$52 sps:$4 sm:$0xff]  }
 0x2c9   :  { %v5931_v6 = vpop.f32.mrf.mxu1  ;;  %6224 = vmatprep.subr.bf16.mxu1 %v15535_v11  ;;  %v15583_v11 = vld [vmem:[%s21918_s1 + $0x18f4] ss:$52 sps:$4 sm:$0xff]   ;;  %v15589_v20 = vld [vmem:[%s21918_s1 + $0x188c] ss:$52 sps:$4 sm:$0xff]   ;;  %v15592_v0 = vld [vmem:[%s21918_s1 + $0x11a4] ss:$52 sps:$4 sm:$0xff]  }
 0x2ca   :  { %v15595_v61 = vld [vmem:[%s21918_s1 + $0x1824] ss:$52 sps:$4 sm:$0xff]   ;;  %v15598_v4 = vld [vmem:[%s21918_s1 + $0x113c] ss:$52 sps:$4 sm:$0xff]  }
 0x2cb   :  { %6184 = vmatpush1.bf16.msra.mxu0 %v15530_v59  ;;  %v15584_v59 = vld [vmem:[%s21918_s1 + $0x1208] ss:$52 sps:$4 sm:$0xff]  }
 0x2cc   :  { %6225 = vmatpush1.bf16.msra.mxu1 %v15533_v60  ;;  %6185 = vmatprep.subr.bf16.mxu0 %v15538_v63  ;;  %v15587_v60 = vld [vmem:[%s21918_s1 + $0x1888] ss:$52 sps:$4 sm:$0xff]   ;;  %v15590_v63 = vld [vmem:[%s21918_s1 + $0x11a0] ss:$52 sps:$4 sm:$0xff]  }
 0x2cd   :  { %6226 = vmatprep.subr.bf16.mxu1 %v15541_v9  ;;  %v15593_v9 = vld [vmem:[%s21918_s1 + $0x1820] ss:$52 sps:$4 sm:$0xff]   ;;  %v15601_v6 = vld [vmem:[%s21918_s1 + $0x17bc] ss:$52 sps:$4 sm:$0xff]  }
 0x2cf   :  { %6186 = vmatpush1.bf16.msra.mxu0 %v15536_v7  ;;  %v15596_v7 = vld [vmem:[%s21918_s1 + $0x1138] ss:$52 sps:$4 sm:$0xff]  }
 0x2d0   :  { %6227 = vmatpush1.bf16.msra.mxu1 %v15539_v8  ;;  %6187 = vmatprep.subr.bf16.mxu0 %v15544_v13  ;;  %v15599_v8 = vld [vmem:[%s21918_s1 + $0x17b8] ss:$52 sps:$4 sm:$0xff]   ;;  %v15604_v13 = vld [vmem:[%s21918_s1 + $0x10d4] ss:$52 sps:$4 sm:$0xff]  }
 0x2d1   :  { %6228 = vmatprep.subr.bf16.mxu1 %v15547_v28  ;;  %v15607_v28 = vld [vmem:[%s21918_s1 + $0x1754] ss:$52 sps:$4 sm:$0xff]  }
 0x2d3   :  { %6188 = vmatpush1.bf16.msra.mxu0 %v15542_v14  ;;  %v15602_v14 = vld [vmem:[%s21918_s1 + $0x10d0] ss:$52 sps:$4 sm:$0xff]  }
 0x2d4   :  { %6229 = vmatpush1.bf16.msra.mxu1 %v15545_v15  ;;  %6189 = vmatprep.subr.bf16.mxu0 %v15550_v19  ;;  %v15605_v15 = vld [vmem:[%s21918_s1 + $0x1750] ss:$52 sps:$4 sm:$0xff]   ;;  %v15610_v19 = vld [vmem:[%s21918_s1 + $0x106c] ss:$52 sps:$4 sm:$0xff]  }
 0x2d5   :  { %6230 = vmatprep.subr.bf16.mxu1 %v15553_v22  ;;  %v15613_v22 = vld [vmem:[%s21918_s1 + $0x16ec] ss:$52 sps:$4 sm:$0xff]  }
 0x2d7   :  { %6190 = vmatpush1.bf16.msra.mxu0 %v15548_v36  ;;  %v15608_v36 = vld [vmem:[%s21918_s1 + $0x1068] ss:$52 sps:$4 sm:$0xff]  }
 0x2d8   :  { %6231 = vmatpush1.bf16.msra.mxu1 %v15551_v23  ;;  %6191 = vmatprep.subr.bf16.mxu0 %v15556_v24  ;;  %v15611_v23 = vld [vmem:[%s21918_s1 + $0x16e8] ss:$52 sps:$4 sm:$0xff]  }
 0x2d9   :  { %6232 = vmatprep.subr.bf16.mxu1 %v15559_v25  ;;  %v985_v24 = vld [vmem:[%s21919_s2 + $0x8] sm:$0x1f] }
 0x2da   :  { %v15614_v25 = vld [vmem:[%s21918_s1 + $0x648] ss:$52 sps:$4 sm:$0xff]  }
 0x2db   :  { %6192 = vmatpush1.bf16.msra.mxu0 %v15554_v26  ;;  %v15615_v26 = vld [vmem:[%s21918_s1 + $0xcc8] ss:$52 sps:$4 sm:$0xff]  }
 0x2dc   :  { %6233 = vmatpush1.bf16.msra.mxu1 %v15557_v27  ;;  %6193 = vmatprep.subr.bf16.mxu0 %v15562_v29  ;;  %v15616_v27 = vld [vmem:[%s21918_s1 + $0x308] ss:$52 sps:$4 sm:$0xff]  }
 0x2dd   :  { %6234 = vmatprep.subr.bf16.mxu1 %v15565_v30  ;;  %v15617_v29 = vld [vmem:[%s21918_s1 + $0x988] ss:$52 sps:$4 sm:$0xff]   ;;  %v15618_v30 = vld [vmem:[%s21918_s1 + $0x5e0] ss:$52 sps:$4 sm:$0xff]  }
 0x2df   :  { %6194 = vmatpush1.bf16.msra.mxu0 %v15560_v33  ;;  %v15619_v33 = vld [vmem:[%s21918_s1 + $0xc60] ss:$52 sps:$4 sm:$0xff]  }
 0x2e0   :  { %6235 = vmatpush1.bf16.msra.mxu1 %v15563_v34  ;;  %6195 = vmatprep.subr.bf16.mxu0 %v15568_v37  ;;  %v1023_v34 = vrot.slane %v985_v24, %v17621_v52  ;;  %v1027_v37 = vrot.slane %v985_v24, %v17630_v55  ;;  %v15641_v24 = vld [vmem:[%s21918_s1 + $0x718] ss:$52 sps:$4 sm:$0xff]  }
 0x2e1   :  { %6236 = vmatprep.subr.bf16.mxu1 %v15571_v38  ;;  %v15620_v38 = vld [vmem:[%s21918_s1 + $0x2a0] ss:$52 sps:$4 sm:$0xff]  }
 0x2e3   :  { %6196 = vmatpush2.bf16.msra.mxu0 %v15566_v40  ;;  %v15621_v40 = vld [vmem:[%s21918_s1 + $0x920] ss:$52 sps:$4 sm:$0xff]  }
 0x2e4   :  { %6237 = vmatpush2.bf16.msra.mxu1 %v15569_v10  ;;  %6197 = vmatprep.subr.bf16.mxu0 %v15574_v41 }
 0x2e5   :  { %6238 = vmatprep.subr.bf16.mxu1 %v15577_v42  ;;  %v15622_v42 = vld [vmem:[%s21918_s1 + $0x578] ss:$52 sps:$4 sm:$0xff]  }
 0x2e7   :  { %6198 = vmatpush2.bf16.msra.mxu0 %v15572_v44  ;;  %v15623_v44 = vld [vmem:[%s21918_s1 + $0xbf8] ss:$52 sps:$4 sm:$0xff]  }
 0x2e8   :  { %6239 = vmatpush2.bf16.msra.mxu1 %v15575_v46  ;;  %6199 = vmatprep.subr.bf16.mxu0 %v15580_v47 }
 0x2e9   :  { %6240 = vmatprep.subr.bf16.mxu1 %v15583_v11 }
 0x2eb   :  { %6200 = vmatpush2.bf16.msra.mxu0 %v15578_v50 }
 0x2ec   :  { %6241 = vmatpush2.bf16.msra.mxu1 %v15581_v51  ;;  %6201 = vmatprep.subr.bf16.mxu0 %v15586_v54 }
 0x2ed   :  { %6242 = vmatprep.subr.bf16.mxu1 %v15589_v20 }
 0x2ef   :  { %6202 = vmatpush2.bf16.msra.mxu0 %v15584_v59 }
 0x2f0   :  { %6243 = vmatpush2.bf16.msra.mxu1 %v15587_v60  ;;  %6203 = vmatprep.subr.bf16.mxu0 %v15592_v0  ;;  %v15624_v60 = vld [vmem:[%s21918_s1 + $0x238] ss:$52 sps:$4 sm:$0xff]  }
 0x2f1   :  { %6244 = vmatprep.subr.bf16.mxu1 %v15595_v61  ;;  %v15625_v0 = vld [vmem:[%s21918_s1 + $0x8b8] ss:$52 sps:$4 sm:$0xff]  }
 0x2f3   :  { %6204 = vmatpush2.bf16.msra.mxu0 %v15590_v63 }
 0x2f4   :  { %6245 = vmatpush2.bf16.msra.mxu1 %v15593_v9  ;;  %6205 = vmatprep.subr.bf16.mxu0 %v15598_v4  ;;  %v15628_v9 = vld [vmem:[%s21918_s1 + $0x1d0] ss:$52 sps:$4 sm:$0xff]  }
 0x2f5   :  { %6246 = vmatprep.subr.bf16.mxu1 %v15601_v6  ;;  %v15629_v4 = vld [vmem:[%s21918_s1 + $0x850] ss:$52 sps:$4 sm:$0xff]   ;;  %v15630_v6 = vld [vmem:[%s21918_s1 + $0x4a8] ss:$52 sps:$4 sm:$0xff]  }
 0x2f7   :  { %6206 = vmatpush2.bf16.msra.mxu0 %v15596_v7  ;;  %v15631_v7 = vld [vmem:[%s21918_s1 + $0xb28] ss:$52 sps:$4 sm:$0xff]  }
 0x2f8   :  { %6247 = vmatpush2.bf16.msra.mxu1 %v15599_v8  ;;  %6207 = vmatprep.subr.bf16.mxu0 %v15604_v13  ;;  %v15632_v8 = vld [vmem:[%s21918_s1 + $0x168] ss:$52 sps:$4 sm:$0xff]  }
 0x2f9   :  { %6248 = vmatprep.subr.bf16.mxu1 %v15607_v28  ;;  %v15633_v13 = vld [vmem:[%s21918_s1 + $0x7e8] ss:$52 sps:$4 sm:$0xff]   ;;  %v15634_v28 = vld [vmem:[%s21918_s1 + $0x440] ss:$52 sps:$4 sm:$0xff]  }
 0x2fb   :  { %6208 = vmatpush2.bf16.msra.mxu0 %v15602_v14  ;;  %v15635_v14 = vld [vmem:[%s21918_s1 + $0xac0] ss:$52 sps:$4 sm:$0xff]  }
 0x2fc   :  { %6249 = vmatpush2.bf16.msra.mxu1 %v15605_v15  ;;  %6209 = vmatprep.subr.bf16.mxu0 %v15610_v19  ;;  %v15636_v15 = vld [vmem:[%s21918_s1 + $0x100] ss:$52 sps:$4 sm:$0xff]  }
 0x2fd   :  { %6250 = vmatprep.subr.bf16.mxu1 %v15613_v22  ;;  %v15637_v19 = vld [vmem:[%s21918_s1 + $0x780] ss:$52 sps:$4 sm:$0xff]   ;;  %v15638_v22 = vld [vmem:[%s21918_s1 + $0x3d8] ss:$52 sps:$4 sm:$0xff]  }
 0x2ff   :  { %6210 = vmatpush2.bf16.msra.mxu0 %v15608_v36  ;;  %v15639_v36 = vld [vmem:[%s21918_s1 + $0xa58] ss:$52 sps:$4 sm:$0xff]  }
 0x300   :  { %6251 = vmatpush2.bf16.msra.mxu1 %v15611_v23  ;;  %14147 = vmatprep.subr.bf16.mxu0 %v15614_v25  ;;  %v15640_v23 = vld [vmem:[%s21918_s1 + $0x98] ss:$52 sps:$4 sm:$0xff]   ;;  %v15642_v25 = vld [vmem:[%s21918_s1 + $0x370] ss:$52 sps:$4 sm:$0xff]  }
 0x301   :  { %14169 = vmatprep.subr.bf16.mxu1 %v15615_v26  ;;  %v15643_v26 = vld [vmem:[%s21918_s1 + $0x9f0] ss:$52 sps:$4 sm:$0xff]  }
 0x302   :  { %v5967_v10 = vpop.f32.mrf.mxu0  ;;  %6212 = vmatmul.mubr.bf16.vlgmr.msra.gmra.mxu0 %v17225_v31 }
 0x303   :  { %v6008_v41 = vpop.f32.mrf.mxu1  ;;  %6253 = vmatmul.mubr.bf16.vlgmr.msra.gmra.mxu1 %v17229_v32  ;;  %v5968_v46 = vadd.f32 %v5967_v10, %v1023_v34  ;;  %14148 = vmatpush3.bf16.msra.mxu0 %v15616_v27  ;;  %v15644_v27 = vld [vmem:[%s21918_s1 + $0x30] ss:$52 sps:$4 sm:$0xff]   ;;  %v15648_v34 = vld [vmem:[%s21918_s1 + $0x1008] ss:$52 sps:$4 sm:$0xff]   ;;  %v15652_v10 = vld [vmem:[%s21918_s1 + $0xfa0] ss:$52 sps:$4 sm:$0xff]  }
 0x304   :  { %14170 = vmatpush3.bf16.msra.mxu1 %v15617_v29  ;;  %v5969_v47 = vpop.f32.mrf.mxu0  ;;  %14149 = vmatprep.subr.bf16.mxu0 %v15618_v30  ;;  %v15645_v29 = vld [vmem:[%s21918_s1 + $0x6b0] ss:$52 sps:$4 sm:$0xff]   ;;  %v15646_v30 = vld [vmem:[%s21918_s1 + $0x1348] ss:$52 sps:$4 sm:$0xff]  }
 0x305   :  { %v6010_v11 = vpop.f32.mrf.mxu1  ;;  %14171 = vmatprep.subr.bf16.mxu1 %v15619_v33  ;;  %v19301_v50 = vadd.f32 %v6008_v41, %v5968_v46  ;;  %v5970_v51 = vadd.f32 %v5969_v47, %v1027_v37  ;;  %6293 = vmatprep.mubr.bf16.mxu0 %v16955_v62  ;;  %v15626_v62 = vld [vmem:[%s21918_s1 + $0x510] ss:$52 sps:$4 sm:$0xff]   ;;  %v15647_v33 = vld [vmem:[%s21918_s1 + $0x19c8] ss:$52 sps:$4 sm:$0xff]   ;;  %v15653_v41 = vld [vmem:[%s21918_s1 + $0x1620] ss:$52 sps:$4 sm:$0xff]  }
 0x306   :  { %6333 = vmatprep.mubr.bf16.mxu1 %v16966_v3  ;;  %v5971_v54 = vpop.f32.mrf.mxu0  ;;  %v15627_v3 = vld [vmem:[%s21918_s1 + $0xb90] ss:$52 sps:$4 sm:$0xff]   ;;  %v15649_v37 = vld [vmem:[%s21918_s1 + $0x1688] ss:$52 sps:$4 sm:$0xff]   ;;  %v15656_v46 = vld [vmem:[%s21918_s1 + $0xf38] ss:$52 sps:$4 sm:$0xff]  }
 0x307   :  { %v6012_v20 = vpop.f32.mrf.mxu1  ;;  %v19305_v59 = vadd.f32 %v6010_v11, %v5970_v51  ;;  %14150 = vmatpush3.bf16.msra.mxu0 %v15620_v38  ;;  %v15650_v38 = vld [vmem:[%s21918_s1 + $0x12e0] ss:$52 sps:$4 sm:$0xff]   ;;  %v15659_v47 = vld [vmem:[%s21918_s1 + $0x1890] ss:$52 sps:$4 sm:$0xff]   ;;  %v15663_v51 = vld [vmem:[%s21918_s1 + $0x1828] ss:$52 sps:$4 sm:$0xff]  }
 0x308   :  { %14172 = vmatpush3.bf16.msra.mxu1 %v15621_v40  ;;  %v5972_v61 = vpop.f32.mrf.mxu0  ;;  %14151 = vmatprep.subr.bf16.mxu0 %v15622_v42  ;;  %v15651_v40 = vld [vmem:[%s21918_s1 + $0x1960] ss:$52 sps:$4 sm:$0xff]   ;;  %v15654_v42 = vld [vmem:[%s21918_s1 + $0x1278] ss:$52 sps:$4 sm:$0xff]   ;;  %v15660_v11 = vld [vmem:[%s21918_s1 + $0xed0] ss:$52 sps:$4 sm:$0xff]  }
 0x309   :  { %v6013_v63 = vpop.f32.mrf.mxu1  ;;  %14173 = vmatprep.subr.bf16.mxu1 %v15623_v44  ;;  %v15655_v44 = vld [vmem:[%s21918_s1 + $0x18f8] ss:$52 sps:$4 sm:$0xff]   ;;  %v15664_v54 = vld [vmem:[%s21918_s1 + $0xe68] ss:$52 sps:$4 sm:$0xff]   ;;  %v15668_v61 = vld [vmem:[%s21918_s1 + $0xe00] ss:$52 sps:$4 sm:$0xff]  }
 0x30a   :  { %v15665_v20 = vld [vmem:[%s21918_s1 + $0x14e8] ss:$52 sps:$4 sm:$0xff]   ;;  %v15669_v63 = vld [vmem:[%s21918_s1 + $0x1480] ss:$52 sps:$4 sm:$0xff]  }
 0x30b   :  { %14152 = vmatpush3.bf16.msra.mxu0 %v15624_v60  ;;  %v15666_v60 = vld [vmem:[%s21918_s1 + $0x1140] ss:$52 sps:$4 sm:$0xff]  }
 0x30c   :  { %14174 = vmatpush3.bf16.msra.mxu1 %v15625_v0  ;;  %14153 = vmatprep.subr.bf16.mxu0 %v15626_v62  ;;  %v15667_v0 = vld [vmem:[%s21918_s1 + $0x17c0] ss:$52 sps:$4 sm:$0xff]   ;;  %v15670_v62 = vld [vmem:[%s21918_s1 + $0x10d8] ss:$52 sps:$4 sm:$0xff]  }
 0x30d   :  { %14175 = vmatprep.subr.bf16.mxu1 %v15627_v3  ;;  %v15671_v3 = vld [vmem:[%s21918_s1 + $0x1758] ss:$52 sps:$4 sm:$0xff]  }
 0x30f   :  { %14154 = vmatpush3.bf16.msra.mxu0 %v15628_v9  ;;  %v15672_v9 = vld [vmem:[%s21918_s1 + $0xd98] ss:$52 sps:$4 sm:$0xff]  }
 0x310   :  { %14176 = vmatpush3.bf16.msra.mxu1 %v15629_v4  ;;  %14155 = vmatprep.subr.bf16.mxu0 %v15630_v6  ;;  %v15673_v4 = vld [vmem:[%s21918_s1 + $0x1418] ss:$52 sps:$4 sm:$0xff]   ;;  %v15674_v6 = vld [vmem:[%s21918_s1 + $0x1070] ss:$52 sps:$4 sm:$0xff]  }
 0x311   :  { %14177 = vmatprep.subr.bf16.mxu1 %v15631_v7  ;;  %v15675_v7 = vld [vmem:[%s21918_s1 + $0x16f0] ss:$52 sps:$4 sm:$0xff]  }
 0x313   :  { %14156 = vmatpush3.bf16.msra.mxu0 %v15632_v8  ;;  %v15676_v8 = vld [vmem:[%s21918_s1 + $0xd30] ss:$52 sps:$4 sm:$0xff]  }
 0x314   :  { %14178 = vmatpush3.bf16.msra.mxu1 %v15633_v13  ;;  %14157 = vmatprep.subr.bf16.mxu0 %v15634_v28  ;;  %v15677_v13 = vld [vmem:[%s21918_s1 + $0x13b0] ss:$52 sps:$4 sm:$0xff]   ;;  %v6422_v28 = vmax.f32 %v17872_v45, 0.0 }
 0x315   :  { %14179 = vmatprep.subr.bf16.mxu1 %v15635_v14  ;;  %v6424_v14 = vmax.f32 %v18285_v49, 0.0  ;;  %v15681_v45 = vld [vmem:[%s21920_s3 + $0x508] ss:$28 sps:$4 sm:$0xff]   ;;  %v15686_v49 = vld [vmem:[%s21920_s3 + $0x154] ss:$28 sps:$4 sm:$0xff]  }
 0x317   :  { %14158 = vmatpush3.bf16.msra.mxu0 %v15636_v15  ;;  %v15680_v15 = vld [vmem:[%s21920_s3 + $0x18c] ss:$28 sps:$4 sm:$0xff]  }
 0x318   :  { %14180 = vmatpush3.bf16.msra.mxu1 %v15637_v19  ;;  %14159 = vmatprep.subr.bf16.mxu0 %v15638_v22  ;;  %v15683_v19 = vld [vmem:[%s21920_s3 + $0x50c] ss:$28 sps:$4 sm:$0xff]  }
 0x319   :  { %14181 = vmatprep.subr.bf16.mxu1 %v15639_v36  ;;  %v15678_v22 = vld [vmem:[%s21920_s3 + $0x188] ss:$28 sps:$4 sm:$0xff]   ;;  %v15689_v36 = vld [vmem:[%s21920_s3 + $0x4d4] ss:$28 sps:$4 sm:$0xff]  }
 0x31b   :  { %14160 = vmatpush3.bf16.msra.mxu0 %v15640_v23  ;;  %v19493_v23 = vpack.c.bf16 %v6422_v28, %v6422_v28  ;;  %v15731_v28 = vld [vmem:[%s21920_s3 + $0x6cc] ss:$28 sps:$4 sm:$0xff]  }
 0x31c   :  { %14182 = vmatpush3.bf16.msra.mxu1 %v15641_v24  ;;  %14161 = vmatprep.subr.bf16.mxu0 %v15642_v25  ;;  %v19495_v24 = vpack.c.bf16 %v6424_v14, %v6424_v14  ;;  %v15729_v14 = vld [vmem:[%s21920_s3 + $0x6c8] ss:$28 sps:$4 sm:$0xff]  }
 0x31d   :  { %14183 = vmatprep.subr.bf16.mxu1 %v15643_v26 }
 0x31f   :  { %14162 = vmatpush3.bf16.msra.mxu0 %v15644_v27  ;;  %v15684_v27 = vld [vmem:[%s21920_s3 + $0x150] ss:$28 sps:$4 sm:$0xff]  }
 0x320   :  { %14184 = vmatpush3.bf16.msra.mxu1 %v15645_v29  ;;  %14191 = vmatprep.subr.bf16.mxu0 %v15646_v30  ;;  %v15687_v29 = vld [vmem:[%s21920_s3 + $0x4d0] ss:$28 sps:$4 sm:$0xff]  }
 0x321   :  { %14213 = vmatprep.subr.bf16.mxu1 %v15647_v33  ;;  %v15692_v33 = vld [vmem:[%s21920_s3 + $0x11c] ss:$28 sps:$4 sm:$0xff]  }
 0x322   :  { %6294 = vmatmul.mubr.bf16.vlgmr.msra.gmra.mxu0 %v17006_v16  ;;  %v15657_v16 = vld [vmem:[%s21918_s1 + $0x15b8] ss:$52 sps:$4 sm:$0xff]  }
 0x323   :  { %6334 = vmatmul.mubr.bf16.vlgmr.msra.gmra.mxu1 %v17008_v17  ;;  %14192 = vmatpush3.bf16.msra.mxu0 %v15648_v34  ;;  %v15658_v17 = vld [vmem:[%s21918_s1 + $0x1210] ss:$52 sps:$4 sm:$0xff]  }
 0x324   :  { %14214 = vmatpush3.bf16.msra.mxu1 %v15649_v37  ;;  %14193 = vmatprep.subr.bf16.mxu0 %v15650_v38 }
 0x325   :  { %14215 = vmatprep.subr.bf16.mxu1 %v15651_v40  ;;  %6373 = vmatprep.mubr.bf16.mxu0 %v17107_v53  ;;  %v15661_v53 = vld [vmem:[%s21918_s1 + $0x1550] ss:$52 sps:$4 sm:$0xff]  }
 0x326   :  { %6413 = vmatprep.mubr.bf16.mxu1 %v17117_v56  ;;  %v15662_v56 = vld [vmem:[%s21918_s1 + $0x11a8] ss:$52 sps:$4 sm:$0xff]  }
 0x327   :  { %14194 = vmatpush3.bf16.msra.mxu0 %v15652_v10 }
 0x328   :  { %14216 = vmatpush3.bf16.msra.mxu1 %v15653_v41  ;;  %14195 = vmatprep.subr.bf16.mxu0 %v15654_v42  ;;  %v15690_v41 = vld [vmem:[%s21920_s3 + $0x118] ss:$28 sps:$4 sm:$0xff]  }
 0x329   :  { %14217 = vmatprep.subr.bf16.mxu1 %v15655_v44  ;;  %v15693_v42 = vld [vmem:[%s21920_s3 + $0x498] ss:$28 sps:$4 sm:$0xff]   ;;  %v15698_v44 = vld [vmem:[%s21920_s3 + $0xe4] ss:$28 sps:$4 sm:$0xff]  }
 0x32b   :  { %14196 = vmatpush3.bf16.msra.mxu0 %v15656_v46 }
 0x32c   :  { %14218 = vmatpush3.bf16.msra.mxu1 %v15657_v16  ;;  %14197 = vmatprep.subr.bf16.mxu0 %v15658_v17  ;;  %v15701_v16 = vld [vmem:[%s21920_s3 + $0x464] ss:$28 sps:$4 sm:$0xff]  }
 0x32d   :  { %14219 = vmatprep.subr.bf16.mxu1 %v15659_v47  ;;  %v15696_v17 = vld [vmem:[%s21920_s3 + $0xe0] ss:$28 sps:$4 sm:$0xff]  }
 0x32e   :  { %v15699_v47 = vld [vmem:[%s21920_s3 + $0x460] ss:$28 sps:$4 sm:$0xff]  }
 0x32f   :  { %14198 = vmatpush3.bf16.msra.mxu0 %v15660_v11  ;;  %v15704_v11 = vld [vmem:[%s21920_s3 + $0xac] ss:$28 sps:$4 sm:$0xff]  }
 0x330   :  { %14220 = vmatpush3.bf16.msra.mxu1 %v15661_v53  ;;  %14199 = vmatprep.subr.bf16.mxu0 %v15662_v56  ;;  %v15707_v53 = vld [vmem:[%s21920_s3 + $0x42c] ss:$28 sps:$4 sm:$0xff]  }
 0x331   :  { %14221 = vmatprep.subr.bf16.mxu1 %v15663_v51  ;;  %v15702_v56 = vld [vmem:[%s21920_s3 + $0xa8] ss:$28 sps:$4 sm:$0xff]  }
 0x332   :  { %v15705_v51 = vld [vmem:[%s21920_s3 + $0x428] ss:$28 sps:$4 sm:$0xff]  }
 0x333   :  { %14200 = vmatpush3.bf16.msra.mxu0 %v15664_v54  ;;  %v15710_v54 = vld [vmem:[%s21920_s3 + $0x74] ss:$28 sps:$4 sm:$0xff]  }
 0x334   :  { %14222 = vmatpush3.bf16.msra.mxu1 %v15665_v20  ;;  %14201 = vmatprep.subr.bf16.mxu0 %v15666_v60  ;;  %v15708_v20 = vld [vmem:[%s21920_s3 + $0x70] ss:$28 sps:$4 sm:$0xff]  }
 0x335   :  { %14223 = vmatprep.subr.bf16.mxu1 %v15667_v0  ;;  %v15713_v60 = vld [vmem:[%s21920_s3 + $0x3f4] ss:$28 sps:$4 sm:$0xff]  }
 0x336   :  { %v15711_v0 = vld [vmem:[%s21920_s3 + $0x3f0] ss:$28 sps:$4 sm:$0xff]  }
 0x337   :  { %14202 = vmatpush3.bf16.msra.mxu0 %v15668_v61  ;;  %v15716_v61 = vld [vmem:[%s21920_s3 + $0x3c] ss:$28 sps:$4 sm:$0xff]  }
 0x338   :  { %14224 = vmatpush3.bf16.msra.mxu1 %v15669_v63  ;;  %14203 = vmatprep.subr.bf16.mxu0 %v15670_v62  ;;  %v15714_v63 = vld [vmem:[%s21920_s3 + $0x38] ss:$28 sps:$4 sm:$0xff]  }
 0x339   :  { %14225 = vmatprep.subr.bf16.mxu1 %v15671_v3  ;;  %v15719_v62 = vld [vmem:[%s21920_s3 + $0x3bc] ss:$28 sps:$4 sm:$0xff]  }
 0x33a   :  { %v15717_v3 = vld [vmem:[%s21920_s3 + $0x3b8] ss:$28 sps:$4 sm:$0xff]  }
 0x33b   :  { %14204 = vmatpush3.bf16.msra.mxu0 %v15672_v9  ;;  %v15722_v9 = vld [vmem:[%s21920_s3 + $0x4] ss:$28 sps:$4 sm:$0xff]  }
 0x33c   :  { %14226 = vmatpush3.bf16.msra.mxu1 %v15673_v4  ;;  %14205 = vmatprep.subr.bf16.mxu0 %v15674_v6  ;;  %v15720_v4 = vld [vmem:[%s21920_s3] ss:$28 sps:$4 sm:$0xff]  }
 0x33d   :  { %14227 = vmatprep.subr.bf16.mxu1 %v15675_v7  ;;  %v15725_v6 = vld [vmem:[%s21920_s3 + $0x384] ss:$28 sps:$4 sm:$0xff]  }
 0x33e   :  { %v15723_v7 = vld [vmem:[%s21920_s3 + $0x380] ss:$28 sps:$4 sm:$0xff]  }
 0x33f   :  { %14206 = vmatpush3.bf16.msra.mxu0 %v15676_v8  ;;  %v15728_v8 = vld [vmem:[%s21920_s3 + $0x34c] ss:$28 sps:$4 sm:$0xff]  }
 0x340   :  { %14228 = vmatpush3.bf16.msra.mxu1 %v15677_v13  ;;  %10800 = vmatprep.subr.bf16.mxu0 %v15680_v15  ;;  %v15726_v13 = vld [vmem:[%s21920_s3 + $0x348] ss:$28 sps:$4 sm:$0xff]   ;;  %v15734_v15 = vld [vmem:[%s21920_s3 + $0x314] ss:$28 sps:$4 sm:$0xff]  }
 0x341   :  { %10841 = vmatprep.subr.bf16.mxu1 %v15683_v19  ;;  %v15737_v19 = vld [vmem:[%s21920_s3 + $0x694] ss:$28 sps:$4 sm:$0xff]  }
 0x342   :  { %v6049_v25 = vpop.f32.mrf.mxu0  ;;  %6374 = vmatmul.mubr.bf16.vlgmr.msra.gmra.mxu0 %v17225_v31  ;;  %v15695_v31 = vld [vmem:[%s21920_s3 + $0x49c] ss:$28 sps:$4 sm:$0xff]  }
 0x343   :  { %v6090_v26 = vpop.f32.mrf.mxu1  ;;  %6414 = vmatmul.mubr.bf16.vlgmr.msra.gmra.mxu1 %v17229_v32  ;;  %v6050_v30 = vadd.f32 %v6049_v25, %v19301_v50  ;;  %10801 = vmatpush1.bf16.msra.mxu0 %v15678_v22  ;;  %v15732_v22 = vld [vmem:[%s21920_s3 + $0x310] ss:$28 sps:$4 sm:$0xff]   ;;  %v15738_v25 = vld [vmem:[%s21920_s3 + $0x2d8] ss:$28 sps:$4 sm:$0xff]  }
 0x344   :  { %10832 = vmatprep.mubr.bf16.mxu0 %v19493_v23  ;;  %10842 = vmatpush1.bf16.msra.mxu1 %v15681_v45  ;;  %v6051_v32 = vpop.f32.mrf.mxu0  ;;  %v15735_v45 = vld [vmem:[%s21920_s3 + $0x690] ss:$28 sps:$4 sm:$0xff]  }
 0x345   :  { %10873 = vmatprep.mubr.bf16.mxu1 %v19495_v24  ;;  %v6092_v34 = vpop.f32.mrf.mxu1  ;;  %v19514_v37 = vadd.f32 %v6090_v26, %v6050_v30  ;;  %v6052_v50 = vadd.f32 %v6051_v32, %v19305_v59  ;;  %10802 = vmatprep.subr.bf16.mxu0 %v15686_v49  ;;  %v15740_v49 = vld [vmem:[%s21920_s3 + $0x2dc] ss:$28 sps:$4 sm:$0xff]   ;;  %v15750_v32 = vld [vmem:[%s21920_s3 + $0x268] ss:$28 sps:$4 sm:$0xff]  }
 0x346   :  { %10843 = vmatprep.subr.bf16.mxu1 %v15689_v36  ;;  %v6053_v38 = vpop.f32.mrf.mxu0  ;;  %v15743_v36 = vld [vmem:[%s21920_s3 + $0x65c] ss:$28 sps:$4 sm:$0xff]  }
 0x347   :  { %v6094_v40 = vpop.f32.mrf.mxu1  ;;  %v19517_v10 = vadd.f32 %v6092_v34, %v6052_v50  ;;  %10803 = vmatpush1.bf16.msra.mxu0 %v15684_v27  ;;  %v15741_v26 = vld [vmem:[%s21920_s3 + $0x658] ss:$28 sps:$4 sm:$0xff]   ;;  %v15746_v27 = vld [vmem:[%s21920_s3 + $0x2a4] ss:$28 sps:$4 sm:$0xff]   ;;  %v15755_v34 = vld [vmem:[%s21920_s3 + $0x5ec] ss:$28 sps:$4 sm:$0xff]  }
 0x348   :  { %10844 = vmatpush1.bf16.msra.mxu1 %v15687_v29  ;;  %v6054_v59 = vpop.f32.mrf.mxu0  ;;  %10804 = vmatprep.subr.bf16.mxu0 %v15692_v33  ;;  %v15749_v29 = vld [vmem:[%s21920_s3 + $0x624] ss:$28 sps:$4 sm:$0xff]   ;;  %v15758_v38 = vld [vmem:[%s21920_s3 + $0x234] ss:$28 sps:$4 sm:$0xff]  }
 0x349   :  { %v6095_v46 = vpop.f32.mrf.mxu1  ;;  %10845 = vmatprep.subr.bf16.mxu1 %v15695_v31  ;;  %v15744_v30 = vld [vmem:[%s21920_s3 + $0x2a0] ss:$28 sps:$4 sm:$0xff]   ;;  %v15752_v31 = vld [vmem:[%s21920_s3 + $0x26c] ss:$28 sps:$4 sm:$0xff]  }
 0x34a   :  { %v15747_v33 = vld [vmem:[%s21920_s3 + $0x620] ss:$28 sps:$4 sm:$0xff]   ;;  %v15753_v50 = vld [vmem:[%s21920_s3 + $0x5e8] ss:$28 sps:$4 sm:$0xff]   ;;  %v15756_v40 = vld [vmem:[%s21920_s3 + $0x230] ss:$28 sps:$4 sm:$0xff]  }
 0x34b   :  { %10805 = vmatpush1.bf16.msra.mxu0 %v15690_v41  ;;  %v15761_v41 = vld [vmem:[%s21920_s3 + $0x5b4] ss:$28 sps:$4 sm:$0xff]   ;;  %v15764_v46 = vld [vmem:[%s21920_s3 + $0x1fc] ss:$28 sps:$4 sm:$0xff]  }
 0x34c   :  { %10846 = vmatpush1.bf16.msra.mxu1 %v15693_v42  ;;  %10806 = vmatprep.subr.bf16.mxu0 %v15698_v44  ;;  %v6421_v42 = vmax.f32 %v17861_v39, 0.0  ;;  %v6423_v44 = vmax.f32 %v18274_v18, 0.0  ;;  %v15759_v59 = vld [vmem:[%s21920_s3 + $0x5b0] ss:$28 sps:$4 sm:$0xff]   ;;  %v15767_v39 = vld [vmem:[%s21920_s3 + $0x57c] ss:$28 sps:$4 sm:$0xff]  }
 0x34d   :  { %10847 = vmatprep.subr.bf16.mxu1 %v15701_v16  ;;  %v15762_v16 = vld [vmem:[%s21920_s3 + $0x1f8] ss:$28 sps:$4 sm:$0xff]   ;;  %v6426_v18 = vmax.f32 %v18697_v21, 0.0  ;;  %v15773_v21 = vld [vmem:[%s21920_s3 + $0x544] ss:$28 sps:$4 sm:$0xff]  }
 0x34f   :  { %10807 = vmatpush1.bf16.msra.mxu0 %v15696_v17  ;;  %v6428_v17 = vmax.f32 %v19112_v2, 0.0  ;;  %v15771_v2 = vld [vmem:[%s21920_s3 + $0x540] ss:$28 sps:$4 sm:$0xff]  }
 0x350   :  { %10848 = vmatpush1.bf16.msra.mxu1 %v15699_v47  ;;  %10808 = vmatprep.subr.bf16.mxu0 %v15704_v11  ;;  %v15765_v47 = vld [vmem:[%s21920_s3 + $0x578] ss:$28 sps:$4 sm:$0xff]   ;;  %v15770_v11 = vld [vmem:[%s21920_s3 + $0x1c4] ss:$28 sps:$4 sm:$0xff]  }
 0x351   :  { %10849 = vmatprep.subr.bf16.mxu1 %v15707_v53  ;;  %v15768_v53 = vld [vmem:[%s21920_s3 + $0x1c0] ss:$28 sps:$4 sm:$0xff]  }
 0x353   :  { %10809 = vmatpush1.bf16.msra.mxu0 %v15702_v56  ;;  %v15776_v56 = vld [vmem:[%s21920_s3 + $0x88c] ss:$28 sps:$4 sm:$0xff]  }
 0x354   :  { %10850 = vmatpush1.bf16.msra.mxu1 %v15705_v51  ;;  %10810 = vmatprep.subr.bf16.mxu0 %v15710_v54  ;;  %v15779_v51 = vld [vmem:[%s21920_s3 + $0xc0c] ss:$28 sps:$4 sm:$0xff]  }
 0x355   :  { %10851 = vmatprep.subr.bf16.mxu1 %v15713_v60  ;;  %v15774_v54 = vld [vmem:[%s21920_s3 + $0x888] ss:$28 sps:$4 sm:$0xff]  }
 0x356   :  { %v19700_v60 = vld [vmem:[%s21919_s2 + $0x8] sm:$0x1f] }
 0x357   :  { %10811 = vmatpush1.bf16.msra.mxu0 %v15708_v20  ;;  %v15777_v20 = vld [vmem:[%s21920_s3 + $0xc08] ss:$28 sps:$4 sm:$0xff]  }
 0x358   :  { %10852 = vmatpush1.bf16.msra.mxu1 %v15711_v0  ;;  %10812 = vmatprep.subr.bf16.mxu0 %v15716_v61  ;;  %v1031_v0 = vrot.slane %v19700_v60, %v18031_v48  ;;  %v15782_v61 = vld [vmem:[%s21920_s3 + $0x854] ss:$28 sps:$4 sm:$0xff]  }
 0x359   :  { %10853 = vmatprep.subr.bf16.mxu1 %v15719_v62  ;;  %v15785_v62 = vld [vmem:[%s21920_s3 + $0xbd4] ss:$28 sps:$4 sm:$0xff]  }
 0x35b   :  { %10813 = vmatpush1.bf16.msra.mxu0 %v15714_v63  ;;  %v19707_v63 = vpack.c.bf16 %v6421_v42, %v6421_v42  ;;  %v15804_v42 = vld [vmem:[%s21920_s3 + $0x770] ss:$28 sps:$4 sm:$0xff]  }
 0x35c   :  { %10854 = vmatpush1.bf16.msra.mxu1 %v15717_v3  ;;  %10814 = vmatprep.subr.bf16.mxu0 %v15722_v9  ;;  %v19712_v3 = vpack.c.bf16 %v6423_v44, %v6423_v44  ;;  %v15780_v9 = vld [vmem:[%s21920_s3 + $0x850] ss:$28 sps:$4 sm:$0xff]  }
 0x35d   :  { %10855 = vmatprep.subr.bf16.mxu1 %v15725_v6  ;;  %v15809_v44 = vld [vmem:[%s21920_s3 + $0xaf4] ss:$28 sps:$4 sm:$0xff]  }
 0x35f   :  { %10815 = vmatpush1.bf16.msra.mxu0 %v15720_v4  ;;  %v19717_v4 = vpack.c.bf16 %v6426_v18, %v6426_v18  ;;  %v15813_v18 = vld [vmem:[%s21920_s3 + $0xab8] ss:$28 sps:$4 sm:$0xff]  }
 0x360   :  { %10856 = vmatpush1.bf16.msra.mxu1 %v15723_v7  ;;  %10816 = vmatprep.subr.bf16.mxu0 %v15728_v8  ;;  %v15783_v8 = vld [vmem:[%s21920_s3 + $0xbd0] ss:$28 sps:$4 sm:$0xff]  }
 0x361   :  { %10857 = vmatprep.subr.bf16.mxu1 %v15731_v28  ;;  %v19726_v28 = vpack.c.bf16 %v6428_v17, %v6428_v17  ;;  %v15818_v17 = vld [vmem:[%s21920_s3 + $0x704] ss:$28 sps:$4 sm:$0xff]  }
 0x363   :  { %10817 = vmatpush2.bf16.msra.mxu0 %v15726_v13  ;;  %v15788_v13 = vld [vmem:[%s21920_s3 + $0x81c] ss:$28 sps:$4 sm:$0xff]  }
 0x364   :  { %10858 = vmatpush2.bf16.msra.mxu1 %v15729_v14  ;;  %10818 = vmatprep.subr.bf16.mxu0 %v15734_v15  ;;  %v15791_v15 = vld [vmem:[%s21920_s3 + $0xb9c] ss:$28 sps:$4 sm:$0xff]  }
 0x365   :  { %10859 = vmatprep.subr.bf16.mxu1 %v15737_v19 }
 0x367   :  { %10819 = vmatpush2.bf16.msra.mxu0 %v15732_v22 }
 0x368   :  { %10860 = vmatpush2.bf16.msra.mxu1 %v15735_v45  ;;  %10820 = vmatprep.subr.bf16.mxu0 %v15740_v49 }
 0x369   :  { %10861 = vmatprep.subr.bf16.mxu1 %v15743_v36 }
 0x36b   :  { %10821 = vmatpush2.bf16.msra.mxu0 %v15738_v25  ;;  %v15786_v25 = vld [vmem:[%s21920_s3 + $0x818] ss:$28 sps:$4 sm:$0xff]  }
 0x36c   :  { %10862 = vmatpush2.bf16.msra.mxu1 %v15741_v26  ;;  %10822 = vmatprep.subr.bf16.mxu0 %v15746_v27  ;;  %v15789_v26 = vld [vmem:[%s21920_s3 + $0xb98] ss:$28 sps:$4 sm:$0xff]   ;;  %v15794_v27 = vld [vmem:[%s21920_s3 + $0x7e4] ss:$28 sps:$4 sm:$0xff]  }
 0x36d   :  { %10863 = vmatprep.subr.bf16.mxu1 %v15749_v29  ;;  %v15797_v29 = vld [vmem:[%s21920_s3 + $0xb64] ss:$28 sps:$4 sm:$0xff]  }
 0x36f   :  { %10823 = vmatpush2.bf16.msra.mxu0 %v15744_v30 }
 0x370   :  { %10864 = vmatpush2.bf16.msra.mxu1 %v15747_v33  ;;  %10824 = vmatprep.subr.bf16.mxu0 %v15752_v31  ;;  %v15792_v31 = vld [vmem:[%s21920_s3 + $0x7e0] ss:$28 sps:$4 sm:$0xff]  }
 0x371   :  { %10865 = vmatprep.subr.bf16.mxu1 %v15755_v34  ;;  %v15800_v34 = vld [vmem:[%s21920_s3 + $0x7ac] ss:$28 sps:$4 sm:$0xff]  }
 0x373   :  { %10825 = vmatpush2.bf16.msra.mxu0 %v15750_v32  ;;  %v15795_v32 = vld [vmem:[%s21920_s3 + $0xb60] ss:$28 sps:$4 sm:$0xff]  }
 0x374   :  { %10866 = vmatpush2.bf16.msra.mxu1 %v15753_v50  ;;  %10826 = vmatprep.subr.bf16.mxu0 %v15758_v38  ;;  %v15803_v50 = vld [vmem:[%s21920_s3 + $0xb2c] ss:$28 sps:$4 sm:$0xff]  }
 0x375   :  { %10867 = vmatprep.subr.bf16.mxu1 %v15761_v41  ;;  %v15798_v38 = vld [vmem:[%s21920_s3 + $0x7a8] ss:$28 sps:$4 sm:$0xff]   ;;  %v15806_v41 = vld [vmem:[%s21920_s3 + $0x774] ss:$28 sps:$4 sm:$0xff]  }
 0x377   :  { %10827 = vmatpush2.bf16.msra.mxu0 %v15756_v40  ;;  %v15801_v40 = vld [vmem:[%s21920_s3 + $0xb28] ss:$28 sps:$4 sm:$0xff]  }
 0x378   :  { %10868 = vmatpush2.bf16.msra.mxu1 %v15759_v59  ;;  %10828 = vmatprep.subr.bf16.mxu0 %v15764_v46  ;;  %v15807_v59 = vld [vmem:[%s21920_s3 + $0xaf0] ss:$28 sps:$4 sm:$0xff]   ;;  %v15812_v46 = vld [vmem:[%s21920_s3 + $0x73c] ss:$28 sps:$4 sm:$0xff]  }
 0x379   :  { %10869 = vmatprep.subr.bf16.mxu1 %v15767_v39  ;;  %v15815_v39 = vld [vmem:[%s21920_s3 + $0xabc] ss:$28 sps:$4 sm:$0xff]  }
 0x37b   :  { %10829 = vmatpush2.bf16.msra.mxu0 %v15762_v16  ;;  %v15810_v16 = vld [vmem:[%s21920_s3 + $0x738] ss:$28 sps:$4 sm:$0xff]  }
 0x37c   :  { %10870 = vmatpush2.bf16.msra.mxu1 %v15765_v47  ;;  %10830 = vmatprep.subr.bf16.mxu0 %v15770_v11  ;;  %v15816_v47 = vld [vmem:[%s21920_s3 + $0x700] ss:$28 sps:$4 sm:$0xff]  }
 0x37d   :  { %10871 = vmatprep.subr.bf16.mxu1 %v15773_v21  ;;  %v15821_v11 = vld [vmem:[%s21920_s3 + $0xa84] ss:$28 sps:$4 sm:$0xff]   ;;  %v15824_v21 = vld [vmem:[%s21920_s3 + $0xa4c] ss:$28 sps:$4 sm:$0xff]  }
 0x37f   :  { %10831 = vmatpush2.bf16.msra.mxu0 %v15768_v53  ;;  %v15819_v53 = vld [vmem:[%s21920_s3 + $0xa80] ss:$28 sps:$4 sm:$0xff]  }
 0x380   :  { %10872 = vmatpush2.bf16.msra.mxu1 %v15771_v2  ;;  %10882 = vmatprep.subr.bf16.mxu0 %v15776_v56  ;;  %v15822_v2 = vld [vmem:[%s21920_s3 + $0xa48] ss:$28 sps:$4 sm:$0xff]  }
 0x381   :  { %10923 = vmatprep.subr.bf16.mxu1 %v15779_v51  ;;  %v15827_v56 = vld [vmem:[%s21920_s3 + $0xdcc] ss:$28 sps:$4 sm:$0xff]  }
 0x382   :  { %v6131_v6 = vpop.f32.mrf.mxu0  ;;  %10833 = vmatmul.mubr.bf16.vlgmr.msra.gmra.mxu0 %v19707_v63  ;;  %v15825_v51 = vld [vmem:[%s21920_s3 + $0xdc8] ss:$28 sps:$4 sm:$0xff]  }
 0x383   :  { %v6172_v7 = vpop.f32.mrf.mxu1  ;;  %v6132_v14 = vadd.f32 %v6131_v6, %v1031_v0  ;;  %10874 = vmatmul.mubr.bf16.vlgmr.msra.gmra.mxu1 %v19712_v3  ;;  %10883 = vmatpush1.bf16.msra.mxu0 %v15774_v54  ;;  %v15830_v54 = vld [vmem:[%s21920_s3 + $0xa14] ss:$28 sps:$4 sm:$0xff]   ;;  %v15839_v6 = vld [vmem:[%s21920_s3 + $0xd5c] ss:$28 sps:$4 sm:$0xff]  }
 0x384   :  { %10914 = vmatprep.mubr.bf16.mxu0 %v19717_v4  ;;  %10924 = vmatpush1.bf16.msra.mxu1 %v15777_v20  ;;  %v19733_v19 = vpop.f32.mrf.mxu0  ;;  %v15828_v20 = vld [vmem:[%s21920_s3 + $0xa10] ss:$28 sps:$4 sm:$0xff]  }
 0x385   :  { %v19735_v22 = vpop.f32.mrf.mxu1  ;;  %v19737_v45 = vadd.f32 %v6172_v7, %v6132_v14  ;;  %10955 = vmatprep.mubr.bf16.mxu1 %v19726_v28  ;;  %10884 = vmatprep.subr.bf16.mxu0 %v15782_v61  ;;  %v15833_v0 = vld [vmem:[%s21920_s3 + $0xd94] ss:$28 sps:$4 sm:$0xff]   ;;  %v15845_v14 = vld [vmem:[%s21920_s3 + $0xd24] ss:$28 sps:$4 sm:$0xff]  }
 0x386   :  { %v6135_v49 = vpop.f32.mrf.mxu0  ;;  %10925 = vmatprep.subr.bf16.mxu1 %v15785_v62  ;;  %v15831_v61 = vld [vmem:[%s21920_s3 + $0xd90] ss:$28 sps:$4 sm:$0xff]   ;;  %v15836_v62 = vld [vmem:[%s21920_s3 + $0x9dc] ss:$28 sps:$4 sm:$0xff]  }
 0x387   :  { %v6176_v36 = vpop.f32.mrf.mxu1  ;;  %10885 = vmatpush1.bf16.msra.mxu0 %v15780_v9  ;;  %v15834_v9 = vld [vmem:[%s21920_s3 + $0x9d8] ss:$28 sps:$4 sm:$0xff]   ;;  %v15848_v49 = vld [vmem:[%s21920_s3 + $0x96c] ss:$28 sps:$4 sm:$0xff]  }
 0x388   :  { %10926 = vmatpush1.bf16.msra.mxu1 %v15783_v8  ;;  %v6136_v30 = vpop.f32.mrf.mxu0  ;;  %10886 = vmatprep.subr.bf16.mxu0 %v15788_v13  ;;  %v15837_v7 = vld [vmem:[%s21920_s3 + $0xd58] ss:$28 sps:$4 sm:$0xff]   ;;  %v15842_v8 = vld [vmem:[%s21920_s3 + $0x9a4] ss:$28 sps:$4 sm:$0xff]  }
 0x389   :  { %v6177_v33 = vpop.f32.mrf.mxu1  ;;  %10927 = vmatprep.subr.bf16.mxu1 %v15791_v15  ;;  %v15840_v13 = vld [vmem:[%s21920_s3 + $0x9a0] ss:$28 sps:$4 sm:$0xff]   ;;  %v15846_v36 = vld [vmem:[%s21920_s3 + $0x968] ss:$28 sps:$4 sm:$0xff]   ;;  %v15857_v30 = vld [vmem:[%s21920_s3 + $0xcb4] ss:$28 sps:$4 sm:$0xff]  }
 0x38a   :  { %v15843_v15 = vld [vmem:[%s21920_s3 + $0xd20] ss:$28 sps:$4 sm:$0xff]   ;;  %v15855_v33 = vld [vmem:[%s21920_s3 + $0xcb0] ss:$28 sps:$4 sm:$0xff]  }
 0x38b   :  { %10887 = vmatpush1.bf16.msra.mxu0 %v15786_v25  ;;  %v15851_v25 = vld [vmem:[%s21920_s3 + $0xcec] ss:$28 sps:$4 sm:$0xff]  }
 0x38c   :  { %10928 = vmatpush1.bf16.msra.mxu1 %v15789_v26  ;;  %10888 = vmatprep.subr.bf16.mxu0 %v15794_v27  ;;  %v15849_v26 = vld [vmem:[%s21920_s3 + $0xce8] ss:$28 sps:$4 sm:$0xff]   ;;  %v15854_v27 = vld [vmem:[%s21920_s3 + $0x934] ss:$28 sps:$4 sm:$0xff]  }
 0x38d   :  { %10929 = vmatprep.subr.bf16.mxu1 %v15797_v29  ;;  %v15852_v29 = vld [vmem:[%s21920_s3 + $0x930] ss:$28 sps:$4 sm:$0xff]  }
 0x38f   :  { %10889 = vmatpush1.bf16.msra.mxu0 %v15792_v31  ;;  %v15860_v31 = vld [vmem:[%s21920_s3 + $0x8fc] ss:$28 sps:$4 sm:$0xff]  }
 0x390   :  { %10930 = vmatpush1.bf16.msra.mxu1 %v15795_v32  ;;  %10890 = vmatprep.subr.bf16.mxu0 %v15800_v34  ;;  %v15858_v32 = vld [vmem:[%s21920_s3 + $0x8f8] ss:$28 sps:$4 sm:$0xff]  }
 0x391   :  { %10931 = vmatprep.subr.bf16.mxu1 %v15803_v50  ;;  %v15863_v34 = vld [vmem:[%s21920_s3 + $0xc7c] ss:$28 sps:$4 sm:$0xff]  }
 0x392   :  { %v15861_v50 = vld [vmem:[%s21920_s3 + $0xc78] ss:$28 sps:$4 sm:$0xff]  }
 0x393   :  { %10891 = vmatpush1.bf16.msra.mxu0 %v15798_v38  ;;  %v15866_v38 = vld [vmem:[%s21920_s3 + $0x8c4] ss:$28 sps:$4 sm:$0xff]  }
 0x394   :  { %10932 = vmatpush1.bf16.msra.mxu1 %v15801_v40  ;;  %10892 = vmatprep.subr.bf16.mxu0 %v15806_v41  ;;  %v15869_v40 = vld [vmem:[%s21920_s3 + $0xc44] ss:$28 sps:$4 sm:$0xff]   ;;  %v1035_v41 = vrot.slane %v19700_v60, %v18046_v57 }
 0x395   :  { %10933 = vmatprep.subr.bf16.mxu1 %v15809_v44 }
 0x397   :  { %10893 = vmatpush1.bf16.msra.mxu0 %v15804_v42  ;;  %v15864_v42 = vld [vmem:[%s21920_s3 + $0x8c0] ss:$28 sps:$4 sm:$0xff]  }
 0x398   :  { %10934 = vmatpush1.bf16.msra.mxu1 %v15807_v59  ;;  %10894 = vmatprep.subr.bf16.mxu0 %v15812_v46 }
 0x399   :  { %10935 = vmatprep.subr.bf16.mxu1 %v15815_v39 }
 0x39b   :  { %10895 = vmatpush1.bf16.msra.mxu0 %v15810_v16 }
 0x39c   :  { %10936 = vmatpush1.bf16.msra.mxu1 %v15813_v18  ;;  %10896 = vmatprep.subr.bf16.mxu0 %v15818_v17 }
 0x39d   :  { %10937 = vmatprep.subr.bf16.mxu1 %v15821_v11 }
 0x39f   :  { %10897 = vmatpush1.bf16.msra.mxu0 %v15816_v47 }
 0x3a0   :  { %10938 = vmatpush1.bf16.msra.mxu1 %v15819_v53  ;;  %10898 = vmatprep.subr.bf16.mxu0 %v15824_v21 }
 0x3a1   :  { %10939 = vmatprep.subr.bf16.mxu1 %v15827_v56 }
 0x3a3   :  { %10899 = vmatpush2.bf16.msra.mxu0 %v15822_v2 }
 0x3a4   :  { %10940 = vmatpush2.bf16.msra.mxu1 %v15825_v51  ;;  %10900 = vmatprep.subr.bf16.mxu0 %v15830_v54 }
 0x3a5   :  { %10941 = vmatprep.subr.bf16.mxu1 %v15833_v0 }
 0x3a7   :  { %10901 = vmatpush2.bf16.msra.mxu0 %v15828_v20 }
 0x3a8   :  { %10942 = vmatpush2.bf16.msra.mxu1 %v15831_v61  ;;  %10902 = vmatprep.subr.bf16.mxu0 %v15836_v62 }
 0x3a9   :  { %10943 = vmatprep.subr.bf16.mxu1 %v15839_v6 }
 0x3ab   :  { %10903 = vmatpush2.bf16.msra.mxu0 %v15834_v9 }
 0x3ac   :  { %10944 = vmatpush2.bf16.msra.mxu1 %v15837_v7  ;;  %10904 = vmatprep.subr.bf16.mxu0 %v15842_v8 }
 0x3ad   :  { %10945 = vmatprep.subr.bf16.mxu1 %v15845_v14 }
 0x3af   :  { %10905 = vmatpush2.bf16.msra.mxu0 %v15840_v13 }
 0x3b0   :  { %10946 = vmatpush2.bf16.msra.mxu1 %v15843_v15  ;;  %10906 = vmatprep.subr.bf16.mxu0 %v15848_v49 }
 0x3b1   :  { %10947 = vmatprep.subr.bf16.mxu1 %v15851_v25 }
 0x3b3   :  { %10907 = vmatpush2.bf16.msra.mxu0 %v15846_v36 }
 0x3b4   :  { %10948 = vmatpush2.bf16.msra.mxu1 %v15849_v26  ;;  %10908 = vmatprep.subr.bf16.mxu0 %v15854_v27 }
 0x3b5   :  { %10949 = vmatprep.subr.bf16.mxu1 %v15857_v30 }
 0x3b7   :  { %10909 = vmatpush2.bf16.msra.mxu0 %v15852_v29 }
 0x3b8   :  { %10950 = vmatpush2.bf16.msra.mxu1 %v15855_v33  ;;  %10910 = vmatprep.subr.bf16.mxu0 %v15860_v31 }
 0x3b9   :  { %10951 = vmatprep.subr.bf16.mxu1 %v15863_v34 }
 0x3bb   :  { %10911 = vmatpush2.bf16.msra.mxu0 %v15858_v32 }
 0x3bc   :  { %14 = vsyncpa [#allocation3], 0  ;;  %v6425_v44 = vmax.f32 %v18686_v12, 0.0  ;;  %10952 = vmatpush2.bf16.msra.mxu1 %v15861_v50  ;;  %10912 = vmatprep.subr.bf16.mxu0 %v15866_v38  ;;  %v15867_v59 = vld [vmem:[%s21920_s3 + $0xc40] ss:$28 sps:$4 sm:$0xff]   ;;  %v6427_v16 = vmax.f32 %v19095_v58, 0.0  ;;  %v6134_v12 = vadd.f32 %v19733_v19, %v1035_v41 }
 0x3bd   :  { %v15872_v46 = vld [vmem:[%s21920_s3 + $0xf8c] ss:$28 sps:$4 sm:$0xff]   ;;  %10953 = vmatprep.subr.bf16.mxu1 %v15869_v40  ;;  %v6430_v18 = vmax.f32 %v19517_v10, 0.0  ;;  %v15878_v10 = vld [vmem:[%s21920_s3 + $0xf54] ss:$28 sps:$4 sm:$0xff]   ;;  %vm10796_vm0 = vcmask 261120  }
 0x3be   :  { %v15875_v39 = vld [vmem:[%s21920_s3 + $0x130c] ss:$28 sps:$4 sm:$0xff]   ;;  %v19917_v47 = vpack.c.bf16 %v6425_v44, %v6425_v44  ;;  %v19922_v11 = vpack.c.bf16 %v6427_v16, %v6427_v16  ;;  %v15881_v19 = vld [vmem:[%s21920_s3 + $0x12d4] ss:$28 sps:$4 sm:$0xff]   ;;  %v6175_v56 = vadd.f32 %v19735_v22, %v6134_v12  ;;  %v15884_v22 = vld [vmem:[%s21920_s3 + $0xf1c] ss:$28 sps:$4 sm:$0xff]  }
 0x3bf   :  { %10913 = vmatpush2.bf16.msra.mxu0 %v15864_v42  ;;  %v15870_v17 = vld [vmem:[%s21920_s3 + $0xf88] ss:$28 sps:$4 sm:$0xff]   ;;  %v19930_v53 = vpack.c.bf16 %v6430_v18, %v6430_v18  ;;  %v15876_v51 = vld [vmem:[%s21920_s3 + $0xf50] ss:$28 sps:$4 sm:$0xff]   ;;  %v15887_v62 = vld [vmem:[%s21920_s3 + $0x129c] ss:$28 sps:$4 sm:$0xff]  }
 0x3c0   :  { %10954 = vmatpush2.bf16.msra.mxu1 %v15867_v59  ;;  %10964 = vmatprep.subr.bf16.mxu0 %v15872_v46  ;;  %v15873_v58 = vld [vmem:[%s21920_s3 + $0x1308] ss:$28 sps:$4 sm:$0xff]   ;;  %v15879_v0 = vld [vmem:[%s21920_s3 + $0x12d0] ss:$28 sps:$4 sm:$0xff]   ;;  %v15882_v8 = vld [vmem:[%s21920_s3 + $0xf18] ss:$28 sps:$4 sm:$0xff]  }
 0x3c1   :  { %11005 = vmatprep.subr.bf16.mxu1 %v15875_v39  ;;  %v15885_v15 = vld [vmem:[%s21920_s3 + $0x1298] ss:$28 sps:$4 sm:$0xff]   ;;  %v15890_v49 = vld [vmem:[%s21920_s3 + $0xee4] ss:$28 sps:$4 sm:$0xff]   ;;  %v15896_v30 = vld [vmem:[%s21920_s3 + $0xeac] ss:$28 sps:$4 sm:$0xff]  }
 0x3c2   :  { %v19932_v21 = vpop.f32.mrf.mxu0  ;;  %10915 = vmatmul.mubr.bf16.vlgmr.msra.gmra.mxu0 %v19917_v47  ;;  %v15893_v25 = vld [vmem:[%s21920_s3 + $0x1264] ss:$28 sps:$4 sm:$0xff]   ;;  %v15899_v33 = vld [vmem:[%s21920_s3 + $0x122c] ss:$28 sps:$4 sm:$0xff]   ;;  %v15902_v34 = vld [vmem:[%s21920_s3 + $0xe74] ss:$28 sps:$4 sm:$0xff]  }
 0x3c3   :  { %v19934_v2 = vpop.f32.mrf.mxu1  ;;  %10956 = vmatmul.mubr.bf16.vlgmr.msra.gmra.mxu1 %v19922_v11  ;;  %10965 = vmatpush1.bf16.msra.mxu0 %v15870_v17  ;;  %v15888_v27 = vld [vmem:[%s21920_s3 + $0xee0] ss:$28 sps:$4 sm:$0xff]   ;;  %v15894_v31 = vld [vmem:[%s21920_s3 + $0xea8] ss:$28 sps:$4 sm:$0xff]   ;;  %v15905_v50 = vld [vmem:[%s21920_s3 + $0x11f4] ss:$28 sps:$4 sm:$0xff]  }
 0x3c4   :  { %10996 = vmatprep.mubr.bf16.mxu0 %v19930_v53  ;;  %11006 = vmatpush1.bf16.msra.mxu1 %v15873_v58  ;;  %v6215_v54 = vpop.f32.mrf.mxu0  ;;  %v15891_v29 = vld [vmem:[%s21920_s3 + $0x1260] ss:$28 sps:$4 sm:$0xff]   ;;  %v15897_v32 = vld [vmem:[%s21920_s3 + $0x1228] ss:$28 sps:$4 sm:$0xff]   ;;  %v15900_v38 = vld [vmem:[%s21920_s3 + $0xe70] ss:$28 sps:$4 sm:$0xff]  }
 0x3c5   :  { %v6256_v20 = vpop.f32.mrf.mxu1  ;;  %v6216_v61 = vadd.f32 %v6215_v54, %v6175_v56  ;;  %10966 = vmatprep.subr.bf16.mxu0 %v15878_v10  ;;  %11007 = vmatprep.subr.bf16.mxu1 %v15881_v19  ;;  %v15903_v40 = vld [vmem:[%s21920_s3 + $0x11f0] ss:$28 sps:$4 sm:$0xff]   ;;  %v15908_v41 = vld [vmem:[%s21920_s3 + $0xe3c] ss:$28 sps:$4 sm:$0xff]   ;;  %v15914_v46 = vld [vmem:[%s21920_s3 + $0xe04] ss:$28 sps:$4 sm:$0xff]  }
 0x3c6   :  { %v6217_v9 = vpop.f32.mrf.mxu0  ;;  %v15911_v42 = vld [vmem:[%s21920_s3 + $0x11bc] ss:$28 sps:$4 sm:$0xff]   ;;  %v15917_v16 = vld [vmem:[%s21920_s3 + $0x1184] ss:$28 sps:$4 sm:$0xff]   ;;  %v15920_v12 = vld [vmem:[%s21920_s3 + $0x114c] ss:$28 sps:$4 sm:$0xff]  }
 0x3c7   :  { %v6258_v6 = vpop.f32.mrf.mxu1  ;;  %v6257_v7 = vadd.f32 %v6256_v20, %v6216_v61  ;;  %10967 = vmatpush1.bf16.msra.mxu0 %v15876_v51  ;;  %v15906_v44 = vld [vmem:[%s21920_s3 + $0xe38] ss:$28 sps:$4 sm:$0xff]   ;;  %v15912_v39 = vld [vmem:[%s21920_s3 + $0xe00] ss:$28 sps:$4 sm:$0xff]   ;;  %v15923_v17 = vld [vmem:[%s21920_s3 + $0x14cc] ss:$28 sps:$4 sm:$0xff]  }
 0x3c8   :  { %11008 = vmatpush1.bf16.msra.mxu1 %v15879_v0  ;;  %v6218_v13 = vpop.f32.mrf.mxu0  ;;  %10968 = vmatprep.subr.bf16.mxu0 %v15884_v22  ;;  %v15909_v59 = vld [vmem:[%s21920_s3 + $0x11b8] ss:$28 sps:$4 sm:$0xff]   ;;  %v15915_v18 = vld [vmem:[%s21920_s3 + $0x1180] ss:$28 sps:$4 sm:$0xff]   ;;  %v15918_v58 = vld [vmem:[%s21920_s3 + $0x1148] ss:$28 sps:$4 sm:$0xff]  }
 0x3c9   :  { %v6259_v14 = vpop.f32.mrf.mxu1  ;;  %v6432_v36 = vmax.f32 %v6257_v7, 0.0  ;;  %11009 = vmatprep.subr.bf16.mxu1 %v15887_v62  ;;  %v15921_v10 = vld [vmem:[%s21920_s3 + $0x14c8] ss:$28 sps:$4 sm:$0xff]   ;;  %v15926_v19 = vld [vmem:[%s21920_s3 + $0x1114] ss:$28 sps:$4 sm:$0xff]   ;;  %vm16740_vm1 = vmmov 0  }
 0x3ca   :  { %v15929_v56 = vld [vmem:[%s21920_s3 + $0x1494] ss:$28 sps:$4 sm:$0xff]   ;;  %v15932_v62 = vld [vmem:[%s21920_s3 + $0x10dc] ss:$28 sps:$4 sm:$0xff]   ;;  %vm12525_vm2 = vcmask 254976  }
 0x3cb   :  { %v19964_v26 = vpack.c.bf16 %v6432_v36, %v6432_v36  ;;  %10969 = vmatpush1.bf16.msra.mxu0 %v15882_v8  ;;  %v15924_v20 = vld [vmem:[%s21920_s3 + $0x1110] ss:$28 sps:$4 sm:$0xff]   ;;  %v15935_v9 = vld [vmem:[%s21920_s3 + $0x145c] ss:$28 sps:$4 sm:$0xff]   ;;  %v15941_v36 = vld [vmem:[%s21920_s3 + $0x1424] ss:$28 sps:$4 sm:$0xff]  }
 0x3cc   :  { %11010 = vmatpush1.bf16.msra.mxu1 %v15885_v15  ;;  %10970 = vmatprep.subr.bf16.mxu0 %v15890_v49  ;;  %v15927_v61 = vld [vmem:[%s21920_s3 + $0x1490] ss:$28 sps:$4 sm:$0xff]   ;;  %v15930_v8 = vld [vmem:[%s21920_s3 + $0x10d8] ss:$28 sps:$4 sm:$0xff]   ;;  %v15938_v49 = vld [vmem:[%s21920_s3 + $0x10a4] ss:$28 sps:$4 sm:$0xff]  }
 0x3cd   :  { %11037 = vmatprep.mubr.bf16.mxu1 %v19964_v26  ;;  %11011 = vmatprep.subr.bf16.mxu1 %v15893_v25  ;;  %v15933_v15 = vld [vmem:[%s21920_s3 + $0x1458] ss:$28 sps:$4 sm:$0xff]   ;;  %v15936_v25 = vld [vmem:[%s21920_s3 + $0x10a0] ss:$28 sps:$4 sm:$0xff]  }
 0x3cf   :  { %10971 = vmatpush1.bf16.msra.mxu0 %v15888_v27  ;;  %v15939_v27 = vld [vmem:[%s21920_s3 + $0x1420] ss:$28 sps:$4 sm:$0xff]  }
 0x3d0   :  { %11012 = vmatpush1.bf16.msra.mxu1 %v15891_v29  ;;  %10972 = vmatprep.subr.bf16.mxu0 %v15896_v30  ;;  %v15944_v29 = vld [vmem:[%s21920_s3 + $0x106c] ss:$28 sps:$4 sm:$0xff]  }
 0x3d1   :  { %11013 = vmatprep.subr.bf16.mxu1 %v15899_v33  ;;  %v15947_v30 = vld [vmem:[%s21920_s3 + $0x13ec] ss:$28 sps:$4 sm:$0xff]  }
 0x3d2   :  { %v15942_v33 = vld [vmem:[%s21920_s3 + $0x1068] ss:$28 sps:$4 sm:$0xff]  }
 0x3d3   :  { %10973 = vmatpush1.bf16.msra.mxu0 %v15894_v31  ;;  %v15945_v31 = vld [vmem:[%s21920_s3 + $0x13e8] ss:$28 sps:$4 sm:$0xff]  }
 0x3d4   :  { %11014 = vmatpush1.bf16.msra.mxu1 %v15897_v32  ;;  %10974 = vmatprep.subr.bf16.mxu0 %v15902_v34  ;;  %v15950_v32 = vld [vmem:[%s21920_s3 + $0x1034] ss:$28 sps:$4 sm:$0xff]  }
 0x3d5   :  { %11015 = vmatprep.subr.bf16.mxu1 %v15905_v50  ;;  %v15953_v34 = vld [vmem:[%s21920_s3 + $0x13b4] ss:$28 sps:$4 sm:$0xff]  }
 0x3d6   :  { %v15948_v50 = vld [vmem:[%s21920_s3 + $0x1030] ss:$28 sps:$4 sm:$0xff]  }
 0x3d7   :  { %10975 = vmatpush1.bf16.msra.mxu0 %v15900_v38  ;;  %v15951_v38 = vld [vmem:[%s21920_s3 + $0x13b0] ss:$28 sps:$4 sm:$0xff]  }
 0x3d8   :  { %11016 = vmatpush1.bf16.msra.mxu1 %v15903_v40  ;;  %10976 = vmatprep.subr.bf16.mxu0 %v15908_v41  ;;  %v15956_v40 = vld [vmem:[%s21920_s3 + $0xffc] ss:$28 sps:$4 sm:$0xff]   ;;  %v6214_v41 = vadd.f32 %v19932_v21, %v19737_v45  ;;  %v15962_v45 = vld [vmem:[%s21920_s3 + $0xfc4] ss:$28 sps:$4 sm:$0xff]  }
 0x3d9   :  { %11017 = vmatprep.subr.bf16.mxu1 %v15911_v42  ;;  %v15959_v42 = vld [vmem:[%s21920_s3 + $0x137c] ss:$28 sps:$4 sm:$0xff]  }
 0x3da   :  { %v6255_v21 = vadd.f32 %v19934_v2, %v6214_v41  ;;  %v15968_v2 = vld [vmem:[%s21920_s3 + $0x514] ss:$28 sps:$4 sm:$0xff]  }
 0x3db   :  { %10977 = vmatpush1.bf16.msra.mxu0 %v15906_v44  ;;  %v15954_v44 = vld [vmem:[%s21920_s3 + $0xff8] ss:$28 sps:$4 sm:$0xff]  }
 0x3dc   :  { %11018 = vmatpush1.bf16.msra.mxu1 %v15909_v59  ;;  %10978 = vmatprep.subr.bf16.mxu0 %v15914_v46  ;;  %v15957_v59 = vld [vmem:[%s21920_s3 + $0x1378] ss:$28 sps:$4 sm:$0xff]   ;;  %v15965_v46 = vld [vmem:[%s21920_s3 + $0x1344] ss:$28 sps:$4 sm:$0xff]  }
 0x3dd   :  { %11019 = vmatprep.subr.bf16.mxu1 %v15917_v16  ;;  %v15960_v16 = vld [vmem:[%s21920_s3 + $0xfc0] ss:$28 sps:$4 sm:$0xff]  }
 0x3df   :  { %10979 = vmatpush1.bf16.msra.mxu0 %v15912_v39  ;;  %v6429_v39 = vmax.f32 %v19514_v37, 0.0  ;;  %v15971_v37 = vld [vmem:[%s21920_s3 + $0x153c] ss:$28 sps:$4 sm:$0xff]  }
 0x3e0   :  { %11020 = vmatpush1.bf16.msra.mxu1 %v15915_v18  ;;  %10980 = vmatprep.subr.bf16.mxu0 %v15920_v12  ;;  %v15963_v18 = vld [vmem:[%s21920_s3 + $0x1340] ss:$28 sps:$4 sm:$0xff]   ;;  %v6431_v12 = vmax.f32 %v6255_v21, 0.0 }
 0x3e1   :  { %11021 = vmatprep.subr.bf16.mxu1 %v15923_v17  ;;  %v1039_v17 = vrot.slane %v19700_v60, %v18444_v1  ;;  %v15974_v60 = vld [vmem:[%s21920_s3 + $0x4dc] ss:$28 sps:$4 sm:$0xff]  }
 0x3e2   :  { %v20039_v51 = vpop.f32.mrf.mxu0  ;;  %v15998_v21 = vld [vmem:[%s21920_s3 + $0x3fc] ss:$28 sps:$4 sm:$0xff]  }
 0x3e3   :  { %v20041_v54 = vpop.f32.mrf.mxu1  ;;  %10981 = vmatpush2.bf16.msra.mxu0 %v15918_v58 }
 0x3e4   :  { %11022 = vmatpush2.bf16.msra.mxu1 %v15921_v10  ;;  %v14164_v0 = vpop.f32.mrf.mxu0  ;;  %10982 = vmatprep.subr.bf16.mxu0 %v15926_v19  ;;  %v15966_v10 = vld [vmem:[%s21920_s3 + $0x510] ss:$28 sps:$4 sm:$0xff]   ;;  %v20139_v19 = vpack.c.bf16 %v6429_v39, %v6429_v39  ;;  %v15993_v39 = vld [vmem:[%s21920_s3 + $0x120] ss:$28 sps:$4 sm:$0xff]  }
 0x3e5   :  { %v20046_v22 = vpop.f32.mrf.mxu1  ;;  %11023 = vmatprep.subr.bf16.mxu1 %v15929_v56  ;;  %v14165_v58 = vadd.f32 %v14164_v0, %v20039_v51  ;;  %v20144_v56 = vpack.c.bf16 %v6431_v12, %v6431_v12  ;;  %v15969_v0 = vld [vmem:[%s21920_s3 + $0x1538] ss:$28 sps:$4 sm:$0xff]   ;;  %v16002_v12 = vld [vmem:[%s21920_s3 + $0x3c0] ss:$28 sps:$4 sm:$0xff]  }
 0x3e6   :  { %v14166_v6 = vpop.f32.mrf.mxu0 }
 0x3e7   :  { %v14188_v7 = vpop.f32.mrf.mxu1  ;;  %10983 = vmatpush2.bf16.msra.mxu0 %v15924_v20  ;;  %v6296_v51 = vadd.f32 %v14165_v58, %v1039_v17  ;;  %v14187_v20 = vadd.f32 %v20046_v22, %v20041_v54  ;;  %v15972_v54 = vld [vmem:[%s21920_s3 + $0x4d8] ss:$28 sps:$4 sm:$0xff]   ;;  %v15999_v17 = vld [vmem:[%s21920_s3 + $0xe8] ss:$28 sps:$4 sm:$0xff]  }
 0x3e8   :  { %11024 = vmatpush2.bf16.msra.mxu1 %v15927_v61  ;;  %v14167_v13 = vpop.f32.mrf.mxu0  ;;  %10984 = vmatprep.subr.bf16.mxu0 %v15932_v62  ;;  %v15980_v7 = vld [vmem:[%s21920_s3 + $0x4a4] ss:$28 sps:$4 sm:$0xff]   ;;  %v16010_v58 = vld [vmem:[%s21920_s3 + $0x38c] ss:$28 sps:$4 sm:$0xff]  }
 0x3e9   :  { %v14189_v14 = vpop.f32.mrf.mxu1  ;;  %11025 = vmatprep.subr.bf16.mxu1 %v15935_v9  ;;  %v15977_v9 = vld [vmem:[%s21920_s3 + $0x1504] ss:$28 sps:$4 sm:$0xff]  }
 0x3ea   :  { %v15975_v14 = vld [vmem:[%s21920_s3 + $0x1500] ss:$28 sps:$4 sm:$0xff]  }
 0x3eb   :  { %10985 = vmatpush2.bf16.msra.mxu0 %v15930_v8  ;;  %v6336_v8 = vadd.f32 %v14187_v20, %v6296_v51  ;;  %v16016_v51 = vld [vmem:[%s21920_s3 + $0x6d4] ss:$28 sps:$4 sm:$0xff]   ;;  %v16013_v20 = vld [vmem:[%s21920_s3 + $0x7c] ss:$28 sps:$4 sm:$0xff]  }
 0x3ec   :  { %11026 = vmatpush2.bf16.msra.mxu1 %v15933_v15  ;;  %10986 = vmatprep.subr.bf16.mxu0 %v15938_v49  ;;  %v16738_v15 = vmov 0  }
 0x3ed   :  { %11027 = vmatprep.subr.bf16.mxu1 %v15941_v36 }
 0x3ef   :  { %10987 = vmatpush2.bf16.msra.mxu0 %v15936_v25  ;;  %v15983_v25 = vld [vmem:[%s21920_s3 + $0x194] ss:$28 sps:$4 sm:$0xff]  }
 0x3f0   :  { %11028 = vmatpush2.bf16.msra.mxu1 %v15939_v27  ;;  %10988 = vmatprep.subr.bf16.mxu0 %v15944_v29 }
 0x3f1   :  { %11029 = vmatprep.subr.bf16.mxu1 %v15947_v30  ;;  %v15978_v30 = vld [vmem:[%s21920_s3 + $0x4a0] ss:$28 sps:$4 sm:$0xff]  }
 0x3f3   :  { %10989 = vmatpush2.bf16.msra.mxu0 %v15942_v33 }
 0x3f4   :  { %11030 = vmatpush2.bf16.msra.mxu1 %v15945_v31  ;;  %10990 = vmatprep.subr.bf16.mxu0 %v15950_v32  ;;  %v15986_v32 = vld [vmem:[%s21920_s3 + $0x46c] ss:$28 sps:$4 sm:$0xff]  }
 0x3f5   :  { %11031 = vmatprep.subr.bf16.mxu1 %v15953_v34 }
 0x3f7   :  { %10991 = vmatpush2.bf16.msra.mxu0 %v15948_v50 }
 0x3f8   :  { %11032 = vmatpush2.bf16.msra.mxu1 %v15951_v38  ;;  %10992 = vmatprep.subr.bf16.mxu0 %v15956_v40  ;;  %v15984_v38 = vld [vmem:[%s21920_s3 + $0x468] ss:$28 sps:$4 sm:$0xff]   ;;  %v15981_v40 = vld [vmem:[%s21920_s3 + $0x190] ss:$28 sps:$4 sm:$0xff]  }
 0x3f9   :  { %11033 = vmatprep.subr.bf16.mxu1 %v15959_v42  ;;  %v15989_v42 = vld [vmem:[%s21920_s3 + $0x15c] ss:$28 sps:$4 sm:$0xff]  }
 0x3fb   :  { %10993 = vmatpush2.bf16.msra.mxu0 %v15954_v44  ;;  %v15992_v44 = vld [vmem:[%s21920_s3 + $0x434] ss:$28 sps:$4 sm:$0xff]  }
 0x3fc   :  { %11034 = vmatpush2.bf16.msra.mxu1 %v15957_v59  ;;  %10994 = vmatprep.subr.bf16.mxu0 %v15962_v45  ;;  %v15990_v59 = vld [vmem:[%s21920_s3 + $0x430] ss:$28 sps:$4 sm:$0xff]   ;;  %v15987_v45 = vld [vmem:[%s21920_s3 + $0x158] ss:$28 sps:$4 sm:$0xff]  }
 0x3fd   :  { %11035 = vmatprep.subr.bf16.mxu1 %v15965_v46  ;;  %v15995_v46 = vld [vmem:[%s21920_s3 + $0x124] ss:$28 sps:$4 sm:$0xff]  }
 0x3ff   :  { %10995 = vmatpush2.bf16.msra.mxu0 %v15960_v16  ;;  %v15996_v16 = vld [vmem:[%s21920_s3 + $0x3f8] ss:$28 sps:$4 sm:$0xff]  }
 0x400   :  { %11036 = vmatpush2.bf16.msra.mxu1 %v15963_v18  ;;  %11128 = vmatprep.subr.bf16.mxu0 %v15968_v2  ;;  %v16004_v18 = vld [vmem:[%s21920_s3 + $0x3c4] ss:$28 sps:$4 sm:$0xff]   ;;  %v16001_v2 = vld [vmem:[%s21920_s3 + $0xec] ss:$28 sps:$4 sm:$0xff]  }
 0x401   :  { %11058 = vmatprep.subr.bf16.mxu1 %v15971_v37  ;;  %v16007_v37 = vld [vmem:[%s21920_s3 + $0xb4] ss:$28 sps:$4 sm:$0xff]  }
 0x402   :  { %v14207_v61 = vpop.f32.mrf.mxu0  ;;  %10997 = vmatmul.mubr.bf16.vlgmr.msra.gmra.mxu0 %v20139_v19 }
 0x403   :  { %v14229_v62 = vpop.f32.mrf.mxu1  ;;  %11038 = vmatmul.mubr.bf16.vlgmr.msra.gmra.mxu1 %v20144_v56  ;;  %11129 = vmatpush1.bf16.msra.mxu0 %v15966_v10  ;;  %v16008_v10 = vld [vmem:[%s21920_s3 + $0x388] ss:$28 sps:$4 sm:$0xff]  }
 0x404   :  { %11160 = vmatprep.mubr.bf16.mxu0 %v19495_v24  ;;  %v14208_v22 = vpop.f32.mrf.mxu0  ;;  %11130 = vmatprep.subr.bf16.mxu0 %v15974_v60  ;;  %v16005_v60 = vld [vmem:[%s21920_s3 + $0xb0] ss:$28 sps:$4 sm:$0xff]  }
 0x405   :  { %v14230_v6 = vpop.f32.mrf.mxu1  ;;  %v14209_v13 = vadd.f32 %v14208_v22, %v14207_v61  ;;  %11059 = vmatpush1.bf16.msra.mxu1 %v15969_v0  ;;  %11078 = vmatprep.mubr.bf16.mxu1 %v16738_v15  ;;  %v16014_v0 = vld [vmem:[%s21920_s3 + $0x6d0] ss:$28 sps:$4 sm:$0xff]   ;;  %v16011_v61 = vld [vmem:[%s21920_s3 + $0x78] ss:$28 sps:$4 sm:$0xff]   ;;  %v16017_v22 = vld [vmem:[%s21920_s3 + $0x40] ss:$28 sps:$4 sm:$0xff]  }
 0x406   :  { %v14210_v49 = vpop.f32.mrf.mxu0  ;;  %11060 = vmatprep.subr.bf16.mxu1 %v15977_v9  ;;  %v14231_v29 = vadd.f32 %v14230_v6, %v14229_v62  ;;  %v16022_v62 = vld [vmem:[%s21920_s3 + $0x69c] ss:$28 sps:$4 sm:$0xff]   ;;  %v16019_v9 = vld [vmem:[%s21920_s3 + $0x44] ss:$28 sps:$4 sm:$0xff]  }
 0x407   :  { %v14232_v36 = vpop.f32.mrf.mxu1  ;;  %v6376_v27 = vadd.f32 %v14209_v13, %v6336_v8  ;;  %11131 = vmatpush1.bf16.msra.mxu0 %v15972_v54  ;;  %v16020_v54 = vld [vmem:[%s21920_s3 + $0x698] ss:$28 sps:$4 sm:$0xff]   ;;  %v16028_v6 = vld [vmem:[%s21920_s3 + $0x664] ss:$28 sps:$4 sm:$0xff]  }
 0x408   :  { %v14211_v33 = vpop.f32.mrf.mxu0  ;;  %11132 = vmatprep.subr.bf16.mxu0 %v15980_v7  ;;  %v16025_v7 = vld [vmem:[%s21920_s3 + $0xc] ss:$28 sps:$4 sm:$0xff]   ;;  %v16026_v8 = vld [vmem:[%s21920_s3 + $0x660] ss:$28 sps:$4 sm:$0xff]   ;;  %v16031_v49 = vld [vmem:[%s21920_s3 + $0x354] ss:$28 sps:$4 sm:$0xff]  }
 0x409   :  { %v14233_v31 = vpop.f32.mrf.mxu1  ;;  %v6416_v34 = vadd.f32 %v14231_v29, %v6376_v27  ;;  %11061 = vmatpush1.bf16.msra.mxu1 %v15975_v14  ;;  %v16023_v13 = vld [vmem:[%s21920_s3 + $0x8] ss:$28 sps:$4 sm:$0xff]   ;;  %v16040_v27 = vld [vmem:[%s21920_s3 + $0x5f4] ss:$28 sps:$4 sm:$0xff]   ;;  %v16037_v29 = vld [vmem:[%s21920_s3 + $0x31c] ss:$28 sps:$4 sm:$0xff]  }
 0x40a   :  { %11087 = vmatprep.subr.bf16.mxu1 %v15983_v25  ;;  %v16034_v14 = vld [vmem:[%s21920_s3 + $0x62c] ss:$28 sps:$4 sm:$0xff]   ;;  %v16035_v33 = vld [vmem:[%s21920_s3 + $0x318] ss:$28 sps:$4 sm:$0xff]  }
 0x40b   :  { %v6433_v50 = vmax.f32 %v6416_v34, 0.0  ;;  %11133 = vmatpush1.bf16.msra.mxu0 %v15978_v30  ;;  %v16032_v36 = vld [vmem:[%s21920_s3 + $0x628] ss:$28 sps:$4 sm:$0xff]   ;;  %v16029_v25 = vld [vmem:[%s21920_s3 + $0x350] ss:$28 sps:$4 sm:$0xff]  }
 0x40c   :  { %11134 = vmatprep.subr.bf16.mxu0 %v15986_v32  ;;  %v16038_v30 = vld [vmem:[%s21920_s3 + $0x5f0] ss:$28 sps:$4 sm:$0xff]   ;;  %v16046_v31 = vld [vmem:[%s21920_s3 + $0x5bc] ss:$28 sps:$4 sm:$0xff]   ;;  %v16043_v32 = vld [vmem:[%s21920_s3 + $0x2e4] ss:$28 sps:$4 sm:$0xff]  }
 0x40d   :  { %v20182_v41 = vpack.c.bf16 %v6433_v50, %v6433_v50  ;;  %v16044_v34 = vld [vmem:[%s21920_s3 + $0x5b8] ss:$28 sps:$4 sm:$0xff]   ;;  %v16041_v50 = vld [vmem:[%s21920_s3 + $0x2e0] ss:$28 sps:$4 sm:$0xff]  }
 0x40f   :  { %14089 = vmatmul.mubr.msk.bf16.vlgmr.msra.gmra.mxu1 %vm10796_vm0, %v20182_v41  ;;  %11135 = vmatpush1.bf16.msra.mxu0 %v15984_v38  ;;  %v16052_v38 = vld [vmem:[%s21920_s3 + $0x584] ss:$28 sps:$4 sm:$0xff]  }
 0x410   :  { %11088 = vmatpush1.bf16.msra.mxu1 %v15981_v40  ;;  %11119 = vmatprep.mubr.bf16.mxu1 %v19493_v23  ;;  %v16049_v40 = vld [vmem:[%s21920_s3 + $0x2ac] ss:$28 sps:$4 sm:$0xff]  }
 0x411   :  { %11089 = vmatprep.subr.bf16.mxu1 %v15989_v42  ;;  %11136 = vmatprep.subr.bf16.mxu0 %v15992_v44  ;;  %v16050_v42 = vld [vmem:[%s21920_s3 + $0x580] ss:$28 sps:$4 sm:$0xff]   ;;  %v16047_v44 = vld [vmem:[%s21920_s3 + $0x2a8] ss:$28 sps:$4 sm:$0xff]  }
 0x413   :  { %11137 = vmatpush1.bf16.msra.mxu0 %v15990_v59  ;;  %v16058_v59 = vld [vmem:[%s21920_s3 + $0x54c] ss:$28 sps:$4 sm:$0xff]  }
 0x414   :  { %11090 = vmatpush1.bf16.msra.mxu1 %v15987_v45  ;;  %11138 = vmatprep.subr.bf16.mxu0 %v15998_v21  ;;  %v16055_v45 = vld [vmem:[%s21920_s3 + $0x274] ss:$28 sps:$4 sm:$0xff]   ;;  %v16056_v21 = vld [vmem:[%s21920_s3 + $0x548] ss:$28 sps:$4 sm:$0xff]  }
 0x415   :  { %11091 = vmatprep.subr.bf16.mxu1 %v15995_v46  ;;  %v16053_v46 = vld [vmem:[%s21920_s3 + $0x270] ss:$28 sps:$4 sm:$0xff]  }
 0x417   :  { %11139 = vmatpush1.bf16.msra.mxu0 %v15996_v16  ;;  %v20334_v16 = vld [vmem:[%s21921_s4] sm:$0x7f] }
 0x418   :  { %11092 = vmatpush1.bf16.msra.mxu1 %v15993_v39  ;;  %11140 = vmatprep.subr.bf16.mxu0 %v16004_v18  ;;  %v16064_v39 = vld [vmem:[%s21920_s3 + $0xc14] ss:$28 sps:$4 sm:$0xff]   ;;  %v16061_v18 = vld [vmem:[%s21920_s3 + $0x23c] ss:$28 sps:$4 sm:$0xff]  }
 0x419   :  { %11093 = vmatprep.subr.bf16.mxu1 %v16001_v2  ;;  %v7236_v2 = vrot.slane %v20334_v16, %v17621_v52  ;;  %v16067_v52 = vld [vmem:[%s21920_s3 + $0x204] ss:$28 sps:$4 sm:$0xff]  }
 0x41b   :  { %11141 = vmatpush1.bf16.msra.mxu0 %v16002_v12  ;;  %v16062_v12 = vld [vmem:[%s21920_s3 + $0xc10] ss:$28 sps:$4 sm:$0xff]  }
 0x41c   :  { %11094 = vmatpush1.bf16.msra.mxu1 %v15999_v17  ;;  %11142 = vmatprep.subr.bf16.mxu0 %v16010_v58  ;;  %v16059_v17 = vld [vmem:[%s21920_s3 + $0x238] ss:$28 sps:$4 sm:$0xff]  }
 0x41d   :  { %11095 = vmatprep.subr.bf16.mxu1 %v16007_v37  ;;  %v16070_v58 = vld [vmem:[%s21920_s3 + $0xbdc] ss:$28 sps:$4 sm:$0xff]   ;;  %v7240_v37 = vrot.slane %v20334_v16, %v17630_v55 }
 0x41e   :  { %v16065_v55 = vld [vmem:[%s21920_s3 + $0x200] ss:$28 sps:$4 sm:$0xff]  }
 0x41f   :  { %11143 = vmatpush1.bf16.msra.mxu0 %v16008_v10 }
 0x420   :  { %11096 = vmatpush1.bf16.msra.mxu1 %v16005_v60  ;;  %11144 = vmatprep.subr.bf16.mxu0 %v16016_v51 }
 0x421   :  { %11097 = vmatprep.subr.bf16.mxu1 %v16013_v20  ;;  %v16068_v20 = vld [vmem:[%s21920_s3 + $0xbd8] ss:$28 sps:$4 sm:$0xff]  }
 0x423   :  { %11145 = vmatpush2.bf16.msra.mxu0 %v16014_v0 }
 0x424   :  { %11098 = vmatpush1.bf16.msra.mxu1 %v16011_v61  ;;  %11146 = vmatprep.subr.bf16.mxu0 %v16022_v62  ;;  %v16076_v61 = vld [vmem:[%s21920_s3 + $0xba4] ss:$28 sps:$4 sm:$0xff]  }
 0x425   :  { %11099 = vmatprep.subr.bf16.mxu1 %v16019_v9 }
 0x427   :  { %11147 = vmatpush2.bf16.msra.mxu0 %v16020_v54 }
 0x428   :  { %11100 = vmatpush1.bf16.msra.mxu1 %v16017_v22  ;;  %11148 = vmatprep.subr.bf16.mxu0 %v16028_v6  ;;  %v16073_v22 = vld [vmem:[%s21920_s3 + $0x1cc] ss:$28 sps:$4 sm:$0xff]  }
 0x429   :  { %11101 = vmatprep.subr.bf16.mxu1 %v16025_v7 }
 0x42b   :  { %11149 = vmatpush2.bf16.msra.mxu0 %v16026_v8 }
 0x42c   :  { %11102 = vmatpush1.bf16.msra.mxu1 %v16023_v13  ;;  %11150 = vmatprep.subr.bf16.mxu0 %v16034_v14  ;;  %v16074_v13 = vld [vmem:[%s21920_s3 + $0xba0] ss:$28 sps:$4 sm:$0xff]  }
 0x42d   :  { %11103 = vmatprep.subr.bf16.mxu1 %v16031_v49  ;;  %v16071_v49 = vld [vmem:[%s21920_s3 + $0x1c8] ss:$28 sps:$4 sm:$0xff]  }
 0x42f   :  { %11151 = vmatpush2.bf16.msra.mxu0 %v16032_v36  ;;  %v16082_v36 = vld [vmem:[%s21920_s3 + $0xb6c] ss:$28 sps:$4 sm:$0xff]  }
 0x430   :  { %11104 = vmatpush2.bf16.msra.mxu1 %v16029_v25  ;;  %11152 = vmatprep.subr.bf16.mxu0 %v16040_v27  ;;  %v16079_v27 = vld [vmem:[%s21920_s3 + $0x894] ss:$28 sps:$4 sm:$0xff]  }
 0x431   :  { %11105 = vmatprep.subr.bf16.mxu1 %v16037_v29  ;;  %v16080_v29 = vld [vmem:[%s21920_s3 + $0xb68] ss:$28 sps:$4 sm:$0xff]  }
 0x433   :  { %11153 = vmatpush2.bf16.msra.mxu0 %v16038_v30  ;;  %v16077_v30 = vld [vmem:[%s21920_s3 + $0x890] ss:$28 sps:$4 sm:$0xff]  }
 0x434   :  { %11106 = vmatpush2.bf16.msra.mxu1 %v16035_v33  ;;  %11154 = vmatprep.subr.bf16.mxu0 %v16046_v31  ;;  %v16085_v33 = vld [vmem:[%s21920_s3 + $0x85c] ss:$28 sps:$4 sm:$0xff]   ;;  %v16088_v31 = vld [vmem:[%s21920_s3 + $0xb34] ss:$28 sps:$4 sm:$0xff]  }
 0x435   :  { %11107 = vmatprep.subr.bf16.mxu1 %v16043_v32  ;;  %v16086_v32 = vld [vmem:[%s21920_s3 + $0xb30] ss:$28 sps:$4 sm:$0xff]  }
 0x437   :  { %11155 = vmatpush2.bf16.msra.mxu0 %v16044_v34  ;;  %v16083_v34 = vld [vmem:[%s21920_s3 + $0x858] ss:$28 sps:$4 sm:$0xff]  }
 0x438   :  { %11108 = vmatpush2.bf16.msra.mxu1 %v16041_v50  ;;  %11156 = vmatprep.subr.bf16.mxu0 %v16052_v38  ;;  %v16094_v50 = vld [vmem:[%s21920_s3 + $0xafc] ss:$28 sps:$4 sm:$0xff]   ;;  %v16091_v38 = vld [vmem:[%s21920_s3 + $0x824] ss:$28 sps:$4 sm:$0xff]  }
 0x439   :  { %11109 = vmatprep.subr.bf16.mxu1 %v16049_v40  ;;  %v16092_v40 = vld [vmem:[%s21920_s3 + $0xaf8] ss:$28 sps:$4 sm:$0xff]  }
 0x43b   :  { %11157 = vmatpush2.bf16.msra.mxu0 %v16050_v42  ;;  %v16089_v42 = vld [vmem:[%s21920_s3 + $0x820] ss:$28 sps:$4 sm:$0xff]  }
 0x43c   :  { %11110 = vmatpush2.bf16.msra.mxu1 %v16047_v44  ;;  %11158 = vmatprep.subr.bf16.mxu0 %v16058_v59  ;;  %v16100_v44 = vld [vmem:[%s21920_s3 + $0xac4] ss:$28 sps:$4 sm:$0xff]   ;;  %v16097_v59 = vld [vmem:[%s21920_s3 + $0x7ec] ss:$28 sps:$4 sm:$0xff]  }
 0x43d   :  { %11111 = vmatprep.subr.bf16.mxu1 %v16055_v45  ;;  %v16098_v45 = vld [vmem:[%s21920_s3 + $0xac0] ss:$28 sps:$4 sm:$0xff]  }
 0x43f   :  { %11159 = vmatpush2.bf16.msra.mxu0 %v16056_v21  ;;  %v16095_v21 = vld [vmem:[%s21920_s3 + $0x7e8] ss:$28 sps:$4 sm:$0xff]  }
 0x440   :  { %11112 = vmatpush2.bf16.msra.mxu1 %v16053_v46  ;;  %11210 = vmatprep.subr.bf16.mxu0 %v16064_v39  ;;  %v16106_v46 = vld [vmem:[%s21920_s3 + $0xa8c] ss:$28 sps:$4 sm:$0xff]   ;;  %v16103_v39 = vld [vmem:[%s21920_s3 + $0x7b4] ss:$28 sps:$4 sm:$0xff]  }
 0x441   :  { %11113 = vmatprep.subr.bf16.mxu1 %v16061_v18  ;;  %v16104_v18 = vld [vmem:[%s21920_s3 + $0xa88] ss:$28 sps:$4 sm:$0xff]  }
 0x442   :  { %v10834_v10 = vpop.f32.mrf.mxu0  ;;  %11161 = vmatmul.mubr.bf16.vlgmr.msra.gmra.mxu0 %v19712_v3 }
 0x443   :  { %v10835_v60 = vadd.f32 %v10834_v10, %v7236_v2  ;;  %v10875_v51 = vpop.f32.mrf.mxu1  ;;  %11211 = vmatpush1.bf16.msra.mxu0 %v16062_v12  ;;  %11242 = vmatprep.mubr.bf16.mxu0 %v19726_v28  ;;  %v16101_v2 = vld [vmem:[%s21920_s3 + $0x7b0] ss:$28 sps:$4 sm:$0xff]   ;;  %v16115_v10 = vld [vmem:[%s21920_s3 + $0x744] ss:$28 sps:$4 sm:$0xff]  }
 0x444   :  { %11114 = vmatpush2.bf16.msra.mxu1 %v16059_v17  ;;  %v10836_v0 = vpop.f32.mrf.mxu0  ;;  %11212 = vmatprep.subr.bf16.mxu0 %v16070_v58  ;;  %v16112_v12 = vld [vmem:[%s21920_s3 + $0xdd4] ss:$28 sps:$4 sm:$0xff]   ;;  %v16109_v17 = vld [vmem:[%s21920_s3 + $0x77c] ss:$28 sps:$4 sm:$0xff]  }
 0x445   :  { %v20369_v62 = vadd.f32 %v10875_v51, %v10835_v60  ;;  %v10837_v9 = vadd.f32 %v10836_v0, %v7240_v37  ;;  %v10877_v54 = vpop.f32.mrf.mxu1  ;;  %11115 = vmatprep.subr.bf16.mxu1 %v16067_v52  ;;  %v16110_v58 = vld [vmem:[%s21920_s3 + $0xdd0] ss:$28 sps:$4 sm:$0xff]   ;;  %v16107_v37 = vld [vmem:[%s21920_s3 + $0x778] ss:$28 sps:$4 sm:$0xff]   ;;  %v16113_v51 = vld [vmem:[%s21920_s3 + $0x740] ss:$28 sps:$4 sm:$0xff]  }
 0x446   :  { %v10838_v6 = vpop.f32.mrf.mxu0  ;;  %v16118_v52 = vld [vmem:[%s21920_s3 + $0xd9c] ss:$28 sps:$4 sm:$0xff]   ;;  %v16121_v0 = vld [vmem:[%s21920_s3 + $0x70c] ss:$28 sps:$4 sm:$0xff]  }
 0x447   :  { %v20374_v7 = vadd.f32 %v10877_v54, %v10837_v9  ;;  %v10879_v8 = vpop.f32.mrf.mxu1  ;;  %11213 = vmatpush1.bf16.msra.mxu0 %v16068_v20  ;;  %v16116_v60 = vld [vmem:[%s21920_s3 + $0xd98] ss:$28 sps:$4 sm:$0xff]   ;;  %v16124_v20 = vld [vmem:[%s21920_s3 + $0xd64] ss:$28 sps:$4 sm:$0xff]   ;;  %v16130_v9 = vld [vmem:[%s21920_s3 + $0xd2c] ss:$28 sps:$4 sm:$0xff]  }
 0x448   :  { %11116 = vmatpush2.bf16.msra.mxu1 %v16065_v55  ;;  %v10839_v14 = vpop.f32.mrf.mxu0  ;;  %11214 = vmatprep.subr.bf16.mxu0 %v16076_v61  ;;  %v16122_v55 = vld [vmem:[%s21920_s3 + $0xd60] ss:$28 sps:$4 sm:$0xff]   ;;  %v16119_v61 = vld [vmem:[%s21920_s3 + $0x708] ss:$28 sps:$4 sm:$0xff]   ;;  %v16127_v54 = vld [vmem:[%s21920_s3 + $0xa54] ss:$28 sps:$4 sm:$0xff]  }
 0x449   :  { %v10880_v25 = vpop.f32.mrf.mxu1  ;;  %11117 = vmatprep.subr.bf16.mxu1 %v16073_v22  ;;  %v16128_v22 = vld [vmem:[%s21920_s3 + $0xd28] ss:$28 sps:$4 sm:$0xff]   ;;  %v16125_v6 = vld [vmem:[%s21920_s3 + $0xa50] ss:$28 sps:$4 sm:$0xff]  }
 0x44a   :  { %v16136_v8 = vld [vmem:[%s21920_s3 + $0xcf4] ss:$28 sps:$4 sm:$0xff]   ;;  %v16139_v25 = vld [vmem:[%s21920_s3 + $0x9e4] ss:$28 sps:$4 sm:$0xff]  }
 0x44b   :  { %11215 = vmatpush1.bf16.msra.mxu0 %v16074_v13  ;;  %v16133_v13 = vld [vmem:[%s21920_s3 + $0xa1c] ss:$28 sps:$4 sm:$0xff]   ;;  %v16134_v14 = vld [vmem:[%s21920_s3 + $0xcf0] ss:$28 sps:$4 sm:$0xff]  }
 0x44c   :  { %11118 = vmatpush2.bf16.msra.mxu1 %v16071_v49  ;;  %11216 = vmatprep.subr.bf16.mxu0 %v16082_v36  ;;  %v16131_v49 = vld [vmem:[%s21920_s3 + $0xa18] ss:$28 sps:$4 sm:$0xff]  }
 0x44d   :  { %11169 = vmatprep.subr.bf16.mxu1 %v16079_v27  ;;  %v16142_v36 = vld [vmem:[%s21920_s3 + $0xcbc] ss:$28 sps:$4 sm:$0xff]  }
 0x44e   :  { %v16140_v27 = vld [vmem:[%s21920_s3 + $0xcb8] ss:$28 sps:$4 sm:$0xff]  }
 0x44f   :  { %11120 = vmatmul.mubr.bf16.vlgmr.msra.gmra.mxu1 %v19707_v63  ;;  %11217 = vmatpush1.bf16.msra.mxu0 %v16080_v29  ;;  %v16137_v29 = vld [vmem:[%s21920_s3 + $0x9e0] ss:$28 sps:$4 sm:$0xff]  }
 0x450   :  { %11170 = vmatpush1.bf16.msra.mxu1 %v16077_v30  ;;  %11201 = vmatprep.mubr.bf16.mxu1 %v19717_v4  ;;  %v16148_v30 = vld [vmem:[%s21920_s3 + $0xc84] ss:$28 sps:$4 sm:$0xff]  }
 0x451   :  { %11171 = vmatprep.subr.bf16.mxu1 %v16085_v33  ;;  %11218 = vmatprep.subr.bf16.mxu0 %v16088_v31  ;;  %v16145_v33 = vld [vmem:[%s21920_s3 + $0x9ac] ss:$28 sps:$4 sm:$0xff]   ;;  %v16146_v31 = vld [vmem:[%s21920_s3 + $0xc80] ss:$28 sps:$4 sm:$0xff]  }
 0x453   :  { %11219 = vmatpush1.bf16.msra.mxu0 %v16086_v32  ;;  %v16143_v32 = vld [vmem:[%s21920_s3 + $0x9a8] ss:$28 sps:$4 sm:$0xff]  }
 0x454   :  { %11172 = vmatpush1.bf16.msra.mxu1 %v16083_v34  ;;  %11220 = vmatprep.subr.bf16.mxu0 %v16094_v50  ;;  %v16154_v34 = vld [vmem:[%s21920_s3 + $0xc4c] ss:$28 sps:$4 sm:$0xff]   ;;  %v16151_v50 = vld [vmem:[%s21920_s3 + $0x974] ss:$28 sps:$4 sm:$0xff]  }
 0x455   :  { %11173 = vmatprep.subr.bf16.mxu1 %v16091_v38  ;;  %v16152_v38 = vld [vmem:[%s21920_s3 + $0xc48] ss:$28 sps:$4 sm:$0xff]  }
 0x457   :  { %11221 = vmatpush1.bf16.msra.mxu0 %v16092_v40  ;;  %v16149_v40 = vld [vmem:[%s21920_s3 + $0x970] ss:$28 sps:$4 sm:$0xff]  }
 0x458   :  { %11174 = vmatpush1.bf16.msra.mxu1 %v16089_v42  ;;  %11222 = vmatprep.subr.bf16.mxu0 %v16100_v44  ;;  %v16160_v42 = vld [vmem:[%s21920_s3 + $0x1314] ss:$28 sps:$4 sm:$0xff]   ;;  %v16157_v44 = vld [vmem:[%s21920_s3 + $0x93c] ss:$28 sps:$4 sm:$0xff]  }
 0x459   :  { %11175 = vmatprep.subr.bf16.mxu1 %v16097_v59  ;;  %v16158_v59 = vld [vmem:[%s21920_s3 + $0x1310] ss:$28 sps:$4 sm:$0xff]  }
 0x45b   :  { %11223 = vmatpush1.bf16.msra.mxu0 %v16098_v45  ;;  %v16155_v45 = vld [vmem:[%s21920_s3 + $0x938] ss:$28 sps:$4 sm:$0xff]  }
 0x45c   :  { %11176 = vmatpush1.bf16.msra.mxu1 %v16095_v21  ;;  %11224 = vmatprep.subr.bf16.mxu0 %v16106_v46  ;;  %v16166_v21 = vld [vmem:[%s21920_s3 + $0x12dc] ss:$28 sps:$4 sm:$0xff]   ;;  %v16163_v46 = vld [vmem:[%s21920_s3 + $0x904] ss:$28 sps:$4 sm:$0xff]  }
 0x45d   :  { %11177 = vmatprep.subr.bf16.mxu1 %v16103_v39 }
 0x45f   :  { %11225 = vmatpush1.bf16.msra.mxu0 %v16104_v18 }
 0x460   :  { %11178 = vmatpush1.bf16.msra.mxu1 %v16101_v2  ;;  %11226 = vmatprep.subr.bf16.mxu0 %v16112_v12  ;;  %v16164_v12 = vld [vmem:[%s21920_s3 + $0x12d8] ss:$28 sps:$4 sm:$0xff]  }
 0x461   :  { %11179 = vmatprep.subr.bf16.mxu1 %v16109_v17 }
 0x463   :  { %11227 = vmatpush2.bf16.msra.mxu0 %v16110_v58  ;;  %v16161_v58 = vld [vmem:[%s21920_s3 + $0x900] ss:$28 sps:$4 sm:$0xff]  }
 0x464   :  { %11180 = vmatpush1.bf16.msra.mxu1 %v16107_v37  ;;  %11228 = vmatprep.subr.bf16.mxu0 %v16118_v52  ;;  %v16172_v37 = vld [vmem:[%s21920_s3 + $0x12a4] ss:$28 sps:$4 sm:$0xff]  }
 0x465   :  { %11181 = vmatprep.subr.bf16.mxu1 %v16115_v10 }
 0x467   :  { %11229 = vmatpush2.bf16.msra.mxu0 %v16116_v60  ;;  %v16169_v60 = vld [vmem:[%s21920_s3 + $0x8cc] ss:$28 sps:$4 sm:$0xff]  }
 0x468   :  { %11182 = vmatpush1.bf16.msra.mxu1 %v16113_v51  ;;  %11230 = vmatprep.subr.bf16.mxu0 %v16124_v20 }
 0x469   :  { %11183 = vmatprep.subr.bf16.mxu1 %v16121_v0 }
 0x46b   :  { %11231 = vmatpush2.bf16.msra.mxu0 %v16122_v55  ;;  %v16170_v55 = vld [vmem:[%s21920_s3 + $0x12a0] ss:$28 sps:$4 sm:$0xff]  }
 0x46c   :  { %11184 = vmatpush1.bf16.msra.mxu1 %v16119_v61  ;;  %11232 = vmatprep.subr.bf16.mxu0 %v16130_v9  ;;  %v16178_v9 = vld [vmem:[%s21920_s3 + $0x126c] ss:$28 sps:$4 sm:$0xff]  }
 0x46d   :  { %11185 = vmatprep.subr.bf16.mxu1 %v16127_v54 }
 0x46f   :  { %11233 = vmatpush2.bf16.msra.mxu0 %v16128_v22  ;;  %v16175_v22 = vld [vmem:[%s21920_s3 + $0xf94] ss:$28 sps:$4 sm:$0xff]  }
 0x470   :  { %11186 = vmatpush2.bf16.msra.mxu1 %v16125_v6  ;;  %11234 = vmatprep.subr.bf16.mxu0 %v16136_v8  ;;  %v16176_v6 = vld [vmem:[%s21920_s3 + $0x1268] ss:$28 sps:$4 sm:$0xff]   ;;  %v16173_v8 = vld [vmem:[%s21920_s3 + $0xf90] ss:$28 sps:$4 sm:$0xff]  }
 0x471   :  { %11187 = vmatprep.subr.bf16.mxu1 %v16133_v13  ;;  %v16181_v13 = vld [vmem:[%s21920_s3 + $0xf5c] ss:$28 sps:$4 sm:$0xff]  }
 0x473   :  { %11235 = vmatpush2.bf16.msra.mxu0 %v16134_v14  ;;  %v16184_v14 = vld [vmem:[%s21920_s3 + $0x1234] ss:$28 sps:$4 sm:$0xff]  }
 0x474   :  { %11188 = vmatpush2.bf16.msra.mxu1 %v16131_v49  ;;  %11236 = vmatprep.subr.bf16.mxu0 %v16142_v36  ;;  %v16182_v49 = vld [vmem:[%s21920_s3 + $0x1230] ss:$28 sps:$4 sm:$0xff]   ;;  %v16179_v36 = vld [vmem:[%s21920_s3 + $0xf58] ss:$28 sps:$4 sm:$0xff]  }
 0x475   :  { %11189 = vmatprep.subr.bf16.mxu1 %v16139_v25  ;;  %v16190_v25 = vld [vmem:[%s21920_s3 + $0x11fc] ss:$28 sps:$4 sm:$0xff]  }
 0x477   :  { %11237 = vmatpush2.bf16.msra.mxu0 %v16140_v27  ;;  %v16187_v27 = vld [vmem:[%s21920_s3 + $0xf24] ss:$28 sps:$4 sm:$0xff]  }
 0x478   :  { %11190 = vmatpush2.bf16.msra.mxu1 %v16137_v29  ;;  %11238 = vmatprep.subr.bf16.mxu0 %v16148_v30  ;;  %v16188_v29 = vld [vmem:[%s21920_s3 + $0x11f8] ss:$28 sps:$4 sm:$0xff]   ;;  %v16185_v30 = vld [vmem:[%s21920_s3 + $0xf20] ss:$28 sps:$4 sm:$0xff]  }
 0x479   :  { %11191 = vmatprep.subr.bf16.mxu1 %v16145_v33  ;;  %v16196_v33 = vld [vmem:[%s21920_s3 + $0x11c4] ss:$28 sps:$4 sm:$0xff]  }
 0x47b   :  { %11239 = vmatpush2.bf16.msra.mxu0 %v16146_v31  ;;  %v16193_v31 = vld [vmem:[%s21920_s3 + $0xeec] ss:$28 sps:$4 sm:$0xff]  }
 0x47c   :  { %11192 = vmatpush2.bf16.msra.mxu1 %v16143_v32  ;;  %11240 = vmatprep.subr.bf16.mxu0 %v16154_v34  ;;  %v16194_v32 = vld [vmem:[%s21920_s3 + $0x11c0] ss:$28 sps:$4 sm:$0xff]   ;;  %v16191_v34 = vld [vmem:[%s21920_s3 + $0xee8] ss:$28 sps:$4 sm:$0xff]  }
 0x47d   :  { %11193 = vmatprep.subr.bf16.mxu1 %v16151_v50  ;;  %v16202_v50 = vld [vmem:[%s21920_s3 + $0x118c] ss:$28 sps:$4 sm:$0xff]  }
 0x47f   :  { %11241 = vmatpush2.bf16.msra.mxu0 %v16152_v38  ;;  %v16199_v38 = vld [vmem:[%s21920_s3 + $0xeb4] ss:$28 sps:$4 sm:$0xff]  }
 0x480   :  { %11194 = vmatpush2.bf16.msra.mxu1 %v16149_v40  ;;  %11292 = vmatprep.subr.bf16.mxu0 %v16160_v42  ;;  %v16200_v40 = vld [vmem:[%s21920_s3 + $0x1188] ss:$28 sps:$4 sm:$0xff]   ;;  %v16197_v42 = vld [vmem:[%s21920_s3 + $0xeb0] ss:$28 sps:$4 sm:$0xff]  }
 0x481   :  { %11195 = vmatprep.subr.bf16.mxu1 %v16157_v44  ;;  %v16208_v44 = vld [vmem:[%s21920_s3 + $0x14d4] ss:$28 sps:$4 sm:$0xff]  }
 0x482   :  { %v10916_v39 = vpop.f32.mrf.mxu0  ;;  %11243 = vmatmul.mubr.bf16.vlgmr.msra.gmra.mxu0 %v19922_v11 }
 0x483   :  { %v10917_v18 = vadd.f32 %v10916_v39, %v20369_v62  ;;  %v10957_v2 = vpop.f32.mrf.mxu1  ;;  %11293 = vmatpush1.bf16.msra.mxu0 %v16158_v59  ;;  %11324 = vmatprep.mubr.bf16.mxu0 %v19964_v26  ;;  %v16205_v59 = vld [vmem:[%s21920_s3 + $0xe7c] ss:$28 sps:$4 sm:$0xff]   ;;  %v16211_v39 = vld [vmem:[%s21920_s3 + $0xe44] ss:$28 sps:$4 sm:$0xff]  }
 0x484   :  { %11196 = vmatpush2.bf16.msra.mxu1 %v16155_v45  ;;  %v10918_v17 = vpop.f32.mrf.mxu0  ;;  %11294 = vmatprep.subr.bf16.mxu0 %v16166_v21  ;;  %v16206_v45 = vld [vmem:[%s21920_s3 + $0x14d0] ss:$28 sps:$4 sm:$0xff]   ;;  %v16203_v21 = vld [vmem:[%s21920_s3 + $0xe78] ss:$28 sps:$4 sm:$0xff]  }
 0x485   :  { %v20570_v62 = vadd.f32 %v10957_v2, %v10917_v18  ;;  %v10919_v52 = vadd.f32 %v10918_v17, %v20374_v7  ;;  %v10959_v10 = vpop.f32.mrf.mxu1  ;;  %11197 = vmatprep.subr.bf16.mxu1 %v16163_v46  ;;  %v16167_v7 = vld [vmem:[%s21920_s3 + $0x8c8] ss:$28 sps:$4 sm:$0xff]   ;;  %v16214_v46 = vld [vmem:[%s21920_s3 + $0x149c] ss:$28 sps:$4 sm:$0xff]  }
 0x486   :  { %v10920_v51 = vpop.f32.mrf.mxu0  ;;  %v16212_v18 = vld [vmem:[%s21920_s3 + $0x1498] ss:$28 sps:$4 sm:$0xff]   ;;  %v16209_v2 = vld [vmem:[%s21920_s3 + $0xe40] ss:$28 sps:$4 sm:$0xff]   ;;  %v16217_v17 = vld [vmem:[%s21920_s3 + $0xe0c] ss:$28 sps:$4 sm:$0xff]  }
 0x487   :  { %v20576_v20 = vadd.f32 %v10959_v10, %v10919_v52  ;;  %v10961_v0 = vpop.f32.mrf.mxu1  ;;  %11295 = vmatpush1.bf16.msra.mxu0 %v16164_v12  ;;  %v16220_v12 = vld [vmem:[%s21920_s3 + $0x1464] ss:$28 sps:$4 sm:$0xff]   ;;  %v16226_v52 = vld [vmem:[%s21920_s3 + $0x142c] ss:$28 sps:$4 sm:$0xff]   ;;  %v16223_v10 = vld [vmem:[%s21920_s3 + $0x1154] ss:$28 sps:$4 sm:$0xff]  }
 0x488   :  { %11198 = vmatpush2.bf16.msra.mxu1 %v16161_v58  ;;  %v10921_v61 = vpop.f32.mrf.mxu0  ;;  %11296 = vmatprep.subr.bf16.mxu0 %v16172_v37  ;;  %v16218_v58 = vld [vmem:[%s21920_s3 + $0x1460] ss:$28 sps:$4 sm:$0xff]   ;;  %v16215_v37 = vld [vmem:[%s21920_s3 + $0xe08] ss:$28 sps:$4 sm:$0xff]   ;;  %v16221_v51 = vld [vmem:[%s21920_s3 + $0x1150] ss:$28 sps:$4 sm:$0xff]  }
 0x489   :  { %v10962_v54 = vpop.f32.mrf.mxu1  ;;  %11199 = vmatprep.subr.bf16.mxu1 %v16169_v60  ;;  %v16224_v60 = vld [vmem:[%s21920_s3 + $0x1428] ss:$28 sps:$4 sm:$0xff]   ;;  %v16232_v0 = vld [vmem:[%s21920_s3 + $0x13f4] ss:$28 sps:$4 sm:$0xff]  }
 0x48a   :  { %v16230_v61 = vld [vmem:[%s21920_s3 + $0x13f0] ss:$28 sps:$4 sm:$0xff]   ;;  %v16235_v54 = vld [vmem:[%s21920_s3 + $0x10e4] ss:$28 sps:$4 sm:$0xff]  }
 0x48b   :  { %11297 = vmatpush1.bf16.msra.mxu0 %v16170_v55  ;;  %v16229_v55 = vld [vmem:[%s21920_s3 + $0x111c] ss:$28 sps:$4 sm:$0xff]  }
 0x48c   :  { %11200 = vmatpush2.bf16.msra.mxu1 %v16167_v7  ;;  %11298 = vmatprep.subr.bf16.mxu0 %v16178_v9  ;;  %v16227_v7 = vld [vmem:[%s21920_s3 + $0x1118] ss:$28 sps:$4 sm:$0xff]  }
 0x48d   :  { %11251 = vmatprep.subr.bf16.mxu1 %v16175_v22  ;;  %v16238_v9 = vld [vmem:[%s21920_s3 + $0x13bc] ss:$28 sps:$4 sm:$0xff]  }
 0x48e   :  { %v16236_v22 = vld [vmem:[%s21920_s3 + $0x13b8] ss:$28 sps:$4 sm:$0xff]  }
 0x48f   :  { %11202 = vmatmul.mubr.bf16.vlgmr.msra.gmra.mxu1 %v19917_v47  ;;  %11299 = vmatpush1.bf16.msra.mxu0 %v16176_v6  ;;  %v16233_v6 = vld [vmem:[%s21920_s3 + $0x10e0] ss:$28 sps:$4 sm:$0xff]  }
 0x490   :  { %11252 = vmatpush1.bf16.msra.mxu1 %v16173_v8  ;;  %11283 = vmatprep.mubr.bf16.mxu1 %v19930_v53  ;;  %v16244_v8 = vld [vmem:[%s21920_s3 + $0x1384] ss:$28 sps:$4 sm:$0xff]  }
 0x491   :  { %11253 = vmatprep.subr.bf16.mxu1 %v16181_v13  ;;  %11300 = vmatprep.subr.bf16.mxu0 %v16184_v14  ;;  %v16241_v13 = vld [vmem:[%s21920_s3 + $0x10ac] ss:$28 sps:$4 sm:$0xff]   ;;  %v16242_v14 = vld [vmem:[%s21920_s3 + $0x1380] ss:$28 sps:$4 sm:$0xff]  }
 0x493   :  { %11301 = vmatpush1.bf16.msra.mxu0 %v16182_v49  ;;  %v16239_v49 = vld [vmem:[%s21920_s3 + $0x10a8] ss:$28 sps:$4 sm:$0xff]  }
 0x494   :  { %11254 = vmatpush1.bf16.msra.mxu1 %v16179_v36  ;;  %11302 = vmatprep.subr.bf16.mxu0 %v16190_v25  ;;  %v16250_v36 = vld [vmem:[%s21920_s3 + $0x134c] ss:$28 sps:$4 sm:$0xff]   ;;  %v16247_v25 = vld [vmem:[%s21920_s3 + $0x1074] ss:$28 sps:$4 sm:$0xff]  }
 0x495   :  { %11255 = vmatprep.subr.bf16.mxu1 %v16187_v27  ;;  %v16248_v27 = vld [vmem:[%s21920_s3 + $0x1348] ss:$28 sps:$4 sm:$0xff]  }
 0x497   :  { %11303 = vmatpush1.bf16.msra.mxu0 %v16188_v29  ;;  %v16245_v29 = vld [vmem:[%s21920_s3 + $0x1070] ss:$28 sps:$4 sm:$0xff]  }
 0x498   :  { %11256 = vmatpush1.bf16.msra.mxu1 %v16185_v30  ;;  %11304 = vmatprep.subr.bf16.mxu0 %v16196_v33  ;;  %v16256_v30 = vld [vmem:[%s21920_s3 + $0x19c] ss:$28 sps:$4 sm:$0xff]  }
 0x499   :  { %11257 = vmatprep.subr.bf16.mxu1 %v16193_v31  ;;  %v16253_v33 = vld [vmem:[%s21920_s3 + $0x103c] ss:$28 sps:$4 sm:$0xff]  }
 0x49a   :  { %v16254_v31 = vld [vmem:[%s21920_s3 + $0x198] ss:$28 sps:$4 sm:$0xff]  }
 0x49b   :  { %11305 = vmatpush1.bf16.msra.mxu0 %v16194_v32  ;;  %v16251_v32 = vld [vmem:[%s21920_s3 + $0x1038] ss:$28 sps:$4 sm:$0xff]  }
 0x49c   :  { %11258 = vmatpush1.bf16.msra.mxu1 %v16191_v34  ;;  %11306 = vmatprep.subr.bf16.mxu0 %v16202_v50  ;;  %v16262_v34 = vld [vmem:[%s21920_s3 + $0x164] ss:$28 sps:$4 sm:$0xff]  }
 0x49d   :  { %11259 = vmatprep.subr.bf16.mxu1 %v16199_v38  ;;  %v16259_v50 = vld [vmem:[%s21920_s3 + $0x1004] ss:$28 sps:$4 sm:$0xff]  }
 0x49f   :  { %11307 = vmatpush1.bf16.msra.mxu0 %v16200_v40 }
 0x4a0   :  { %11260 = vmatpush1.bf16.msra.mxu1 %v16197_v42  ;;  %11308 = vmatprep.subr.bf16.mxu0 %v16208_v44  ;;  %v16260_v44 = vld [vmem:[%s21920_s3 + $0x160] ss:$28 sps:$4 sm:$0xff]  }
 0x4a1   :  { %11261 = vmatprep.subr.bf16.mxu1 %v16205_v59 }
 0x4a3   :  { %11309 = vmatpush2.bf16.msra.mxu0 %v16206_v45  ;;  %v16257_v45 = vld [vmem:[%s21920_s3 + $0x1000] ss:$28 sps:$4 sm:$0xff]  }
 0x4a4   :  { %11262 = vmatpush1.bf16.msra.mxu1 %v16203_v21  ;;  %11310 = vmatprep.subr.bf16.mxu0 %v16214_v46  ;;  %v16268_v21 = vld [vmem:[%s21920_s3 + $0x12c] ss:$28 sps:$4 sm:$0xff]  }
 0x4a5   :  { %11263 = vmatprep.subr.bf16.mxu1 %v16211_v39 }
 0x4a7   :  { %11311 = vmatpush2.bf16.msra.mxu0 %v16212_v18  ;;  %v16265_v18 = vld [vmem:[%s21920_s3 + $0xfcc] ss:$28 sps:$4 sm:$0xff]  }
 0x4a8   :  { %11264 = vmatpush1.bf16.msra.mxu1 %v16209_v2  ;;  %11312 = vmatprep.subr.bf16.mxu0 %v16220_v12 }
 0x4a9   :  { %11265 = vmatprep.subr.bf16.mxu1 %v16217_v17 }
 0x4ab   :  { %11313 = vmatpush2.bf16.msra.mxu0 %v16218_v58  ;;  %v16266_v58 = vld [vmem:[%s21920_s3 + $0x128] ss:$28 sps:$4 sm:$0xff]  }
 0x4ac   :  { %11266 = vmatpush1.bf16.msra.mxu1 %v16215_v37  ;;  %11314 = vmatprep.subr.bf16.mxu0 %v16226_v52  ;;  %v16274_v52 = vld [vmem:[%s21920_s3 + $0xf4] ss:$28 sps:$4 sm:$0xff]  }
 0x4ad   :  { %11267 = vmatprep.subr.bf16.mxu1 %v16223_v10 }
 0x4af   :  { %11315 = vmatpush2.bf16.msra.mxu0 %v16224_v60  ;;  %v16271_v60 = vld [vmem:[%s21920_s3 + $0x1544] ss:$28 sps:$4 sm:$0xff]  }
 0x4b0   :  { %11268 = vmatpush2.bf16.msra.mxu1 %v16221_v51  ;;  %11316 = vmatprep.subr.bf16.mxu0 %v16232_v0  ;;  %v16272_v51 = vld [vmem:[%s21920_s3 + $0xf0] ss:$28 sps:$4 sm:$0xff]   ;;  %v16269_v0 = vld [vmem:[%s21920_s3 + $0x1540] ss:$28 sps:$4 sm:$0xff]  }
 0x4b1   :  { %11269 = vmatprep.subr.bf16.mxu1 %v16229_v55  ;;  %v16280_v55 = vld [vmem:[%s21920_s3 + $0xbc] ss:$28 sps:$4 sm:$0xff]  }
 0x4b3   :  { %11317 = vmatpush2.bf16.msra.mxu0 %v16230_v61  ;;  %v16277_v61 = vld [vmem:[%s21920_s3 + $0x150c] ss:$28 sps:$4 sm:$0xff]  }
 0x4b4   :  { %11270 = vmatpush2.bf16.msra.mxu1 %v16227_v7  ;;  %11318 = vmatprep.subr.bf16.mxu0 %v16238_v9  ;;  %v16278_v9 = vld [vmem:[%s21920_s3 + $0xb8] ss:$28 sps:$4 sm:$0xff]  }
 0x4b5   :  { %11271 = vmatprep.subr.bf16.mxu1 %v16235_v54 }
 0x4b7   :  { %11319 = vmatpush2.bf16.msra.mxu0 %v16236_v22  ;;  %v16275_v22 = vld [vmem:[%s21920_s3 + $0x1508] ss:$28 sps:$4 sm:$0xff]  }
 0x4b8   :  { %11272 = vmatpush2.bf16.msra.mxu1 %v16233_v6  ;;  %11320 = vmatprep.subr.bf16.mxu0 %v16244_v8  ;;  %v16283_v6 = vld [vmem:[%s21920_s3 + $0x84] ss:$28 sps:$4 sm:$0xff]  }
 0x4b9   :  { %11273 = vmatprep.subr.bf16.mxu1 %v16241_v13  ;;  %v16286_v13 = vld [vmem:[%s21920_s3 + $0x51c] ss:$28 sps:$4 sm:$0xff]  }
 0x4bb   :  { %11321 = vmatpush2.bf16.msra.mxu0 %v16242_v14 }
 0x4bc   :  { %11274 = vmatpush2.bf16.msra.mxu1 %v16239_v49  ;;  %11322 = vmatprep.subr.bf16.mxu0 %v16250_v36  ;;  %v16281_v36 = vld [vmem:[%s21920_s3 + $0x80] ss:$28 sps:$4 sm:$0xff]  }
 0x4bd   :  { %11275 = vmatprep.subr.bf16.mxu1 %v16247_v25  ;;  %v16284_v25 = vld [vmem:[%s21920_s3 + $0x518] ss:$28 sps:$4 sm:$0xff]  }
 0x4bf   :  { %11323 = vmatpush2.bf16.msra.mxu0 %v16248_v27 }
 0x4c0   :  { %11276 = vmatpush2.bf16.msra.mxu1 %v16245_v29  ;;  %11374 = vmatprep.subr.bf16.mxu0 %v16256_v30  ;;  %v16289_v29 = vld [vmem:[%s21920_s3 + $0x4c] ss:$28 sps:$4 sm:$0xff]   ;;  %v16292_v30 = vld [vmem:[%s21920_s3 + $0x4e4] ss:$28 sps:$4 sm:$0xff]  }
 0x4c1   :  { %11277 = vmatprep.subr.bf16.mxu1 %v16253_v33  ;;  %v16287_v33 = vld [vmem:[%s21920_s3 + $0x48] ss:$28 sps:$4 sm:$0xff]  }
 0x4c2   :  { %v10998_v38 = vpop.f32.mrf.mxu0  ;;  %11325 = vmatmul.mubr.bf16.vlgmr.msra.gmra.mxu0 %v20144_v56 }
 0x4c3   :  { %v10999_v40 = vadd.f32 %v10998_v38, %v20570_v62  ;;  %v11039_v42 = vpop.f32.mrf.mxu1  ;;  %11375 = vmatpush1.bf16.msra.mxu0 %v16254_v31  ;;  %11406 = vmatprep.mubr.bf16.mxu0 %v19493_v23  ;;  %v16290_v31 = vld [vmem:[%s21920_s3 + $0x4e0] ss:$28 sps:$4 sm:$0xff]   ;;  %v16296_v38 = vld [vmem:[%s21920_s3 + $0x4a8] ss:$28 sps:$4 sm:$0xff]  }
 0x4c4   :  { %11278 = vmatpush2.bf16.msra.mxu1 %v16251_v32  ;;  %v11000_v59 = vpop.f32.mrf.mxu0  ;;  %11376 = vmatprep.subr.bf16.mxu0 %v16262_v34  ;;  %v16295_v32 = vld [vmem:[%s21920_s3 + $0x14] ss:$28 sps:$4 sm:$0xff]   ;;  %v16298_v34 = vld [vmem:[%s21920_s3 + $0x4ac] ss:$28 sps:$4 sm:$0xff]  }
 0x4c5   :  { %v11040_v62 = vadd.f32 %v11039_v42, %v10999_v40  ;;  %v11001_v46 = vadd.f32 %v11000_v59, %v20576_v20  ;;  %v11041_v39 = vpop.f32.mrf.mxu1  ;;  %11279 = vmatprep.subr.bf16.mxu1 %v16259_v50  ;;  %v16263_v20 = vld [vmem:[%s21920_s3 + $0xfc8] ss:$28 sps:$4 sm:$0xff]   ;;  %v16293_v50 = vld [vmem:[%s21920_s3 + $0x10] ss:$28 sps:$4 sm:$0xff]   ;;  %v16301_v40 = vld [vmem:[%s21920_s3 + $0x35c] ss:$28 sps:$4 sm:$0xff]  }
 0x4c6   :  { %v11002_v2 = vpop.f32.mrf.mxu0  ;;  %v16304_v42 = vld [vmem:[%s21920_s3 + $0x474] ss:$28 sps:$4 sm:$0xff]  }
 0x4c7   :  { %v11042_v12 = vadd.f32 %v11041_v39, %v11001_v46  ;;  %v11043_v17 = vpop.f32.mrf.mxu1  ;;  %11377 = vmatpush1.bf16.msra.mxu0 %v16260_v44  ;;  %v16299_v44 = vld [vmem:[%s21920_s3 + $0x358] ss:$28 sps:$4 sm:$0xff]   ;;  %v16302_v59 = vld [vmem:[%s21920_s3 + $0x470] ss:$28 sps:$4 sm:$0xff]   ;;  %v16311_v2 = vld [vmem:[%s21920_s3 + $0x2e8] ss:$28 sps:$4 sm:$0xff]  }
 0x4c8   :  { %11280 = vmatpush2.bf16.msra.mxu1 %v16257_v45  ;;  %v11003_v37 = vpop.f32.mrf.mxu0  ;;  %11378 = vmatprep.subr.bf16.mxu0 %v16268_v21  ;;  %v16307_v45 = vld [vmem:[%s21920_s3 + $0x324] ss:$28 sps:$4 sm:$0xff]   ;;  %v16310_v21 = vld [vmem:[%s21920_s3 + $0x43c] ss:$28 sps:$4 sm:$0xff]   ;;  %v16313_v39 = vld [vmem:[%s21920_s3 + $0x2ec] ss:$28 sps:$4 sm:$0xff]  }
 0x4c9   :  { %v11044_v10 = vpop.f32.mrf.mxu1  ;;  %11281 = vmatprep.subr.bf16.mxu1 %v16265_v18  ;;  %v16308_v46 = vld [vmem:[%s21920_s3 + $0x438] ss:$28 sps:$4 sm:$0xff]   ;;  %v16316_v18 = vld [vmem:[%s21920_s3 + $0x404] ss:$28 sps:$4 sm:$0xff]   ;;  %v16317_v37 = vld [vmem:[%s21920_s3 + $0x2b0] ss:$28 sps:$4 sm:$0xff]  }
 0x4ca   :  { %v16319_v17 = vld [vmem:[%s21920_s3 + $0x2b4] ss:$28 sps:$4 sm:$0xff]  }
 0x4cb   :  { %11379 = vmatpush1.bf16.msra.mxu0 %v16266_v58  ;;  %v16322_v58 = vld [vmem:[%s21920_s3 + $0x3cc] ss:$28 sps:$4 sm:$0xff]   ;;  %v16328_v10 = vld [vmem:[%s21920_s3 + $0x394] ss:$28 sps:$4 sm:$0xff]  }
 0x4cc   :  { %11282 = vmatpush2.bf16.msra.mxu1 %v16263_v20  ;;  %11380 = vmatprep.subr.bf16.mxu0 %v16274_v52  ;;  %v16320_v20 = vld [vmem:[%s21920_s3 + $0x3c8] ss:$28 sps:$4 sm:$0xff]   ;;  %v16325_v52 = vld [vmem:[%s21920_s3 + $0x27c] ss:$28 sps:$4 sm:$0xff]  }
 0x4cd   :  { %11345 = vmatprep.subr.bf16.mxu1 %v16271_v60  ;;  %v16323_v60 = vld [vmem:[%s21920_s3 + $0x278] ss:$28 sps:$4 sm:$0xff]  }
 0x4cf   :  { %11284 = vmatmul.mubr.bf16.vlgmr.msra.gmra.mxu1 %v20139_v19  ;;  %v11080_v7 = vpop.f32.mrf.mxu1  ;;  %11381 = vmatpush1.bf16.msra.mxu0 %v16272_v51  ;;  %v16326_v51 = vld [vmem:[%s21920_s3 + $0x390] ss:$28 sps:$4 sm:$0xff]  }
 0x4d0   :  { %v20804_v54 = vadd.f32 %v11080_v7, %v11040_v62  ;;  %11346 = vmatpush1.bf16.msra.mxu1 %v16269_v0  ;;  %11382 = vmatprep.subr.bf16.mxu0 %v16280_v55  ;;  %v16305_v62 = vld [vmem:[%s21920_s3 + $0x320] ss:$28 sps:$4 sm:$0xff]   ;;  %v16332_v7 = vld [vmem:[%s21920_s3 + $0x6d8] ss:$28 sps:$4 sm:$0xff]  }
 0x4d1   :  { %v11082_v8 = vpop.f32.mrf.mxu1  ;;  %11347 = vmatprep.subr.bf16.mxu1 %v16277_v61  ;;  %11365 = vmatprep.mubr.bf16.mxu1 %v16738_v15  ;;  %v16331_v0 = vld [vmem:[%s21920_s3 + $0x244] ss:$28 sps:$4 sm:$0xff]   ;;  %v16334_v55 = vld [vmem:[%s21920_s3 + $0x6dc] ss:$28 sps:$4 sm:$0xff]  }
 0x4d2   :  { %v20816_v14 = vadd.f32 %v11082_v8, %v11042_v12  ;;  %v16314_v12 = vld [vmem:[%s21920_s3 + $0x400] ss:$28 sps:$4 sm:$0xff]  }
 0x4d3   :  { %v11084_v49 = vpop.f32.mrf.mxu1  ;;  %11383 = vmatpush1.bf16.msra.mxu0 %v16278_v9  ;;  %v16329_v61 = vld [vmem:[%s21920_s3 + $0x240] ss:$28 sps:$4 sm:$0xff]   ;;  %v16337_v9 = vld [vmem:[%s21920_s3 + $0x20c] ss:$28 sps:$4 sm:$0xff]  }
 0x4d4   :  { %11348 = vmatpush1.bf16.msra.mxu1 %v16275_v22  ;;  %11384 = vmatprep.subr.bf16.mxu0 %v16283_v6  ;;  %v16340_v22 = vld [vmem:[%s21920_s3 + $0x6a4] ss:$28 sps:$4 sm:$0xff]   ;;  %v16346_v49 = vld [vmem:[%s21920_s3 + $0x66c] ss:$28 sps:$4 sm:$0xff]  }
 0x4d5   :  { %v11085_v27 = vpop.f32.mrf.mxu1  ;;  %11415 = vmatprep.subr.bf16.mxu1 %v16286_v13  ;;  %v16335_v6 = vld [vmem:[%s21920_s3 + $0x208] ss:$28 sps:$4 sm:$0xff]   ;;  %v16338_v8 = vld [vmem:[%s21920_s3 + $0x6a0] ss:$28 sps:$4 sm:$0xff]   ;;  %v16343_v13 = vld [vmem:[%s21920_s3 + $0x1d4] ss:$28 sps:$4 sm:$0xff]  }
 0x4d6   :  { %v16352_v27 = vld [vmem:[%s21920_s3 + $0x89c] ss:$28 sps:$4 sm:$0xff]  }
 0x4d7   :  { %14090 = vmatmul.mubr.msk.bf16.vlgmr.msra.gmra.mxu1 %vm10796_vm0, %v20182_v41  ;;  %11385 = vmatpush1.bf16.msra.mxu0 %v16281_v36  ;;  %v16341_v36 = vld [vmem:[%s21920_s3 + $0x1d0] ss:$28 sps:$4 sm:$0xff]  }
 0x4d8   :  { %11416 = vmatpush1.bf16.msra.mxu1 %v16284_v25  ;;  %11447 = vmatprep.mubr.bf16.mxu1 %v19495_v24  ;;  %v16344_v25 = vld [vmem:[%s21920_s3 + $0x668] ss:$28 sps:$4 sm:$0xff]  }
 0x4d9   :  { %11386 = vmatprep.subr.bf16.mxu0 %v16289_v29  ;;  %11417 = vmatprep.subr.bf16.mxu1 %v16292_v30  ;;  %v16349_v29 = vld [vmem:[%s21920_s3 + $0x634] ss:$28 sps:$4 sm:$0xff]  }
 0x4da   :  { %v16350_v30 = vld [vmem:[%s21920_s3 + $0x898] ss:$28 sps:$4 sm:$0xff]  }
 0x4db   :  { %11387 = vmatpush1.bf16.msra.mxu0 %v16287_v33  ;;  %v16347_v33 = vld [vmem:[%s21920_s3 + $0x630] ss:$28 sps:$4 sm:$0xff]  }
 0x4dc   :  { %11418 = vmatpush1.bf16.msra.mxu1 %v16290_v31  ;;  %11388 = vmatprep.subr.bf16.mxu0 %v16295_v32  ;;  %v16358_v31 = vld [vmem:[%s21920_s3 + $0x864] ss:$28 sps:$4 sm:$0xff]   ;;  %v16355_v32 = vld [vmem:[%s21920_s3 + $0x5fc] ss:$28 sps:$4 sm:$0xff]  }
 0x4dd   :  { %11419 = vmatprep.subr.bf16.mxu1 %v16298_v34 }
 0x4df   :  { %11389 = vmatpush1.bf16.msra.mxu0 %v16293_v50  ;;  %v16356_v50 = vld [vmem:[%s21920_s3 + $0x860] ss:$28 sps:$4 sm:$0xff]  }
 0x4e0   :  { %11420 = vmatpush1.bf16.msra.mxu1 %v16296_v38  ;;  %11390 = vmatprep.subr.bf16.mxu0 %v16301_v40  ;;  %v16353_v40 = vld [vmem:[%s21920_s3 + $0x5f8] ss:$28 sps:$4 sm:$0xff]  }
 0x4e1   :  { %11421 = vmatprep.subr.bf16.mxu1 %v16304_v42  ;;  %v16364_v42 = vld [vmem:[%s21920_s3 + $0x82c] ss:$28 sps:$4 sm:$0xff]  }
 0x4e3   :  { %11391 = vmatpush2.bf16.msra.mxu0 %v16299_v44  ;;  %v16361_v44 = vld [vmem:[%s21920_s3 + $0x5c4] ss:$28 sps:$4 sm:$0xff]  }
 0x4e4   :  { %11422 = vmatpush1.bf16.msra.mxu1 %v16302_v59  ;;  %11392 = vmatprep.subr.bf16.mxu0 %v16307_v45  ;;  %v16362_v45 = vld [vmem:[%s21920_s3 + $0x828] ss:$28 sps:$4 sm:$0xff]  }
 0x4e5   :  { %11423 = vmatprep.subr.bf16.mxu1 %v16310_v21 }
 0x4e7   :  { %11393 = vmatpush2.bf16.msra.mxu0 %v16305_v62  ;;  %v16359_v62 = vld [vmem:[%s21920_s3 + $0x5c0] ss:$28 sps:$4 sm:$0xff]  }
 0x4e8   :  { %11424 = vmatpush1.bf16.msra.mxu1 %v16308_v46  ;;  %11394 = vmatprep.subr.bf16.mxu0 %v16313_v39  ;;  %v16370_v46 = vld [vmem:[%s21920_s3 + $0x7f4] ss:$28 sps:$4 sm:$0xff]   ;;  %v16367_v39 = vld [vmem:[%s21920_s3 + $0x58c] ss:$28 sps:$4 sm:$0xff]  }
 0x4e9   :  { %11425 = vmatprep.subr.bf16.mxu1 %v16316_v18  ;;  %v16368_v18 = vld [vmem:[%s21920_s3 + $0x7f0] ss:$28 sps:$4 sm:$0xff]  }
 0x4eb   :  { %11395 = vmatpush2.bf16.msra.mxu0 %v16311_v2  ;;  %v7244_v2 = vrot.slane %v20334_v16, %v18031_v48  ;;  %v16374_v48 = vld [vmem:[%s21920_s3 + $0x7b8] ss:$28 sps:$4 sm:$0xff]  }
 0x4ec   :  { %11426 = vmatpush1.bf16.msra.mxu1 %v16314_v12  ;;  %11396 = vmatprep.subr.bf16.mxu0 %v16319_v17  ;;  %v16365_v12 = vld [vmem:[%s21920_s3 + $0x588] ss:$28 sps:$4 sm:$0xff]   ;;  %v16376_v17 = vld [vmem:[%s21920_s3 + $0x7bc] ss:$28 sps:$4 sm:$0xff]  }
 0x4ed   :  { %11427 = vmatprep.subr.bf16.mxu1 %v16322_v58  ;;  %v16373_v58 = vld [vmem:[%s21920_s3 + $0x554] ss:$28 sps:$4 sm:$0xff]  }
 0x4ef   :  { %11397 = vmatpush2.bf16.msra.mxu0 %v16317_v37  ;;  %v7248_v37 = vrot.slane %v20334_v16, %v18046_v57  ;;  %v16382_v57 = vld [vmem:[%s21920_s3 + $0xc1c] ss:$28 sps:$4 sm:$0xff]  }
 0x4f0   :  { %11428 = vmatpush1.bf16.msra.mxu1 %v16320_v20  ;;  %11398 = vmatprep.subr.bf16.mxu0 %v16325_v52 }
 0x4f1   :  { %11429 = vmatprep.subr.bf16.mxu1 %v16328_v10  ;;  %v16371_v10 = vld [vmem:[%s21920_s3 + $0x550] ss:$28 sps:$4 sm:$0xff]  }
 0x4f3   :  { %11399 = vmatpush2.bf16.msra.mxu0 %v16323_v60  ;;  %v16379_v60 = vld [vmem:[%s21920_s3 + $0x784] ss:$28 sps:$4 sm:$0xff]  }
 0x4f4   :  { %11430 = vmatpush1.bf16.msra.mxu1 %v16326_v51  ;;  %11400 = vmatprep.subr.bf16.mxu0 %v16331_v0 }
 0x4f5   :  { %11431 = vmatprep.subr.bf16.mxu1 %v16334_v55 }
 0x4f7   :  { %11401 = vmatpush2.bf16.msra.mxu0 %v16329_v61  ;;  %v16377_v61 = vld [vmem:[%s21920_s3 + $0x780] ss:$28 sps:$4 sm:$0xff]  }
 0x4f8   :  { %11432 = vmatpush2.bf16.msra.mxu1 %v16332_v7  ;;  %11402 = vmatprep.subr.bf16.mxu0 %v16337_v9  ;;  %v16380_v7 = vld [vmem:[%s21920_s3 + $0xc18] ss:$28 sps:$4 sm:$0xff]  }
 0x4f9   :  { %11433 = vmatprep.subr.bf16.mxu1 %v16340_v22 }
 0x4fb   :  { %11403 = vmatpush2.bf16.msra.mxu0 %v16335_v6  ;;  %v16385_v6 = vld [vmem:[%s21920_s3 + $0x74c] ss:$28 sps:$4 sm:$0xff]  }
 0x4fc   :  { %11434 = vmatpush2.bf16.msra.mxu1 %v16338_v8  ;;  %11404 = vmatprep.subr.bf16.mxu0 %v16343_v13  ;;  %v16388_v8 = vld [vmem:[%s21920_s3 + $0xbe4] ss:$28 sps:$4 sm:$0xff]  }
 0x4fd   :  { %11435 = vmatprep.subr.bf16.mxu1 %v16346_v49  ;;  %v16383_v13 = vld [vmem:[%s21920_s3 + $0x748] ss:$28 sps:$4 sm:$0xff]   ;;  %v16386_v49 = vld [vmem:[%s21920_s3 + $0xbe0] ss:$28 sps:$4 sm:$0xff]  }
 0x4ff   :  { %11405 = vmatpush2.bf16.msra.mxu0 %v16341_v36  ;;  %v16391_v36 = vld [vmem:[%s21920_s3 + $0x714] ss:$28 sps:$4 sm:$0xff]  }
 0x500   :  { %11436 = vmatpush2.bf16.msra.mxu1 %v16344_v25  ;;  %11456 = vmatprep.subr.bf16.mxu0 %v16352_v27  ;;  %v16394_v25 = vld [vmem:[%s21920_s3 + $0xbac] ss:$28 sps:$4 sm:$0xff]  }
 0x501   :  { %11437 = vmatprep.subr.bf16.mxu1 %v16349_v29  ;;  %v16389_v27 = vld [vmem:[%s21920_s3 + $0x710] ss:$28 sps:$4 sm:$0xff]   ;;  %v16392_v29 = vld [vmem:[%s21920_s3 + $0xba8] ss:$28 sps:$4 sm:$0xff]  }
 0x502   :  { %v11162_v34 = vpop.f32.mrf.mxu0  ;;  %11407 = vmatmul.mubr.bf16.vlgmr.msra.gmra.mxu0 %v19707_v63 }
 0x503   :  { %11457 = vmatpush1.bf16.msra.mxu0 %v16350_v30  ;;  %11488 = vmatprep.mubr.bf16.mxu0 %v19717_v4  ;;  %v16397_v30 = vld [vmem:[%s21920_s3 + $0xa5c] ss:$28 sps:$4 sm:$0xff]  }
 0x504   :  { %11438 = vmatpush2.bf16.msra.mxu1 %v16347_v33  ;;  %v11164_v38 = vpop.f32.mrf.mxu0  ;;  %11458 = vmatprep.subr.bf16.mxu0 %v16358_v31  ;;  %v16400_v33 = vld [vmem:[%s21920_s3 + $0xb74] ss:$28 sps:$4 sm:$0xff]  }
 0x505   :  { %11439 = vmatprep.subr.bf16.mxu1 %v16355_v32  ;;  %v16395_v31 = vld [vmem:[%s21920_s3 + $0xa58] ss:$28 sps:$4 sm:$0xff]   ;;  %v16398_v32 = vld [vmem:[%s21920_s3 + $0xb70] ss:$28 sps:$4 sm:$0xff]  }
 0x506   :  { %v11166_v59 = vpop.f32.mrf.mxu0 }
 0x507   :  { %11459 = vmatpush1.bf16.msra.mxu0 %v16356_v50  ;;  %v16406_v50 = vld [vmem:[%s21920_s3 + $0xb3c] ss:$28 sps:$4 sm:$0xff]   ;;  %v16407_v59 = vld [vmem:[%s21920_s3 + $0x9e8] ss:$28 sps:$4 sm:$0xff]  }
 0x508   :  { %11440 = vmatpush2.bf16.msra.mxu1 %v16353_v40  ;;  %v11167_v21 = vpop.f32.mrf.mxu0  ;;  %11460 = vmatprep.subr.bf16.mxu0 %v16364_v42  ;;  %v16404_v40 = vld [vmem:[%s21920_s3 + $0xb38] ss:$28 sps:$4 sm:$0xff]   ;;  %v16409_v42 = vld [vmem:[%s21920_s3 + $0x9ec] ss:$28 sps:$4 sm:$0xff]  }
 0x509   :  { %11441 = vmatprep.subr.bf16.mxu1 %v16361_v44  ;;  %v16412_v44 = vld [vmem:[%s21920_s3 + $0xb04] ss:$28 sps:$4 sm:$0xff]   ;;  %v16415_v21 = vld [vmem:[%s21920_s3 + $0x9b4] ss:$28 sps:$4 sm:$0xff]  }
 0x50b   :  { %11461 = vmatpush1.bf16.msra.mxu0 %v16362_v45  ;;  %v16410_v45 = vld [vmem:[%s21920_s3 + $0xb00] ss:$28 sps:$4 sm:$0xff]  }
 0x50c   :  { %11442 = vmatpush2.bf16.msra.mxu1 %v16359_v62  ;;  %11462 = vmatprep.subr.bf16.mxu0 %v16370_v46  ;;  %v16418_v62 = vld [vmem:[%s21920_s3 + $0xacc] ss:$28 sps:$4 sm:$0xff]  }
 0x50d   :  { %11443 = vmatprep.subr.bf16.mxu1 %v16367_v39  ;;  %v16413_v46 = vld [vmem:[%s21920_s3 + $0x9b0] ss:$28 sps:$4 sm:$0xff]   ;;  %v16416_v39 = vld [vmem:[%s21920_s3 + $0xac8] ss:$28 sps:$4 sm:$0xff]  }
 0x50f   :  { %v11121_v20 = vpop.f32.mrf.mxu1  ;;  %11463 = vmatpush1.bf16.msra.mxu0 %v16368_v18  ;;  %v16421_v18 = vld [vmem:[%s21920_s3 + $0x97c] ss:$28 sps:$4 sm:$0xff]  }
 0x510   :  { %v11122_v52 = vadd.f32 %v11121_v20, %v7244_v2  ;;  %11444 = vmatpush2.bf16.msra.mxu1 %v16365_v12  ;;  %11464 = vmatprep.subr.bf16.mxu0 %v16376_v17  ;;  %v16424_v2 = vld [vmem:[%s21920_s3 + $0xa94] ss:$28 sps:$4 sm:$0xff]   ;;  %v16425_v20 = vld [vmem:[%s21920_s3 + $0x940] ss:$28 sps:$4 sm:$0xff]  }
 0x511   :  { %v11123_v51 = vpop.f32.mrf.mxu1  ;;  %11445 = vmatprep.subr.bf16.mxu1 %v16373_v58  ;;  %v16419_v12 = vld [vmem:[%s21920_s3 + $0x978] ss:$28 sps:$4 sm:$0xff]   ;;  %v16422_v17 = vld [vmem:[%s21920_s3 + $0xa90] ss:$28 sps:$4 sm:$0xff]   ;;  %v16427_v58 = vld [vmem:[%s21920_s3 + $0x944] ss:$28 sps:$4 sm:$0xff]  }
 0x512   :  { %v11124_v16 = vadd.f32 %v11123_v51, %v7248_v37  ;;  %v21019_v0 = vadd.f32 %v11162_v34, %v11122_v52  ;;  %v16403_v34 = vld [vmem:[%s21920_s3 + $0xa24] ss:$28 sps:$4 sm:$0xff]   ;;  %v16430_v37 = vld [vmem:[%s21920_s3 + $0xddc] ss:$28 sps:$4 sm:$0xff]   ;;  %v16433_v52 = vld [vmem:[%s21920_s3 + $0x90c] ss:$28 sps:$4 sm:$0xff]  }
 0x513   :  { %v11125_v55 = vpop.f32.mrf.mxu1  ;;  %11465 = vmatpush1.bf16.msra.mxu0 %v16374_v48  ;;  %v16428_v48 = vld [vmem:[%s21920_s3 + $0xdd8] ss:$28 sps:$4 sm:$0xff]   ;;  %v16434_v51 = vld [vmem:[%s21920_s3 + $0xda0] ss:$28 sps:$4 sm:$0xff]  }
 0x514   :  { %11446 = vmatpush2.bf16.msra.mxu1 %v16371_v10  ;;  %11466 = vmatprep.subr.bf16.mxu0 %v16379_v60  ;;  %v21027_v9 = vadd.f32 %v11164_v38, %v11124_v16  ;;  %v16401_v38 = vld [vmem:[%s21920_s3 + $0xa20] ss:$28 sps:$4 sm:$0xff]   ;;  %v16431_v60 = vld [vmem:[%s21920_s3 + $0x908] ss:$28 sps:$4 sm:$0xff]   ;;  %v16437_v55 = vld [vmem:[%s21920_s3 + $0x8d0] ss:$28 sps:$4 sm:$0xff]  }
 0x515   :  { %v11126_v22 = vpop.f32.mrf.mxu1  ;;  %11497 = vmatprep.subr.bf16.mxu1 %v16382_v57  ;;  %v16436_v10 = vld [vmem:[%s21920_s3 + $0xda4] ss:$28 sps:$4 sm:$0xff]   ;;  %v16439_v57 = vld [vmem:[%s21920_s3 + $0x8d4] ss:$28 sps:$4 sm:$0xff]   ;;  %v16442_v16 = vld [vmem:[%s21920_s3 + $0xd6c] ss:$28 sps:$4 sm:$0xff]  }
 0x516   :  { %v16445_v22 = vld [vmem:[%s21920_s3 + $0xd34] ss:$28 sps:$4 sm:$0xff]  }
 0x517   :  { %11448 = vmatmul.mubr.bf16.vlgmr.msra.gmra.mxu1 %v19712_v3  ;;  %11467 = vmatpush1.bf16.msra.mxu0 %v16377_v61  ;;  %v16440_v61 = vld [vmem:[%s21920_s3 + $0xd68] ss:$28 sps:$4 sm:$0xff]  }
 0x518   :  { %11498 = vmatpush1.bf16.msra.mxu1 %v16380_v7  ;;  %11529 = vmatprep.mubr.bf16.mxu1 %v19726_v28  ;;  %v16448_v7 = vld [vmem:[%s21920_s3 + $0xf9c] ss:$28 sps:$4 sm:$0xff]  }
 0x519   :  { %11468 = vmatprep.subr.bf16.mxu0 %v16385_v6  ;;  %11499 = vmatprep.subr.bf16.mxu1 %v16388_v8  ;;  %v16446_v6 = vld [vmem:[%s21920_s3 + $0xf98] ss:$28 sps:$4 sm:$0xff]   ;;  %v16443_v8 = vld [vmem:[%s21920_s3 + $0xd30] ss:$28 sps:$4 sm:$0xff]  }
 0x51b   :  { %11469 = vmatpush1.bf16.msra.mxu0 %v16383_v13  ;;  %v16454_v13 = vld [vmem:[%s21920_s3 + $0xf64] ss:$28 sps:$4 sm:$0xff]  }
 0x51c   :  { %11500 = vmatpush1.bf16.msra.mxu1 %v16386_v49  ;;  %11470 = vmatprep.subr.bf16.mxu0 %v16391_v36  ;;  %v16451_v49 = vld [vmem:[%s21920_s3 + $0xcfc] ss:$28 sps:$4 sm:$0xff]  }
 0x51d   :  { %11501 = vmatprep.subr.bf16.mxu1 %v16394_v25  ;;  %v16452_v25 = vld [vmem:[%s21920_s3 + $0xf60] ss:$28 sps:$4 sm:$0xff]  }
 0x51f   :  { %11471 = vmatpush1.bf16.msra.mxu0 %v16389_v27 }
 0x520   :  { %11502 = vmatpush1.bf16.msra.mxu1 %v16392_v29  ;;  %11472 = vmatprep.subr.bf16.mxu0 %v16397_v30  ;;  %v16449_v29 = vld [vmem:[%s21920_s3 + $0xcf8] ss:$28 sps:$4 sm:$0xff]   ;;  %v16460_v30 = vld [vmem:[%s21920_s3 + $0xf2c] ss:$28 sps:$4 sm:$0xff]  }
 0x521   :  { %11503 = vmatprep.subr.bf16.mxu1 %v16400_v33  ;;  %v16457_v33 = vld [vmem:[%s21920_s3 + $0xcc4] ss:$28 sps:$4 sm:$0xff]  }
 0x523   :  { %11473 = vmatpush2.bf16.msra.mxu0 %v16395_v31 }
 0x524   :  { %11504 = vmatpush1.bf16.msra.mxu1 %v16398_v32  ;;  %11474 = vmatprep.subr.bf16.mxu0 %v16403_v34  ;;  %v16458_v32 = vld [vmem:[%s21920_s3 + $0xf28] ss:$28 sps:$4 sm:$0xff]  }
 0x525   :  { %11505 = vmatprep.subr.bf16.mxu1 %v16406_v50  ;;  %v16455_v50 = vld [vmem:[%s21920_s3 + $0xcc0] ss:$28 sps:$4 sm:$0xff]  }
 0x527   :  { %11475 = vmatpush2.bf16.msra.mxu0 %v16401_v38  ;;  %v16466_v38 = vld [vmem:[%s21920_s3 + $0xef4] ss:$28 sps:$4 sm:$0xff]  }
 0x528   :  { %11506 = vmatpush1.bf16.msra.mxu1 %v16404_v40  ;;  %11476 = vmatprep.subr.bf16.mxu0 %v16409_v42  ;;  %v16463_v40 = vld [vmem:[%s21920_s3 + $0xc8c] ss:$28 sps:$4 sm:$0xff]  }
 0x529   :  { %11507 = vmatprep.subr.bf16.mxu1 %v16412_v44  ;;  %v16464_v42 = vld [vmem:[%s21920_s3 + $0xef0] ss:$28 sps:$4 sm:$0xff]   ;;  %v16461_v44 = vld [vmem:[%s21920_s3 + $0xc88] ss:$28 sps:$4 sm:$0xff]  }
 0x52b   :  { %11477 = vmatpush2.bf16.msra.mxu0 %v16407_v59  ;;  %v16472_v59 = vld [vmem:[%s21920_s3 + $0xebc] ss:$28 sps:$4 sm:$0xff]  }
 0x52c   :  { %11508 = vmatpush1.bf16.msra.mxu1 %v16410_v45  ;;  %11478 = vmatprep.subr.bf16.mxu0 %v16415_v21  ;;  %v16469_v45 = vld [vmem:[%s21920_s3 + $0xc54] ss:$28 sps:$4 sm:$0xff]  }
 0x52d   :  { %11509 = vmatprep.subr.bf16.mxu1 %v16418_v62  ;;  %v16470_v62 = vld [vmem:[%s21920_s3 + $0xeb8] ss:$28 sps:$4 sm:$0xff]  }
 0x52f   :  { %11479 = vmatpush2.bf16.msra.mxu0 %v16413_v46 }
 0x530   :  { %11510 = vmatpush1.bf16.msra.mxu1 %v16416_v39  ;;  %11480 = vmatprep.subr.bf16.mxu0 %v16421_v18  ;;  %v16467_v39 = vld [vmem:[%s21920_s3 + $0xc50] ss:$28 sps:$4 sm:$0xff]   ;;  %v16475_v18 = vld [vmem:[%s21920_s3 + $0xe84] ss:$28 sps:$4 sm:$0xff]  }
 0x531   :  { %11511 = vmatprep.subr.bf16.mxu1 %v16424_v2 }
 0x533   :  { %11481 = vmatpush2.bf16.msra.mxu0 %v16419_v12  ;;  %v16478_v12 = vld [vmem:[%s21920_s3 + $0x131c] ss:$28 sps:$4 sm:$0xff]  }
 0x534   :  { %11512 = vmatpush1.bf16.msra.mxu1 %v16422_v17  ;;  %11482 = vmatprep.subr.bf16.mxu0 %v16427_v58 }
 0x535   :  { %11513 = vmatprep.subr.bf16.mxu1 %v16430_v37  ;;  %v16473_v37 = vld [vmem:[%s21920_s3 + $0xe80] ss:$28 sps:$4 sm:$0xff]  }
 0x537   :  { %11483 = vmatpush2.bf16.msra.mxu0 %v16425_v20  ;;  %v16476_v20 = vld [vmem:[%s21920_s3 + $0x1318] ss:$28 sps:$4 sm:$0xff]  }
 0x538   :  { %11514 = vmatpush2.bf16.msra.mxu1 %v16428_v48  ;;  %11484 = vmatprep.subr.bf16.mxu0 %v16433_v52 }
 0x539   :  { %11515 = vmatprep.subr.bf16.mxu1 %v16436_v10  ;;  %v16484_v10 = vld [vmem:[%s21920_s3 + $0x12e4] ss:$28 sps:$4 sm:$0xff]  }
 0x53b   :  { %11485 = vmatpush2.bf16.msra.mxu0 %v16431_v60  ;;  %v16479_v60 = vld [vmem:[%s21920_s3 + $0xe48] ss:$28 sps:$4 sm:$0xff]  }
 0x53c   :  { %11516 = vmatpush2.bf16.msra.mxu1 %v16434_v51  ;;  %11486 = vmatprep.subr.bf16.mxu0 %v16439_v57  ;;  %v16482_v51 = vld [vmem:[%s21920_s3 + $0x12e0] ss:$28 sps:$4 sm:$0xff]   ;;  %v16487_v57 = vld [vmem:[%s21920_s3 + $0xe14] ss:$28 sps:$4 sm:$0xff]  }
 0x53d   :  { %11517 = vmatprep.subr.bf16.mxu1 %v16442_v16  ;;  %v16490_v16 = vld [vmem:[%s21920_s3 + $0x12ac] ss:$28 sps:$4 sm:$0xff]  }
 0x53f   :  { %11487 = vmatpush2.bf16.msra.mxu0 %v16437_v55  ;;  %v16485_v55 = vld [vmem:[%s21920_s3 + $0xe10] ss:$28 sps:$4 sm:$0xff]  }
 0x540   :  { %11518 = vmatpush2.bf16.msra.mxu1 %v16440_v61  ;;  %11538 = vmatprep.subr.bf16.mxu0 %v16448_v7  ;;  %v16488_v61 = vld [vmem:[%s21920_s3 + $0x12a8] ss:$28 sps:$4 sm:$0xff]   ;;  %v16493_v7 = vld [vmem:[%s21920_s3 + $0x115c] ss:$28 sps:$4 sm:$0xff]  }
 0x541   :  { %11519 = vmatprep.subr.bf16.mxu1 %v16445_v22  ;;  %v16496_v22 = vld [vmem:[%s21920_s3 + $0x1274] ss:$28 sps:$4 sm:$0xff]  }
 0x542   :  { %v11244_v36 = vpop.f32.mrf.mxu0  ;;  %11489 = vmatmul.mubr.bf16.vlgmr.msra.gmra.mxu0 %v19917_v47 }
 0x543   :  { %11539 = vmatpush1.bf16.msra.mxu0 %v16446_v6  ;;  %11570 = vmatprep.mubr.bf16.mxu0 %v19930_v53  ;;  %v16491_v6 = vld [vmem:[%s21920_s3 + $0x1158] ss:$28 sps:$4 sm:$0xff]  }
 0x544   :  { %11520 = vmatpush2.bf16.msra.mxu1 %v16443_v8  ;;  %v11246_v27 = vpop.f32.mrf.mxu0  ;;  %11540 = vmatprep.subr.bf16.mxu0 %v16454_v13  ;;  %v16494_v8 = vld [vmem:[%s21920_s3 + $0x1270] ss:$28 sps:$4 sm:$0xff]   ;;  %v16499_v13 = vld [vmem:[%s21920_s3 + $0x1124] ss:$28 sps:$4 sm:$0xff]  }
 0x545   :  { %11521 = vmatprep.subr.bf16.mxu1 %v16451_v49  ;;  %v16502_v49 = vld [vmem:[%s21920_s3 + $0x123c] ss:$28 sps:$4 sm:$0xff]  }
 0x546   :  { %v11248_v31 = vpop.f32.mrf.mxu0 }
 0x547   :  { %11541 = vmatpush1.bf16.msra.mxu0 %v16452_v25  ;;  %v16500_v25 = vld [vmem:[%s21920_s3 + $0x1238] ss:$28 sps:$4 sm:$0xff]  }
 0x548   :  { %11522 = vmatpush2.bf16.msra.mxu1 %v16449_v29  ;;  %v11249_v34 = vpop.f32.mrf.mxu0  ;;  %11542 = vmatprep.subr.bf16.mxu0 %v16460_v30  ;;  %v16508_v29 = vld [vmem:[%s21920_s3 + $0x1204] ss:$28 sps:$4 sm:$0xff]   ;;  %v16511_v31 = vld [vmem:[%s21920_s3 + $0x10b4] ss:$28 sps:$4 sm:$0xff]  }
 0x549   :  { %11523 = vmatprep.subr.bf16.mxu1 %v16457_v33  ;;  %v16503_v30 = vld [vmem:[%s21920_s3 + $0x10e8] ss:$28 sps:$4 sm:$0xff]   ;;  %v16506_v33 = vld [vmem:[%s21920_s3 + $0x1200] ss:$28 sps:$4 sm:$0xff]   ;;  %v16509_v34 = vld [vmem:[%s21920_s3 + $0x10b0] ss:$28 sps:$4 sm:$0xff]  }
 0x54b   :  { %11543 = vmatpush1.bf16.msra.mxu0 %v16458_v32  ;;  %v16514_v32 = vld [vmem:[%s21920_s3 + $0x11cc] ss:$28 sps:$4 sm:$0xff]  }
 0x54c   :  { %11524 = vmatpush2.bf16.msra.mxu1 %v16455_v50  ;;  %11544 = vmatprep.subr.bf16.mxu0 %v16466_v38  ;;  %v16512_v50 = vld [vmem:[%s21920_s3 + $0x11c8] ss:$28 sps:$4 sm:$0xff]   ;;  %v16517_v38 = vld [vmem:[%s21920_s3 + $0x107c] ss:$28 sps:$4 sm:$0xff]  }
 0x54d   :  { %11525 = vmatprep.subr.bf16.mxu1 %v16463_v40  ;;  %v16520_v40 = vld [vmem:[%s21920_s3 + $0x1194] ss:$28 sps:$4 sm:$0xff]  }
 0x54f   :  { %v11203_v21 = vpop.f32.mrf.mxu1  ;;  %11545 = vmatpush1.bf16.msra.mxu0 %v16464_v42  ;;  %v16515_v42 = vld [vmem:[%s21920_s3 + $0x1078] ss:$28 sps:$4 sm:$0xff]  }
 0x550   :  { %v11204_v46 = vadd.f32 %v11203_v21, %v21019_v0  ;;  %11526 = vmatpush2.bf16.msra.mxu1 %v16461_v44  ;;  %11546 = vmatprep.subr.bf16.mxu0 %v16472_v59  ;;  %v16518_v44 = vld [vmem:[%s21920_s3 + $0x1190] ss:$28 sps:$4 sm:$0xff]   ;;  %v16523_v59 = vld [vmem:[%s21920_s3 + $0x1044] ss:$28 sps:$4 sm:$0xff]  }
 0x551   :  { %v11205_v2 = vpop.f32.mrf.mxu1  ;;  %11527 = vmatprep.subr.bf16.mxu1 %v16469_v45  ;;  %v16526_v45 = vld [vmem:[%s21920_s3 + $0x14dc] ss:$28 sps:$4 sm:$0xff]  }
 0x552   :  { %v11206_v17 = vadd.f32 %v11205_v2, %v21027_v9  ;;  %v21221_v58 = vadd.f32 %v11244_v36, %v11204_v46  ;;  %v16481_v9 = vld [vmem:[%s21920_s3 + $0xe4c] ss:$28 sps:$4 sm:$0xff]   ;;  %v16497_v36 = vld [vmem:[%s21920_s3 + $0x1120] ss:$28 sps:$4 sm:$0xff]  }
 0x553   :  { %v11207_v0 = vpop.f32.mrf.mxu1  ;;  %11547 = vmatpush1.bf16.msra.mxu0 %v16470_v62  ;;  %v16521_v21 = vld [vmem:[%s21920_s3 + $0x1040] ss:$28 sps:$4 sm:$0xff]   ;;  %v16524_v62 = vld [vmem:[%s21920_s3 + $0x14d8] ss:$28 sps:$4 sm:$0xff]   ;;  %v16529_v46 = vld [vmem:[%s21920_s3 + $0x100c] ss:$28 sps:$4 sm:$0xff]  }
 0x554   :  { %11528 = vmatpush2.bf16.msra.mxu1 %v16467_v39  ;;  %11548 = vmatprep.subr.bf16.mxu0 %v16475_v18  ;;  %v21229_v48 = vadd.f32 %v11246_v27, %v11206_v17  ;;  %v16505_v27 = vld [vmem:[%s21920_s3 + $0x10ec] ss:$28 sps:$4 sm:$0xff]   ;;  %v16532_v39 = vld [vmem:[%s21920_s3 + $0x14a4] ss:$28 sps:$4 sm:$0xff]  }
 0x555   :  { %v11208_v52 = vpop.f32.mrf.mxu1  ;;  %11579 = vmatprep.subr.bf16.mxu1 %v16478_v12  ;;  %v16527_v18 = vld [vmem:[%s21920_s3 + $0x1008] ss:$28 sps:$4 sm:$0xff]   ;;  %v16530_v2 = vld [vmem:[%s21920_s3 + $0x14a0] ss:$28 sps:$4 sm:$0xff]   ;;  %v16535_v12 = vld [vmem:[%s21920_s3 + $0xfd4] ss:$28 sps:$4 sm:$0xff]  }
 0x556   :  { %v16538_v17 = vld [vmem:[%s21920_s3 + $0x146c] ss:$28 sps:$4 sm:$0xff]   ;;  %v16541_v52 = vld [vmem:[%s21920_s3 + $0x1434] ss:$28 sps:$4 sm:$0xff]  }
 0x557   :  { %11530 = vmatmul.mubr.bf16.vlgmr.msra.gmra.mxu1 %v19922_v11  ;;  %11549 = vmatpush1.bf16.msra.mxu0 %v16473_v37  ;;  %v16533_v0 = vld [vmem:[%s21920_s3 + $0xfd0] ss:$28 sps:$4 sm:$0xff]   ;;  %v16536_v37 = vld [vmem:[%s21920_s3 + $0x1468] ss:$28 sps:$4 sm:$0xff]  }
 0x558   :  { %11580 = vmatpush1.bf16.msra.mxu1 %v16476_v20  ;;  %11611 = vmatprep.mubr.bf16.mxu1 %v19964_v26  ;;  %v16544_v20 = vld [vmem:[%s21920_s3 + $0x154c] ss:$28 sps:$4 sm:$0xff]  }
 0x559   :  { %11550 = vmatprep.subr.bf16.mxu0 %v16481_v9  ;;  %11581 = vmatprep.subr.bf16.mxu1 %v16484_v10  ;;  %v16542_v9 = vld [vmem:[%s21920_s3 + $0x1548] ss:$28 sps:$4 sm:$0xff]   ;;  %v16539_v10 = vld [vmem:[%s21920_s3 + $0x1430] ss:$28 sps:$4 sm:$0xff]  }
 0x55b   :  { %11551 = vmatpush1.bf16.msra.mxu0 %v16479_v60  ;;  %v16550_v60 = vld [vmem:[%s21920_s3 + $0x1514] ss:$28 sps:$4 sm:$0xff]  }
 0x55c   :  { %11582 = vmatpush1.bf16.msra.mxu1 %v16482_v51  ;;  %11552 = vmatprep.subr.bf16.mxu0 %v16487_v57  ;;  %v16547_v51 = vld [vmem:[%s21920_s3 + $0x13fc] ss:$28 sps:$4 sm:$0xff]  }
 0x55d   :  { %11583 = vmatprep.subr.bf16.mxu1 %v16490_v16  ;;  %v16548_v16 = vld [vmem:[%s21920_s3 + $0x1510] ss:$28 sps:$4 sm:$0xff]  }
 0x55f   :  { %11553 = vmatpush1.bf16.msra.mxu0 %v16485_v55 }
 0x560   :  { %11584 = vmatpush1.bf16.msra.mxu1 %v16488_v61  ;;  %11554 = vmatprep.subr.bf16.mxu0 %v16493_v7  ;;  %v16545_v61 = vld [vmem:[%s21920_s3 + $0x13f8] ss:$28 sps:$4 sm:$0xff]   ;;  %v16554_v7 = vld [vmem:[%s21920_s3 + $0x6e0] ss:$28 sps:$4 sm:$0xff]  }
 0x561   :  { %11585 = vmatprep.subr.bf16.mxu1 %v16496_v22  ;;  %v16553_v22 = vld [vmem:[%s21920_s3 + $0x13c4] ss:$28 sps:$4 sm:$0xff]  }
 0x563   :  { %11555 = vmatpush2.bf16.msra.mxu0 %v16491_v6 }
 0x564   :  { %11586 = vmatpush1.bf16.msra.mxu1 %v16494_v8  ;;  %11556 = vmatprep.subr.bf16.mxu0 %v16499_v13  ;;  %v16551_v13 = vld [vmem:[%s21920_s3 + $0x13c0] ss:$28 sps:$4 sm:$0xff]  }
 0x565   :  { %11587 = vmatprep.subr.bf16.mxu1 %v16502_v49  ;;  %v16559_v49 = vld [vmem:[%s21920_s3 + $0x6a8] ss:$28 sps:$4 sm:$0xff]  }
 0x567   :  { %11557 = vmatpush2.bf16.msra.mxu0 %v16497_v36  ;;  %v16558_v36 = vld [vmem:[%s21920_s3 + $0x138c] ss:$28 sps:$4 sm:$0xff]  }
 0x568   :  { %11588 = vmatpush1.bf16.msra.mxu1 %v16500_v25  ;;  %11558 = vmatprep.subr.bf16.mxu0 %v16505_v27  ;;  %v16560_v25 = vld [vmem:[%s21920_s3 + $0x4e8] ss:$28 sps:$4 sm:$0xff]  }
 0x569   :  { %11589 = vmatprep.subr.bf16.mxu1 %v16508_v29  ;;  %v16556_v27 = vld [vmem:[%s21920_s3 + $0x1388] ss:$28 sps:$4 sm:$0xff]   ;;  %v16564_v29 = vld [vmem:[%s21920_s3 + $0x670] ss:$28 sps:$4 sm:$0xff]  }
 0x56b   :  { %11559 = vmatpush2.bf16.msra.mxu0 %v16503_v30  ;;  %v16563_v30 = vld [vmem:[%s21920_s3 + $0x1354] ss:$28 sps:$4 sm:$0xff]  }
 0x56c   :  { %11590 = vmatpush1.bf16.msra.mxu1 %v16506_v33  ;;  %11560 = vmatprep.subr.bf16.mxu0 %v16511_v31  ;;  %v16565_v33 = vld [vmem:[%s21920_s3 + $0x4b0] ss:$28 sps:$4 sm:$0xff]  }
 0x56d   :  { %11591 = vmatprep.subr.bf16.mxu1 %v16514_v32  ;;  %v16561_v32 = vld [vmem:[%s21920_s3 + $0x1350] ss:$28 sps:$4 sm:$0xff]  }
 0x56f   :  { %11561 = vmatpush2.bf16.msra.mxu0 %v16509_v34  ;;  %v16567_v34 = vld [vmem:[%s21920_s3 + $0x638] ss:$28 sps:$4 sm:$0xff]  }
 0x570   :  { %11592 = vmatpush1.bf16.msra.mxu1 %v16512_v50  ;;  %11562 = vmatprep.subr.bf16.mxu0 %v16517_v38  ;;  %v16566_v38 = vld [vmem:[%s21920_s3 + $0x360] ss:$28 sps:$4 sm:$0xff]  }
 0x571   :  { %11593 = vmatprep.subr.bf16.mxu1 %v16520_v40 }
 0x573   :  { %11563 = vmatpush2.bf16.msra.mxu0 %v16515_v42 }
 0x574   :  { %11594 = vmatpush1.bf16.msra.mxu1 %v16518_v44  ;;  %11564 = vmatprep.subr.bf16.mxu0 %v16523_v59  ;;  %v16569_v44 = vld [vmem:[%s21920_s3 + $0x478] ss:$28 sps:$4 sm:$0xff]   ;;  %v16568_v59 = vld [vmem:[%s21920_s3 + $0x1a0] ss:$28 sps:$4 sm:$0xff]  }
 0x575   :  { %11595 = vmatprep.subr.bf16.mxu1 %v16526_v45 }
 0x577   :  { %11565 = vmatpush2.bf16.msra.mxu0 %v16521_v21 }
 0x578   :  { %11596 = vmatpush2.bf16.msra.mxu1 %v16524_v62  ;;  %11566 = vmatprep.subr.bf16.mxu0 %v16529_v46  ;;  %v16571_v62 = vld [vmem:[%s21920_s3 + $0x600] ss:$28 sps:$4 sm:$0xff]  }
 0x579   :  { %11597 = vmatprep.subr.bf16.mxu1 %v16532_v39  ;;  %v16573_v39 = vld [vmem:[%s21920_s3 + $0x440] ss:$28 sps:$4 sm:$0xff]  }
 0x57b   :  { %11567 = vmatpush2.bf16.msra.mxu0 %v16527_v18 }
 0x57c   :  { %11598 = vmatpush2.bf16.msra.mxu1 %v16530_v2  ;;  %11568 = vmatprep.subr.bf16.mxu0 %v16535_v12  ;;  %v16572_v2 = vld [vmem:[%s21920_s3 + $0x168] ss:$28 sps:$4 sm:$0xff]  }
 0x57d   :  { %11599 = vmatprep.subr.bf16.mxu1 %v16538_v17  ;;  %v16575_v12 = vld [vmem:[%s21920_s3 + $0x5c8] ss:$28 sps:$4 sm:$0xff]  }
 0x57f   :  { %11569 = vmatpush2.bf16.msra.mxu0 %v16533_v0  ;;  %v16574_v0 = vld [vmem:[%s21920_s3 + $0x2f0] ss:$28 sps:$4 sm:$0xff]  }
 0x580   :  { %11600 = vmatpush2.bf16.msra.mxu1 %v16536_v37  ;;  %11632 = vmatprep.subr.bf16.mxu0 %v16544_v20 }
 0x581   :  { %11601 = vmatprep.subr.bf16.mxu1 %v16541_v52  ;;  %v16576_v52 = vld [vmem:[%s21920_s3 + $0x130] ss:$28 sps:$4 sm:$0xff]  }
 0x582   :  { %v11326_v57 = vpop.f32.mrf.mxu0  ;;  %11571 = vmatmul.mubr.bf16.vlgmr.msra.gmra.mxu0 %v20139_v19 }
 0x583   :  { %11633 = vmatpush1.bf16.msra.mxu0 %v16542_v9  ;;  %11652 = vmatprep.mubr.bf16.mxu0 %v16738_v15  ;;  %v16555_v15 = vld [vmem:[%s21920_s3 + $0x520] ss:$28 sps:$4 sm:$0xff]   ;;  %v16579_v9 = vld [vmem:[%s21920_s3 + $0x590] ss:$28 sps:$4 sm:$0xff]  }
 0x584   :  { %11602 = vmatpush2.bf16.msra.mxu1 %v16539_v10  ;;  %v11328_v55 = vpop.f32.mrf.mxu0  ;;  %11634 = vmatprep.subr.bf16.mxu0 %v16550_v60  ;;  %v16578_v60 = vld [vmem:[%s21920_s3 + $0x2b8] ss:$28 sps:$4 sm:$0xff]  }
 0x585   :  { %11603 = vmatprep.subr.bf16.mxu1 %v16547_v51  ;;  %v16581_v51 = vld [vmem:[%s21920_s3 + $0x3d0] ss:$28 sps:$4 sm:$0xff]  }
 0x586   :  { %v11330_v6 = vpop.f32.mrf.mxu0 }
 0x587   :  { %11635 = vmatpush1.bf16.msra.mxu0 %v16548_v16  ;;  %v16583_v16 = vld [vmem:[%s21920_s3 + $0x558] ss:$28 sps:$4 sm:$0xff]   ;;  %v16586_v6 = vld [vmem:[%s21920_s3 + $0x248] ss:$28 sps:$4 sm:$0xff]  }
 0x588   :  { %11604 = vmatpush2.bf16.msra.mxu1 %v16545_v61  ;;  %v11331_v8 = vpop.f32.mrf.mxu0  ;;  %14257 = vmatprep.subr.bf16.mxu0 %v16554_v7  ;;  %v16585_v61 = vld [vmem:[%s21920_s3 + $0x398] ss:$28 sps:$4 sm:$0xff]   ;;  %v16584_v7 = vld [vmem:[%s21920_s3 + $0xc0] ss:$28 sps:$4 sm:$0xff]  }
 0x589   :  { %11605 = vmatprep.subr.bf16.mxu1 %v16553_v22  ;;  %v16587_v22 = vld [vmem:[%s21920_s3 + $0xde0] ss:$28 sps:$4 sm:$0xff]   ;;  %v16588_v8 = vld [vmem:[%s21920_s3 + $0x88] ss:$28 sps:$4 sm:$0xff]  }
 0x58a   :  { %14091 = vmatmul.mubr.msk.bf16.vlgmr.msra.gmra.mxu0 %vm10796_vm0, %v20182_v41 }
 0x58b   :  { %14258 = vmatpush3.bf16.msra.mxu0 %v16555_v15  ;;  %11733 = vmatprep.mubr.bf16.mxu0 %v19495_v24  ;;  %v16589_v15 = vld [vmem:[%s21920_s3 + $0xc20] ss:$28 sps:$4 sm:$0xff]  }
 0x58c   :  { %11606 = vmatpush2.bf16.msra.mxu1 %v16551_v13  ;;  %14259 = vmatprep.subr.bf16.mxu0 %v16559_v49  ;;  %v16591_v13 = vld [vmem:[%s21920_s3 + $0xda8] ss:$28 sps:$4 sm:$0xff]   ;;  %v16590_v49 = vld [vmem:[%s21920_s3 + $0x210] ss:$28 sps:$4 sm:$0xff]  }
 0x58d   :  { %11607 = vmatprep.subr.bf16.mxu1 %v16558_v36  ;;  %v16593_v36 = vld [vmem:[%s21920_s3 + $0xbe8] ss:$28 sps:$4 sm:$0xff]  }
 0x58f   :  { %v11285_v24 = vpop.f32.mrf.mxu1  ;;  %14260 = vmatpush3.bf16.msra.mxu0 %v16560_v25  ;;  %v16592_v25 = vld [vmem:[%s21920_s3 + $0x50] ss:$28 sps:$4 sm:$0xff]  }
 0x590   :  { %v11286_v31 = vadd.f32 %v11285_v24, %v21221_v58  ;;  %11608 = vmatpush2.bf16.msra.mxu1 %v16556_v27  ;;  %14261 = vmatprep.subr.bf16.mxu0 %v16564_v29  ;;  %v16595_v27 = vld [vmem:[%s21920_s3 + $0xd70] ss:$28 sps:$4 sm:$0xff]   ;;  %v16596_v29 = vld [vmem:[%s21920_s3 + $0x18] ss:$28 sps:$4 sm:$0xff]   ;;  %v16598_v24 = vld [vmem:[%s21920_s3 + $0xa60] ss:$28 sps:$4 sm:$0xff]  }
 0x591   :  { %v11287_v50 = vpop.f32.mrf.mxu1  ;;  %11609 = vmatprep.subr.bf16.mxu1 %v16563_v30  ;;  %v16599_v30 = vld [vmem:[%s21920_s3 + $0xd38] ss:$28 sps:$4 sm:$0xff]  }
 0x592   :  { %v11288_v40 = vadd.f32 %v11287_v50, %v21229_v48  ;;  %v11327_v42 = vadd.f32 %v11326_v57, %v11286_v31  ;;  %v16570_v48 = vld [vmem:[%s21920_s3 + $0x328] ss:$28 sps:$4 sm:$0xff]   ;;  %v16580_v57 = vld [vmem:[%s21920_s3 + $0xf8] ss:$28 sps:$4 sm:$0xff]   ;;  %v16600_v31 = vld [vmem:[%s21920_s3 + $0x8a0] ss:$28 sps:$4 sm:$0xff]  }
 0x593   :  { %v11289_v58 = vpop.f32.mrf.mxu1  ;;  %14262 = vmatpush3.bf16.msra.mxu0 %v16565_v33  ;;  %v16601_v33 = vld [vmem:[%s21920_s3 + $0xb78] ss:$28 sps:$4 sm:$0xff]   ;;  %v16605_v50 = vld [vmem:[%s21920_s3 + $0xb40] ss:$28 sps:$4 sm:$0xff]  }
 0x594   :  { %11610 = vmatpush2.bf16.msra.mxu1 %v16561_v32  ;;  %14263 = vmatprep.subr.bf16.mxu0 %v16567_v34  ;;  %v11329_v45 = vadd.f32 %v11328_v55, %v11288_v40  ;;  %v16582_v55 = vld [vmem:[%s21920_s3 + $0x280] ss:$28 sps:$4 sm:$0xff]   ;;  %v16602_v32 = vld [vmem:[%s21920_s3 + $0xa28] ss:$28 sps:$4 sm:$0xff]   ;;  %v16611_v58 = vld [vmem:[%s21920_s3 + $0xc90] ss:$28 sps:$4 sm:$0xff]  }
 0x595   :  { %v11290_v21 = vpop.f32.mrf.mxu1  ;;  %14235 = vmatprep.subr.bf16.mxu1 %v16566_v38  ;;  %v16603_v34 = vld [vmem:[%s21920_s3 + $0xd00] ss:$28 sps:$4 sm:$0xff]   ;;  %v16604_v38 = vld [vmem:[%s21920_s3 + $0x868] ss:$28 sps:$4 sm:$0xff]  }
 0x596   :  { %v16607_v40 = vld [vmem:[%s21920_s3 + $0xcc8] ss:$28 sps:$4 sm:$0xff]   ;;  %v16615_v21 = vld [vmem:[%s21920_s3 + $0xc58] ss:$28 sps:$4 sm:$0xff]  }
 0x597   :  { %v11367_v46 = vpop.f32.mrf.mxu1  ;;  %11612 = vmatmul.mubr.bf16.vlgmr.msra.gmra.mxu1 %v20144_v56  ;;  %14264 = vmatpush3.bf16.msra.mxu0 %v16569_v44  ;;  %v16610_v44 = vld [vmem:[%s21920_s3 + $0x9b8] ss:$28 sps:$4 sm:$0xff]  }
 0x598   :  { %v21442_v18 = vadd.f32 %v11367_v46, %v11327_v42  ;;  %14236 = vmatpush3.bf16.msra.mxu1 %v16568_v59  ;;  %11693 = vmatprep.mubr.bf16.mxu1 %v19493_v23  ;;  %v16577_v23 = vld [vmem:[%s21920_s3 + $0x408] ss:$28 sps:$4 sm:$0xff]   ;;  %v16613_v59 = vld [vmem:[%s21920_s3 + $0xad0] ss:$28 sps:$4 sm:$0xff]   ;;  %v16617_v46 = vld [vmem:[%s21920_s3 + $0xa98] ss:$28 sps:$4 sm:$0xff]  }
 0x599   :  { %v11369_v17 = vpop.f32.mrf.mxu1  ;;  %14237 = vmatprep.subr.bf16.mxu1 %v16570_v48  ;;  %14265 = vmatprep.subr.bf16.mxu0 %v16571_v62  ;;  %v16609_v42 = vld [vmem:[%s21920_s3 + $0xb08] ss:$28 sps:$4 sm:$0xff]   ;;  %v16614_v48 = vld [vmem:[%s21920_s3 + $0x980] ss:$28 sps:$4 sm:$0xff]  }
 0x59a   :  { %v21454_v37 = vadd.f32 %v11369_v17, %v11329_v45  ;;  %v16612_v45 = vld [vmem:[%s21920_s3 + $0x7f8] ss:$28 sps:$4 sm:$0xff]   ;;  %v16618_v17 = vld [vmem:[%s21920_s3 + $0x948] ss:$28 sps:$4 sm:$0xff]  }
 0x59b   :  { %v11371_v20 = vpop.f32.mrf.mxu1  ;;  %14266 = vmatpush3.bf16.msra.mxu0 %v16573_v39 }
 0x59c   :  { %14238 = vmatpush3.bf16.msra.mxu1 %v16572_v2  ;;  %14267 = vmatprep.subr.bf16.mxu0 %v16575_v12  ;;  %v16616_v2 = vld [vmem:[%s21920_s3 + $0x7c0] ss:$28 sps:$4 sm:$0xff]  }
 0x59d   :  { %v11372_v10 = vpop.f32.mrf.mxu1  ;;  %14239 = vmatprep.subr.bf16.mxu1 %v16574_v0  ;;  %v16619_v12 = vld [vmem:[%s21920_s3 + $0x14e0] ss:$28 sps:$4 sm:$0xff]  }
 0x59e   :  { %v16621_v20 = vld [vmem:[%s21920_s3 + $0x1320] ss:$28 sps:$4 sm:$0xff]   ;;  %v16622_v10 = vld [vmem:[%s21920_s3 + $0x910] ss:$28 sps:$4 sm:$0xff]  }
 0x59f   :  { %14268 = vmatpush3.bf16.msra.mxu0 %v16577_v23 }
 0x5a0   :  { %14240 = vmatpush3.bf16.msra.mxu1 %v16576_v52  ;;  %14269 = vmatprep.subr.bf16.mxu0 %v16579_v9  ;;  %v16620_v52 = vld [vmem:[%s21920_s3 + $0x788] ss:$28 sps:$4 sm:$0xff]  }
 0x5a1   :  { %14241 = vmatprep.subr.bf16.mxu1 %v16578_v60  ;;  %v16623_v9 = vld [vmem:[%s21920_s3 + $0x14a8] ss:$28 sps:$4 sm:$0xff]  }
 0x5a2   :  { %v16625_v60 = vld [vmem:[%s21920_s3 + $0x12e8] ss:$28 sps:$4 sm:$0xff]  }
 0x5a3   :  { %14270 = vmatpush3.bf16.msra.mxu0 %v16581_v51  ;;  %v16624_v51 = vld [vmem:[%s21920_s3 + $0x750] ss:$28 sps:$4 sm:$0xff]  }
 0x5a4   :  { %14242 = vmatpush3.bf16.msra.mxu1 %v16580_v57  ;;  %14271 = vmatprep.subr.bf16.mxu0 %v16583_v16  ;;  %v16627_v57 = vld [vmem:[%s21920_s3 + $0x1470] ss:$28 sps:$4 sm:$0xff]   ;;  %v16628_v16 = vld [vmem:[%s21920_s3 + $0x718] ss:$28 sps:$4 sm:$0xff]  }
 0x5a5   :  { %14243 = vmatprep.subr.bf16.mxu1 %v16582_v55  ;;  %v16631_v55 = vld [vmem:[%s21920_s3 + $0x1438] ss:$28 sps:$4 sm:$0xff]  }
 0x5a7   :  { %14272 = vmatpush3.bf16.msra.mxu0 %v16585_v61  ;;  %v16630_v61 = vld [vmem:[%s21920_s3 + $0x1160] ss:$28 sps:$4 sm:$0xff]  }
 0x5a8   :  { %14244 = vmatpush3.bf16.msra.mxu1 %v16584_v7  ;;  %14301 = vmatprep.subr.bf16.mxu0 %v16587_v22  ;;  %v21633_v7 = vld [vmem:[%s21921_s4] sm:$0x7f] }
 0x5a9   :  { %14245 = vmatprep.subr.bf16.mxu1 %v16586_v6  ;;  %v7252_v22 = vrot.slane %v21633_v7, %v18444_v1  ;;  %v16633_v6 = vld [vmem:[%s21920_s3 + $0x1278] ss:$28 sps:$4 sm:$0xff]   ;;  %v16634_v1 = vld [vmem:[%s21920_s3 + $0x1128] ss:$28 sps:$4 sm:$0xff]  }
 0x5aa   :  { %11734 = vmatmul.mubr.bf16.vlgmr.msra.gmra.mxu0 %v19712_v3  ;;  %v16594_v3 = vld [vmem:[%s21920_s3 + $0x1d8] ss:$28 sps:$4 sm:$0xff]  }
 0x5ab   :  { %14302 = vmatpush3.bf16.msra.mxu0 %v16589_v15  ;;  %11813 = vmatprep.mubr.bf16.mxu0 %v19726_v28  ;;  %v16597_v28 = vld [vmem:[%s21920_s3 + $0xbb0] ss:$28 sps:$4 sm:$0xff]   ;;  %v7256_v15 = vrot.slane %v21633_v7, %v1010_v5  ;;  %v16637_v5 = vld [vmem:[%s21920_s3 + $0x1240] ss:$28 sps:$4 sm:$0xff]  }
 0x5ac   :  { %14246 = vmatpush3.bf16.msra.mxu1 %v16588_v8  ;;  %14303 = vmatprep.subr.bf16.mxu0 %v16591_v13  ;;  %v16632_v8 = vld [vmem:[%s21920_s3 + $0xfa0] ss:$28 sps:$4 sm:$0xff]  }
 0x5ad   :  { %14247 = vmatprep.subr.bf16.mxu1 %v16590_v49  ;;  %v16635_v13 = vld [vmem:[%s21920_s3 + $0x1400] ss:$28 sps:$4 sm:$0xff]  }
 0x5af   :  { %14304 = vmatpush3.bf16.msra.mxu0 %v16593_v36 }
 0x5b0   :  { %14248 = vmatpush3.bf16.msra.mxu1 %v16592_v25  ;;  %14305 = vmatprep.subr.bf16.mxu0 %v16595_v27 }
 0x5b1   :  { %14249 = vmatprep.subr.bf16.mxu1 %v16594_v3  ;;  %v16636_v3 = vld [vmem:[%s21920_s3 + $0xf68] ss:$28 sps:$4 sm:$0xff]  }
 0x5b3   :  { %14306 = vmatpush3.bf16.msra.mxu0 %v16597_v28  ;;  %v16639_v28 = vld [vmem:[%s21920_s3 + $0x13c8] ss:$28 sps:$4 sm:$0xff]  }
 0x5b4   :  { %14250 = vmatpush3.bf16.msra.mxu1 %v16596_v29  ;;  %14307 = vmatprep.subr.bf16.mxu0 %v16599_v30  ;;  %v16638_v29 = vld [vmem:[%s21920_s3 + $0x10f0] ss:$28 sps:$4 sm:$0xff]  }
 0x5b5   :  { %14279 = vmatprep.subr.bf16.mxu1 %v16598_v24 }
 0x5b7   :  { %11694 = vmatmul.mubr.bf16.vlgmr.msra.gmra.mxu1 %v19707_v63  ;;  %14308 = vmatpush3.bf16.msra.mxu0 %v16601_v33  ;;  %v16606_v63 = vld [vmem:[%s21920_s3 + $0x9f0] ss:$28 sps:$4 sm:$0xff]  }
 0x5b8   :  { %14280 = vmatpush3.bf16.msra.mxu1 %v16600_v31  ;;  %11773 = vmatprep.mubr.bf16.mxu1 %v19717_v4  ;;  %v16608_v4 = vld [vmem:[%s21920_s3 + $0x830] ss:$28 sps:$4 sm:$0xff]  }
 0x5b9   :  { %14281 = vmatprep.subr.bf16.mxu1 %v16602_v32  ;;  %14309 = vmatprep.subr.bf16.mxu0 %v16603_v34  ;;  %v16640_v33 = vld [vmem:[%s21920_s3 + $0xf30] ss:$28 sps:$4 sm:$0xff]   ;;  %v16642_v34 = vld [vmem:[%s21920_s3 + $0x10b8] ss:$28 sps:$4 sm:$0xff]  }
 0x5ba   :  { %v16643_v31 = vld [vmem:[%s21920_s3 + $0x1390] ss:$28 sps:$4 sm:$0xff]  }
 0x5bb   :  { %14310 = vmatpush3.bf16.msra.mxu0 %v16605_v50  ;;  %v16645_v50 = vld [vmem:[%s21920_s3 + $0x11d0] ss:$28 sps:$4 sm:$0xff]  }
 0x5bc   :  { %14282 = vmatpush3.bf16.msra.mxu1 %v16604_v38  ;;  %14311 = vmatprep.subr.bf16.mxu0 %v16607_v40  ;;  %v16644_v38 = vld [vmem:[%s21920_s3 + $0xef8] ss:$28 sps:$4 sm:$0xff]  }
 0x5bd   :  { %14283 = vmatprep.subr.bf16.mxu1 %v16606_v63  ;;  %v16647_v40 = vld [vmem:[%s21920_s3 + $0x1358] ss:$28 sps:$4 sm:$0xff]   ;;  %v16646_v63 = vld [vmem:[%s21920_s3 + $0x1080] ss:$28 sps:$4 sm:$0xff]  }
 0x5bf   :  { %14312 = vmatpush3.bf16.msra.mxu0 %v16609_v42  ;;  %v16649_v42 = vld [vmem:[%s21920_s3 + $0x1198] ss:$28 sps:$4 sm:$0xff]  }
 0x5c0   :  { %14284 = vmatpush3.bf16.msra.mxu1 %v16608_v4  ;;  %14313 = vmatprep.subr.bf16.mxu0 %v16611_v58  ;;  %v16648_v4 = vld [vmem:[%s21920_s3 + $0xec0] ss:$28 sps:$4 sm:$0xff]  }
 0x5c1   :  { %14285 = vmatprep.subr.bf16.mxu1 %v16610_v44  ;;  %v16651_v58 = vld [vmem:[%s21922_s5 + $0x78] sm:$0xff]   ;;  %v11942_v44 = vmax.f32 %v20816_v14, 0.0  ;;  %v16655_v14 = vld [vmem:[%s21922_s5 + $0x70] sm:$0xff]  }
 0x5c2   :  { %v11408_v62 = vpop.f32.mrf.mxu0 }
 0x5c3   :  { %14314 = vmatpush3.bf16.msra.mxu0 %v16613_v59  ;;  %v11409_v49 = vadd.f32 %v11408_v62, %v7252_v22  ;;  %v16650_v59 = vld [vmem:[%s21920_s3 + $0x1048] ss:$28 sps:$4 sm:$0xff]   ;;  %v16654_v62 = vld [vmem:[%s21920_s3 + $0x1010] ss:$28 sps:$4 sm:$0xff]  }
 0x5c4   :  { %14286 = vmatpush3.bf16.msra.mxu1 %v16612_v45  ;;  %v11410_v39 = vpop.f32.mrf.mxu0  ;;  %14315 = vmatprep.subr.bf16.mxu0 %v16615_v21  ;;  %v16653_v45 = vld [vmem:[%s21922_s5 + $0x38] sm:$0xff]   ;;  %v16652_v21 = vld [vmem:[%s21920_s3 + $0xe88] ss:$28 sps:$4 sm:$0xff]   ;;  %v16675_v22 = vld [vmem:[%s21922_s5 + $0xb0] sm:$0xff]  }
 0x5c5   :  { %14287 = vmatprep.subr.bf16.mxu1 %v16614_v48  ;;  %v11411_v25 = vadd.f32 %v11410_v39, %v7256_v15  ;;  %v11949_v48 = vpack.c.bf16 %v11942_v44, %v11942_v44  ;;  %v16656_v39 = vld [vmem:[%s21920_s3 + $0xe50] ss:$28 sps:$4 sm:$0xff]  }
 0x5c6   :  { %v11412_v0 = vpop.f32.mrf.mxu0 }
 0x5c7   :  { %14316 = vmatpush3.bf16.msra.mxu0 %v16617_v46  ;;  %v16657_v46 = vld [vmem:[%s21922_s5 + $0x30] sm:$0xff]   ;;  %v16662_v0 = vld [vmem:[%s21922_s5 + $0x60] sm:$0xff]  }
 0x5c8   :  { %14288 = vmatpush3.bf16.msra.mxu1 %v16616_v2  ;;  %v11413_v23 = vpop.f32.mrf.mxu0  ;;  %14345 = vmatprep.subr.bf16.mxu0 %v16619_v12  ;;  %v16659_v2 = vld [vmem:[%s21922_s5 + $0x68] sm:$0xff]  }
 0x5c9   :  { %14289 = vmatprep.subr.bf16.mxu1 %v16618_v17  ;;  %v16661_v12 = vld [vmem:[%s21922_s5 + $0x28] sm:$0xff]   ;;  %v16660_v17 = vld [vmem:[%s21920_s3 + $0xe18] ss:$28 sps:$4 sm:$0xff]  }
 0x5ca   :  { %11814 = vmatmul.mubr.bf16.vlgmr.msra.gmra.mxu0 %v19922_v11  ;;  %v16626_v11 = vld [vmem:[%s21920_s3 + $0x8d8] ss:$28 sps:$4 sm:$0xff]   ;;  %v16663_v23 = vld [vmem:[%s21920_s3 + $0x1550] ss:$28 sps:$4 sm:$0xff]  }
 0x5cb   :  { %14346 = vmatpush3.bf16.msra.mxu0 %v16621_v20  ;;  %11893 = vmatprep.mubr.bf16.mxu0 %v19964_v26  ;;  %v16629_v26 = vld [vmem:[%s21920_s3 + $0x12b0] ss:$28 sps:$4 sm:$0xff]   ;;  %v16664_v20 = vld [vmem:[%s21922_s5 + $0x20] sm:$0xff]  }
 0x5cc   :  { %14290 = vmatpush3.bf16.msra.mxu1 %v16620_v52  ;;  %14347 = vmatprep.subr.bf16.mxu0 %v16623_v9  ;;  %v16665_v52 = vld [vmem:[%s21922_s5 + $0x58] sm:$0xff]   ;;  %v16739_v9 = vmov 0.0  }
 0x5cd   :  { %14291 = vmatprep.subr.bf16.mxu1 %v16622_v10  ;;  %v16667_v10 = vld [vmem:[%s21922_s5 + $0x18] sm:$0xff]  }
 0x5cf   :  { %14348 = vmatpush3.bf16.msra.mxu0 %v16625_v60  ;;  %v16666_v60 = vld [vmem:[%s21920_s3 + $0x1518] ss:$28 sps:$4 sm:$0xff]  }
 0x5d0   :  { %14292 = vmatpush3.bf16.msra.mxu1 %v16624_v51  ;;  %14349 = vmatprep.subr.bf16.mxu0 %v16627_v57  ;;  %v16668_v51 = vld [vmem:[%s21922_s5 + $0x50] sm:$0xff]   ;;  %v11944_v57 = vmax.f32 %v21454_v37, 0.0 }
 0x5d1   :  { %14293 = vmatprep.subr.bf16.mxu1 %v16626_v11  ;;  %v16670_v11 = vld [vmem:[%s21922_s5 + $0x10] sm:$0xff]  }
 0x5d2   :  { %v16673_v37 = vld [vmem:[%s21922_s5 + $0xf0] sm:$0xff]  }
 0x5d3   :  { %14350 = vmatpush3.bf16.msra.mxu0 %v16629_v26  ;;  %v16671_v26 = vld [vmem:[%s21922_s5 + $0xb8] sm:$0xff]  }
 0x5d4   :  { %14294 = vmatpush3.bf16.msra.mxu1 %v16628_v16  ;;  %14351 = vmatprep.subr.bf16.mxu0 %v16631_v55  ;;  %v16672_v16 = vld [vmem:[%s21922_s5 + $0x48] sm:$0xff]   ;;  %v11951_v55 = vpack.c.bf16 %v11944_v57, %v11944_v57 }
 0x5d5   :  { %14323 = vmatprep.subr.bf16.mxu1 %v16630_v61  ;;  %v16674_v61 = vld [vmem:[%s21922_s5 + $0x8] sm:$0xff]  }
 0x5d7   :  { %v11449_v36 = vpop.f32.mrf.mxu1  ;;  %11774 = vmatmul.mubr.bf16.vlgmr.msra.gmra.mxu1 %v19917_v47  ;;  %14352 = vmatpush3.bf16.msra.mxu0 %v16633_v6  ;;  %v16676_v6 = vld [vmem:[%s21922_s5 + $0x40] sm:$0xff]  }
 0x5d8   :  { %v21656_v27 = vadd.f32 %v11449_v36, %v11409_v49  ;;  %14324 = vmatpush3.bf16.msra.mxu1 %v16632_v8  ;;  %11853 = vmatprep.mubr.bf16.mxu1 %v19930_v53  ;;  %v16641_v53 = vld [vmem:[%s21920_s3 + $0x1208] ss:$28 sps:$4 sm:$0xff]  }
 0x5d9   :  { %v11451_v47 = vpop.f32.mrf.mxu1  ;;  %14325 = vmatprep.subr.bf16.mxu1 %v16634_v1  ;;  %14353 = vmatprep.subr.bf16.mxu0 %v16635_v13  ;;  %v16678_v1 = vld [vmem:[%s21922_s5] sm:$0xff]   ;;  %v11941_v13 = vmax.f32 %v20804_v54, 0.0  ;;  %v16679_v36 = vld [vmem:[%s21922_s5 + $0xa8] sm:$0xff]  }
 0x5da   :  { %v21668_v30 = vadd.f32 %v11451_v47, %v11411_v25 }
 0x5db   :  { %v11453_v24 = vpop.f32.mrf.mxu1  ;;  %14354 = vmatpush3.bf16.msra.mxu0 %v16637_v5  ;;  %v16690_v5 = vld [vmem:[%s21922_s5 + $0x178] sm:$0xff]  }
 0x5dc   :  { %14326 = vmatpush3.bf16.msra.mxu1 %v16636_v3  ;;  %14355 = vmatprep.subr.bf16.mxu0 %v16639_v28  ;;  %v16691_v3 = vld [vmem:[%s21922_s5 + $0x138] sm:$0xff]   ;;  %v11948_v28 = vpack.c.bf16 %v11941_v13, %v11941_v13 }
 0x5dd   :  { %v11454_v32 = vpop.f32.mrf.mxu1  ;;  %14327 = vmatprep.subr.bf16.mxu1 %v16638_v29  ;;  %v16681_v29 = vld [vmem:[%s21922_s5 + $0xa0] sm:$0xff]   ;;  %v16682_v24 = vld [vmem:[%s21922_s5 + $0xd8] sm:$0xff]  }
 0x5de   :  { %v16684_v32 = vld [vmem:[%s21922_s5 + $0xd0] sm:$0xff]  }
 0x5df   :  { %14356 = vmatpush3.bf16.msra.mxu0 %v16641_v53  ;;  %v16693_v53 = vld [vmem:[%s21922_s5 + $0x130] sm:$0xff]  }
 0x5e0   :  { %14328 = vmatpush3.bf16.msra.mxu1 %v16640_v33  ;;  %14357 = vmatprep.subr.bf16.mxu0 %v16643_v31  ;;  %v16683_v33 = vld [vmem:[%s21922_s5 + $0x98] sm:$0xff]   ;;  %v16694_v31 = vld [vmem:[%s21922_s5 + $0x168] sm:$0xff]  }
 0x5e1   :  { %14329 = vmatprep.subr.bf16.mxu1 %v16642_v34  ;;  %v16695_v34 = vld [vmem:[%s21922_s5 + $0x128] sm:$0xff]  }
 0x5e3   :  { %14358 = vmatpush3.bf16.msra.mxu0 %v16645_v50  ;;  %v16685_v50 = vld [vmem:[%s21922_s5 + $0x90] sm:$0xff]  }
 0x5e4   :  { %14330 = vmatpush3.bf16.msra.mxu1 %v16644_v38  ;;  %14359 = vmatprep.subr.bf16.mxu0 %v16647_v40  ;;  %v16696_v38 = vld [vmem:[%s21922_s5 + $0x160] sm:$0xff]   ;;  %v16686_v40 = vld [vmem:[%s21922_s5 + $0xc8] sm:$0xff]  }
 0x5e5   :  { %14331 = vmatprep.subr.bf16.mxu1 %v16646_v63  ;;  %v16697_v63 = vld [vmem:[%s21922_s5 + $0x120] sm:$0xff]  }
 0x5e7   :  { %14360 = vmatpush3.bf16.msra.mxu0 %v16649_v42  ;;  %v16687_v42 = vld [vmem:[%s21922_s5 + $0x88] sm:$0xff]  }
 0x5e8   :  { %14332 = vmatpush3.bf16.msra.mxu1 %v16648_v4  ;;  %14370 = vmatprep.subr.bf16.mxu0 %v16651_v58  ;;  %v16698_v4 = vld [vmem:[%s21922_s5 + $0x158] sm:$0xff]   ;;  %v16688_v58 = vld [vmem:[%s21922_s5 + $0xc0] sm:$0xff]  }
 0x5e9   :  { %14333 = vmatprep.subr.bf16.mxu1 %v16650_v59  ;;  %v16699_v59 = vld [vmem:[%s21922_s5 + $0x118] sm:$0xff]  }
 0x5ea   :  { %11894 = vmatmul.mubr.bf16.vlgmr.msra.gmra.mxu0 %v20144_v56  ;;  %v16658_v56 = vld [vmem:[%s21920_s3 + $0xfd8] ss:$28 sps:$4 sm:$0xff]   ;;  %s16741_s3 = smov [#allocation2]  }
 0x5eb   :  { %14371 = vmatpush3.bf16.msra.mxu0 %v16653_v45  ;;  %12397 = vmatprep.mubr.bf16.mxu0 %v11949_v48  ;;  %v16689_v45 = vld [vmem:[%s21922_s5 + $0x80] sm:$0xff]   ;;  %s12563_s14 = sshll.u32 %s16741_s3, 4  ;;  %s12564_s14 = int_to_ptr.vmem [resolvable:$true] %s12563_s14 }
 0x5ec   :  { %14334 = vmatpush3.bf16.msra.mxu1 %v16652_v21  ;;  %14372 = vmatprep.subr.bf16.mxu0 %v16655_v14  ;;  %v16700_v21 = vld [vmem:[%s21922_s5 + $0x150] sm:$0xff]   ;;  %v11943_v14 = vmax.f32 %v21442_v18, 0.0  ;;  %v16703_v18 = vld [vmem:[%s21922_s5 + $0x108] sm:$0xff]   ;;  %s16715_s4 = scalar_lea.vmem %s12564_s14, 32  ;;  %p16720_p1 = scmp.lt.s32.totalorder %s12564_s14, %s12564_s14 }
 0x5ed   :  { %14335 = vmatprep.subr.bf16.mxu1 %v16654_v62  ;;  %p16716_p0 = scmp.ne.s32.totalorder %s12564_s14, %s16715_s4  ;;  %p16721_p2 = scmp.lt.s32.totalorder %s16715_s4, %s16715_s4 }
 0x5ef   :  { %14373 = vmatpush3.bf16.msra.mxu0 %v16657_v46  ;;  %v16701_v46 = vld [vmem:[%s21922_s5 + $0x110] sm:$0xff]   ;;  %p16722_p3 = por %p16721_p2, %p16720_p1 }
 0x5f0   :  { %14336 = vmatpush3.bf16.msra.mxu1 %v16656_v39  ;;  %14374 = vmatprep.subr.bf16.mxu0 %v16659_v2  ;;  %v16702_v39 = vld [vmem:[%s21922_s5 + $0x148] sm:$0xff]   ;;  %v11950_v2 = vpack.c.bf16 %v11943_v14, %v11943_v14 }
 0x5f1   :  { %14337 = vmatprep.subr.bf16.mxu1 %v16658_v56  ;;  %p16723_p4 = pnand %p16722_p3, %p16716_p0 }
 0x5f3   :  { %14375 = vmatpush3.bf16.msra.mxu0 %v16661_v12  ;;  %v16704_v12 = vld [vmem:[%s21922_s5 + $0x140] sm:$0xff]  }
 0x5f4   :  { %14338 = vmatpush3.bf16.msra.mxu1 %v16660_v17  ;;  %14376 = vmatprep.subr.bf16.mxu0 %v16662_v0  ;;  %v16705_v17 = vld [vmem:[%s21922_s5 + $0x100] sm:$0xff]   ;;  %v16706_v0 = vld [vmem:[%s21922_s5 + $0x188] sm:$0xff]  }
 0x5f5   :  { %14439 = vmatprep.subr.bf16.mxu1 %v16739_v9 }
 0x5f7   :  { %11854 = vmatmul.mubr.bf16.vlgmr.msra.gmra.mxu1 %v20139_v19  ;;  %14377 = vmatpush3.bf16.msra.mxu0 %v16664_v20  ;;  %v16669_v19 = vld [vmem:[%s21922_s5 + $0xf8] sm:$0xff]  }
 0x5f8   :  { %14440 = vmatpush3.bf16.msra.mxu1 %v16663_v23  ;;  %14378 = vmatprep.subr.bf16.mxu0 %v16665_v52  ;;  %v16707_v23 = vld [vmem:[%s21922_s5 + $0x180] sm:$0xff]  }
 0x5f9   :  { %14441 = vmatprep.subr.bf16.mxu1 %v16739_v9  ;;  %14443 = vmatprep.mubr.msk.bf16.mxu1 %vm16740_vm1, %v16739_v9 }
 0x5fb   :  { %14379 = vmatpush3.bf16.msra.mxu0 %v16667_v10 }
 0x5fc   :  { %14442 = vmatpush3.bf16.msra.mxu1 %v16666_v60  ;;  %14380 = vmatprep.subr.bf16.mxu0 %v16668_v51 }
 0x5fd   :  { %14392 = vmatprep.subr.bf16.mxu1 %v16669_v19 }
 0x5ff   :  { %14444 = vmatmul.mubr.msk.bf16.vlgmr.msra.gmra.mxu1 %vm10796_vm0, %v20182_v41  ;;  %14381 = vmatpush3.bf16.msra.mxu0 %v16670_v11  ;;  %v16677_v41 = vld [vmem:[%s21922_s5 + $0xe8] sm:$0xff]  }
 0x600   :  { %14393 = vmatpush3.bf16.msra.mxu1 %v16671_v26  ;;  %12437 = vmatprep.mubr.bf16.mxu1 %v11951_v55 }
 0x601   :  { %14382 = vmatprep.subr.bf16.mxu0 %v16672_v16  ;;  %14394 = vmatprep.subr.bf16.mxu1 %v16673_v37 }
 0x602   :  { %v11490_v15 = vpop.f32.mrf.mxu0 }
 0x603   :  { %v21795_v8 = vadd.f32 %v11490_v15, %v21656_v27  ;;  %14383 = vmatpush3.bf16.msra.mxu0 %v16674_v61  ;;  %v16680_v27 = vld [vmem:[%s21922_s5 + $0xe0] sm:$0xff]  }
 0x604   :  { %14395 = vmatpush3.bf16.msra.mxu1 %v16675_v22  ;;  %v11492_v49 = vpop.f32.mrf.mxu0  ;;  %14384 = vmatprep.subr.bf16.mxu0 %v16676_v6 }
 0x605   :  { %v21808_v25 = vadd.f32 %v11492_v49, %v21668_v30  ;;  %14396 = vmatprep.subr.bf16.mxu1 %v16677_v41  ;;  %v16692_v30 = vld [vmem:[%s21922_s5 + $0x170] sm:$0xff]  }
 0x606   :  { %v11494_v54 = vpop.f32.mrf.mxu0 }
 0x607   :  { %14385 = vmatpush3.bf16.msra.mxu0 %v16678_v1 }
 0x608   :  { %14397 = vmatpush3.bf16.msra.mxu1 %v16679_v36  ;;  %v11495_v47 = vpop.f32.mrf.mxu0  ;;  %14414 = vmatprep.subr.bf16.mxu0 %v16690_v5 }
 0x609   :  { %14398 = vmatprep.subr.bf16.mxu1 %v16680_v27 }
 0x60a   :  { %12398 = vmatmul.mubr.bf16.vlgmr.msra.gmra.mxu0 %v11948_v28 }
 0x60b   :  { %14415 = vmatpush3.bf16.msra.mxu0 %v16691_v3 }
 0x60c   :  { %14399 = vmatpush3.bf16.msra.mxu1 %v16681_v29  ;;  %14416 = vmatprep.subr.bf16.mxu0 %v16692_v30 }
 0x60d   :  { %14400 = vmatprep.subr.bf16.mxu1 %v16682_v24 }
 0x60f   :  { %14417 = vmatpush3.bf16.msra.mxu0 %v16693_v53 }
 0x610   :  { %14401 = vmatpush3.bf16.msra.mxu1 %v16683_v33  ;;  %14418 = vmatprep.subr.bf16.mxu0 %v16694_v31 }
 0x611   :  { %14402 = vmatprep.subr.bf16.mxu1 %v16684_v32 }
 0x613   :  { %14419 = vmatpush3.bf16.msra.mxu0 %v16695_v34 }
 0x614   :  { %14403 = vmatpush3.bf16.msra.mxu1 %v16685_v50  ;;  %14420 = vmatprep.subr.bf16.mxu0 %v16696_v38 }
 0x615   :  { %14404 = vmatprep.subr.bf16.mxu1 %v16686_v40 }
 0x617   :  { %v11531_v44 = vpop.f32.mrf.mxu1  ;;  %14421 = vmatpush3.bf16.msra.mxu0 %v16697_v63 }
 0x618   :  { %14405 = vmatpush3.bf16.msra.mxu1 %v16687_v42  ;;  %14422 = vmatprep.subr.bf16.mxu0 %v16698_v4  ;;  %v11532_v26 = vadd.f32 %v11531_v44, %v21795_v8  ;;  %v7260_v42 = vrot.slane %v21633_v7, %v1014_v35 }
 0x619   :  { %v11533_v48 = vpop.f32.mrf.mxu1  ;;  %14406 = vmatprep.subr.bf16.mxu1 %v16688_v58 }
 0x61a   :  { %v11534_v16 = vadd.f32 %v11533_v48, %v21808_v25 }
 0x61b   :  { %v11535_v62 = vpop.f32.mrf.mxu1  ;;  %14423 = vmatpush3.bf16.msra.mxu0 %v16699_v59 }
 0x61c   :  { %14407 = vmatpush3.bf16.msra.mxu1 %v16689_v45  ;;  %14424 = vmatprep.subr.bf16.mxu0 %v16700_v21 }
 0x61d   :  { %v11536_v56 = vpop.f32.mrf.mxu1  ;;  %14447 = vmatprep.subr.bf16.mxu1 %v16739_v9 }
 0x61f   :  { %12438 = vmatmul.mubr.bf16.vlgmr.msra.gmra.mxu1 %v11950_v2  ;;  %14425 = vmatpush3.bf16.msra.mxu0 %v16701_v46 }
 0x620   :  { %14426 = vmatprep.subr.bf16.mxu0 %v16702_v39  ;;  %14451 = vmatprep.mubr.msk.bf16.mxu1 %vm16740_vm1, %v16739_v9 }
 0x621   :  { %14448 = vmatpush3.bf16.msra.mxu1 %v16706_v0 }
 0x622   :  { %14449 = vmatprep.subr.bf16.mxu1 %v16739_v9 }
 0x623   :  { %14427 = vmatpush3.bf16.msra.mxu0 %v16703_v18 }
 0x624   :  { %14428 = vmatprep.subr.bf16.mxu0 %v16704_v12 }
 0x625   :  { %14450 = vmatpush3.bf16.msra.mxu1 %v16707_v23 }
 0x627   :  { %14429 = vmatpush3.bf16.msra.mxu0 %v16705_v17 }
 0x642   :  { %v11572_v20 = vpop.f32.mrf.mxu0 }
 0x643   :  { %v11573_v37 = vadd.f32 %v11572_v20, %v11532_v26 }
 0x644   :  { %v11574_v52 = vpop.f32.mrf.mxu0 }
 0x645   :  { %v11575_v9 = vadd.f32 %v11574_v52, %v11534_v16  ;;  %v14093_v16 = vld [vmem:[%s21923_s6] ss:$0 sm:$0xff] }
 0x646   :  { %v11576_v10 = vpop.f32.mrf.mxu0 }
 0x648   :  { %v11577_v60 = vpop.f32.mrf.mxu0 }
 0x64a   :  { %v11654_v51 = vpop.f32.mrf.mxu0 }
 0x64c   :  { %v11656_v19 = vpop.f32.mrf.mxu0 }
 0x64e   :  { %v11658_v57 = vpop.f32.mrf.mxu0 }
 0x650   :  { %v11659_v11 = vpop.f32.mrf.mxu0 }
 0x657   :  { %v11613_v55 = vpop.f32.mrf.mxu1 }
 0x658   :  { %v11614_v61 = vadd.f32 %v11613_v55, %v11573_v37 }
 0x659   :  { %v11615_v22 = vpop.f32.mrf.mxu1 }
 0x65a   :  { %v11655_v6 = vadd.f32 %v11654_v51, %v11614_v61  ;;  %v11616_v41 = vadd.f32 %v11615_v22, %v11575_v9 }
 0x65b   :  { %v11617_v15 = vpop.f32.mrf.mxu1 }
 0x65c   :  { %v11657_v1 = vadd.f32 %v11656_v19, %v11616_v41  ;;  %v11945_v13 = vmax.f32 %v11655_v6, 0.0 }
 0x65d   :  { %v11618_v49 = vpop.f32.mrf.mxu1 }
 0x65e   :  { %v11946_v36 = vmax.f32 %v11657_v1, 0.0  ;;  %v11952_v27 = vpack.c.bf16 %v11945_v13, %v11945_v13 }
 0x660   :  { %v11953_v5 = vpack.c.bf16 %v11946_v36, %v11946_v36 }
 0x662   :  { %12477 = vmatprep.mubr.bf16.mxu0 %v11953_v5 }
 0x663   :  { %12478 = vmatmul.mubr.bf16.vlgmr.msra.gmra.mxu0 %v11952_v27 }
 0x66a   :  { %v14273_v54 = vpop.f32.mrf.mxu0 }
 0x66c   :  { %v14274_v8 = vpop.f32.mrf.mxu0 }
 0x66d   :  { %v14275_v3 = vadd.f32 %v14274_v8, %v14273_v54 }
 0x66e   :  { %v14276_v25 = vpop.f32.mrf.mxu0 }
 0x670   :  { %v14277_v28 = vpop.f32.mrf.mxu0 }
 0x677   :  { %v14251_v47 = vpop.f32.mrf.mxu1 }
 0x679   :  { %v14252_v29 = vpop.f32.mrf.mxu1 }
 0x67a   :  { %v14253_v4 = vadd.f32 %v14252_v29, %v14251_v47 }
 0x67b   :  { %v14254_v30 = vpop.f32.mrf.mxu1 }
 0x67c   :  { %v11696_v59 = vadd.f32 %v14253_v4, %v7260_v42 }
 0x67d   :  { %v14255_v24 = vpop.f32.mrf.mxu1 }
 0x67e   :  { %v11736_v14 = vadd.f32 %v14275_v3, %v11696_v59 }
 0x68a   :  { %v14317_v53 = vpop.f32.mrf.mxu0 }
 0x68c   :  { %v14318_v33 = vpop.f32.mrf.mxu0 }
 0x68d   :  { %v14319_v46 = vadd.f32 %v14318_v33, %v14317_v53 }
 0x68e   :  { %v14320_v31 = vpop.f32.mrf.mxu0 }
 0x690   :  { %v14321_v32 = vpop.f32.mrf.mxu0 }
 0x697   :  { %v14295_v34 = vpop.f32.mrf.mxu1 }
 0x699   :  { %v14296_v50 = vpop.f32.mrf.mxu1 }
 0x69a   :  { %v14297_v21 = vadd.f32 %v14296_v50, %v14295_v34  ;;  %v14145_v50 = vld [vmem:[%s21924_s7] ss:$0 sm:$0xff] }
 0x69b   :  { %v14298_v38 = vpop.f32.mrf.mxu1 }
 0x69c   :  { %v11776_v48 = vadd.f32 %v14297_v21, %v11736_v14 }
 0x69d   :  { %v14299_v40 = vpop.f32.mrf.mxu1 }
 0x69e   :  { %v11816_v2 = vadd.f32 %v14319_v46, %v11776_v48  ;;  %v14146_v40 = vld [vmem:[%s21925_s8] ss:$0 sm:$0xff] }
 0x6aa   :  { %v14361_v63 = vpop.f32.mrf.mxu0 }
 0x6ac   :  { %v14362_v58 = vpop.f32.mrf.mxu0 }
 0x6ad   :  { %v14363_v12 = vadd.f32 %v14362_v58, %v14361_v63 }
 0x6ae   :  { %v14364_v44 = vpop.f32.mrf.mxu0 }
 0x6b0   :  { %v14365_v45 = vpop.f32.mrf.mxu0 }
 0x6b7   :  { %v14339_v62 = vpop.f32.mrf.mxu1 }
 0x6b9   :  { %v14340_v39 = vpop.f32.mrf.mxu1 }
 0x6ba   :  { %v14341_v56 = vadd.f32 %v14340_v39, %v14339_v62 }
 0x6bb   :  { %v14342_v18 = vpop.f32.mrf.mxu1 }
 0x6bc   :  { %v11856_v17 = vadd.f32 %v14341_v56, %v11816_v2 }
 0x6bd   :  { %v14343_v0 = vpop.f32.mrf.mxu1 }
 0x6be   :  { %v11896_v43 = vadd.f32 %v14363_v12, %v11856_v17 }
 0x6bf   :  { %v11935_v20 = vpop.f32.mrf.mxu1 }
 0x6c0   :  { %v11936_v35 = vadd.f32 %v11935_v20, %v11896_v43 }
 0x6c1   :  { %v14445_v7 = vpop.f32.mrf.mxu1 }
 0x6c2   :  { %v11947_v23 = vmax.f32 %v11936_v35, 0.0 }
 0x6c3   :  { %v11938_v52 = vpop.f32.mrf.mxu1 }
 0x6c4   :  { %v11954_v10 = vpack.c.bf16 %v11947_v23, %v11947_v23 }
 0x6c5   :  { %v14446_v60 = vpop.f32.mrf.mxu1 }
 0x6c6   :  { %14452 = vmatmul.mubr.msk.bf16.vlgmr.msra.gmra.mxu1 %vm10796_vm0, %v11954_v10 }
 0x6ca   :  { %v14386_v51 = vpop.f32.mrf.mxu0 }
 0x6cc   :  { %v14387_v19 = vpop.f32.mrf.mxu0 }
 0x6cd   :  { %v14388_v57 = vadd.f32 %v14387_v19, %v14386_v51 }
 0x6ce   :  { %v14389_v11 = vpop.f32.mrf.mxu0 }
 0x6cf   :  { %v12400_v9 = vadd.f32 %v14388_v57, %v14093_v16 }
 0x6d0   :  { %v14390_v26 = vpop.f32.mrf.mxu0 }
 0x6df   :  { %v14408_v37 = vpop.f32.mrf.mxu1 }
 0x6e1   :  { %v14409_v55 = vpop.f32.mrf.mxu1 }
 0x6e2   :  { %v14410_v61 = vadd.f32 %v14409_v55, %v14408_v37 }
 0x6e3   :  { %v14411_v22 = vpop.f32.mrf.mxu1 }
 0x6e4   :  { %v12440_v6 = vadd.f32 %v14410_v61, %v12400_v9 }
 0x6e5   :  { %v14412_v41 = vpop.f32.mrf.mxu1 }
 0x723   :  { %v14430_v15 = vpop.f32.mrf.mxu0 }
 0x725   :  { %v14431_v1 = vpop.f32.mrf.mxu0 }
 0x726   :  { %v14432_v13 = vadd.f32 %v14431_v1, %v14430_v15 }
 0x727   :  { %v14433_v49 = vpop.f32.mrf.mxu0 }
 0x728   :  { %v12480_v36 = vadd.f32 %v14432_v13, %v12440_v6 }
 0x729   :  { %v14434_v5 = vpop.f32.mrf.mxu0 }
 0x786   :  { %v12519_v27 = vpop.f32.mrf.mxu1 }
 0x787   :  { %v12520_v54 = vadd.f32 %v12519_v27, %v12480_v36 }
 0x788   :  { %v14453_v8 = vpop.f32.mrf.mxu1 }
 0x789   :  { %v12526_v3 = vsel %vm12525_vm2, %v12520_v54, 0.0 }
 0x78a   :  { %v12522_v25 = vpop.f32.mrf.mxu1  ;;  %12527 = vadd.xlane.f32.xlu0 %v12526_v3 }
 0x78c   :  { %v14454_v28 = vpop.f32.mrf.mxu1 }
 0x813   :  { %v12528_v47 = vpop.xlane.xlu0 %12527 }
 0x814   :  { %v12530_v29 = vmul.f32 0.03125, %v12528_v47 }
 0x816   :  { %v12531_v30 = vsub.f32 %v12520_v54, %v12530_v29 }
 0x818   :  { %v12532_v24 = vmul.f32 %v12531_v30, %v12531_v30 }
 0x81a   :  { %v12533_v53 = vsel %vm12525_vm2, %v12532_v24, 0.0 }
 0x81b   :  { %12534 = vadd.xlane.f32.xlu0 %v12533_v53 }
 0x8a4   :  { %v12535_v33 = vpop.xlane.xlu0 %12534 }
 0x8a5   :  { %v12536_v31 = vmul.f32 0.03125, %v12535_v33 }
 0x8a7   :  { %v12537_v32 = vadd.f32 1e-05, %v12536_v31 }
 0x8a9   :  { %16708 = vrsqrt.f32 %v12537_v32 }
 0x8b6   :  { %v16709_v34 = vpop.eup %16708 }
 0x8b7   :  { %v12539_v38 = vmul.f32 %v16709_v34, %v12531_v30 }
 0x8b9   :  { %v12547_v63 = vmul.f32 %v14145_v50, %v12539_v38 }
 0x8bb   :  { %v12555_v42 = vadd.f32 %v14146_v40, %v12547_v63 }
 0x8bd   :  { %12556 = vst.msk [vmem:[#allocation2] sm:$0x3] %vm12525_vm2, %v12555_v42 }
 0x8be   :  { %16726 = shalt.err (!%p16723_p4)
}
 0x8bf   :  { %12566 = dma.vmem_to_hbm [thread:$0]  %s12564_s14, 32, %s21926_s9, [#allocation3]  }
 0x8c0   :  { %16735 = dma.done.wait [#allocation3], 32  }
 0x8c1   :  { %16736 = vsyncadd [#allocation3], 4294967264 }
 0x8c2   :  { %12570 = vsyncpa [#allocation3], 1 }

</bundles_post_ra>
